<compile_context>
chip_gen: v7x
topology: tpu7x:2x2x1
jax: 0.10.0
libtpu: 0.0.40
codegen_flags: <defaults>
</compile_context>

<pallas_src>
import functools

import jax
import jax.numpy as jnp
from jax.experimental import pallas as pl
from jax.experimental.pallas import tpu as pltpu


# ----------------------------------------------------------------------------
# One pooled conv row: 3x3 "same" conv + bias + ReLU + 2x2 maxpool for output
# rows (2*h2, 2*h2+1) of CB images, with (kw, cin) pre-folded into the matmul
# contraction (3 MXU dots, one per kh).
# ----------------------------------------------------------------------------
def _conv_pool_rows(src_ref, w_ref, b_ref, bb, CB, h2, W, Cout):
    # src_ref : (., 2*Hout+2, W, K) bf16 zero-padded (kw,cin)-unfolded records
    # w_ref   : (3, K, Cout) bf16 with K = 3*Cin, index = kw*Cin + cin
    # b_ref   : (1, Cout) f32
    # returns : (CB, W//2, Cout) f32 — pooled output row h2
    K = src_ref.shape[-1]
    r0 = 2 * h2
    acc = jnp.zeros((CB * 2 * W, Cout), jnp.float32)
    for kh in range(3):                                     # 3 deep dots, K = 3*Cin
        lhs = src_ref[pl.ds(bb, CB), pl.ds(r0 + kh, 2), :, :].reshape(CB * 2 * W, K)
        acc = acc + jnp.dot(lhs, w_ref[kh], preferred_element_type=jnp.float32)
    y = jnp.maximum(acc + b_ref[...], 0.0)                  # bias + ReLU
    y = y.reshape(CB, 2, W, Cout)
    y = jnp.maximum(y[:, 0], y[:, 1])                       # pool over H
    y = y.reshape(CB, W // 2, 2, Cout)
    return jnp.maximum(y[:, :, 0, :], y[:, :, 1, :])        # pool over W


# ----------------------------------------------------------------------------
# Stage one pooled activation row into the next layer's zero-padded,
# (kw, cin)-unfolded record buffer:  dst[h2+1, w, kw*Cin + c] = act[w+kw-1, c].
# Three shifted lane-block stores; the never-written halo spots stay zero.
# ----------------------------------------------------------------------------
def _stage_row_kw_unfold(dst_ref, pooled, h2, Wn, Cin):
    CB = pooled.shape[0]
    p = pooled.astype(dst_ref.dtype)                        # (CB, Wn, Cin)
    row = h2 + 1
    dst_ref[:, pl.ds(row, 1), 1:Wn, 0:Cin] = (
        p[:, 0:Wn - 1, :].reshape(CB, 1, Wn - 1, Cin))      # kw = 0
    dst_ref[:, pl.ds(row, 1), :, Cin:2 * Cin] = (
        p.reshape(CB, 1, Wn, Cin))                          # kw = 1
    dst_ref[:, pl.ds(row, 1), 0:Wn - 1, 2 * Cin:3 * Cin] = (
        p[:, 1:Wn, :].reshape(CB, 1, Wn - 1, Cin))          # kw = 2


# ----------------------------------------------------------------------------
# Fully fused network kernel: one grid step = one batch block of B images.
# ----------------------------------------------------------------------------
def _fused_net_kernel(x_ref, w1_ref, b1_ref, w2_ref, b2_ref, w3_ref, b3_ref,
                      wf1_ref, bf1_ref, wf2_ref, bf2_ref,
                      out_ref, xq2, xq3, c3out, *, B, CH):
    # Zero only the 1-pixel halo of the record buffers (interiors are always
    # fully overwritten below; re-zeroing every step is cheap and is safe under
    # "parallel"/megacore grid execution).
    xq2[:, 0:1, :, :] = jnp.zeros((CH, 1, 16, 96), jnp.bfloat16)
    xq2[:, 17:18, :, :] = jnp.zeros((CH, 1, 16, 96), jnp.bfloat16)
    xq2[:, :, 0:1, 0:32] = jnp.zeros((CH, 18, 1, 32), jnp.bfloat16)
    xq2[:, :, 15:16, 64:96] = jnp.zeros((CH, 18, 1, 32), jnp.bfloat16)
    xq3[:, 0:1, :, :] = jnp.zeros((CH, 1, 8, 192), jnp.bfloat16)
    xq3[:, 9:10, :, :] = jnp.zeros((CH, 1, 8, 192), jnp.bfloat16)
    xq3[:, :, 0:1, 0:64] = jnp.zeros((CH, 10, 1, 64), jnp.bfloat16)
    xq3[:, :, 7:8, 128:192] = jnp.zeros((CH, 10, 1, 64), jnp.bfloat16)

    # Conv stack, one batch chunk of CH images at a time (keeps every f32
    # accumulator small; the record scratches are chunk-sized and reused).
    for cb in range(B // CH):                               # static unroll (<= 4)
        bb = cb * CH

        # conv1 + ReLU + pool: records (.,34,32,9) -> (CH,16,32), staged kw-unfolded.
        @pl.loop(0, 16)
        def _(h2):
            pooled = _conv_pool_rows(x_ref, w1_ref, b1_ref, bb, CH, h2, 32, 32)
            _stage_row_kw_unfold(xq2, pooled, h2, 16, 32)

        # conv2 + ReLU + pool: (CH,18,16,96) -> (CH,8,64), staged kw-unfolded.
        @pl.loop(0, 8)
        def _(h2):
            pooled = _conv_pool_rows(xq2, w2_ref, b2_ref, 0, CH, h2, 16, 64)
            _stage_row_kw_unfold(xq3, pooled, h2, 8, 64)

        # conv3 + ReLU + pool + NHWC flatten into c3out (lane = h*512 + w*128 + c).
        for h2 in range(4):                                 # static: static lane offsets
            pooled = _conv_pool_rows(xq3, w3_ref, b3_ref, 0, CH, h2, 8, 128)
            pb = pooled.astype(jnp.bfloat16)                # (CH, 4, 128)
            for w in range(4):
                i = h2 * 4 + w
                c3out[bb:bb + CH, i * 128:(i + 1) * 128] = pb[:, w, :]

    # fc1 (+ReLU) as a single K=2048 matmul over the whole block, then fc2.
    # TODO(synk): Dropout(0.25) is identity in eval/inference mode.
    h1 = jnp.dot(c3out[...], wf1_ref[...],
                 preferred_element_type=jnp.float32) + bf1_ref[...]
    h1 = jnp.maximum(h1, 0.0).astype(jnp.bfloat16)
    logits = jnp.dot(h1, wf2_ref[...],
                     preferred_element_type=jnp.float32) + bf2_ref[...]
    out_ref[...] = logits                                   # (B, 128) lane-dense store


# ----------------------------------------------------------------------------
# Wrapper: lane-dense conv1 records + single pallas_call over batch blocks.
# ----------------------------------------------------------------------------
def _make_conv1_records(x_nhwc):
    # (N,32,32,3) f32 -> zero-padded, (kw,cin)-unfolded bf16 records (N,34,32,9):
    #   rec[n, h, w, kw*3 + c] = x_pad[n, h, w + kw, c]
    xp = jnp.pad(x_nhwc, ((0, 0), (1, 1), (1, 1), (0, 0)))
    rec = jnp.concatenate([xp[:, :, kw:kw + 32, :] for kw in range(3)], axis=-1)
    return rec.astype(jnp.bfloat16)


def fused_net(x_nchw, params, *, max_block=32):
    N = x_nchw.shape[0]
    assert x_nchw.shape[1:] == (3, 32, 32), "Net expects 3x32x32 inputs (fc1 = 128*4*4)"

    # Batch blocking: up to 32 images per grid step, chunked by 8 inside the kernel.
    if N <= 8:
        B = N
    else:
        B = min(max_block, 8 * int(pl.cdiv(N, 8)))
    CH = 8 if B % 8 == 0 else B
    Np = int(pl.cdiv(N, B)) * B

    x = jnp.transpose(x_nchw, (0, 2, 3, 1))                 # NCHW -> NHWC
    if Np != N:
        x = jnp.pad(x, ((0, Np - N), (0, 0), (0, 0), (0, 0)))
    xrec = _make_conv1_records(x)                           # (Np, 34, 32, 9) bf16

    flops_per_img = 2 * (32 * 32 * 32 * 27 + 16 * 16 * 64 * 288
                         + 8 * 8 * 128 * 576 + 2048 * 512 + 512 * 128)
    param_bytes = sum(int(v.size) * v.dtype.itemsize for v in params.values())
    cost = pl.CostEstimate(
        flops=Np * flops_per_img,
        transcendentals=0,
        bytes_accessed=int(xrec.size) * 2 + param_bytes + Np * 128 * 4)

    zero2 = lambda n: (0, 0)
    zero3 = lambda n: (0, 0, 0)

    out = pl.pallas_call(
        functools.partial(_fused_net_kernel, B=B, CH=CH),
        out_shape=jax.ShapeDtypeStruct((Np, 128), jnp.float32),
        grid=(Np // B,),
        in_specs=[
            pl.BlockSpec((B, 34, 32, 9), lambda n: (n, 0, 0, 0)),   # conv1 records
            pl.BlockSpec((3, 9, 32), zero3),                        # w1 (kh, kw*cin, cout)
            pl.BlockSpec((1, 32), zero2),                           # b1
            pl.BlockSpec((3, 96, 64), zero3),                       # w2
            pl.BlockSpec((1, 64), zero2),                           # b2
            pl.BlockSpec((3, 192, 128), zero3),                     # w3
            pl.BlockSpec((1, 128), zero2),                          # b3
            pl.BlockSpec((2048, 512), zero2),                       # fc1 (NHWC-flatten order)
            pl.BlockSpec((1, 512), zero2),                          # fc1 bias
            pl.BlockSpec((512, 128), zero2),                        # fc2 (padded to 128 lanes)
            pl.BlockSpec((1, 128), zero2),                          # fc2 bias
        ],
        out_specs=pl.BlockSpec((B, 128), lambda n: (n, 0)),
        scratch_shapes=[
            pltpu.VMEM((CH, 18, 16, 96), jnp.bfloat16),   # conv2 input records (1 chunk)
            pltpu.VMEM((CH, 10, 8, 192), jnp.bfloat16),   # conv3 input records (1 chunk)
            pltpu.VMEM((B, 2048), jnp.bfloat16),          # pooled conv3, NHWC-flattened
        ],
        compiler_params=pltpu.CompilerParams(
            dimension_semantics=("parallel",),
            vmem_limit_bytes=48 * 1024 * 1024),
        cost_estimate=cost,
    )(xrec, params["w1"], params["b1"], params["w2"], params["b2"],
      params["w3"], params["b3"], params["fc1_w"], params["fc1_b"],
      params["fc2_w"], params["fc2_b"])
    return out[:N, :10]


# ----------------------------------------------------------------------------
# Parameters: deterministic synthetic init generated in PyTorch layouts, then
# converted to the kernel-friendly layouts (bf16 for the MXU operands).
# ----------------------------------------------------------------------------
def make_params(key):
    ks = jax.random.split(key, 10)

    def conv_w(k, cout, cin):
        # torch (Cout, Cin, 3, 3) -> (kh, kw, cin, cout) -> (3, 3*cin, cout), bf16
        w = 0.05 * jax.random.normal(k, (cout, cin, 3, 3), jnp.float32)
        w = jnp.transpose(w, (2, 3, 1, 0)).reshape(3, 3 * cin, cout)
        return w.astype(jnp.bfloat16)

    def conv_b(k, cout):
        return (0.05 * jax.random.normal(k, (cout,), jnp.float32)).reshape(1, cout)

    # fc1: torch (512, 128*4*4) consumes NCHW flatten order (i = c*16 + h*4 + w).
    # Permute offline to lane order h*512 + w*128 + c so the kernel's NHWC-flattened
    # conv3 output feeds it directly.
    w_fc1 = 0.05 * jax.random.normal(ks[6], (512, 128 * 4 * 4), jnp.float32)
    w_fc1 = jnp.transpose(w_fc1.reshape(512, 128, 4, 4), (2, 3, 1, 0)).reshape(2048, 512)
    w_fc1 = w_fc1.astype(jnp.bfloat16)
    b_fc1 = (0.05 * jax.random.normal(ks[7], (512,), jnp.float32)).reshape(1, 512)

    # fc2: torch (10, 512) -> (512, 10), zero-padded to (512, 128) for a lane-dense
    # output store; the wrapper slices the first 10 logits.
    w_fc2_t = 0.05 * jax.random.normal(ks[8], (10, 512), jnp.float32)
    w_fc2 = jnp.zeros((512, 128), jnp.float32).at[:, :10].set(
        jnp.transpose(w_fc2_t)).astype(jnp.bfloat16)
    b_fc2 = jnp.zeros((1, 128), jnp.float32).at[0, :10].set(
        0.05 * jax.random.normal(ks[9], (10,), jnp.float32))

    return {
        "w1": conv_w(ks[0], 32, 3),   "b1": conv_b(ks[1], 32),
        "w2": conv_w(ks[2], 64, 32),  "b2": conv_b(ks[3], 64),
        "w3": conv_w(ks[4], 128, 64), "b3": conv_b(ks[5], 128),
        "fc1_w": w_fc1, "fc1_b": b_fc1,
        "fc2_w": w_fc2, "fc2_b": b_fc2,
    }


# ----------------------------------------------------------------------------
# Forward pass == Net.forward (inference)
# ----------------------------------------------------------------------------
@jax.jit
def net_forward(x_nchw, params):
    return fused_net(x_nchw, params)


if __name__ == "__main__":
    key = jax.random.PRNGKey(0)
    kx, kp = jax.random.split(key)
    # fc1 expects 128*4*4 after three 2x2 pools -> input spatial must be 32x32
    x = jax.random.normal(kx, (2, 3, 32, 32), jnp.float32)
    params = make_params(kp)

    out = net_forward(x, params)
    out = jax.block_until_ready(out)
    assert out.shape == (2, 10) and out.dtype == jnp.float32
    print("KERNEL_OK")
</pallas_src>

<mosaic_0001>
module attributes {stable_mosaic.version = 11 : i64} {
  func.func @_fused_net_kernel(%arg0: i32, %arg1: memref<2x34x32x9xbf16, #tpu.memory_space<vmem>>, %arg2: memref<3x9x32xbf16, #tpu.memory_space<vmem>>, %arg3: memref<1x32xf32, #tpu.memory_space<vmem>>, %arg4: memref<3x96x64xbf16, #tpu.memory_space<vmem>>, %arg5: memref<1x64xf32, #tpu.memory_space<vmem>>, %arg6: memref<3x192x128xbf16, #tpu.memory_space<vmem>>, %arg7: memref<1x128xf32, #tpu.memory_space<vmem>>, %arg8: memref<2048x512xbf16, #tpu.memory_space<vmem>>, %arg9: memref<1x512xf32, #tpu.memory_space<vmem>>, %arg10: memref<512x128xbf16, #tpu.memory_space<vmem>>, %arg11: memref<1x128xf32, #tpu.memory_space<vmem>>, %arg12: memref<2x128xf32, #tpu.memory_space<vmem>>, %arg13: memref<2x18x16x96xbf16, #tpu.memory_space<vmem>>, %arg14: memref<2x10x8x192xbf16, #tpu.memory_space<vmem>>, %arg15: memref<2x2048xbf16, #tpu.memory_space<vmem>>) attributes {dimension_semantics = [#tpu.dimension_semantics<parallel>], iteration_bounds = array<i64: 1>, scalar_prefetch = 0 : i64, scratch_operands = 3 : i64, tpu.core_type = #tpu.core_type<tc>, window_params = [{transform_indices = @transform_0, window_bounds = array<i64: 2, 34, 32, 9>}, {pipeline_mode = #tpu.pipeline_mode<synchronous>, transform_indices = @transform_1, window_bounds = array<i64: 3, 9, 32>}, {pipeline_mode = #tpu.pipeline_mode<synchronous>, transform_indices = @transform_2, window_bounds = array<i64: 1, 32>}, {pipeline_mode = #tpu.pipeline_mode<synchronous>, transform_indices = @transform_3, window_bounds = array<i64: 3, 96, 64>}, {pipeline_mode = #tpu.pipeline_mode<synchronous>, transform_indices = @transform_4, window_bounds = array<i64: 1, 64>}, {pipeline_mode = #tpu.pipeline_mode<synchronous>, transform_indices = @transform_5, window_bounds = array<i64: 3, 192, 128>}, {pipeline_mode = #tpu.pipeline_mode<synchronous>, transform_indices = @transform_6, window_bounds = array<i64: 1, 128>}, {pipeline_mode = #tpu.pipeline_mode<synchronous>, transform_indices = @transform_7, window_bounds = array<i64: 2048, 512>}, {pipeline_mode = #tpu.pipeline_mode<synchronous>, transform_indices = @transform_8, window_bounds = array<i64: 1, 512>}, {pipeline_mode = #tpu.pipeline_mode<synchronous>, transform_indices = @transform_9, window_bounds = array<i64: 512, 128>}, {pipeline_mode = #tpu.pipeline_mode<synchronous>, transform_indices = @transform_10, window_bounds = array<i64: 1, 128>}, {transform_indices = @transform_11, window_bounds = array<i64: 2, 128>}]} {
    %cst = arith.constant 0.000000e+00 : bf16
    %0 = vector.broadcast %cst : bf16 to vector<2x1x16x96xbf16>
    %c0 = arith.constant 0 : index
    %c0_0 = arith.constant 0 : index
    %c0_1 = arith.constant 0 : index
    %c0_2 = arith.constant 0 : index
    %1 = vector.load %arg13[%c0, %c0_0, %c0_1, %c0_2] : memref<2x18x16x96xbf16, #tpu.memory_space<vmem>>, vector<2x1x16x96xbf16>
    tpu.vector_store %arg13[%c0, %c0_0, %c0_1, %c0_2], %0 {strides = array<i32>} : memref<2x18x16x96xbf16, #tpu.memory_space<vmem>>, vector<2x1x16x96xbf16>,
    %cst_3 = arith.constant 0.000000e+00 : bf16
    %2 = vector.broadcast %cst_3 : bf16 to vector<2x1x16x96xbf16>
    %c0_4 = arith.constant 0 : index
    %c17 = arith.constant 17 : index
    %c0_5 = arith.constant 0 : index
    %c0_6 = arith.constant 0 : index
    %3 = vector.load %arg13[%c0_4, %c17, %c0_5, %c0_6] : memref<2x18x16x96xbf16, #tpu.memory_space<vmem>>, vector<2x1x16x96xbf16>
    tpu.vector_store %arg13[%c0_4, %c17, %c0_5, %c0_6], %2 {strides = array<i32>} : memref<2x18x16x96xbf16, #tpu.memory_space<vmem>>, vector<2x1x16x96xbf16>,
    %cst_7 = arith.constant 0.000000e+00 : bf16
    %4 = vector.broadcast %cst_7 : bf16 to vector<2x18x1x32xbf16>
    %c0_8 = arith.constant 0 : index
    %c0_9 = arith.constant 0 : index
    %c0_10 = arith.constant 0 : index
    %c0_11 = arith.constant 0 : index
    %5 = vector.load %arg13[%c0_8, %c0_9, %c0_10, %c0_11] : memref<2x18x16x96xbf16, #tpu.memory_space<vmem>>, vector<2x18x1x32xbf16>
    tpu.vector_store %arg13[%c0_8, %c0_9, %c0_10, %c0_11], %4 {strides = array<i32>} : memref<2x18x16x96xbf16, #tpu.memory_space<vmem>>, vector<2x18x1x32xbf16>,
    %cst_12 = arith.constant 0.000000e+00 : bf16
    %6 = vector.broadcast %cst_12 : bf16 to vector<2x18x1x32xbf16>
    %c0_13 = arith.constant 0 : index
    %c0_14 = arith.constant 0 : index
    %c15 = arith.constant 15 : index
    %c64 = arith.constant 64 : index
    %7 = vector.load %arg13[%c0_13, %c0_14, %c15, %c64] : memref<2x18x16x96xbf16, #tpu.memory_space<vmem>>, vector<2x18x1x32xbf16>
    tpu.vector_store %arg13[%c0_13, %c0_14, %c15, %c64], %6 {strides = array<i32>} : memref<2x18x16x96xbf16, #tpu.memory_space<vmem>>, vector<2x18x1x32xbf16>,
    %cst_15 = arith.constant 0.000000e+00 : bf16
    %8 = vector.broadcast %cst_15 : bf16 to vector<2x1x8x192xbf16>
    %c0_16 = arith.constant 0 : index
    %c0_17 = arith.constant 0 : index
    %c0_18 = arith.constant 0 : index
    %c0_19 = arith.constant 0 : index
    %9 = vector.load %arg14[%c0_16, %c0_17, %c0_18, %c0_19] : memref<2x10x8x192xbf16, #tpu.memory_space<vmem>>, vector<2x1x8x192xbf16>
    tpu.vector_store %arg14[%c0_16, %c0_17, %c0_18, %c0_19], %8 {strides = array<i32>} : memref<2x10x8x192xbf16, #tpu.memory_space<vmem>>, vector<2x1x8x192xbf16>,
    %cst_20 = arith.constant 0.000000e+00 : bf16
    %10 = vector.broadcast %cst_20 : bf16 to vector<2x1x8x192xbf16>
    %c0_21 = arith.constant 0 : index
    %c9 = arith.constant 9 : index
    %c0_22 = arith.constant 0 : index
    %c0_23 = arith.constant 0 : index
    %11 = vector.load %arg14[%c0_21, %c9, %c0_22, %c0_23] : memref<2x10x8x192xbf16, #tpu.memory_space<vmem>>, vector<2x1x8x192xbf16>
    tpu.vector_store %arg14[%c0_21, %c9, %c0_22, %c0_23], %10 {strides = array<i32>} : memref<2x10x8x192xbf16, #tpu.memory_space<vmem>>, vector<2x1x8x192xbf16>,
    %cst_24 = arith.constant 0.000000e+00 : bf16
    %12 = vector.broadcast %cst_24 : bf16 to vector<2x10x1x64xbf16>
    %c0_25 = arith.constant 0 : index
    %c0_26 = arith.constant 0 : index
    %c0_27 = arith.constant 0 : index
    %c0_28 = arith.constant 0 : index
    %13 = vector.load %arg14[%c0_25, %c0_26, %c0_27, %c0_28] : memref<2x10x8x192xbf16, #tpu.memory_space<vmem>>, vector<2x10x1x64xbf16>
    tpu.vector_store %arg14[%c0_25, %c0_26, %c0_27, %c0_28], %12 {strides = array<i32>} : memref<2x10x8x192xbf16, #tpu.memory_space<vmem>>, vector<2x10x1x64xbf16>,
    %cst_29 = arith.constant 0.000000e+00 : bf16
    %14 = vector.broadcast %cst_29 : bf16 to vector<2x10x1x64xbf16>
    %c0_30 = arith.constant 0 : index
    %c0_31 = arith.constant 0 : index
    %c7 = arith.constant 7 : index
    %c128 = arith.constant 128 : index
    %15 = vector.load %arg14[%c0_30, %c0_31, %c7, %c128] : memref<2x10x8x192xbf16, #tpu.memory_space<vmem>>, vector<2x10x1x64xbf16>
    tpu.vector_store %arg14[%c0_30, %c0_31, %c7, %c128], %14 {strides = array<i32>} : memref<2x10x8x192xbf16, #tpu.memory_space<vmem>>, vector<2x10x1x64xbf16>,
    %c0_i32 = arith.constant 0 : i32
    %c16_i32 = arith.constant 16 : i32
    %16 = arith.addi %c0_i32, %c16_i32 : i32
    %c1_i32 = arith.constant 1 : i32
    scf.for %arg16 = %c0_i32 to %16 step %c1_i32  : i32 {
      %c1_i32_174 = arith.constant 1 : i32
      %229 = arith.muli %arg16, %c1_i32_174 : i32
      %c0_i32_175 = arith.constant 0 : i32
      %230 = arith.addi %c0_i32_175, %229 : i32
      %c2_i32 = arith.constant 2 : i32
      %231 = arith.muli %c2_i32, %230 : i32
      %cst_176 = arith.constant 0.000000e+00 : f32
      %232 = vector.broadcast %cst_176 : f32 to vector<128x32xf32>
      %c0_i32_177 = arith.constant 0 : i32
      %233 = arith.addi %231, %c0_i32_177 : i32
      %c0_178 = arith.constant 0 : index
      %234 = arith.index_cast %233 : i32 to index
      %c0_179 = arith.constant 0 : index
      %c0_180 = arith.constant 0 : index
      %235 = vector.load %arg1[%c0_178, %234, %c0_179, %c0_180] : memref<2x34x32x9xbf16, #tpu.memory_space<vmem>>, vector<2x2x32x9xbf16>
      %236 = vector.shape_cast %235 : vector<2x2x32x9xbf16> to vector<128x9xbf16>
      %c0_181 = arith.constant 0 : index
      %c0_182 = arith.constant 0 : index
      %c0_183 = arith.constant 0 : index
      %237 = vector.load %arg2[%c0_181, %c0_182, %c0_183] : memref<3x9x32xbf16, #tpu.memory_space<vmem>>, vector<1x9x32xbf16>
      %238 = vector.shape_cast %237 : vector<1x9x32xbf16> to vector<9x32xbf16>
      %cst_184 = arith.constant dense<0.000000e+00> : vector<128x32xf32>
      %239 = tpu.matmul %236, %238, %cst_184 {dimension_numbers = #tpu.dot_dimension_numbers<[1], [0], [0], [1], [0, 0, 1, 1], [], []>} : vector<128x9xbf16>, vector<9x32xbf16>, vector<128x32xf32> -> vector<128x32xf32>
      %240 = arith.addf %232, %239 : vector<128x32xf32>
      %c1_i32_185 = arith.constant 1 : i32
      %241 = arith.addi %231, %c1_i32_185 : i32
      %c0_186 = arith.constant 0 : index
      %242 = arith.index_cast %241 : i32 to index
      %c0_187 = arith.constant 0 : index
      %c0_188 = arith.constant 0 : index
      %243 = vector.load %arg1[%c0_186, %242, %c0_187, %c0_188] : memref<2x34x32x9xbf16, #tpu.memory_space<vmem>>, vector<2x2x32x9xbf16>
      %244 = vector.shape_cast %243 : vector<2x2x32x9xbf16> to vector<128x9xbf16>
      %c1_189 = arith.constant 1 : index
      %c0_190 = arith.constant 0 : index
      %c0_191 = arith.constant 0 : index
      %245 = vector.load %arg2[%c1_189, %c0_190, %c0_191] : memref<3x9x32xbf16, #tpu.memory_space<vmem>>, vector<1x9x32xbf16>
      %246 = vector.shape_cast %245 : vector<1x9x32xbf16> to vector<9x32xbf16>
      %cst_192 = arith.constant dense<0.000000e+00> : vector<128x32xf32>
      %247 = tpu.matmul %244, %246, %cst_192 {dimension_numbers = #tpu.dot_dimension_numbers<[1], [0], [0], [1], [0, 0, 1, 1], [], []>} : vector<128x9xbf16>, vector<9x32xbf16>, vector<128x32xf32> -> vector<128x32xf32>
      %248 = arith.addf %240, %247 : vector<128x32xf32>
      %c2_i32_193 = arith.constant 2 : i32
      %249 = arith.addi %231, %c2_i32_193 : i32
      %c0_194 = arith.constant 0 : index
      %250 = arith.index_cast %249 : i32 to index
      %c0_195 = arith.constant 0 : index
      %c0_196 = arith.constant 0 : index
      %251 = vector.load %arg1[%c0_194, %250, %c0_195, %c0_196] : memref<2x34x32x9xbf16, #tpu.memory_space<vmem>>, vector<2x2x32x9xbf16>
      %252 = vector.shape_cast %251 : vector<2x2x32x9xbf16> to vector<128x9xbf16>
      %c2_197 = arith.constant 2 : index
      %c0_198 = arith.constant 0 : index
      %c0_199 = arith.constant 0 : index
      %253 = vector.load %arg2[%c2_197, %c0_198, %c0_199] : memref<3x9x32xbf16, #tpu.memory_space<vmem>>, vector<1x9x32xbf16>
      %254 = vector.shape_cast %253 : vector<1x9x32xbf16> to vector<9x32xbf16>
      %cst_200 = arith.constant dense<0.000000e+00> : vector<128x32xf32>
      %255 = tpu.matmul %252, %254, %cst_200 {dimension_numbers = #tpu.dot_dimension_numbers<[1], [0], [0], [1], [0, 0, 1, 1], [], []>} : vector<128x9xbf16>, vector<9x32xbf16>, vector<128x32xf32> -> vector<128x32xf32>
      %256 = arith.addf %248, %255 : vector<128x32xf32>
      %c0_201 = arith.constant 0 : index
      %c0_202 = arith.constant 0 : index
      %257 = vector.load %arg3[%c0_201, %c0_202] : memref<1x32xf32, #tpu.memory_space<vmem>>, vector<1x32xf32>
      %258 = vector.broadcast %257 : vector<1x32xf32> to vector<128x32xf32>
      %259 = arith.addf %256, %258 : vector<128x32xf32>
      %cst_203 = arith.constant 0.000000e+00 : f32
      %260 = vector.broadcast %cst_203 : f32 to vector<128x32xf32>
      %261 = arith.maximumf %259, %260 : vector<128x32xf32>
      %262 = vector.shape_cast %261 : vector<128x32xf32> to vector<2x2x32x32xf32>
      %263 = vector.extract_strided_slice %262 {offsets = [0, 0, 0, 0], sizes = [2, 1, 32, 32], strides = [1, 1, 1, 1]} : vector<2x2x32x32xf32> to vector<2x1x32x32xf32>
      %264 = vector.shape_cast %263 : vector<2x1x32x32xf32> to vector<2x32x32xf32>
      %265 = vector.extract_strided_slice %262 {offsets = [0, 1, 0, 0], sizes = [2, 1, 32, 32], strides = [1, 1, 1, 1]} : vector<2x2x32x32xf32> to vector<2x1x32x32xf32>
      %266 = vector.shape_cast %265 : vector<2x1x32x32xf32> to vector<2x32x32xf32>
      %267 = arith.maximumf %264, %266 : vector<2x32x32xf32>
      %268 = vector.shape_cast %267 : vector<2x32x32xf32> to vector<2x16x2x32xf32>
      %269 = vector.extract_strided_slice %268 {offsets = [0, 0, 0, 0], sizes = [2, 16, 1, 32], strides = [1, 1, 1, 1]} : vector<2x16x2x32xf32> to vector<2x16x1x32xf32>
      %270 = vector.shape_cast %269 : vector<2x16x1x32xf32> to vector<2x16x32xf32>
      %271 = vector.extract_strided_slice %268 {offsets = [0, 0, 1, 0], sizes = [2, 16, 1, 32], strides = [1, 1, 1, 1]} : vector<2x16x2x32xf32> to vector<2x16x1x32xf32>
      %272 = vector.shape_cast %271 : vector<2x16x1x32xf32> to vector<2x16x32xf32>
      %273 = arith.maximumf %270, %272 : vector<2x16x32xf32>
      %274 = arith.truncf %273 : vector<2x16x32xf32> to vector<2x16x32xbf16>
      %c1_i32_204 = arith.constant 1 : i32
      %275 = arith.addi %230, %c1_i32_204 : i32
      %276 = vector.extract_strided_slice %274 {offsets = [0, 0, 0], sizes = [2, 15, 32], strides = [1, 1, 1]} : vector<2x16x32xbf16> to vector<2x15x32xbf16>
      %277 = vector.shape_cast %276 : vector<2x15x32xbf16> to vector<2x1x15x32xbf16>
      %c0_205 = arith.constant 0 : index
      %278 = arith.index_cast %275 : i32 to index
      %c1_206 = arith.constant 1 : index
      %c0_207 = arith.constant 0 : index
      %279 = vector.load %arg13[%c0_205, %278, %c1_206, %c0_207] : memref<2x18x16x96xbf16, #tpu.memory_space<vmem>>, vector<2x1x15x32xbf16>
      tpu.vector_store %arg13[%c0_205, %278, %c1_206, %c0_207], %277 {strides = array<i32>} : memref<2x18x16x96xbf16, #tpu.memory_space<vmem>>, vector<2x1x15x32xbf16>,
      %280 = vector.shape_cast %274 : vector<2x16x32xbf16> to vector<2x1x16x32xbf16>
      %c0_208 = arith.constant 0 : index
      %281 = arith.index_cast %275 : i32 to index
      %c0_209 = arith.constant 0 : index
      %c32 = arith.constant 32 : index
      %282 = vector.load %arg13[%c0_208, %281, %c0_209, %c32] : memref<2x18x16x96xbf16, #tpu.memory_space<vmem>>, vector<2x1x16x32xbf16>
      tpu.vector_store %arg13[%c0_208, %281, %c0_209, %c32], %280 {strides = array<i32>} : memref<2x18x16x96xbf16, #tpu.memory_space<vmem>>, vector<2x1x16x32xbf16>,
      %283 = vector.extract_strided_slice %274 {offsets = [0, 1, 0], sizes = [2, 15, 32], strides = [1, 1, 1]} : vector<2x16x32xbf16> to vector<2x15x32xbf16>
      %284 = vector.shape_cast %283 : vector<2x15x32xbf16> to vector<2x1x15x32xbf16>
      %c0_210 = arith.constant 0 : index
      %285 = arith.index_cast %275 : i32 to index
      %c0_211 = arith.constant 0 : index
      %c64_212 = arith.constant 64 : index
      %286 = vector.load %arg13[%c0_210, %285, %c0_211, %c64_212] : memref<2x18x16x96xbf16, #tpu.memory_space<vmem>>, vector<2x1x15x32xbf16>
      tpu.vector_store %arg13[%c0_210, %285, %c0_211, %c64_212], %284 {strides = array<i32>} : memref<2x18x16x96xbf16, #tpu.memory_space<vmem>>, vector<2x1x15x32xbf16>,
    }
    %c16_i32_32 = arith.constant 16 : i32
    %c0_i32_33 = arith.constant 0 : i32
    %c8_i32 = arith.constant 8 : i32
    %17 = arith.addi %c0_i32_33, %c8_i32 : i32
    %c1_i32_34 = arith.constant 1 : i32
    scf.for %arg16 = %c0_i32_33 to %17 step %c1_i32_34  : i32 {
      %c1_i32_174 = arith.constant 1 : i32
      %229 = arith.muli %arg16, %c1_i32_174 : i32
      %c0_i32_175 = arith.constant 0 : i32
      %230 = arith.addi %c0_i32_175, %229 : i32
      %c2_i32 = arith.constant 2 : i32
      %231 = arith.muli %c2_i32, %230 : i32
      %cst_176 = arith.constant 0.000000e+00 : f32
      %232 = vector.broadcast %cst_176 : f32 to vector<64x64xf32>
      %c0_i32_177 = arith.constant 0 : i32
      %233 = arith.addi %231, %c0_i32_177 : i32
      %c0_178 = arith.constant 0 : index
      %234 = arith.index_cast %233 : i32 to index
      %c0_179 = arith.constant 0 : index
      %c0_180 = arith.constant 0 : index
      %235 = vector.load %arg13[%c0_178, %234, %c0_179, %c0_180] : memref<2x18x16x96xbf16, #tpu.memory_space<vmem>>, vector<2x2x16x96xbf16>
      %236 = vector.shape_cast %235 : vector<2x2x16x96xbf16> to vector<64x96xbf16>
      %c0_181 = arith.constant 0 : index
      %c0_182 = arith.constant 0 : index
      %c0_183 = arith.constant 0 : index
      %237 = vector.load %arg4[%c0_181, %c0_182, %c0_183] : memref<3x96x64xbf16, #tpu.memory_space<vmem>>, vector<1x96x64xbf16>
      %238 = vector.shape_cast %237 : vector<1x96x64xbf16> to vector<96x64xbf16>
      %cst_184 = arith.constant dense<0.000000e+00> : vector<64x64xf32>
      %239 = tpu.matmul %236, %238, %cst_184 {dimension_numbers = #tpu.dot_dimension_numbers<[1], [0], [0], [1], [0, 0, 1, 1], [], []>} : vector<64x96xbf16>, vector<96x64xbf16>, vector<64x64xf32> -> vector<64x64xf32>
      %240 = arith.addf %232, %239 : vector<64x64xf32>
      %c1_i32_185 = arith.constant 1 : i32
      %241 = arith.addi %231, %c1_i32_185 : i32
      %c0_186 = arith.constant 0 : index
      %242 = arith.index_cast %241 : i32 to index
      %c0_187 = arith.constant 0 : index
      %c0_188 = arith.constant 0 : index
      %243 = vector.load %arg13[%c0_186, %242, %c0_187, %c0_188] : memref<2x18x16x96xbf16, #tpu.memory_space<vmem>>, vector<2x2x16x96xbf16>
      %244 = vector.shape_cast %243 : vector<2x2x16x96xbf16> to vector<64x96xbf16>
      %c1_189 = arith.constant 1 : index
      %c0_190 = arith.constant 0 : index
      %c0_191 = arith.constant 0 : index
      %245 = vector.load %arg4[%c1_189, %c0_190, %c0_191] : memref<3x96x64xbf16, #tpu.memory_space<vmem>>, vector<1x96x64xbf16>
      %246 = vector.shape_cast %245 : vector<1x96x64xbf16> to vector<96x64xbf16>
      %cst_192 = arith.constant dense<0.000000e+00> : vector<64x64xf32>
      %247 = tpu.matmul %244, %246, %cst_192 {dimension_numbers = #tpu.dot_dimension_numbers<[1], [0], [0], [1], [0, 0, 1, 1], [], []>} : vector<64x96xbf16>, vector<96x64xbf16>, vector<64x64xf32> -> vector<64x64xf32>
      %248 = arith.addf %240, %247 : vector<64x64xf32>
      %c2_i32_193 = arith.constant 2 : i32
      %249 = arith.addi %231, %c2_i32_193 : i32
      %c0_194 = arith.constant 0 : index
      %250 = arith.index_cast %249 : i32 to index
      %c0_195 = arith.constant 0 : index
      %c0_196 = arith.constant 0 : index
      %251 = vector.load %arg13[%c0_194, %250, %c0_195, %c0_196] : memref<2x18x16x96xbf16, #tpu.memory_space<vmem>>, vector<2x2x16x96xbf16>
      %252 = vector.shape_cast %251 : vector<2x2x16x96xbf16> to vector<64x96xbf16>
      %c2_197 = arith.constant 2 : index
      %c0_198 = arith.constant 0 : index
      %c0_199 = arith.constant 0 : index
      %253 = vector.load %arg4[%c2_197, %c0_198, %c0_199] : memref<3x96x64xbf16, #tpu.memory_space<vmem>>, vector<1x96x64xbf16>
      %254 = vector.shape_cast %253 : vector<1x96x64xbf16> to vector<96x64xbf16>
      %cst_200 = arith.constant dense<0.000000e+00> : vector<64x64xf32>
      %255 = tpu.matmul %252, %254, %cst_200 {dimension_numbers = #tpu.dot_dimension_numbers<[1], [0], [0], [1], [0, 0, 1, 1], [], []>} : vector<64x96xbf16>, vector<96x64xbf16>, vector<64x64xf32> -> vector<64x64xf32>
      %256 = arith.addf %248, %255 : vector<64x64xf32>
      %c0_201 = arith.constant 0 : index
      %c0_202 = arith.constant 0 : index
      %257 = vector.load %arg5[%c0_201, %c0_202] : memref<1x64xf32, #tpu.memory_space<vmem>>, vector<1x64xf32>
      %258 = vector.broadcast %257 : vector<1x64xf32> to vector<64x64xf32>
      %259 = arith.addf %256, %258 : vector<64x64xf32>
      %cst_203 = arith.constant 0.000000e+00 : f32
      %260 = vector.broadcast %cst_203 : f32 to vector<64x64xf32>
      %261 = arith.maximumf %259, %260 : vector<64x64xf32>
      %262 = vector.shape_cast %261 : vector<64x64xf32> to vector<2x2x16x64xf32>
      %263 = vector.extract_strided_slice %262 {offsets = [0, 0, 0, 0], sizes = [2, 1, 16, 64], strides = [1, 1, 1, 1]} : vector<2x2x16x64xf32> to vector<2x1x16x64xf32>
      %264 = vector.shape_cast %263 : vector<2x1x16x64xf32> to vector<2x16x64xf32>
      %265 = vector.extract_strided_slice %262 {offsets = [0, 1, 0, 0], sizes = [2, 1, 16, 64], strides = [1, 1, 1, 1]} : vector<2x2x16x64xf32> to vector<2x1x16x64xf32>
      %266 = vector.shape_cast %265 : vector<2x1x16x64xf32> to vector<2x16x64xf32>
      %267 = arith.maximumf %264, %266 : vector<2x16x64xf32>
      %268 = vector.shape_cast %267 : vector<2x16x64xf32> to vector<2x8x2x64xf32>
      %269 = vector.extract_strided_slice %268 {offsets = [0, 0, 0, 0], sizes = [2, 8, 1, 64], strides = [1, 1, 1, 1]} : vector<2x8x2x64xf32> to vector<2x8x1x64xf32>
      %270 = vector.shape_cast %269 : vector<2x8x1x64xf32> to vector<2x8x64xf32>
      %271 = vector.extract_strided_slice %268 {offsets = [0, 0, 1, 0], sizes = [2, 8, 1, 64], strides = [1, 1, 1, 1]} : vector<2x8x2x64xf32> to vector<2x8x1x64xf32>
      %272 = vector.shape_cast %271 : vector<2x8x1x64xf32> to vector<2x8x64xf32>
      %273 = arith.maximumf %270, %272 : vector<2x8x64xf32>
      %274 = arith.truncf %273 : vector<2x8x64xf32> to vector<2x8x64xbf16>
      %c1_i32_204 = arith.constant 1 : i32
      %275 = arith.addi %230, %c1_i32_204 : i32
      %276 = vector.extract_strided_slice %274 {offsets = [0, 0, 0], sizes = [2, 7, 64], strides = [1, 1, 1]} : vector<2x8x64xbf16> to vector<2x7x64xbf16>
      %277 = vector.shape_cast %276 : vector<2x7x64xbf16> to vector<2x1x7x64xbf16>
      %c0_205 = arith.constant 0 : index
      %278 = arith.index_cast %275 : i32 to index
      %c1_206 = arith.constant 1 : index
      %c0_207 = arith.constant 0 : index
      %279 = vector.load %arg14[%c0_205, %278, %c1_206, %c0_207] : memref<2x10x8x192xbf16, #tpu.memory_space<vmem>>, vector<2x1x7x64xbf16>
      tpu.vector_store %arg14[%c0_205, %278, %c1_206, %c0_207], %277 {strides = array<i32>} : memref<2x10x8x192xbf16, #tpu.memory_space<vmem>>, vector<2x1x7x64xbf16>,
      %280 = vector.shape_cast %274 : vector<2x8x64xbf16> to vector<2x1x8x64xbf16>
      %c0_208 = arith.constant 0 : index
      %281 = arith.index_cast %275 : i32 to index
      %c0_209 = arith.constant 0 : index
      %c64_210 = arith.constant 64 : index
      %282 = vector.load %arg14[%c0_208, %281, %c0_209, %c64_210] : memref<2x10x8x192xbf16, #tpu.memory_space<vmem>>, vector<2x1x8x64xbf16>
      tpu.vector_store %arg14[%c0_208, %281, %c0_209, %c64_210], %280 {strides = array<i32>} : memref<2x10x8x192xbf16, #tpu.memory_space<vmem>>, vector<2x1x8x64xbf16>,
      %283 = vector.extract_strided_slice %274 {offsets = [0, 1, 0], sizes = [2, 7, 64], strides = [1, 1, 1]} : vector<2x8x64xbf16> to vector<2x7x64xbf16>
      %284 = vector.shape_cast %283 : vector<2x7x64xbf16> to vector<2x1x7x64xbf16>
      %c0_211 = arith.constant 0 : index
      %285 = arith.index_cast %275 : i32 to index
      %c0_212 = arith.constant 0 : index
      %c128_213 = arith.constant 128 : index
      %286 = vector.load %arg14[%c0_211, %285, %c0_212, %c128_213] : memref<2x10x8x192xbf16, #tpu.memory_space<vmem>>, vector<2x1x7x64xbf16>
      tpu.vector_store %arg14[%c0_211, %285, %c0_212, %c128_213], %284 {strides = array<i32>} : memref<2x10x8x192xbf16, #tpu.memory_space<vmem>>, vector<2x1x7x64xbf16>,
    }
    %c8_i32_35 = arith.constant 8 : i32
    %cst_36 = arith.constant 0.000000e+00 : f32
    %18 = vector.broadcast %cst_36 : f32 to vector<32x128xf32>
    %c0_37 = arith.constant 0 : index
    %c0_38 = arith.constant 0 : index
    %c0_39 = arith.constant 0 : index
    %c0_40 = arith.constant 0 : index
    %19 = vector.load %arg14[%c0_37, %c0_38, %c0_39, %c0_40] : memref<2x10x8x192xbf16, #tpu.memory_space<vmem>>, vector<2x2x8x192xbf16>
    %20 = vector.shape_cast %19 : vector<2x2x8x192xbf16> to vector<32x192xbf16>
    %c0_41 = arith.constant 0 : index
    %c0_42 = arith.constant 0 : index
    %c0_43 = arith.constant 0 : index
    %21 = vector.load %arg6[%c0_41, %c0_42, %c0_43] : memref<3x192x128xbf16, #tpu.memory_space<vmem>>, vector<1x192x128xbf16>
    %22 = vector.shape_cast %21 : vector<1x192x128xbf16> to vector<192x128xbf16>
    %cst_44 = arith.constant dense<0.000000e+00> : vector<32x128xf32>
    %23 = tpu.matmul %20, %22, %cst_44 {dimension_numbers = #tpu.dot_dimension_numbers<[1], [0], [0], [1], [0, 0, 1, 1], [], []>} : vector<32x192xbf16>, vector<192x128xbf16>, vector<32x128xf32> -> vector<32x128xf32>
    %24 = arith.addf %18, %23 : vector<32x128xf32>
    %c0_45 = arith.constant 0 : index
    %c1 = arith.constant 1 : index
    %c0_46 = arith.constant 0 : index
    %c0_47 = arith.constant 0 : index
    %25 = vector.load %arg14[%c0_45, %c1, %c0_46, %c0_47] : memref<2x10x8x192xbf16, #tpu.memory_space<vmem>>, vector<2x2x8x192xbf16>
    %26 = vector.shape_cast %25 : vector<2x2x8x192xbf16> to vector<32x192xbf16>
    %c1_48 = arith.constant 1 : index
    %c0_49 = arith.constant 0 : index
    %c0_50 = arith.constant 0 : index
    %27 = vector.load %arg6[%c1_48, %c0_49, %c0_50] : memref<3x192x128xbf16, #tpu.memory_space<vmem>>, vector<1x192x128xbf16>
    %28 = vector.shape_cast %27 : vector<1x192x128xbf16> to vector<192x128xbf16>
    %cst_51 = arith.constant dense<0.000000e+00> : vector<32x128xf32>
    %29 = tpu.matmul %26, %28, %cst_51 {dimension_numbers = #tpu.dot_dimension_numbers<[1], [0], [0], [1], [0, 0, 1, 1], [], []>} : vector<32x192xbf16>, vector<192x128xbf16>, vector<32x128xf32> -> vector<32x128xf32>
    %30 = arith.addf %24, %29 : vector<32x128xf32>
    %c0_52 = arith.constant 0 : index
    %c2 = arith.constant 2 : index
    %c0_53 = arith.constant 0 : index
    %c0_54 = arith.constant 0 : index
    %31 = vector.load %arg14[%c0_52, %c2, %c0_53, %c0_54] : memref<2x10x8x192xbf16, #tpu.memory_space<vmem>>, vector<2x2x8x192xbf16>
    %32 = vector.shape_cast %31 : vector<2x2x8x192xbf16> to vector<32x192xbf16>
    %c2_55 = arith.constant 2 : index
    %c0_56 = arith.constant 0 : index
    %c0_57 = arith.constant 0 : index
    %33 = vector.load %arg6[%c2_55, %c0_56, %c0_57] : memref<3x192x128xbf16, #tpu.memory_space<vmem>>, vector<1x192x128xbf16>
    %34 = vector.shape_cast %33 : vector<1x192x128xbf16> to vector<192x128xbf16>
    %cst_58 = arith.constant dense<0.000000e+00> : vector<32x128xf32>
    %35 = tpu.matmul %32, %34, %cst_58 {dimension_numbers = #tpu.dot_dimension_numbers<[1], [0], [0], [1], [0, 0, 1, 1], [], []>} : vector<32x192xbf16>, vector<192x128xbf16>, vector<32x128xf32> -> vector<32x128xf32>
    %36 = arith.addf %30, %35 : vector<32x128xf32>
    %c0_59 = arith.constant 0 : index
    %c0_60 = arith.constant 0 : index
    %37 = vector.load %arg7[%c0_59, %c0_60] : memref<1x128xf32, #tpu.memory_space<vmem>>, vector<1x128xf32>
    %38 = vector.broadcast %37 : vector<1x128xf32> to vector<32x128xf32>
    %39 = arith.addf %36, %38 : vector<32x128xf32>
    %cst_61 = arith.constant 0.000000e+00 : f32
    %40 = vector.broadcast %cst_61 : f32 to vector<32x128xf32>
    %41 = arith.maximumf %39, %40 : vector<32x128xf32>
    %42 = vector.shape_cast %41 : vector<32x128xf32> to vector<2x2x8x128xf32>
    %43 = vector.extract_strided_slice %42 {offsets = [0, 0, 0, 0], sizes = [2, 1, 8, 128], strides = [1, 1, 1, 1]} : vector<2x2x8x128xf32> to vector<2x1x8x128xf32>
    %44 = vector.shape_cast %43 : vector<2x1x8x128xf32> to vector<2x8x128xf32>
    %45 = vector.extract_strided_slice %42 {offsets = [0, 1, 0, 0], sizes = [2, 1, 8, 128], strides = [1, 1, 1, 1]} : vector<2x2x8x128xf32> to vector<2x1x8x128xf32>
    %46 = vector.shape_cast %45 : vector<2x1x8x128xf32> to vector<2x8x128xf32>
    %47 = arith.maximumf %44, %46 : vector<2x8x128xf32>
    %48 = vector.shape_cast %47 : vector<2x8x128xf32> to vector<2x4x2x128xf32>
    %49 = vector.extract_strided_slice %48 {offsets = [0, 0, 0, 0], sizes = [2, 4, 1, 128], strides = [1, 1, 1, 1]} : vector<2x4x2x128xf32> to vector<2x4x1x128xf32>
    %50 = vector.shape_cast %49 : vector<2x4x1x128xf32> to vector<2x4x128xf32>
    %51 = vector.extract_strided_slice %48 {offsets = [0, 0, 1, 0], sizes = [2, 4, 1, 128], strides = [1, 1, 1, 1]} : vector<2x4x2x128xf32> to vector<2x4x1x128xf32>
    %52 = vector.shape_cast %51 : vector<2x4x1x128xf32> to vector<2x4x128xf32>
    %53 = arith.maximumf %50, %52 : vector<2x4x128xf32>
    %54 = arith.truncf %53 : vector<2x4x128xf32> to vector<2x4x128xbf16>
    %55 = vector.extract_strided_slice %54 {offsets = [0, 0, 0], sizes = [2, 1, 128], strides = [1, 1, 1]} : vector<2x4x128xbf16> to vector<2x1x128xbf16>
    %56 = vector.shape_cast %55 : vector<2x1x128xbf16> to vector<2x128xbf16>
    %c0_62 = arith.constant 0 : index
    %c0_63 = arith.constant 0 : index
    %57 = vector.load %arg15[%c0_62, %c0_63] : memref<2x2048xbf16, #tpu.memory_space<vmem>>, vector<2x128xbf16>
    tpu.vector_store %arg15[%c0_62, %c0_63], %56 {strides = array<i32>} : memref<2x2048xbf16, #tpu.memory_space<vmem>>, vector<2x128xbf16>,
    %58 = vector.extract_strided_slice %54 {offsets = [0, 1, 0], sizes = [2, 1, 128], strides = [1, 1, 1]} : vector<2x4x128xbf16> to vector<2x1x128xbf16>
    %59 = vector.shape_cast %58 : vector<2x1x128xbf16> to vector<2x128xbf16>
    %c0_64 = arith.constant 0 : index
    %c128_65 = arith.constant 128 : index
    %60 = vector.load %arg15[%c0_64, %c128_65] : memref<2x2048xbf16, #tpu.memory_space<vmem>>, vector<2x128xbf16>
    tpu.vector_store %arg15[%c0_64, %c128_65], %59 {strides = array<i32>} : memref<2x2048xbf16, #tpu.memory_space<vmem>>, vector<2x128xbf16>,
    %61 = vector.extract_strided_slice %54 {offsets = [0, 2, 0], sizes = [2, 1, 128], strides = [1, 1, 1]} : vector<2x4x128xbf16> to vector<2x1x128xbf16>
    %62 = vector.shape_cast %61 : vector<2x1x128xbf16> to vector<2x128xbf16>
    %c0_66 = arith.constant 0 : index
    %c256 = arith.constant 256 : index
    %63 = vector.load %arg15[%c0_66, %c256] : memref<2x2048xbf16, #tpu.memory_space<vmem>>, vector<2x128xbf16>
    tpu.vector_store %arg15[%c0_66, %c256], %62 {strides = array<i32>} : memref<2x2048xbf16, #tpu.memory_space<vmem>>, vector<2x128xbf16>,
    %64 = vector.extract_strided_slice %54 {offsets = [0, 3, 0], sizes = [2, 1, 128], strides = [1, 1, 1]} : vector<2x4x128xbf16> to vector<2x1x128xbf16>
    %65 = vector.shape_cast %64 : vector<2x1x128xbf16> to vector<2x128xbf16>
    %c0_67 = arith.constant 0 : index
    %c384 = arith.constant 384 : index
    %66 = vector.load %arg15[%c0_67, %c384] : memref<2x2048xbf16, #tpu.memory_space<vmem>>, vector<2x128xbf16>
    tpu.vector_store %arg15[%c0_67, %c384], %65 {strides = array<i32>} : memref<2x2048xbf16, #tpu.memory_space<vmem>>, vector<2x128xbf16>,
    %cst_68 = arith.constant 0.000000e+00 : f32
    %67 = vector.broadcast %cst_68 : f32 to vector<32x128xf32>
    %c0_69 = arith.constant 0 : index
    %c2_70 = arith.constant 2 : index
    %c0_71 = arith.constant 0 : index
    %c0_72 = arith.constant 0 : index
    %68 = vector.load %arg14[%c0_69, %c2_70, %c0_71, %c0_72] : memref<2x10x8x192xbf16, #tpu.memory_space<vmem>>, vector<2x2x8x192xbf16>
    %69 = vector.shape_cast %68 : vector<2x2x8x192xbf16> to vector<32x192xbf16>
    %c0_73 = arith.constant 0 : index
    %c0_74 = arith.constant 0 : index
    %c0_75 = arith.constant 0 : index
    %70 = vector.load %arg6[%c0_73, %c0_74, %c0_75] : memref<3x192x128xbf16, #tpu.memory_space<vmem>>, vector<1x192x128xbf16>
    %71 = vector.shape_cast %70 : vector<1x192x128xbf16> to vector<192x128xbf16>
    %cst_76 = arith.constant dense<0.000000e+00> : vector<32x128xf32>
    %72 = tpu.matmul %69, %71, %cst_76 {dimension_numbers = #tpu.dot_dimension_numbers<[1], [0], [0], [1], [0, 0, 1, 1], [], []>} : vector<32x192xbf16>, vector<192x128xbf16>, vector<32x128xf32> -> vector<32x128xf32>
    %73 = arith.addf %67, %72 : vector<32x128xf32>
    %c0_77 = arith.constant 0 : index
    %c3 = arith.constant 3 : index
    %c0_78 = arith.constant 0 : index
    %c0_79 = arith.constant 0 : index
    %74 = vector.load %arg14[%c0_77, %c3, %c0_78, %c0_79] : memref<2x10x8x192xbf16, #tpu.memory_space<vmem>>, vector<2x2x8x192xbf16>
    %75 = vector.shape_cast %74 : vector<2x2x8x192xbf16> to vector<32x192xbf16>
    %c1_80 = arith.constant 1 : index
    %c0_81 = arith.constant 0 : index
    %c0_82 = arith.constant 0 : index
    %76 = vector.load %arg6[%c1_80, %c0_81, %c0_82] : memref<3x192x128xbf16, #tpu.memory_space<vmem>>, vector<1x192x128xbf16>
    %77 = vector.shape_cast %76 : vector<1x192x128xbf16> to vector<192x128xbf16>
    %cst_83 = arith.constant dense<0.000000e+00> : vector<32x128xf32>
    %78 = tpu.matmul %75, %77, %cst_83 {dimension_numbers = #tpu.dot_dimension_numbers<[1], [0], [0], [1], [0, 0, 1, 1], [], []>} : vector<32x192xbf16>, vector<192x128xbf16>, vector<32x128xf32> -> vector<32x128xf32>
    %79 = arith.addf %73, %78 : vector<32x128xf32>
    %c0_84 = arith.constant 0 : index
    %c4 = arith.constant 4 : index
    %c0_85 = arith.constant 0 : index
    %c0_86 = arith.constant 0 : index
    %80 = vector.load %arg14[%c0_84, %c4, %c0_85, %c0_86] : memref<2x10x8x192xbf16, #tpu.memory_space<vmem>>, vector<2x2x8x192xbf16>
    %81 = vector.shape_cast %80 : vector<2x2x8x192xbf16> to vector<32x192xbf16>
    %c2_87 = arith.constant 2 : index
    %c0_88 = arith.constant 0 : index
    %c0_89 = arith.constant 0 : index
    %82 = vector.load %arg6[%c2_87, %c0_88, %c0_89] : memref<3x192x128xbf16, #tpu.memory_space<vmem>>, vector<1x192x128xbf16>
    %83 = vector.shape_cast %82 : vector<1x192x128xbf16> to vector<192x128xbf16>
    %cst_90 = arith.constant dense<0.000000e+00> : vector<32x128xf32>
    %84 = tpu.matmul %81, %83, %cst_90 {dimension_numbers = #tpu.dot_dimension_numbers<[1], [0], [0], [1], [0, 0, 1, 1], [], []>} : vector<32x192xbf16>, vector<192x128xbf16>, vector<32x128xf32> -> vector<32x128xf32>
    %85 = arith.addf %79, %84 : vector<32x128xf32>
    %c0_91 = arith.constant 0 : index
    %c0_92 = arith.constant 0 : index
    %86 = vector.load %arg7[%c0_91, %c0_92] : memref<1x128xf32, #tpu.memory_space<vmem>>, vector<1x128xf32>
    %87 = vector.broadcast %86 : vector<1x128xf32> to vector<32x128xf32>
    %88 = arith.addf %85, %87 : vector<32x128xf32>
    %cst_93 = arith.constant 0.000000e+00 : f32
    %89 = vector.broadcast %cst_93 : f32 to vector<32x128xf32>
    %90 = arith.maximumf %88, %89 : vector<32x128xf32>
    %91 = vector.shape_cast %90 : vector<32x128xf32> to vector<2x2x8x128xf32>
    %92 = vector.extract_strided_slice %91 {offsets = [0, 0, 0, 0], sizes = [2, 1, 8, 128], strides = [1, 1, 1, 1]} : vector<2x2x8x128xf32> to vector<2x1x8x128xf32>
    %93 = vector.shape_cast %92 : vector<2x1x8x128xf32> to vector<2x8x128xf32>
    %94 = vector.extract_strided_slice %91 {offsets = [0, 1, 0, 0], sizes = [2, 1, 8, 128], strides = [1, 1, 1, 1]} : vector<2x2x8x128xf32> to vector<2x1x8x128xf32>
    %95 = vector.shape_cast %94 : vector<2x1x8x128xf32> to vector<2x8x128xf32>
    %96 = arith.maximumf %93, %95 : vector<2x8x128xf32>
    %97 = vector.shape_cast %96 : vector<2x8x128xf32> to vector<2x4x2x128xf32>
    %98 = vector.extract_strided_slice %97 {offsets = [0, 0, 0, 0], sizes = [2, 4, 1, 128], strides = [1, 1, 1, 1]} : vector<2x4x2x128xf32> to vector<2x4x1x128xf32>
    %99 = vector.shape_cast %98 : vector<2x4x1x128xf32> to vector<2x4x128xf32>
    %100 = vector.extract_strided_slice %97 {offsets = [0, 0, 1, 0], sizes = [2, 4, 1, 128], strides = [1, 1, 1, 1]} : vector<2x4x2x128xf32> to vector<2x4x1x128xf32>
    %101 = vector.shape_cast %100 : vector<2x4x1x128xf32> to vector<2x4x128xf32>
    %102 = arith.maximumf %99, %101 : vector<2x4x128xf32>
    %103 = arith.truncf %102 : vector<2x4x128xf32> to vector<2x4x128xbf16>
    %104 = vector.extract_strided_slice %103 {offsets = [0, 0, 0], sizes = [2, 1, 128], strides = [1, 1, 1]} : vector<2x4x128xbf16> to vector<2x1x128xbf16>
    %105 = vector.shape_cast %104 : vector<2x1x128xbf16> to vector<2x128xbf16>
    %c0_94 = arith.constant 0 : index
    %c512 = arith.constant 512 : index
    %106 = vector.load %arg15[%c0_94, %c512] : memref<2x2048xbf16, #tpu.memory_space<vmem>>, vector<2x128xbf16>
    tpu.vector_store %arg15[%c0_94, %c512], %105 {strides = array<i32>} : memref<2x2048xbf16, #tpu.memory_space<vmem>>, vector<2x128xbf16>,
    %107 = vector.extract_strided_slice %103 {offsets = [0, 1, 0], sizes = [2, 1, 128], strides = [1, 1, 1]} : vector<2x4x128xbf16> to vector<2x1x128xbf16>
    %108 = vector.shape_cast %107 : vector<2x1x128xbf16> to vector<2x128xbf16>
    %c0_95 = arith.constant 0 : index
    %c640 = arith.constant 640 : index
    %109 = vector.load %arg15[%c0_95, %c640] : memref<2x2048xbf16, #tpu.memory_space<vmem>>, vector<2x128xbf16>
    tpu.vector_store %arg15[%c0_95, %c640], %108 {strides = array<i32>} : memref<2x2048xbf16, #tpu.memory_space<vmem>>, vector<2x128xbf16>,
    %110 = vector.extract_strided_slice %103 {offsets = [0, 2, 0], sizes = [2, 1, 128], strides = [1, 1, 1]} : vector<2x4x128xbf16> to vector<2x1x128xbf16>
    %111 = vector.shape_cast %110 : vector<2x1x128xbf16> to vector<2x128xbf16>
    %c0_96 = arith.constant 0 : index
    %c768 = arith.constant 768 : index
    %112 = vector.load %arg15[%c0_96, %c768] : memref<2x2048xbf16, #tpu.memory_space<vmem>>, vector<2x128xbf16>
    tpu.vector_store %arg15[%c0_96, %c768], %111 {strides = array<i32>} : memref<2x2048xbf16, #tpu.memory_space<vmem>>, vector<2x128xbf16>,
    %113 = vector.extract_strided_slice %103 {offsets = [0, 3, 0], sizes = [2, 1, 128], strides = [1, 1, 1]} : vector<2x4x128xbf16> to vector<2x1x128xbf16>
    %114 = vector.shape_cast %113 : vector<2x1x128xbf16> to vector<2x128xbf16>
    %c0_97 = arith.constant 0 : index
    %c896 = arith.constant 896 : index
    %115 = vector.load %arg15[%c0_97, %c896] : memref<2x2048xbf16, #tpu.memory_space<vmem>>, vector<2x128xbf16>
    tpu.vector_store %arg15[%c0_97, %c896], %114 {strides = array<i32>} : memref<2x2048xbf16, #tpu.memory_space<vmem>>, vector<2x128xbf16>,
    %cst_98 = arith.constant 0.000000e+00 : f32
    %116 = vector.broadcast %cst_98 : f32 to vector<32x128xf32>
    %c0_99 = arith.constant 0 : index
    %c4_100 = arith.constant 4 : index
    %c0_101 = arith.constant 0 : index
    %c0_102 = arith.constant 0 : index
    %117 = vector.load %arg14[%c0_99, %c4_100, %c0_101, %c0_102] : memref<2x10x8x192xbf16, #tpu.memory_space<vmem>>, vector<2x2x8x192xbf16>
    %118 = vector.shape_cast %117 : vector<2x2x8x192xbf16> to vector<32x192xbf16>
    %c0_103 = arith.constant 0 : index
    %c0_104 = arith.constant 0 : index
    %c0_105 = arith.constant 0 : index
    %119 = vector.load %arg6[%c0_103, %c0_104, %c0_105] : memref<3x192x128xbf16, #tpu.memory_space<vmem>>, vector<1x192x128xbf16>
    %120 = vector.shape_cast %119 : vector<1x192x128xbf16> to vector<192x128xbf16>
    %cst_106 = arith.constant dense<0.000000e+00> : vector<32x128xf32>
    %121 = tpu.matmul %118, %120, %cst_106 {dimension_numbers = #tpu.dot_dimension_numbers<[1], [0], [0], [1], [0, 0, 1, 1], [], []>} : vector<32x192xbf16>, vector<192x128xbf16>, vector<32x128xf32> -> vector<32x128xf32>
    %122 = arith.addf %116, %121 : vector<32x128xf32>
    %c0_107 = arith.constant 0 : index
    %c5 = arith.constant 5 : index
    %c0_108 = arith.constant 0 : index
    %c0_109 = arith.constant 0 : index
    %123 = vector.load %arg14[%c0_107, %c5, %c0_108, %c0_109] : memref<2x10x8x192xbf16, #tpu.memory_space<vmem>>, vector<2x2x8x192xbf16>
    %124 = vector.shape_cast %123 : vector<2x2x8x192xbf16> to vector<32x192xbf16>
    %c1_110 = arith.constant 1 : index
    %c0_111 = arith.constant 0 : index
    %c0_112 = arith.constant 0 : index
    %125 = vector.load %arg6[%c1_110, %c0_111, %c0_112] : memref<3x192x128xbf16, #tpu.memory_space<vmem>>, vector<1x192x128xbf16>
    %126 = vector.shape_cast %125 : vector<1x192x128xbf16> to vector<192x128xbf16>
    %cst_113 = arith.constant dense<0.000000e+00> : vector<32x128xf32>
    %127 = tpu.matmul %124, %126, %cst_113 {dimension_numbers = #tpu.dot_dimension_numbers<[1], [0], [0], [1], [0, 0, 1, 1], [], []>} : vector<32x192xbf16>, vector<192x128xbf16>, vector<32x128xf32> -> vector<32x128xf32>
    %128 = arith.addf %122, %127 : vector<32x128xf32>
    %c0_114 = arith.constant 0 : index
    %c6 = arith.constant 6 : index
    %c0_115 = arith.constant 0 : index
    %c0_116 = arith.constant 0 : index
    %129 = vector.load %arg14[%c0_114, %c6, %c0_115, %c0_116] : memref<2x10x8x192xbf16, #tpu.memory_space<vmem>>, vector<2x2x8x192xbf16>
    %130 = vector.shape_cast %129 : vector<2x2x8x192xbf16> to vector<32x192xbf16>
    %c2_117 = arith.constant 2 : index
    %c0_118 = arith.constant 0 : index
    %c0_119 = arith.constant 0 : index
    %131 = vector.load %arg6[%c2_117, %c0_118, %c0_119] : memref<3x192x128xbf16, #tpu.memory_space<vmem>>, vector<1x192x128xbf16>
    %132 = vector.shape_cast %131 : vector<1x192x128xbf16> to vector<192x128xbf16>
    %cst_120 = arith.constant dense<0.000000e+00> : vector<32x128xf32>
    %133 = tpu.matmul %130, %132, %cst_120 {dimension_numbers = #tpu.dot_dimension_numbers<[1], [0], [0], [1], [0, 0, 1, 1], [], []>} : vector<32x192xbf16>, vector<192x128xbf16>, vector<32x128xf32> -> vector<32x128xf32>
    %134 = arith.addf %128, %133 : vector<32x128xf32>
    %c0_121 = arith.constant 0 : index
    %c0_122 = arith.constant 0 : index
    %135 = vector.load %arg7[%c0_121, %c0_122] : memref<1x128xf32, #tpu.memory_space<vmem>>, vector<1x128xf32>
    %136 = vector.broadcast %135 : vector<1x128xf32> to vector<32x128xf32>
    %137 = arith.addf %134, %136 : vector<32x128xf32>
    %cst_123 = arith.constant 0.000000e+00 : f32
    %138 = vector.broadcast %cst_123 : f32 to vector<32x128xf32>
    %139 = arith.maximumf %137, %138 : vector<32x128xf32>
    %140 = vector.shape_cast %139 : vector<32x128xf32> to vector<2x2x8x128xf32>
    %141 = vector.extract_strided_slice %140 {offsets = [0, 0, 0, 0], sizes = [2, 1, 8, 128], strides = [1, 1, 1, 1]} : vector<2x2x8x128xf32> to vector<2x1x8x128xf32>
    %142 = vector.shape_cast %141 : vector<2x1x8x128xf32> to vector<2x8x128xf32>
    %143 = vector.extract_strided_slice %140 {offsets = [0, 1, 0, 0], sizes = [2, 1, 8, 128], strides = [1, 1, 1, 1]} : vector<2x2x8x128xf32> to vector<2x1x8x128xf32>
    %144 = vector.shape_cast %143 : vector<2x1x8x128xf32> to vector<2x8x128xf32>
    %145 = arith.maximumf %142, %144 : vector<2x8x128xf32>
    %146 = vector.shape_cast %145 : vector<2x8x128xf32> to vector<2x4x2x128xf32>
    %147 = vector.extract_strided_slice %146 {offsets = [0, 0, 0, 0], sizes = [2, 4, 1, 128], strides = [1, 1, 1, 1]} : vector<2x4x2x128xf32> to vector<2x4x1x128xf32>
    %148 = vector.shape_cast %147 : vector<2x4x1x128xf32> to vector<2x4x128xf32>
    %149 = vector.extract_strided_slice %146 {offsets = [0, 0, 1, 0], sizes = [2, 4, 1, 128], strides = [1, 1, 1, 1]} : vector<2x4x2x128xf32> to vector<2x4x1x128xf32>
    %150 = vector.shape_cast %149 : vector<2x4x1x128xf32> to vector<2x4x128xf32>
    %151 = arith.maximumf %148, %150 : vector<2x4x128xf32>
    %152 = arith.truncf %151 : vector<2x4x128xf32> to vector<2x4x128xbf16>
    %153 = vector.extract_strided_slice %152 {offsets = [0, 0, 0], sizes = [2, 1, 128], strides = [1, 1, 1]} : vector<2x4x128xbf16> to vector<2x1x128xbf16>
    %154 = vector.shape_cast %153 : vector<2x1x128xbf16> to vector<2x128xbf16>
    %c0_124 = arith.constant 0 : index
    %c1024 = arith.constant 1024 : index
    %155 = vector.load %arg15[%c0_124, %c1024] : memref<2x2048xbf16, #tpu.memory_space<vmem>>, vector<2x128xbf16>
    tpu.vector_store %arg15[%c0_124, %c1024], %154 {strides = array<i32>} : memref<2x2048xbf16, #tpu.memory_space<vmem>>, vector<2x128xbf16>,
    %156 = vector.extract_strided_slice %152 {offsets = [0, 1, 0], sizes = [2, 1, 128], strides = [1, 1, 1]} : vector<2x4x128xbf16> to vector<2x1x128xbf16>
    %157 = vector.shape_cast %156 : vector<2x1x128xbf16> to vector<2x128xbf16>
    %c0_125 = arith.constant 0 : index
    %c1152 = arith.constant 1152 : index
    %158 = vector.load %arg15[%c0_125, %c1152] : memref<2x2048xbf16, #tpu.memory_space<vmem>>, vector<2x128xbf16>
    tpu.vector_store %arg15[%c0_125, %c1152], %157 {strides = array<i32>} : memref<2x2048xbf16, #tpu.memory_space<vmem>>, vector<2x128xbf16>,
    %159 = vector.extract_strided_slice %152 {offsets = [0, 2, 0], sizes = [2, 1, 128], strides = [1, 1, 1]} : vector<2x4x128xbf16> to vector<2x1x128xbf16>
    %160 = vector.shape_cast %159 : vector<2x1x128xbf16> to vector<2x128xbf16>
    %c0_126 = arith.constant 0 : index
    %c1280 = arith.constant 1280 : index
    %161 = vector.load %arg15[%c0_126, %c1280] : memref<2x2048xbf16, #tpu.memory_space<vmem>>, vector<2x128xbf16>
    tpu.vector_store %arg15[%c0_126, %c1280], %160 {strides = array<i32>} : memref<2x2048xbf16, #tpu.memory_space<vmem>>, vector<2x128xbf16>,
    %162 = vector.extract_strided_slice %152 {offsets = [0, 3, 0], sizes = [2, 1, 128], strides = [1, 1, 1]} : vector<2x4x128xbf16> to vector<2x1x128xbf16>
    %163 = vector.shape_cast %162 : vector<2x1x128xbf16> to vector<2x128xbf16>
    %c0_127 = arith.constant 0 : index
    %c1408 = arith.constant 1408 : index
    %164 = vector.load %arg15[%c0_127, %c1408] : memref<2x2048xbf16, #tpu.memory_space<vmem>>, vector<2x128xbf16>
    tpu.vector_store %arg15[%c0_127, %c1408], %163 {strides = array<i32>} : memref<2x2048xbf16, #tpu.memory_space<vmem>>, vector<2x128xbf16>,
    %cst_128 = arith.constant 0.000000e+00 : f32
    %165 = vector.broadcast %cst_128 : f32 to vector<32x128xf32>
    %c0_129 = arith.constant 0 : index
    %c6_130 = arith.constant 6 : index
    %c0_131 = arith.constant 0 : index
    %c0_132 = arith.constant 0 : index
    %166 = vector.load %arg14[%c0_129, %c6_130, %c0_131, %c0_132] : memref<2x10x8x192xbf16, #tpu.memory_space<vmem>>, vector<2x2x8x192xbf16>
    %167 = vector.shape_cast %166 : vector<2x2x8x192xbf16> to vector<32x192xbf16>
    %c0_133 = arith.constant 0 : index
    %c0_134 = arith.constant 0 : index
    %c0_135 = arith.constant 0 : index
    %168 = vector.load %arg6[%c0_133, %c0_134, %c0_135] : memref<3x192x128xbf16, #tpu.memory_space<vmem>>, vector<1x192x128xbf16>
    %169 = vector.shape_cast %168 : vector<1x192x128xbf16> to vector<192x128xbf16>
    %cst_136 = arith.constant dense<0.000000e+00> : vector<32x128xf32>
    %170 = tpu.matmul %167, %169, %cst_136 {dimension_numbers = #tpu.dot_dimension_numbers<[1], [0], [0], [1], [0, 0, 1, 1], [], []>} : vector<32x192xbf16>, vector<192x128xbf16>, vector<32x128xf32> -> vector<32x128xf32>
    %171 = arith.addf %165, %170 : vector<32x128xf32>
    %c0_137 = arith.constant 0 : index
    %c7_138 = arith.constant 7 : index
    %c0_139 = arith.constant 0 : index
    %c0_140 = arith.constant 0 : index
    %172 = vector.load %arg14[%c0_137, %c7_138, %c0_139, %c0_140] : memref<2x10x8x192xbf16, #tpu.memory_space<vmem>>, vector<2x2x8x192xbf16>
    %173 = vector.shape_cast %172 : vector<2x2x8x192xbf16> to vector<32x192xbf16>
    %c1_141 = arith.constant 1 : index
    %c0_142 = arith.constant 0 : index
    %c0_143 = arith.constant 0 : index
    %174 = vector.load %arg6[%c1_141, %c0_142, %c0_143] : memref<3x192x128xbf16, #tpu.memory_space<vmem>>, vector<1x192x128xbf16>
    %175 = vector.shape_cast %174 : vector<1x192x128xbf16> to vector<192x128xbf16>
    %cst_144 = arith.constant dense<0.000000e+00> : vector<32x128xf32>
    %176 = tpu.matmul %173, %175, %cst_144 {dimension_numbers = #tpu.dot_dimension_numbers<[1], [0], [0], [1], [0, 0, 1, 1], [], []>} : vector<32x192xbf16>, vector<192x128xbf16>, vector<32x128xf32> -> vector<32x128xf32>
    %177 = arith.addf %171, %176 : vector<32x128xf32>
    %c0_145 = arith.constant 0 : index
    %c8 = arith.constant 8 : index
    %c0_146 = arith.constant 0 : index
    %c0_147 = arith.constant 0 : index
    %178 = vector.load %arg14[%c0_145, %c8, %c0_146, %c0_147] : memref<2x10x8x192xbf16, #tpu.memory_space<vmem>>, vector<2x2x8x192xbf16>
    %179 = vector.shape_cast %178 : vector<2x2x8x192xbf16> to vector<32x192xbf16>
    %c2_148 = arith.constant 2 : index
    %c0_149 = arith.constant 0 : index
    %c0_150 = arith.constant 0 : index
    %180 = vector.load %arg6[%c2_148, %c0_149, %c0_150] : memref<3x192x128xbf16, #tpu.memory_space<vmem>>, vector<1x192x128xbf16>
    %181 = vector.shape_cast %180 : vector<1x192x128xbf16> to vector<192x128xbf16>
    %cst_151 = arith.constant dense<0.000000e+00> : vector<32x128xf32>
    %182 = tpu.matmul %179, %181, %cst_151 {dimension_numbers = #tpu.dot_dimension_numbers<[1], [0], [0], [1], [0, 0, 1, 1], [], []>} : vector<32x192xbf16>, vector<192x128xbf16>, vector<32x128xf32> -> vector<32x128xf32>
    %183 = arith.addf %177, %182 : vector<32x128xf32>
    %c0_152 = arith.constant 0 : index
    %c0_153 = arith.constant 0 : index
    %184 = vector.load %arg7[%c0_152, %c0_153] : memref<1x128xf32, #tpu.memory_space<vmem>>, vector<1x128xf32>
    %185 = vector.broadcast %184 : vector<1x128xf32> to vector<32x128xf32>
    %186 = arith.addf %183, %185 : vector<32x128xf32>
    %cst_154 = arith.constant 0.000000e+00 : f32
    %187 = vector.broadcast %cst_154 : f32 to vector<32x128xf32>
    %188 = arith.maximumf %186, %187 : vector<32x128xf32>
    %189 = vector.shape_cast %188 : vector<32x128xf32> to vector<2x2x8x128xf32>
    %190 = vector.extract_strided_slice %189 {offsets = [0, 0, 0, 0], sizes = [2, 1, 8, 128], strides = [1, 1, 1, 1]} : vector<2x2x8x128xf32> to vector<2x1x8x128xf32>
    %191 = vector.shape_cast %190 : vector<2x1x8x128xf32> to vector<2x8x128xf32>
    %192 = vector.extract_strided_slice %189 {offsets = [0, 1, 0, 0], sizes = [2, 1, 8, 128], strides = [1, 1, 1, 1]} : vector<2x2x8x128xf32> to vector<2x1x8x128xf32>
    %193 = vector.shape_cast %192 : vector<2x1x8x128xf32> to vector<2x8x128xf32>
    %194 = arith.maximumf %191, %193 : vector<2x8x128xf32>
    %195 = vector.shape_cast %194 : vector<2x8x128xf32> to vector<2x4x2x128xf32>
    %196 = vector.extract_strided_slice %195 {offsets = [0, 0, 0, 0], sizes = [2, 4, 1, 128], strides = [1, 1, 1, 1]} : vector<2x4x2x128xf32> to vector<2x4x1x128xf32>
    %197 = vector.shape_cast %196 : vector<2x4x1x128xf32> to vector<2x4x128xf32>
    %198 = vector.extract_strided_slice %195 {offsets = [0, 0, 1, 0], sizes = [2, 4, 1, 128], strides = [1, 1, 1, 1]} : vector<2x4x2x128xf32> to vector<2x4x1x128xf32>
    %199 = vector.shape_cast %198 : vector<2x4x1x128xf32> to vector<2x4x128xf32>
    %200 = arith.maximumf %197, %199 : vector<2x4x128xf32>
    %201 = arith.truncf %200 : vector<2x4x128xf32> to vector<2x4x128xbf16>
    %202 = vector.extract_strided_slice %201 {offsets = [0, 0, 0], sizes = [2, 1, 128], strides = [1, 1, 1]} : vector<2x4x128xbf16> to vector<2x1x128xbf16>
    %203 = vector.shape_cast %202 : vector<2x1x128xbf16> to vector<2x128xbf16>
    %c0_155 = arith.constant 0 : index
    %c1536 = arith.constant 1536 : index
    %204 = vector.load %arg15[%c0_155, %c1536] : memref<2x2048xbf16, #tpu.memory_space<vmem>>, vector<2x128xbf16>
    tpu.vector_store %arg15[%c0_155, %c1536], %203 {strides = array<i32>} : memref<2x2048xbf16, #tpu.memory_space<vmem>>, vector<2x128xbf16>,
    %205 = vector.extract_strided_slice %201 {offsets = [0, 1, 0], sizes = [2, 1, 128], strides = [1, 1, 1]} : vector<2x4x128xbf16> to vector<2x1x128xbf16>
    %206 = vector.shape_cast %205 : vector<2x1x128xbf16> to vector<2x128xbf16>
    %c0_156 = arith.constant 0 : index
    %c1664 = arith.constant 1664 : index
    %207 = vector.load %arg15[%c0_156, %c1664] : memref<2x2048xbf16, #tpu.memory_space<vmem>>, vector<2x128xbf16>
    tpu.vector_store %arg15[%c0_156, %c1664], %206 {strides = array<i32>} : memref<2x2048xbf16, #tpu.memory_space<vmem>>, vector<2x128xbf16>,
    %208 = vector.extract_strided_slice %201 {offsets = [0, 2, 0], sizes = [2, 1, 128], strides = [1, 1, 1]} : vector<2x4x128xbf16> to vector<2x1x128xbf16>
    %209 = vector.shape_cast %208 : vector<2x1x128xbf16> to vector<2x128xbf16>
    %c0_157 = arith.constant 0 : index
    %c1792 = arith.constant 1792 : index
    %210 = vector.load %arg15[%c0_157, %c1792] : memref<2x2048xbf16, #tpu.memory_space<vmem>>, vector<2x128xbf16>
    tpu.vector_store %arg15[%c0_157, %c1792], %209 {strides = array<i32>} : memref<2x2048xbf16, #tpu.memory_space<vmem>>, vector<2x128xbf16>,
    %211 = vector.extract_strided_slice %201 {offsets = [0, 3, 0], sizes = [2, 1, 128], strides = [1, 1, 1]} : vector<2x4x128xbf16> to vector<2x1x128xbf16>
    %212 = vector.shape_cast %211 : vector<2x1x128xbf16> to vector<2x128xbf16>
    %c0_158 = arith.constant 0 : index
    %c1920 = arith.constant 1920 : index
    %213 = vector.load %arg15[%c0_158, %c1920] : memref<2x2048xbf16, #tpu.memory_space<vmem>>, vector<2x128xbf16>
    tpu.vector_store %arg15[%c0_158, %c1920], %212 {strides = array<i32>} : memref<2x2048xbf16, #tpu.memory_space<vmem>>, vector<2x128xbf16>,
    %c0_159 = arith.constant 0 : index
    %c0_160 = arith.constant 0 : index
    %214 = vector.load %arg15[%c0_159, %c0_160] : memref<2x2048xbf16, #tpu.memory_space<vmem>>, vector<2x2048xbf16>
    %c0_161 = arith.constant 0 : index
    %c0_162 = arith.constant 0 : index
    %215 = vector.load %arg8[%c0_161, %c0_162] : memref<2048x512xbf16, #tpu.memory_space<vmem>>, vector<2048x512xbf16>
    %cst_163 = arith.constant dense<0.000000e+00> : vector<2x512xf32>
    %216 = tpu.matmul %214, %215, %cst_163 {dimension_numbers = #tpu.dot_dimension_numbers<[1], [0], [0], [1], [0, 0, 1, 1], [], []>} : vector<2x2048xbf16>, vector<2048x512xbf16>, vector<2x512xf32> -> vector<2x512xf32>
    %c0_164 = arith.constant 0 : index
    %c0_165 = arith.constant 0 : index
    %217 = vector.load %arg9[%c0_164, %c0_165] : memref<1x512xf32, #tpu.memory_space<vmem>>, vector<1x512xf32>
    %218 = vector.broadcast %217 : vector<1x512xf32> to vector<2x512xf32>
    %219 = arith.addf %216, %218 : vector<2x512xf32>
    %cst_166 = arith.constant 0.000000e+00 : f32
    %220 = vector.broadcast %cst_166 : f32 to vector<2x512xf32>
    %221 = arith.maximumf %219, %220 : vector<2x512xf32>
    %222 = arith.truncf %221 : vector<2x512xf32> to vector<2x512xbf16>
    %c0_167 = arith.constant 0 : index
    %c0_168 = arith.constant 0 : index
    %223 = vector.load %arg10[%c0_167, %c0_168] : memref<512x128xbf16, #tpu.memory_space<vmem>>, vector<512x128xbf16>
    %cst_169 = arith.constant dense<0.000000e+00> : vector<2x128xf32>
    %224 = tpu.matmul %222, %223, %cst_169 {dimension_numbers = #tpu.dot_dimension_numbers<[1], [0], [0], [1], [0, 0, 1, 1], [], []>} : vector<2x512xbf16>, vector<512x128xbf16>, vector<2x128xf32> -> vector<2x128xf32>
    %c0_170 = arith.constant 0 : index
    %c0_171 = arith.constant 0 : index
    %225 = vector.load %arg11[%c0_170, %c0_171] : memref<1x128xf32, #tpu.memory_space<vmem>>, vector<1x128xf32>
    %226 = vector.broadcast %225 : vector<1x128xf32> to vector<2x128xf32>
    %227 = arith.addf %224, %226 : vector<2x128xf32>
    %c0_172 = arith.constant 0 : index
    %c0_173 = arith.constant 0 : index
    %228 = vector.load %arg12[%c0_172, %c0_173] : memref<2x128xf32, #tpu.memory_space<vmem>>, vector<2x128xf32>
    tpu.vector_store %arg12[%c0_172, %c0_173], %227 {strides = array<i32>} : memref<2x128xf32, #tpu.memory_space<vmem>>, vector<2x128xf32>,
    return
  }
  func.func @transform_0(%arg0: i32) -> (i32, i32, i32, i32) {
    %c0_i32 = arith.constant 0 : i32
    %c0_i32_0 = arith.constant 0 : i32
    %c0_i32_1 = arith.constant 0 : i32
    %c0_i32_2 = arith.constant 0 : i32
    return %arg0, %c0_i32, %c0_i32_0, %c0_i32_1 : i32, i32, i32, i32
  }
  func.func @transform_1(%arg0: i32) -> (i32, i32, i32) {
    %c0_i32 = arith.constant 0 : i32
    %c0_i32_0 = arith.constant 0 : i32
    %c0_i32_1 = arith.constant 0 : i32
    %c0_i32_2 = arith.constant 0 : i32
    return %c0_i32, %c0_i32_0, %c0_i32_1 : i32, i32, i32
  }
  func.func @transform_2(%arg0: i32) -> (i32, i32) {
    %c0_i32 = arith.constant 0 : i32
    %c0_i32_0 = arith.constant 0 : i32
    %c0_i32_1 = arith.constant 0 : i32
    return %c0_i32, %c0_i32_0 : i32, i32
  }
  func.func @transform_3(%arg0: i32) -> (i32, i32, i32) {
    %c0_i32 = arith.constant 0 : i32
    %c0_i32_0 = arith.constant 0 : i32
    %c0_i32_1 = arith.constant 0 : i32
    %c0_i32_2 = arith.constant 0 : i32
    return %c0_i32, %c0_i32_0, %c0_i32_1 : i32, i32, i32
  }
  func.func @transform_4(%arg0: i32) -> (i32, i32) {
    %c0_i32 = arith.constant 0 : i32
    %c0_i32_0 = arith.constant 0 : i32
    %c0_i32_1 = arith.constant 0 : i32
    return %c0_i32, %c0_i32_0 : i32, i32
  }
  func.func @transform_5(%arg0: i32) -> (i32, i32, i32) {
    %c0_i32 = arith.constant 0 : i32
    %c0_i32_0 = arith.constant 0 : i32
    %c0_i32_1 = arith.constant 0 : i32
    %c0_i32_2 = arith.constant 0 : i32
    return %c0_i32, %c0_i32_0, %c0_i32_1 : i32, i32, i32
  }
  func.func @transform_6(%arg0: i32) -> (i32, i32) {
    %c0_i32 = arith.constant 0 : i32
    %c0_i32_0 = arith.constant 0 : i32
    %c0_i32_1 = arith.constant 0 : i32
    return %c0_i32, %c0_i32_0 : i32, i32
  }
  func.func @transform_7(%arg0: i32) -> (i32, i32) {
    %c0_i32 = arith.constant 0 : i32
    %c0_i32_0 = arith.constant 0 : i32
    %c0_i32_1 = arith.constant 0 : i32
    return %c0_i32, %c0_i32_0 : i32, i32
  }
  func.func @transform_8(%arg0: i32) -> (i32, i32) {
    %c0_i32 = arith.constant 0 : i32
    %c0_i32_0 = arith.constant 0 : i32
    %c0_i32_1 = arith.constant 0 : i32
    return %c0_i32, %c0_i32_0 : i32, i32
  }
  func.func @transform_9(%arg0: i32) -> (i32, i32) {
    %c0_i32 = arith.constant 0 : i32
    %c0_i32_0 = arith.constant 0 : i32
    %c0_i32_1 = arith.constant 0 : i32
    return %c0_i32, %c0_i32_0 : i32, i32
  }
  func.func @transform_10(%arg0: i32) -> (i32, i32) {
    %c0_i32 = arith.constant 0 : i32
    %c0_i32_0 = arith.constant 0 : i32
    %c0_i32_1 = arith.constant 0 : i32
    return %c0_i32, %c0_i32_0 : i32, i32
  }
  func.func @transform_11(%arg0: i32) -> (i32, i32) {
    %c0_i32 = arith.constant 0 : i32
    %c0_i32_0 = arith.constant 0 : i32
    return %arg0, %c0_i32 : i32, i32
  }
}

</mosaic_0001>

<bundles_post_ra>
// kernel: net_forward.1
= control target key start
LH: loop header
LB: loop body
LE: loop exit
PB: predicated region body
PF: predicated region fallthrough
CT: control target
= control target key end

     0   :  { %16 = vsyncpa [#allocation6], 0  ;;  %s15112_s0 = inlined_call_operand.vmem [shape: bf16[2,34,32,9], index: 0, kind: input, shape index: {}]   ;;  %s15113_s1 = inlined_call_operand.vmem [shape: bf16[3,9,32], index: 1, kind: input, shape index: {}]   ;;  %s15114_s2 = inlined_call_operand.hbm [shape: f32[1,32], index: 2, kind: input, shape index: {}]   ;;  %s15115_s3 = inlined_call_operand.vmem [shape: bf16[3,96,64], index: 3, kind: input, shape index: {}]   ;;  %s15116_s4 = inlined_call_operand.hbm [shape: f32[1,64], index: 4, kind: input, shape index: {}]   ;;  %s15117_s5 = inlined_call_operand.hbm [shape: bf16[3,192,128], index: 5, kind: input, shape index: {}]   ;;  %s15118_s6 = inlined_call_operand.hbm [shape: f32[1,128], index: 6, kind: input, shape index: {}]   ;;  %s15119_s7 = inlined_call_operand.hbm [shape: bf16[2048,512], index: 7, kind: input, shape index: {}]   ;;  %s15120_s8 = inlined_call_operand.hbm [shape: f32[1,512], index: 8, kind: input, shape index: {}]   ;;  %s15121_s9 = inlined_call_operand.hbm [shape: bf16[512,128], index: 9, kind: input, shape index: {}]   ;;  %s15122_s10 = inlined_call_operand.hbm [shape: f32[1,128], index: 10, kind: input, shape index: {}]   ;;  %s15123_s11 = inlined_call_operand.hbm [shape: f32[2,128], index: 11, kind: output, shape index: {}]  }
   0x1   :  { %17 = vsyncpa [#allocation9], 0 }
   0x2   :  { %18 = vsyncpa [#allocation12], 0 }
   0x3   :  { %19 = vsyncpa [#allocation15], 0 }
   0x4   :  { %20 = vsyncpa [#allocation18], 0 }
   0x5   :  { %21 = vsyncpa [#allocation7], 0  ;;  %s13316_s17 = smov [#allocation8]   ;;  %s13317_s19 = smov [#allocation11]  }
   0x6   :  { %s44_s18 = sshll.u32 %s13316_s17, 4  ;;  %s66_s20 = sshll.u32 %s13317_s19, 4  ;;  %s45_s18 = int_to_ptr.vmem [resolvable:$true] %s44_s18  ;;  %s67_s20 = int_to_ptr.vmem [resolvable:$true] %s66_s20 }
   0x7   :  { %s13090_s23 = scalar_lea.hbm %s15116_s4, 16 }
   0x8   :  { %p13091_p0 = scmp.ne.s32.totalorder %s15116_s4, %s13090_s23  ;;  %p13094_p1 = scmp.lt.u32.totalorder %s13090_s23, %s15116_s4 }
   0xa   :  { %p13096_p2 = pnand %p13094_p1, %p13091_p0 }
   0xc   :  { %13099 = shalt.err (!%p13096_p2)
}
   0xd   :  { %s13100_s28 = scalar_lea.vmem %s45_s18, 16  ;;  %s13104_s29 = scalar_lea.vmem %s45_s18, 32 }
   0xe   :  { %p13101_p3 = scmp.ne.s32.totalorder %s45_s18, %s13100_s28  ;;  %p13105_p4 = scmp.lt.s32.totalorder %s45_s18, %s45_s18 }
   0xf   :  { %p13106_p5 = scmp.lt.s32.totalorder %s13104_s29, %s13100_s28 }
  0x11   :  { %p13107_p6 = por %p13106_p5, %p13105_p4 }
  0x13   :  { %p13108_p7 = pnand %p13107_p6, %p13101_p3 }
  0x15   :  { %13111 = shalt.err (!%p13108_p7)
}
  0x16   :  { %47 = dma.hbm_to_vmem [thread:$0]  %s15116_s4, 16, %s45_s18, [#allocation9]  }
  0x17   :  { %s13112_s15 = scalar_lea.hbm %s15118_s6, 16 }
  0x18   :  { %p13113_p8 = scmp.ne.s32.totalorder %s15118_s6, %s13112_s15  ;;  %p13116_p9 = scmp.lt.u32.totalorder %s13112_s15, %s15118_s6 }
  0x1a   :  { %p13118_p10 = pnand %p13116_p9, %p13113_p8 }
  0x1c   :  { %13121 = shalt.err (!%p13118_p10)
}
  0x1d   :  { %s13122_s22 = scalar_lea.vmem %s67_s20, 16  ;;  %s13126_s23 = scalar_lea.vmem %s67_s20, 32 }
  0x1e   :  { %p13123_p11 = scmp.ne.s32.totalorder %s67_s20, %s13122_s22  ;;  %p13127_p12 = scmp.lt.s32.totalorder %s67_s20, %s67_s20 }
  0x1f   :  { %p13128_p13 = scmp.lt.s32.totalorder %s13126_s23, %s13122_s22 }
  0x21   :  { %p13129_p0 = por %p13128_p13, %p13127_p12 }
  0x23   :  { %p13130_p1 = pnand %p13129_p0, %p13123_p11 }
  0x25   :  { %13133 = shalt.err (!%p13130_p1)
}
  0x26   :  { %69 = dma.hbm_to_vmem [thread:$0]  %s15118_s6, 16, %s67_s20, [#allocation12]  }
  0x27   :  { %s13318_s24 = smov [#allocation14]   ;;  %s13319_s26 = smov [#allocation5]  }
  0x28   :  { %s88_s25 = sshll.u32 %s13318_s24, 4  ;;  %s32_s27 = sshll.u32 %s13319_s26, 4  ;;  %s89_s25 = int_to_ptr.vmem [resolvable:$true] %s88_s25  ;;  %s33_s27 = int_to_ptr.vmem [resolvable:$true] %s32_s27 }
  0x29   :  { %s13134_s30 = scalar_lea.hbm %s15120_s8, 64 }
  0x2a   :  { %p13135_p2 = scmp.ne.s32.totalorder %s15120_s8, %s13134_s30  ;;  %p13138_p3 = scmp.lt.u32.totalorder %s13134_s30, %s15120_s8 }
  0x2c   :  { %p13140_p4 = pnand %p13138_p3, %p13135_p2 }
  0x2e   :  { %13143 = shalt.err (!%p13140_p4)
}
  0x2f   :  { %s13144_s6 = scalar_lea.vmem %s89_s25, 64  ;;  %p13149_p6 = scmp.lt.s32.totalorder %s89_s25, %s89_s25 }
  0x30   :  { %p13145_p5 = scmp.ne.s32.totalorder %s89_s25, %s13144_s6  ;;  %p13150_p7 = scmp.lt.s32.totalorder %s13144_s6, %s13144_s6 }
  0x32   :  { %p13151_p8 = por %p13150_p7, %p13149_p6 }
  0x34   :  { %p13152_p9 = pnand %p13151_p8, %p13145_p5 }
  0x36   :  { %13155 = shalt.err (!%p13152_p9)
}
  0x37   :  { %91 = dma.hbm_to_vmem [thread:$0]  %s15120_s8, 64, %s89_s25, [#allocation15]  }
  0x38   :  { %s13156_s21 = scalar_lea.hbm %s15114_s2, 16 }
  0x39   :  { %p13157_p10 = scmp.ne.s32.totalorder %s15114_s2, %s13156_s21  ;;  %p13160_p11 = scmp.lt.u32.totalorder %s13156_s21, %s15114_s2 }
  0x3b   :  { %p13162_p12 = pnand %p13160_p11, %p13157_p10 }
  0x3d   :  { %13165 = shalt.err (!%p13162_p12)
}
  0x3e   :  { %s13166_s24 = scalar_lea.vmem %s33_s27, 16  ;;  %s13170_s26 = scalar_lea.vmem %s33_s27, 32 }
  0x3f   :  { %p13167_p13 = scmp.ne.s32.totalorder %s33_s27, %s13166_s24  ;;  %p13171_p0 = scmp.lt.s32.totalorder %s33_s27, %s33_s27 }
  0x40   :  { %p13172_p1 = scmp.lt.s32.totalorder %s13170_s26, %s13166_s24 }
  0x42   :  { %p13173_p2 = por %p13172_p1, %p13171_p0 }
  0x44   :  { %p13174_p3 = pnand %p13173_p2, %p13167_p13 }
  0x46   :  { %13177 = shalt.err (!%p13174_p3)
}
  0x47   :  { %35 = dma.hbm_to_vmem [thread:$0]  %s15114_s2, 16, %s33_s27, [#allocation6]  }
  0x48   :  { %s13320_s28 = smov [#allocation10]   ;;  %s13178_s13 = scalar_lea.hbm %s15117_s5, 4608 }
  0x49   :  { %s53_s29 = sshll.u32 %s13320_s28, 4  ;;  %p13179_p4 = scmp.ne.s32.totalorder %s15117_s5, %s13178_s13  ;;  %s54_s29 = int_to_ptr.vmem [resolvable:$true] %s53_s29 }
  0x4a   :  { %p13182_p5 = scmp.lt.u32.totalorder %s13178_s13, %s15117_s5 }
  0x4c   :  { %p13184_p6 = pnand %p13182_p5, %p13179_p4 }
  0x4e   :  { %13187 = shalt.err (!%p13184_p6)
}
  0x4f   :  { %s13188_s16 = scalar_lea.vmem %s54_s29, 4608  ;;  %p13193_p8 = scmp.lt.s32.totalorder %s54_s29, %s54_s29 }
  0x50   :  { %p13189_p7 = scmp.ne.s32.totalorder %s54_s29, %s13188_s16  ;;  %p13194_p9 = scmp.lt.s32.totalorder %s13188_s16, %s13188_s16 }
  0x52   :  { %p13195_p10 = por %p13194_p9, %p13193_p8 }
  0x54   :  { %p13196_p11 = pnand %p13195_p10, %p13189_p7 }
  0x56   :  { %13199 = shalt.err (!%p13196_p11)
}
  0x57   :  { %s13321_s2 = smov 64   ;;  %s13322_s27 = smov 4  }
  0x58   :  { %59 = dma.hbm_to_vmem [thread:$0]  %s15117_s5, 4608, %s54_s29, [#allocation9], %s13321_s2, %s13321_s2, %s13322_s27  }
  0x59   :  { %s13323_s21 = smov [#allocation13]   ;;  %s13200_s18 = scalar_lea.hbm %s15119_s7, 65536 }
  0x5a   :  { %s75_s22 = sshll.u32 %s13323_s21, 4  ;;  %p13201_p12 = scmp.ne.s32.totalorder %s15119_s7, %s13200_s18  ;;  %s76_s22 = int_to_ptr.vmem [resolvable:$true] %s75_s22 }
  0x5b   :  { %p13204_p13 = scmp.lt.u32.totalorder %s13200_s18, %s15119_s7 }
  0x5d   :  { %p13206_p0 = pnand %p13204_p13, %p13201_p12 }
  0x5f   :  { %13209 = shalt.err (!%p13206_p0)
}
  0x60   :  { %s13210_s28 = scalar_lea.vmem %s76_s22, 65536  ;;  %p13215_p2 = scmp.lt.s32.totalorder %s76_s22, %s76_s22 }
  0x61   :  { %p13211_p1 = scmp.ne.s32.totalorder %s76_s22, %s13210_s28  ;;  %p13216_p3 = scmp.lt.s32.totalorder %s13210_s28, %s13210_s28 }
  0x63   :  { %p13217_p4 = por %p13216_p3, %p13215_p2 }
  0x65   :  { %p13218_p5 = pnand %p13217_p4, %p13211_p1 }
  0x67   :  { %13221 = shalt.err (!%p13218_p5)
}
  0x68   :  { %s13324_s5 = smov 256   ;;  %s13325_s29 = smov 16  }
  0x69   :  { %81 = dma.hbm_to_vmem [thread:$0]  %s15119_s7, 65536, %s76_s22, [#allocation12], %s13324_s5, %s13324_s5, %s13325_s29  }
  0x6a   :  { %s13326_s13 = smov [#allocation16]   ;;  %s13327_s15 = smov [#allocation17]  }
  0x6b   :  { %s97_s14 = sshll.u32 %s13326_s13, 4  ;;  %s110_s6 = sshll.u32 %s13327_s15, 4  ;;  %s98_s14 = int_to_ptr.vmem [resolvable:$true] %s97_s14  ;;  %s111_s6 = int_to_ptr.vmem [resolvable:$true] %s110_s6 }
  0x6c   :  { %s13222_s17 = scalar_lea.hbm %s15121_s9, 4096 }
  0x6d   :  { %p13223_p6 = scmp.ne.s32.totalorder %s15121_s9, %s13222_s17  ;;  %p13226_p7 = scmp.lt.u32.totalorder %s13222_s17, %s15121_s9 }
  0x6f   :  { %p13228_p8 = pnand %p13226_p7, %p13223_p6 }
  0x71   :  { %13231 = shalt.err (!%p13228_p8)
}
  0x72   :  { %s13232_s7 = scalar_lea.vmem %s98_s14, 4096  ;;  %p13237_p10 = scmp.lt.s32.totalorder %s98_s14, %s98_s14 }
  0x73   :  { %p13233_p9 = scmp.ne.s32.totalorder %s98_s14, %s13232_s7  ;;  %p13238_p11 = scmp.lt.s32.totalorder %s13232_s7, %s13232_s7 }
  0x75   :  { %p13239_p12 = por %p13238_p11, %p13237_p10 }
  0x77   :  { %p13240_p13 = pnand %p13239_p12, %p13233_p9 }
  0x79   :  { %13243 = shalt.err (!%p13240_p13)
}
  0x7a   :  { %103 = dma.hbm_to_vmem [thread:$0]  %s15121_s9, 4096, %s98_s14, [#allocation15], %s13321_s2, %s13321_s2, %s13322_s27  }
  0x7b   :  { %s13244_s8 = scalar_lea.hbm %s15122_s10, 16 }
  0x7c   :  { %p13245_p0 = scmp.ne.s32.totalorder %s15122_s10, %s13244_s8  ;;  %p13248_p1 = scmp.lt.u32.totalorder %s13244_s8, %s15122_s10 }
  0x7e   :  { %p13250_p2 = pnand %p13248_p1, %p13245_p0 }
  0x80   :  { %13253 = shalt.err (!%p13250_p2)
}
  0x81   :  { %s13254_s30 = scalar_lea.vmem %s111_s6, 16  ;;  %s13258_s12 = scalar_lea.vmem %s111_s6, 32 }
  0x82   :  { %p13255_p3 = scmp.ne.s32.totalorder %s111_s6, %s13254_s30  ;;  %p13259_p4 = scmp.lt.s32.totalorder %s111_s6, %s111_s6 }
  0x83   :  { %p13260_p5 = scmp.lt.s32.totalorder %s13258_s12, %s13254_s30 }
  0x85   :  { %p13261_p6 = por %p13260_p5, %p13259_p4 }
  0x87   :  { %p13262_p7 = pnand %p13261_p6, %p13255_p3 }
  0x89   :  { %13265 = shalt.err (!%p13262_p7)
}
  0x8a   :  { %113 = dma.hbm_to_vmem [thread:$0]  %s15122_s10, 16, %s111_s6, [#allocation18]  }
  0x8b   :  { %13296 = dma.done.wait [#allocation6], 16  }
  0x8c   :  { %13297 = vsyncadd [#allocation6], 4294967280 }
  0x8d   :  { %13298 = dma.done.wait [#allocation9], 4624  }
  0x8e   :  { %13299 = vsyncadd [#allocation9], 4294962672 }
  0x8f   :  { %13300 = dma.done.wait [#allocation12], 65552  }
  0x90   :  { %13301 = vsyncadd [#allocation12], 4294901744 }
  0x91   :  { %13302 = dma.done.wait [#allocation15], 4160  }
  0x92   :  { %13303 = vsyncadd [#allocation15], 4294963136 }
  0x93   :  { %13304 = dma.done.wait [#allocation18], 16  }
  0x94   :  { %13305 = vsyncadd [#allocation18], 4294967280  ;;  %vm139_vm0 = vcmask 785408   ;;  %vm367_vm1 = vcmask 1043456   ;;  %vm368_vm2 = vcmask 523268   ;;  %v15124_v0 = vmov 0  }
  0x95   :  { %140 = vst.msk [vmem:[#allocation2] sm:$0xff] %vm139_vm0, %v15124_v0  ;;  %141 = vst.msk [vmem:[#allocation2 + $0x90] sm:$0xff] %vm139_vm0, %v15124_v0  ;;  %vm145_vm4 = vcmask 253952   ;;  %vm146_vm5 = vsmask.f32 256  ;;  %vm256_vm7 = vcmask 785927  }
  0x96   :  { %143 = vst.msk [vmem:[#allocation2 + $0x88] sm:$0xff] %vm139_vm0, %v15124_v0  ;;  %144 = vst.msk [vmem:[#allocation2 + $0x118] sm:$0xff] %vm139_vm0, %v15124_v0  ;;  %v151_v2 = vld [vmem:[#allocation2 + $0x8] sm:$0x1]  ;;  %v154_v3 = vld [vmem:[#allocation2 + $0x10] sm:$0x1] }
  0x97   :  { %vm369_vm3 = vmor %vm368_vm2, %vm367_vm1  ;;  %v157_v4 = vld [vmem:[#allocation2 + $0x18] sm:$0x1]  ;;  %v160_v10 = vld [vmem:[#allocation2 + $0x20] sm:$0x1]  ;;  %vm257_vm8 = vsmask.f32 7966 }
  0x98   :  { %370 = vst.msk [vmem:[#allocation3] sm:$0xff] %vm369_vm3, %v15124_v0  ;;  %371 = vst.msk [vmem:[#allocation3 + $0x50] sm:$0xff] %vm369_vm3, %v15124_v0  ;;  %v163_v11 = vld [vmem:[#allocation2 + $0x28] sm:$0x1]  ;;  %v166_v14 = vld [vmem:[#allocation2 + $0x30] sm:$0x1] }
  0x99   :  { %373 = vst.msk [vmem:[#allocation3 + $0x48] sm:$0xff] %vm369_vm3, %v15124_v0  ;;  %374 = vst.msk [vmem:[#allocation3 + $0x98] sm:$0xff] %vm369_vm3, %v15124_v0  ;;  %v169_v15 = vld [vmem:[#allocation2 + $0x38] sm:$0x1]  ;;  %v172_v18 = vld [vmem:[#allocation2 + $0x40] sm:$0x1] }
  0x9a   :  { %vm13513_vm6 = vmand %vm145_vm4, %vm146_vm5  ;;  %v175_v19 = vld [vmem:[#allocation2 + $0x48] sm:$0x1]  ;;  %v178_v22 = vld [vmem:[#allocation2 + $0x50] sm:$0x1]  ;;  %vm375_vm10 = vcmask 516096   ;;  %vm437_vm11 = vcmask 519171  }
  0x9b   :  { %v152_v6 = vsel %vm13513_vm6, 0, %v151_v2  ;;  %v155_v7 = vsel %vm13513_vm6, 0, %v154_v3  ;;  %v158_v8 = vsel %vm13513_vm6, 0, %v157_v4  ;;  %v161_v12 = vsel %vm13513_vm6, 0, %v160_v10  ;;  %v181_v23 = vld [vmem:[#allocation2 + $0x58] sm:$0x1]  ;;  %vm13583_vm9 = vmand %vm256_vm7, %vm257_vm8 }
  0x9c   :  { %v148_v5 = vld [vmem:[#allocation2] sm:$0x1]  ;;  %153 = vst [vmem:[#allocation2 + $0x8] sm:$0x1] %v152_v6  ;;  %156 = vst [vmem:[#allocation2 + $0x10] sm:$0x1] %v155_v7 }
  0x9d   :  { %v149_v9 = vsel %vm13513_vm6, 0, %v148_v5  ;;  %159 = vst [vmem:[#allocation2 + $0x18] sm:$0x1] %v158_v8  ;;  %v164_v13 = vsel %vm13513_vm6, 0, %v163_v11  ;;  %162 = vst [vmem:[#allocation2 + $0x20] sm:$0x1] %v161_v12 }
  0x9e   :  { %150 = vst [vmem:[#allocation2] sm:$0x1] %v149_v9  ;;  %165 = vst [vmem:[#allocation2 + $0x28] sm:$0x1] %v164_v13  ;;  %v167_v16 = vsel %vm13513_vm6, 0, %v166_v14  ;;  %v170_v17 = vsel %vm13513_vm6, 0, %v169_v15 }
  0x9f   :  { %168 = vst [vmem:[#allocation2 + $0x30] sm:$0x1] %v167_v16  ;;  %171 = vst [vmem:[#allocation2 + $0x38] sm:$0x1] %v170_v17  ;;  %v173_v20 = vsel %vm13513_vm6, 0, %v172_v18  ;;  %v176_v21 = vsel %vm13513_vm6, 0, %v175_v19 }
  0xa0   :  { %174 = vst [vmem:[#allocation2 + $0x40] sm:$0x1] %v173_v20  ;;  %177 = vst [vmem:[#allocation2 + $0x48] sm:$0x1] %v176_v21  ;;  %v179_v24 = vsel %vm13513_vm6, 0, %v178_v22  ;;  %v182_v25 = vsel %vm13513_vm6, 0, %v181_v23 }
  0xa1   :  { %v184_v26 = vld [vmem:[#allocation2 + $0x60] sm:$0x1]  ;;  %v187_v27 = vld [vmem:[#allocation2 + $0x68] sm:$0x1]  ;;  %180 = vst [vmem:[#allocation2 + $0x50] sm:$0x1] %v179_v24  ;;  %vm13661_vm13 = vmand %vm375_vm10, %vm146_vm5 }
  0xa2   :  { %183 = vst [vmem:[#allocation2 + $0x58] sm:$0x1] %v182_v25  ;;  %v185_v28 = vsel %vm13513_vm6, 0, %v184_v26  ;;  %v188_v29 = vsel %vm13513_vm6, 0, %v187_v27  ;;  %v190_v30 = vld [vmem:[#allocation2 + $0x70] sm:$0x1] }
  0xa3   :  { %v193_v31 = vld [vmem:[#allocation2 + $0x78] sm:$0x1]  ;;  %186 = vst [vmem:[#allocation2 + $0x60] sm:$0x1] %v185_v28  ;;  %189 = vst [vmem:[#allocation2 + $0x68] sm:$0x1] %v188_v29 }
  0xa4   :  { %v191_v32 = vsel %vm13513_vm6, 0, %v190_v30  ;;  %v194_v33 = vsel %vm13513_vm6, 0, %v193_v31  ;;  %v196_v34 = vld [vmem:[#allocation2 + $0x80] sm:$0x1]  ;;  %v199_v35 = vld [vmem:[#allocation2 + $0x88] sm:$0x1] }
  0xa5   :  { %192 = vst [vmem:[#allocation2 + $0x70] sm:$0x1] %v191_v32  ;;  %195 = vst [vmem:[#allocation2 + $0x78] sm:$0x1] %v194_v33  ;;  %v197_v36 = vsel %vm13513_vm6, 0, %v196_v34  ;;  %v200_v37 = vsel %vm13513_vm6, 0, %v199_v35 }
  0xa6   :  { %v202_v38 = vld [vmem:[#allocation2 + $0x90] sm:$0x1]  ;;  %v205_v39 = vld [vmem:[#allocation2 + $0x98] sm:$0x1]  ;;  %198 = vst [vmem:[#allocation2 + $0x80] sm:$0x1] %v197_v36 }
  0xa7   :  { %201 = vst [vmem:[#allocation2 + $0x88] sm:$0x1] %v200_v37  ;;  %v203_v40 = vsel %vm13513_vm6, 0, %v202_v38  ;;  %v206_v41 = vsel %vm13513_vm6, 0, %v205_v39  ;;  %v208_v42 = vld [vmem:[#allocation2 + $0xa0] sm:$0x1] }
  0xa8   :  { %v211_v43 = vld [vmem:[#allocation2 + $0xa8] sm:$0x1]  ;;  %204 = vst [vmem:[#allocation2 + $0x90] sm:$0x1] %v203_v40  ;;  %207 = vst [vmem:[#allocation2 + $0x98] sm:$0x1] %v206_v41 }
  0xa9   :  { %v209_v44 = vsel %vm13513_vm6, 0, %v208_v42  ;;  %v212_v45 = vsel %vm13513_vm6, 0, %v211_v43  ;;  %v214_v46 = vld [vmem:[#allocation2 + $0xb0] sm:$0x1]  ;;  %v217_v47 = vld [vmem:[#allocation2 + $0xb8] sm:$0x1] }
  0xaa   :  { %210 = vst [vmem:[#allocation2 + $0xa0] sm:$0x1] %v209_v44  ;;  %213 = vst [vmem:[#allocation2 + $0xa8] sm:$0x1] %v212_v45  ;;  %v215_v48 = vsel %vm13513_vm6, 0, %v214_v46  ;;  %v218_v49 = vsel %vm13513_vm6, 0, %v217_v47 }
  0xab   :  { %v220_v50 = vld [vmem:[#allocation2 + $0xc0] sm:$0x1]  ;;  %v223_v51 = vld [vmem:[#allocation2 + $0xc8] sm:$0x1]  ;;  %216 = vst [vmem:[#allocation2 + $0xb0] sm:$0x1] %v215_v48 }
  0xac   :  { %219 = vst [vmem:[#allocation2 + $0xb8] sm:$0x1] %v218_v49  ;;  %v221_v52 = vsel %vm13513_vm6, 0, %v220_v50  ;;  %v224_v53 = vsel %vm13513_vm6, 0, %v223_v51  ;;  %v226_v54 = vld [vmem:[#allocation2 + $0xd0] sm:$0x1] }
  0xad   :  { %v229_v55 = vld [vmem:[#allocation2 + $0xd8] sm:$0x1]  ;;  %222 = vst [vmem:[#allocation2 + $0xc0] sm:$0x1] %v221_v52  ;;  %225 = vst [vmem:[#allocation2 + $0xc8] sm:$0x1] %v224_v53 }
  0xae   :  { %v227_v56 = vsel %vm13513_vm6, 0, %v226_v54  ;;  %v230_v57 = vsel %vm13513_vm6, 0, %v229_v55  ;;  %v232_v58 = vld [vmem:[#allocation2 + $0xe0] sm:$0x1]  ;;  %v235_v59 = vld [vmem:[#allocation2 + $0xe8] sm:$0x1] }
  0xaf   :  { %228 = vst [vmem:[#allocation2 + $0xd0] sm:$0x1] %v227_v56  ;;  %231 = vst [vmem:[#allocation2 + $0xd8] sm:$0x1] %v230_v57  ;;  %v233_v60 = vsel %vm13513_vm6, 0, %v232_v58  ;;  %v236_v61 = vsel %vm13513_vm6, 0, %v235_v59 }
  0xb0   :  { %v238_v62 = vld [vmem:[#allocation2 + $0xf0] sm:$0x1]  ;;  %v241_v63 = vld [vmem:[#allocation2 + $0xf8] sm:$0x1]  ;;  %234 = vst [vmem:[#allocation2 + $0xe0] sm:$0x1] %v233_v60 }
  0xb1   :  { %237 = vst [vmem:[#allocation2 + $0xe8] sm:$0x1] %v236_v61  ;;  %v239_v2 = vsel %vm13513_vm6, 0, %v238_v62  ;;  %v242_v3 = vsel %vm13513_vm6, 0, %v241_v63  ;;  %v244_v4 = vld [vmem:[#allocation2 + $0x100] sm:$0x1] }
  0xb2   :  { %v247_v5 = vld [vmem:[#allocation2 + $0x108] sm:$0x1]  ;;  %240 = vst [vmem:[#allocation2 + $0xf0] sm:$0x1] %v239_v2  ;;  %243 = vst [vmem:[#allocation2 + $0xf8] sm:$0x1] %v242_v3 }
  0xb3   :  { %v245_v7 = vsel %vm13513_vm6, 0, %v244_v4  ;;  %v248_v8 = vsel %vm13513_vm6, 0, %v247_v5  ;;  %v250_v9 = vld [vmem:[#allocation2 + $0x110] sm:$0x1]  ;;  %v253_v10 = vld [vmem:[#allocation2 + $0x118] sm:$0x1] }
  0xb4   :  { %246 = vst [vmem:[#allocation2 + $0x100] sm:$0x1] %v245_v7  ;;  %249 = vst [vmem:[#allocation2 + $0x108] sm:$0x1] %v248_v8  ;;  %v251_v11 = vsel %vm13513_vm6, 0, %v250_v9  ;;  %v254_v12 = vsel %vm13513_vm6, 0, %v253_v10 }
  0xb5   :  { %v259_v13 = vld [vmem:[#allocation2] sm:$0x80]  ;;  %v262_v14 = vld [vmem:[#allocation2 + $0x8] sm:$0x80]  ;;  %252 = vst [vmem:[#allocation2 + $0x110] sm:$0x1] %v251_v11 }
  0xb6   :  { %255 = vst [vmem:[#allocation2 + $0x118] sm:$0x1] %v254_v12  ;;  %v260_v15 = vsel %vm13583_vm9, 0, %v259_v13  ;;  %v263_v16 = vsel %vm13583_vm9, 0, %v262_v14  ;;  %v265_v17 = vld [vmem:[#allocation2 + $0x10] sm:$0x80] }
  0xb7   :  { %v268_v18 = vld [vmem:[#allocation2 + $0x18] sm:$0x80]  ;;  %261 = vst [vmem:[#allocation2] sm:$0x80] %v260_v15  ;;  %264 = vst [vmem:[#allocation2 + $0x8] sm:$0x80] %v263_v16 }
  0xb8   :  { %v266_v19 = vsel %vm13583_vm9, 0, %v265_v17  ;;  %v269_v1 = vsel %vm13583_vm9, 0, %v268_v18  ;;  %v271_v20 = vld [vmem:[#allocation2 + $0x20] sm:$0x80]  ;;  %v274_v21 = vld [vmem:[#allocation2 + $0x28] sm:$0x80] }
  0xb9   :  { %267 = vst [vmem:[#allocation2 + $0x10] sm:$0x80] %v266_v19  ;;  %270 = vst [vmem:[#allocation2 + $0x18] sm:$0x80] %v269_v1  ;;  %v272_v22 = vsel %vm13583_vm9, 0, %v271_v20  ;;  %v275_v23 = vsel %vm13583_vm9, 0, %v274_v21 }
  0xba   :  { %v277_v24 = vld [vmem:[#allocation2 + $0x30] sm:$0x80]  ;;  %v280_v25 = vld [vmem:[#allocation2 + $0x38] sm:$0x80]  ;;  %273 = vst [vmem:[#allocation2 + $0x20] sm:$0x80] %v272_v22 }
  0xbb   :  { %276 = vst [vmem:[#allocation2 + $0x28] sm:$0x80] %v275_v23  ;;  %v278_v26 = vsel %vm13583_vm9, 0, %v277_v24  ;;  %v281_v27 = vsel %vm13583_vm9, 0, %v280_v25  ;;  %v283_v28 = vld [vmem:[#allocation2 + $0x40] sm:$0x80] }
  0xbc   :  { %v286_v29 = vld [vmem:[#allocation2 + $0x48] sm:$0x80]  ;;  %279 = vst [vmem:[#allocation2 + $0x30] sm:$0x80] %v278_v26  ;;  %282 = vst [vmem:[#allocation2 + $0x38] sm:$0x80] %v281_v27 }
  0xbd   :  { %v284_v30 = vsel %vm13583_vm9, 0, %v283_v28  ;;  %v287_v31 = vsel %vm13583_vm9, 0, %v286_v29  ;;  %v289_v32 = vld [vmem:[#allocation2 + $0x50] sm:$0x80]  ;;  %v292_v33 = vld [vmem:[#allocation2 + $0x58] sm:$0x80] }
  0xbe   :  { %285 = vst [vmem:[#allocation2 + $0x40] sm:$0x80] %v284_v30  ;;  %288 = vst [vmem:[#allocation2 + $0x48] sm:$0x80] %v287_v31  ;;  %v290_v34 = vsel %vm13583_vm9, 0, %v289_v32  ;;  %v293_v35 = vsel %vm13583_vm9, 0, %v292_v33 }
  0xbf   :  { %v295_v36 = vld [vmem:[#allocation2 + $0x60] sm:$0x80]  ;;  %v298_v37 = vld [vmem:[#allocation2 + $0x68] sm:$0x80]  ;;  %291 = vst [vmem:[#allocation2 + $0x50] sm:$0x80] %v290_v34 }
  0xc0   :  { %294 = vst [vmem:[#allocation2 + $0x58] sm:$0x80] %v293_v35  ;;  %v296_v38 = vsel %vm13583_vm9, 0, %v295_v36  ;;  %v299_v39 = vsel %vm13583_vm9, 0, %v298_v37  ;;  %v301_v40 = vld [vmem:[#allocation2 + $0x70] sm:$0x80] }
  0xc1   :  { %v304_v41 = vld [vmem:[#allocation2 + $0x78] sm:$0x80]  ;;  %297 = vst [vmem:[#allocation2 + $0x60] sm:$0x80] %v296_v38  ;;  %300 = vst [vmem:[#allocation2 + $0x68] sm:$0x80] %v299_v39 }
  0xc2   :  { %v302_v42 = vsel %vm13583_vm9, 0, %v301_v40  ;;  %v305_v43 = vsel %vm13583_vm9, 0, %v304_v41  ;;  %v307_v44 = vld [vmem:[#allocation2 + $0x80] sm:$0x80]  ;;  %v310_v45 = vld [vmem:[#allocation2 + $0x88] sm:$0x80] }
  0xc3   :  { %303 = vst [vmem:[#allocation2 + $0x70] sm:$0x80] %v302_v42  ;;  %306 = vst [vmem:[#allocation2 + $0x78] sm:$0x80] %v305_v43  ;;  %v308_v46 = vsel %vm13583_vm9, 0, %v307_v44  ;;  %v311_v47 = vsel %vm13583_vm9, 0, %v310_v45 }
  0xc4   :  { %v313_v48 = vld [vmem:[#allocation2 + $0x90] sm:$0x80]  ;;  %v316_v49 = vld [vmem:[#allocation2 + $0x98] sm:$0x80]  ;;  %309 = vst [vmem:[#allocation2 + $0x80] sm:$0x80] %v308_v46 }
  0xc5   :  { %312 = vst [vmem:[#allocation2 + $0x88] sm:$0x80] %v311_v47  ;;  %v314_v50 = vsel %vm13583_vm9, 0, %v313_v48  ;;  %v317_v51 = vsel %vm13583_vm9, 0, %v316_v49  ;;  %v319_v52 = vld [vmem:[#allocation2 + $0xa0] sm:$0x80] }
  0xc6   :  { %v322_v53 = vld [vmem:[#allocation2 + $0xa8] sm:$0x80]  ;;  %315 = vst [vmem:[#allocation2 + $0x90] sm:$0x80] %v314_v50  ;;  %318 = vst [vmem:[#allocation2 + $0x98] sm:$0x80] %v317_v51 }
  0xc7   :  { %v320_v54 = vsel %vm13583_vm9, 0, %v319_v52  ;;  %v323_v55 = vsel %vm13583_vm9, 0, %v322_v53  ;;  %v325_v56 = vld [vmem:[#allocation2 + $0xb0] sm:$0x80]  ;;  %v328_v57 = vld [vmem:[#allocation2 + $0xb8] sm:$0x80] }
  0xc8   :  { %321 = vst [vmem:[#allocation2 + $0xa0] sm:$0x80] %v320_v54  ;;  %324 = vst [vmem:[#allocation2 + $0xa8] sm:$0x80] %v323_v55  ;;  %v326_v58 = vsel %vm13583_vm9, 0, %v325_v56  ;;  %v329_v59 = vsel %vm13583_vm9, 0, %v328_v57 }
  0xc9   :  { %v331_v60 = vld [vmem:[#allocation2 + $0xc0] sm:$0x80]  ;;  %v334_v61 = vld [vmem:[#allocation2 + $0xc8] sm:$0x80]  ;;  %327 = vst [vmem:[#allocation2 + $0xb0] sm:$0x80] %v326_v58 }
  0xca   :  { %330 = vst [vmem:[#allocation2 + $0xb8] sm:$0x80] %v329_v59  ;;  %v332_v62 = vsel %vm13583_vm9, 0, %v331_v60  ;;  %v335_v63 = vsel %vm13583_vm9, 0, %v334_v61  ;;  %v337_v2 = vld [vmem:[#allocation2 + $0xd0] sm:$0x80] }
  0xcb   :  { %v340_v3 = vld [vmem:[#allocation2 + $0xd8] sm:$0x80]  ;;  %333 = vst [vmem:[#allocation2 + $0xc0] sm:$0x80] %v332_v62  ;;  %336 = vst [vmem:[#allocation2 + $0xc8] sm:$0x80] %v335_v63 }
  0xcc   :  { %v338_v4 = vsel %vm13583_vm9, 0, %v337_v2  ;;  %v341_v5 = vsel %vm13583_vm9, 0, %v340_v3  ;;  %v343_v7 = vld [vmem:[#allocation2 + $0xe0] sm:$0x80]  ;;  %v346_v8 = vld [vmem:[#allocation2 + $0xe8] sm:$0x80] }
  0xcd   :  { %339 = vst [vmem:[#allocation2 + $0xd0] sm:$0x80] %v338_v4  ;;  %342 = vst [vmem:[#allocation2 + $0xd8] sm:$0x80] %v341_v5  ;;  %v344_v9 = vsel %vm13583_vm9, 0, %v343_v7  ;;  %v347_v10 = vsel %vm13583_vm9, 0, %v346_v8 }
  0xce   :  { %v349_v11 = vld [vmem:[#allocation2 + $0xf0] sm:$0x80]  ;;  %v352_v12 = vld [vmem:[#allocation2 + $0xf8] sm:$0x80]  ;;  %vm438_vm12 = vsmask.f32 7950 }
  0xcf   :  { %345 = vst [vmem:[#allocation2 + $0xe0] sm:$0x80] %v344_v9  ;;  %348 = vst [vmem:[#allocation2 + $0xe8] sm:$0x80] %v347_v10  ;;  %v350_v13 = vsel %vm13583_vm9, 0, %v349_v11  ;;  %v353_v14 = vsel %vm13583_vm9, 0, %v352_v12 }
  0xd0   :  { %v355_v15 = vld [vmem:[#allocation2 + $0x100] sm:$0x80]  ;;  %v358_v16 = vld [vmem:[#allocation2 + $0x108] sm:$0x80]  ;;  %351 = vst [vmem:[#allocation2 + $0xf0] sm:$0x80] %v350_v13  ;;  %vm13707_vm14 = vmand %vm437_vm11, %vm438_vm12 }
  0xd1   :  { %354 = vst [vmem:[#allocation2 + $0xf8] sm:$0x80] %v353_v14  ;;  %v356_v18 = vsel %vm13583_vm9, 0, %v355_v15  ;;  %v359_v19 = vsel %vm13583_vm9, 0, %v358_v16  ;;  %v361_v1 = vld [vmem:[#allocation2 + $0x110] sm:$0x80] }
  0xd2   :  { %v364_v20 = vld [vmem:[#allocation2 + $0x118] sm:$0x80]  ;;  %357 = vst [vmem:[#allocation2 + $0x100] sm:$0x80] %v356_v18  ;;  %360 = vst [vmem:[#allocation2 + $0x108] sm:$0x80] %v359_v19 }
  0xd3   :  { %v362_v21 = vsel %vm13583_vm9, 0, %v361_v1  ;;  %v365_v22 = vsel %vm13583_vm9, 0, %v364_v20  ;;  %v377_v23 = vld [vmem:[#allocation3] sm:$0x1]  ;;  %v380_v24 = vld [vmem:[#allocation3 + $0x8] sm:$0x1] }
  0xd4   :  { %363 = vst [vmem:[#allocation2 + $0x110] sm:$0x80] %v362_v21  ;;  %366 = vst [vmem:[#allocation2 + $0x118] sm:$0x80] %v365_v22  ;;  %v378_v25 = vsel %vm13661_vm13, 0, %v377_v23  ;;  %v381_v26 = vsel %vm13661_vm13, 0, %v380_v24 }
  0xd5   :  { %v383_v27 = vld [vmem:[#allocation3 + $0x10] sm:$0x1]  ;;  %v386_v28 = vld [vmem:[#allocation3 + $0x18] sm:$0x1]  ;;  %379 = vst [vmem:[#allocation3] sm:$0x1] %v378_v25 }
  0xd6   :  { %382 = vst [vmem:[#allocation3 + $0x8] sm:$0x1] %v381_v26  ;;  %v384_v29 = vsel %vm13661_vm13, 0, %v383_v27  ;;  %v387_v6 = vsel %vm13661_vm13, 0, %v386_v28  ;;  %v389_v30 = vld [vmem:[#allocation3 + $0x20] sm:$0x1] }
  0xd7   :  { %v392_v31 = vld [vmem:[#allocation3 + $0x28] sm:$0x1]  ;;  %385 = vst [vmem:[#allocation3 + $0x10] sm:$0x1] %v384_v29  ;;  %388 = vst [vmem:[#allocation3 + $0x18] sm:$0x1] %v387_v6 }
  0xd8   :  { %v390_v32 = vsel %vm13661_vm13, 0, %v389_v30  ;;  %v393_v33 = vsel %vm13661_vm13, 0, %v392_v31  ;;  %v395_v34 = vld [vmem:[#allocation3 + $0x30] sm:$0x1]  ;;  %v398_v35 = vld [vmem:[#allocation3 + $0x38] sm:$0x1] }
  0xd9   :  { %391 = vst [vmem:[#allocation3 + $0x20] sm:$0x1] %v390_v32  ;;  %394 = vst [vmem:[#allocation3 + $0x28] sm:$0x1] %v393_v33  ;;  %v396_v36 = vsel %vm13661_vm13, 0, %v395_v34  ;;  %v399_v37 = vsel %vm13661_vm13, 0, %v398_v35 }
  0xda   :  { %v401_v38 = vld [vmem:[#allocation3 + $0x40] sm:$0x1]  ;;  %v404_v39 = vld [vmem:[#allocation3 + $0x48] sm:$0x1]  ;;  %397 = vst [vmem:[#allocation3 + $0x30] sm:$0x1] %v396_v36 }
  0xdb   :  { %400 = vst [vmem:[#allocation3 + $0x38] sm:$0x1] %v399_v37  ;;  %v402_v40 = vsel %vm13661_vm13, 0, %v401_v38  ;;  %v405_v41 = vsel %vm13661_vm13, 0, %v404_v39  ;;  %v407_v42 = vld [vmem:[#allocation3 + $0x50] sm:$0x1] }
  0xdc   :  { %v410_v43 = vld [vmem:[#allocation3 + $0x58] sm:$0x1]  ;;  %403 = vst [vmem:[#allocation3 + $0x40] sm:$0x1] %v402_v40  ;;  %406 = vst [vmem:[#allocation3 + $0x48] sm:$0x1] %v405_v41 }
  0xdd   :  { %v408_v44 = vsel %vm13661_vm13, 0, %v407_v42  ;;  %v411_v45 = vsel %vm13661_vm13, 0, %v410_v43  ;;  %v413_v46 = vld [vmem:[#allocation3 + $0x60] sm:$0x1]  ;;  %v416_v47 = vld [vmem:[#allocation3 + $0x68] sm:$0x1] }
  0xde   :  { %409 = vst [vmem:[#allocation3 + $0x50] sm:$0x1] %v408_v44  ;;  %412 = vst [vmem:[#allocation3 + $0x58] sm:$0x1] %v411_v45  ;;  %v414_v48 = vsel %vm13661_vm13, 0, %v413_v46  ;;  %v417_v49 = vsel %vm13661_vm13, 0, %v416_v47 }
  0xdf   :  { %v419_v50 = vld [vmem:[#allocation3 + $0x70] sm:$0x1]  ;;  %v422_v51 = vld [vmem:[#allocation3 + $0x78] sm:$0x1]  ;;  %415 = vst [vmem:[#allocation3 + $0x60] sm:$0x1] %v414_v48 }
  0xe0   :  { %418 = vst [vmem:[#allocation3 + $0x68] sm:$0x1] %v417_v49  ;;  %v420_v52 = vsel %vm13661_vm13, 0, %v419_v50  ;;  %v423_v53 = vsel %vm13661_vm13, 0, %v422_v51  ;;  %v425_v54 = vld [vmem:[#allocation3 + $0x80] sm:$0x1] }
  0xe1   :  { %v428_v55 = vld [vmem:[#allocation3 + $0x88] sm:$0x1]  ;;  %421 = vst [vmem:[#allocation3 + $0x70] sm:$0x1] %v420_v52  ;;  %424 = vst [vmem:[#allocation3 + $0x78] sm:$0x1] %v423_v53 }
  0xe2   :  { %v426_v57 = vsel %vm13661_vm13, 0, %v425_v54  ;;  %v429_v58 = vsel %vm13661_vm13, 0, %v428_v55  ;;  %v431_v59 = vld [vmem:[#allocation3 + $0x90] sm:$0x1]  ;;  %v434_v60 = vld [vmem:[#allocation3 + $0x98] sm:$0x1] }
  0xe3   :  { %427 = vst [vmem:[#allocation3 + $0x80] sm:$0x1] %v426_v57  ;;  %430 = vst [vmem:[#allocation3 + $0x88] sm:$0x1] %v429_v58  ;;  %v432_v61 = vsel %vm13661_vm13, 0, %v431_v59  ;;  %v435_v62 = vsel %vm13661_vm13, 0, %v434_v60 }
  0xe4   :  { %v440_v63 = vld [vmem:[#allocation3 + $0x4] sm:$0x8]  ;;  %v443_v2 = vld [vmem:[#allocation3 + $0xc] sm:$0x8]  ;;  %433 = vst [vmem:[#allocation3 + $0x90] sm:$0x1] %v432_v61 }
  0xe5   :  { %436 = vst [vmem:[#allocation3 + $0x98] sm:$0x1] %v435_v62  ;;  %v441_v3 = vsel %vm13707_vm14, 0, %v440_v63  ;;  %v444_v4 = vsel %vm13707_vm14, 0, %v443_v2  ;;  %v446_v5 = vld [vmem:[#allocation3 + $0x14] sm:$0x8] }
  0xe6   :  { %v449_v7 = vld [vmem:[#allocation3 + $0x1c] sm:$0x8]  ;;  %442 = vst [vmem:[#allocation3 + $0x4] sm:$0x8] %v441_v3  ;;  %445 = vst [vmem:[#allocation3 + $0xc] sm:$0x8] %v444_v4 }
  0xe7   :  { %v447_v8 = vsel %vm13707_vm14, 0, %v446_v5  ;;  %v450_v9 = vsel %vm13707_vm14, 0, %v449_v7  ;;  %v452_v10 = vld [vmem:[#allocation3 + $0x24] sm:$0x8]  ;;  %v455_v11 = vld [vmem:[#allocation3 + $0x2c] sm:$0x8] }
  0xe8   :  { %448 = vst [vmem:[#allocation3 + $0x14] sm:$0x8] %v447_v8  ;;  %451 = vst [vmem:[#allocation3 + $0x1c] sm:$0x8] %v450_v9  ;;  %v453_v12 = vsel %vm13707_vm14, 0, %v452_v10  ;;  %v456_v13 = vsel %vm13707_vm14, 0, %v455_v11 }
  0xe9   :  { %v458_v14 = vld [vmem:[#allocation3 + $0x34] sm:$0x8]  ;;  %v461_v15 = vld [vmem:[#allocation3 + $0x3c] sm:$0x8]  ;;  %454 = vst [vmem:[#allocation3 + $0x24] sm:$0x8] %v453_v12 }
  0xea   :  { %457 = vst [vmem:[#allocation3 + $0x2c] sm:$0x8] %v456_v13  ;;  %v459_v16 = vsel %vm13707_vm14, 0, %v458_v14  ;;  %v462_v17 = vsel %vm13707_vm14, 0, %v461_v15  ;;  %v464_v18 = vld [vmem:[#allocation3 + $0x44] sm:$0x8] }
  0xeb   :  { %v467_v19 = vld [vmem:[#allocation3 + $0x4c] sm:$0x8]  ;;  %460 = vst [vmem:[#allocation3 + $0x34] sm:$0x8] %v459_v16  ;;  %463 = vst [vmem:[#allocation3 + $0x3c] sm:$0x8] %v462_v17 }
  0xec   :  { %v465_v1 = vsel %vm13707_vm14, 0, %v464_v18  ;;  %v468_v20 = vsel %vm13707_vm14, 0, %v467_v19  ;;  %v470_v21 = vld [vmem:[#allocation3 + $0x54] sm:$0x8]  ;;  %v473_v22 = vld [vmem:[#allocation3 + $0x5c] sm:$0x8] }
  0xed   :  { %466 = vst [vmem:[#allocation3 + $0x44] sm:$0x8] %v465_v1  ;;  %469 = vst [vmem:[#allocation3 + $0x4c] sm:$0x8] %v468_v20  ;;  %v471_v23 = vsel %vm13707_vm14, 0, %v470_v21  ;;  %v474_v24 = vsel %vm13707_vm14, 0, %v473_v22 }
  0xee   :  { %v476_v25 = vld [vmem:[#allocation3 + $0x64] sm:$0x8]  ;;  %v479_v26 = vld [vmem:[#allocation3 + $0x6c] sm:$0x8]  ;;  %472 = vst [vmem:[#allocation3 + $0x54] sm:$0x8] %v471_v23 }
  0xef   :  { %475 = vst [vmem:[#allocation3 + $0x5c] sm:$0x8] %v474_v24  ;;  %v477_v27 = vsel %vm13707_vm14, 0, %v476_v25  ;;  %v480_v28 = vsel %vm13707_vm14, 0, %v479_v26  ;;  %v482_v29 = vld [vmem:[#allocation3 + $0x74] sm:$0x8] }
  0xf0   :  { %v485_v6 = vld [vmem:[#allocation3 + $0x7c] sm:$0x8]  ;;  %478 = vst [vmem:[#allocation3 + $0x64] sm:$0x8] %v477_v27  ;;  %481 = vst [vmem:[#allocation3 + $0x6c] sm:$0x8] %v480_v28 }
  0xf1   :  { %v483_v30 = vsel %vm13707_vm14, 0, %v482_v29  ;;  %v486_v31 = vsel %vm13707_vm14, 0, %v485_v6  ;;  %v488_v32 = vld [vmem:[#allocation3 + $0x84] sm:$0x8]  ;;  %v491_v33 = vld [vmem:[#allocation3 + $0x8c] sm:$0x8] }
  0xf2   :  { %484 = vst [vmem:[#allocation3 + $0x74] sm:$0x8] %v483_v30  ;;  %487 = vst [vmem:[#allocation3 + $0x7c] sm:$0x8] %v486_v31  ;;  %v489_v34 = vsel %vm13707_vm14, 0, %v488_v32  ;;  %v492_v35 = vsel %vm13707_vm14, 0, %v491_v33 }
  0xf3   :  { %v494_v36 = vld [vmem:[#allocation3 + $0x94] sm:$0x8]  ;;  %v497_v37 = vld [vmem:[#allocation3 + $0x9c] sm:$0x8]  ;;  %490 = vst [vmem:[#allocation3 + $0x84] sm:$0x8] %v489_v34 }
  0xf4   :  { %493 = vst [vmem:[#allocation3 + $0x8c] sm:$0x8] %v492_v35  ;;  %v495_v38 = vsel %vm13707_vm14, 0, %v494_v36  ;;  %v498_v39 = vsel %vm13707_vm14, 0, %v497_v37  ;;  %s13759_s10 = smov 0  }
  0xf5   :  { %496 = vst [vmem:[#allocation3 + $0x94] sm:$0x8] %v495_v38  ;;  %499 = vst [vmem:[#allocation3 + $0x9c] sm:$0x8] %v498_v39 }
  0xf6 LB: > { %v12064_v40 = vld [vmem:[%s15113_s1 + $0x8] sm:$0x1f]   ;;  %vm621_vm15 = vcmask 1044480   ;;  %v13329_v41 = vmov 65535   ;;  %v12065_v43 = vld [vmem:[%s15113_s1] sm:$0x1f]   ;;  %v1160_v29 = vlaneseq  ;;  %s13310_s10 = sphi %s13759_s10, %s505_s10  }
  0xf7   : > { %v622_v42 = vsel %vm367_vm1, 4294967295, %v13329_v41  ;;  %s11668_s6 = sshll.u32 %s13310_s10, 5  ;;  %vm596_vm2 = vcmask 72704   ;;  %v12070_v51 = vld [vmem:[%s15113_s1 + $0x10] sm:$0x1f]   ;;  %vm1547_vm3 = vcmask 1042434  }
  0xf8   : > { %v623_v44 = vsel %vm621_vm15, %v622_v42, 0  ;;  %s13775_s17 = scalar_lea.vmem %s15112_s0, %s11668_s6  ;;  %v13330_v27 = vmov 1983009808   ;;  %v13828_v6 = vld [vmem:[#allocation5] ss:$0 sm:$0xff]  ;;  %v13831_v34 = vshrl.u32 %v1160_v29, 7 }
  0xf9   : > { %v625_v45 = vand.u32 %v12064_v40, %v623_v44  ;;  %v794_v46 = vand.u32 %v12065_v43, %v623_v44  ;;  %v12066_v47 = vld [vmem:[%s13775_s17 + $0x10] sm:$0xff]   ;;  %v12067_v48 = vld [vmem:[%s13775_s17] sm:$0xff]   ;;  %v12068_v49 = vld [vmem:[%s13775_s17 + $0x18] sm:$0xff]   ;;  %v986_v53 = vand.u32 %v12070_v51, %v623_v44  ;;  %v1158_v28 = vunpack.c.l.s4 %v13330_v27  ;;  %s13331_s23 = smov 32   ;;  %s13332_s4 = smov 64  }
  0xfa   : > { %v12069_v50 = vld [vmem:[%s13775_s17 + $0x8] sm:$0xff]   ;;  %11793 = vmatprep.mubr.msk.bf16.mxu1 %vm596_vm2, %v12066_v47  ;;  %11811 = vmatprep.mubr.msk.bf16.mxu0 %vm596_vm2, %v12067_v48  ;;  %v12071_v52 = vld [vmem:[%s13775_s17 + $0x20] sm:$0xff]   ;;  %v12072_v54 = vld [vmem:[%s13775_s17 + $0x10] sm:$0xff]   ;;  %vm1550_vm4 = vcmask 1043459   ;;  %vm1565_vm5 = vcmask 1041409   ;;  %vm1553_vm6 = vcmask 1044484  }
  0xfb   : > { %11791 = vmatprep.subr.bf16.mxu1 %v625_v45  ;;  %11809 = vmatprep.subr.bf16.mxu0 %v794_v46  ;;  %v12073_v55 = vld [vmem:[%s13775_s17 + $0x28] sm:$0xff]   ;;  %v12074_v56 = vld [vmem:[%s13775_s17 + $0x18] sm:$0xff]   ;;  %v12075_v57 = vld [vmem:[%s13775_s17 + $0x230] sm:$0xff]   ;;  %v1159_v33 = vunpack.c.0.s8 %v1158_v28  ;;  %vm1556_vm7 = vcmask 1045509   ;;  %vm1559_vm8 = vcmask 1046534   ;;  %vm1562_vm9 = vcmask 1047559  }
  0xfc   : > { %11792 = vmatpush3.bf16.msra.mxu1 %v625_v45  ;;  %11810 = vmatpush3.bf16.msra.mxu0 %v794_v46  ;;  %v12076_v58 = vld [vmem:[%s13775_s17 + $0x20] sm:$0xff]   ;;  %v12077_v59 = vld [vmem:[%s13775_s17 + $0x238] sm:$0xff]   ;;  %v12078_v60 = vld [vmem:[%s13775_s17 + $0x28] sm:$0xff]   ;;  %vm1612_vm10 = vcmask 261120   ;;  %vm1613_vm11 = vsmask.f32 7938 }
  0xfd   : > { %11905 = vmatprep.subr.bf16.mxu1 %v794_v46  ;;  %11827 = vmatprep.subr.bf16.mxu0 %v986_v53  ;;  %v12079_v61 = vld [vmem:[%s13775_s17 + $0x240] sm:$0xff]   ;;  %v12080_v62 = vld [vmem:[%s13775_s17 + $0x30] sm:$0xff]   ;;  %v12081_v63 = vld [vmem:[%s13775_s17 + $0x248] sm:$0xff]   ;;  %v13839_v48 = vsub.s32 %v1159_v33, %v13831_v34  ;;  %s10731_s7 = sshll.u32 %s13310_s10, 3  ;;  %vm1689_vm13 = vcmask 523520   ;;  %vm1752_vm14 = vcmask 785920  }
  0xfe   : > { %v12082_v2 = vld [vmem:[%s13775_s17 + $0x38] sm:$0xff]   ;;  %v12083_v3 = vld [vmem:[%s13775_s17 + $0x220] sm:$0xff]   ;;  %v12085_v5 = vld [vmem:[%s13775_s17 + $0x228] sm:$0xff]   ;;  %s14211_s22 = scalar_lea.vmem [#allocation2], %s10731_s7  ;;  %vm1753_vm15 = vsmask.f32 7424 }
  0xff   : > { %11794 = vmatmul.mubr.msk.bf16.vlgmr.msra.gmra.mrb[0].mxu1 %vm596_vm2, %v12068_v49  ;;  %11812 = vmatmul.mubr.msk.bf16.vlgmr.msra.gmra.mrb[0].mxu0 %vm596_vm2, %v12069_v50  ;;  %v12084_v4 = vld [vmem:[%s13775_s17 + $0x240] sm:$0xff]   ;;  %v12086_v7 = vld [vmem:[%s13775_s17 + $0x248] sm:$0xff]   ;;  %v12087_v8 = vld [vmem:[%s13775_s17 + $0x230] sm:$0xff]   ;;  %s505_s10 = sadd.s32 1, %s13310_s10  }
 0x100   : > { %11906 = vmatpush3.bf16.msra.mxu1 %v794_v46  ;;  %11797 = vmatprep.mubr.msk.bf16.mxu1 %vm596_vm2, %v12071_v52  ;;  %v12088_v9 = vld [vmem:[%s13775_s17 + $0x250] sm:$0xff]   ;;  %v12089_v10 = vld [vmem:[%s13775_s17 + $0x238] sm:$0xff]   ;;  %vm14207_vm12 = vmand %vm1612_vm10, %vm1613_vm11  ;;  %p502_p8 = scmp.ge.s32.totalorder %s505_s10, 16  }
 0x101   : > { %11815 = vmatprep.mubr.msk.bf16.mxu0 %vm596_vm2, %v12072_v54  ;;  %11828 = vmatpush3.bf16.msra.mxu0 %v986_v53  ;;  %v12090_v11 = vld [vmem:[%s13775_s17 + $0x258] sm:$0xff]   ;;  %s14253_s18 = smov (%p502_p8), 0  }
 0x107   : > { %11798 = vmatmul.mubr.msk.bf16.gmra.mrb[4].mxu1 %vm596_vm2, %v12073_v55  ;;  %11816 = vmatmul.mubr.msk.bf16.gmra.mrb[4].mxu0 %vm596_vm2, %v12074_v56 }
 0x108   : > { %11801 = vmatprep.mubr.msk.bf16.mxu1 %vm596_vm2, %v12075_v57  ;;  %11829 = vmatprep.mubr.msk.bf16.mxu0 %vm596_vm2, %v12076_v58 }
 0x10f   : > { %11802 = vmatmul.mubr.msk.bf16.gmra.mrb[8].mxu1 %vm596_vm2, %v12077_v59  ;;  %11830 = vmatmul.mubr.msk.bf16.vlgmr.msra.gmra.mrb[0].mxu0 %vm596_vm2, %v12078_v60 }
 0x110   : > { %11805 = vmatprep.mubr.msk.bf16.mxu1 %vm596_vm2, %v12079_v61  ;;  %11833 = vmatprep.mubr.msk.bf16.mxu0 %vm596_vm2, %v12080_v62 }
 0x117   : > { %11806 = vmatmul.mubr.msk.bf16.gmra.mrb[12].mxu1 %vm596_vm2, %v12081_v63  ;;  %11834 = vmatmul.mubr.msk.bf16.gmra.mrb[4].mxu0 %vm596_vm2, %v12082_v2 }
 0x118   : > { %11819 = vmatprep.mubr.msk.bf16.mxu1 %vm596_vm2, %v12083_v3  ;;  %11837 = vmatprep.mubr.msk.bf16.mxu0 %vm596_vm2, %v12084_v4 }
 0x11f   : > { %11820 = vmatmul.mubr.msk.bf16.vlgmr.msra.gmra.mrb[8].mxu1 %vm596_vm2, %v12085_v5  ;;  %11838 = vmatmul.mubr.msk.bf16.gmra.mrb[8].mxu0 %vm596_vm2, %v12086_v7 }
 0x120   : > { %11823 = vmatprep.mubr.msk.bf16.mxu1 %vm596_vm2, %v12087_v8  ;;  %11841 = vmatprep.mubr.msk.bf16.mxu0 %vm596_vm2, %v12088_v9 }
 0x127   : > { %11824 = vmatmul.mubr.msk.bf16.gmra.mrb[12].mxu1 %vm596_vm2, %v12089_v10  ;;  %11842 = vmatmul.mubr.msk.bf16.gmra.mrb[12].mxu0 %vm596_vm2, %v12090_v11  ;;  %vm1754_vm2 = vmand %vm1752_vm14, %vm1753_vm15 }
 0x1d2   : > { %v11795_v12 = vpop.f32.mrb[0].mxu1 }
 0x1d3   : > { %v661_v13 = vpop.f32.mrb[1].mxu1 }
 0x1d4   : > { %v11796_v14 = vpop.f32.mrb[2].mxu1 }
 0x1d5   : > { %v664_v15 = vpop.f32.mrb[3].mxu1 }
 0x1da   : > { %v11799_v16 = vpop.f32.mrb[4].mxu1 }
 0x1db   : > { %v677_v17 = vpop.f32.mrb[5].mxu1 }
 0x1dc   : > { %v11800_v18 = vpop.f32.mrb[6].mxu1 }
 0x1dd   : > { %v680_v19 = vpop.f32.mrb[7].mxu1 }
 0x1e2   : > { %v11831_v1 = vpop.f32.mrb[0].mxu0 }
 0x1e3   : > { %v11907_v20 = vadd.f32 %v11831_v1, %v11795_v12  ;;  %v1022_v21 = vpop.f32.mrb[1].mxu0 }
 0x1e4   : > { %v11908_v22 = vadd.f32 %v1022_v21, %v661_v13  ;;  %v11832_v23 = vpop.f32.mrb[2].mxu0 }
 0x1e5   : > { %v11909_v24 = vadd.f32 %v11832_v23, %v11796_v14  ;;  %v1025_v25 = vpop.f32.mrb[3].mxu0  ;;  %v1110_v31 = vadd.f32 %v11907_v20, %v13828_v6 }
 0x1e6   : > { %v11910_v26 = vadd.f32 %v1025_v25, %v664_v15  ;;  %v1108_v36 = vadd.f32 %v11908_v22, %v13828_v6 }
 0x1e7   : > { %v1111_v39 = vadd.f32 %v11909_v24, %v13828_v6  ;;  %v1126_v46 = vmax.f32 %v1110_v31, 0.0 }
 0x1e8   : > { %v1109_v43 = vadd.f32 %v11910_v26, %v13828_v6  ;;  %v1124_v50 = vmax.f32 %v1108_v36, 0.0 }
 0x1e9   : > { %v1127_v53 = vmax.f32 %v1111_v39, 0.0 }
 0x1ea   : > { %v11835_v30 = vpop.f32.mrb[4].mxu0  ;;  %v1125_v56 = vmax.f32 %v1109_v43, 0.0 }
 0x1eb   : > { %v11911_v32 = vadd.f32 %v11835_v30, %v11799_v16  ;;  %v1038_v35 = vpop.f32.mrb[5].mxu0 }
 0x1ec   : > { %v11912_v37 = vadd.f32 %v1038_v35, %v677_v17  ;;  %v11836_v38 = vpop.f32.mrb[6].mxu0 }
 0x1ed   : > { %v1114_v40 = vadd.f32 %v11911_v32, %v13828_v6  ;;  %v11913_v41 = vadd.f32 %v11836_v38, %v11800_v18  ;;  %v1041_v42 = vpop.f32.mrb[7].mxu0 }
 0x1ee   : > { %v1112_v44 = vadd.f32 %v11912_v37, %v13828_v6  ;;  %v11914_v45 = vadd.f32 %v1041_v42, %v680_v19 }
 0x1ef   : > { %v1130_v47 = vmax.f32 %v1114_v40, 0.0  ;;  %v1115_v49 = vadd.f32 %v11913_v41, %v13828_v6 }
 0x1f0   : > { %v1128_v51 = vmax.f32 %v1112_v44, 0.0  ;;  %v1113_v52 = vadd.f32 %v11914_v45, %v13828_v6 }
 0x1f1   : > { %v1142_v54 = vmax.f32 %v1126_v46, %v1130_v47  ;;  %v1131_v55 = vmax.f32 %v1115_v49, 0.0 }
 0x1f2   : > { %v1140_v57 = vmax.f32 %v1124_v50, %v1128_v51  ;;  %v1129_v58 = vmax.f32 %v1113_v52, 0.0  ;;  %v11821_v59 = vpop.f32.mrb[8].mxu1  ;;  %v11839_v60 = vpop.f32.mrb[8].mxu0 }
 0x1f3   : > { %v1190_v61 = vcombine.high %v1142_v54, %v1142_v54  ;;  %v1197_v62 = vrot.slane %v1142_v54, %v13839_v48  ;;  %v13844_v63 = vmax.f32 %v1127_v53, %v1131_v55  ;;  %v13846_v2 = vadd.f32 %v11839_v60, %v11821_v59  ;;  %v862_v3 = vpop.f32.mrb[9].mxu1  ;;  %v1054_v4 = vpop.f32.mrb[9].mxu0 }
 0x1f4   : > { %v1156_v5 = vcombine.high %v1140_v57, %v1140_v57  ;;  %v1163_v7 = vrot.slane %v1140_v57, %v13839_v48  ;;  %v13849_v8 = vmax.f32 %v1125_v56, %v1129_v58  ;;  %v13851_v9 = vadd.f32 %v1054_v4, %v862_v3  ;;  %v13853_v10 = vpop.f32.mrb[10].mxu1  ;;  %v13855_v11 = vpop.f32.mrb[10].mxu0 }
 0x1f5   : > { %v1204_v12 = vrot.slane %v1190_v61, %v13839_v48  ;;  %v1205_v13 = vcombine.high %v1197_v62, %v1197_v62  ;;  %v10707_v14 = vrot.slane %v1197_v62, 9  ;;  %v13858_v15 = vpop.f32.mrb[11].mxu1  ;;  %v13860_v16 = vpop.f32.mrb[11].mxu0  ;;  %v1207_v1 = vcombine.high %v13844_v63, %v13844_v63 }
 0x1f6   : > { %v1170_v17 = vrot.slane %v1156_v5, %v13839_v48  ;;  %v1171_v18 = vcombine.high %v1163_v7, %v1163_v7  ;;  %v10699_v19 = vrot.slane %v1163_v7, 9  ;;  %v1214_v55 = vrot.slane %v13844_v63, %v13839_v48 }
 0x1f7   : > { %v1206_v20 = vcombine.high %v1204_v12, %v1204_v12  ;;  %v10708_v21 = vrot.slane %v1205_v13, 9  ;;  %v10709_v22 = vrot.slane %v1204_v12, 9  ;;  %v1428_v23 = vmax.f32 %v1197_v62, %v10707_v14 }
 0x1f8   : > { %v1172_v24 = vcombine.high %v1170_v17, %v1170_v17  ;;  %v10700_v25 = vrot.slane %v1171_v18, 9  ;;  %v10701_v26 = vrot.slane %v1170_v17, 9  ;;  %v1420_v27 = vmax.f32 %v1163_v7, %v10699_v19 }
 0x1f9   : > { %v10710_v28 = vrot.slane %v1206_v20, 9  ;;  %v1429_v29 = vmax.f32 %v1205_v13, %v10708_v21  ;;  %v1430_v30 = vmax.f32 %v1204_v12, %v10709_v22  ;;  %v1460_v31 = vpack.c.bf16 %v1428_v23, %v1428_v23 }
 0x1fa   : > { %v10702_v32 = vrot.slane %v1172_v24, 9  ;;  %v1421_v33 = vmax.f32 %v1171_v18, %v10700_v25  ;;  %v1422_v35 = vmax.f32 %v1170_v17, %v10701_v26  ;;  %v1452_v36 = vpack.c.bf16 %v1420_v27, %v1420_v27  ;;  %v13865_v37 = vpop.f32.mrb[12].mxu1  ;;  %v13867_v38 = vpop.f32.mrb[12].mxu0 }
 0x1fb   : > { %v1431_v39 = vmax.f32 %v1206_v20, %v10710_v28  ;;  %v1461_v40 = vpack.c.bf16 %v1429_v29, %v1429_v29  ;;  %v1462_v41 = vpack.c.bf16 %v1430_v30, %v1430_v30  ;;  %v13869_v42 = vunpack.c.l.b16 %v1460_v31  ;;  %v13871_v43 = vpop.f32.mrb[13].mxu1  ;;  %v13873_v44 = vpop.f32.mrb[13].mxu0 }
 0x1fc   : > { %v1423_v45 = vmax.f32 %v1172_v24, %v10702_v32  ;;  %v1453_v46 = vpack.c.bf16 %v1421_v33, %v1421_v33  ;;  %v1454_v47 = vpack.c.bf16 %v1422_v35, %v1422_v35  ;;  %v13875_v49 = vunpack.c.l.b16 %v1452_v36  ;;  %v13877_v50 = vpop.f32.mrb[14].mxu1  ;;  %v13879_v51 = vpop.f32.mrb[14].mxu0 }
 0x1fd   : > { %v1463_v52 = vpack.c.bf16 %v1431_v39, %v1431_v39  ;;  %v13881_v53 = vunpack.c.l.b16 %v1461_v40  ;;  %v13883_v54 = vunpack.c.l.b16 %v1462_v41  ;;  %v13887_v56 = vpop.f32.mrb[15].mxu1  ;;  %v1073_v57 = vpop.f32.mrb[15].mxu0  ;;  %v1564_v61 = vrot.slane %v13869_v42, 7 }
 0x1fe   : > { %v1455_v58 = vpack.c.bf16 %v1423_v45, %v1423_v45  ;;  %v13889_v59 = vunpack.c.l.b16 %v1453_v46  ;;  %v13891_v60 = vunpack.c.l.b16 %v1454_v47  ;;  %v1545_v63 = vrot.slane %v13875_v49, 7 }
 0x1ff   : > { %v13894_v62 = vunpack.c.l.b16 %v1463_v52  ;;  %v1567_v3 = vrot.slane %v13881_v53, 6  ;;  %v1569_v4 = vrot.slane %v13883_v54, 5  ;;  %v1639_v5 = vrot.slane %v13881_v53, 7 }
 0x200   : > { %v1546_v7 = vrot.slane %v13889_v59, 6  ;;  %v1221_v12 = vrot.slane %v1207_v1, %v13839_v48  ;;  %v1222_v13 = vcombine.high %v1214_v55, %v1214_v55  ;;  %v13902_v14 = vunpack.c.l.b16 %v1455_v58 }
 0x201   : > { %v1549_v17 = vrot.slane %v13891_v60, 5  ;;  %v10711_v18 = vrot.slane %v1214_v55, 9  ;;  %v1173_v19 = vcombine.high %v13849_v8, %v13849_v8  ;;  %v1625_v20 = vrot.slane %v13889_v59, 7 }
 0x202   : > { %v10712_v21 = vrot.slane %v1222_v13, 9  ;;  %v10713_v22 = vrot.slane %v1221_v12, 9  ;;  %v1180_v23 = vrot.slane %v13849_v8, %v13839_v48  ;;  %v1692_v1 = vrot.slane %v13891_v60, 7 }
 0x203   : > { %v1432_v25 = vmax.f32 %v1214_v55, %v10711_v18  ;;  %v1187_v26 = vrot.slane %v1173_v19, %v13839_v48  ;;  %v1548_v27 = vsel %vm1547_vm3, %v1546_v7, %v1545_v63  ;;  %v1118_v35 = vadd.f32 %v13846_v2, %v13828_v6 }
 0x204   : > { %v1433_v28 = vmax.f32 %v1222_v13, %v10712_v21  ;;  %v1188_v29 = vcombine.high %v1180_v23, %v1180_v23  ;;  %v10703_v30 = vrot.slane %v1180_v23, 9  ;;  %v1434_v31 = vmax.f32 %v1221_v12, %v10713_v22 }
 0x205   : > { %v1464_v32 = vpack.c.bf16 %v1432_v25, %v1432_v25  ;;  %v10705_v33 = vrot.slane %v1187_v26, 9  ;;  %v1116_v40 = vadd.f32 %v13851_v9, %v13828_v6  ;;  %v13919_v41 = vsel %vm1550_vm4, %v1549_v17, %v1548_v27 }
 0x206   : > { %v1465_v36 = vpack.c.bf16 %v1433_v28, %v1433_v28  ;;  %v10704_v8 = vrot.slane %v1188_v29, 9  ;;  %v1424_v39 = vmax.f32 %v1180_v23, %v10703_v30  ;;  %v11917_v47 = vadd.f32 %v13855_v11, %v13853_v10 }
 0x207   : > { %v13922_v46 = vunpack.c.l.b16 %v1464_v32  ;;  %v1426_v2 = vmax.f32 %v1187_v26, %v10705_v33  ;;  %v11918_v58 = vadd.f32 %v13860_v16, %v13858_v15  ;;  %v1466_v63 = vpack.c.bf16 %v1434_v31, %v1434_v31 }
 0x208   : > { %v13926_v52 = vunpack.c.l.b16 %v1465_v36  ;;  %v1425_v55 = vmax.f32 %v1188_v29, %v10704_v8  ;;  %v1189_v7 = vcombine.high %v1187_v26, %v1187_v26  ;;  %v1134_v9 = vmax.f32 %v1118_v35, 0.0 }
 0x209   : > { %v11919_v13 = vadd.f32 %v13867_v38, %v13865_v37  ;;  %v1456_v18 = vpack.c.bf16 %v1424_v39, %v1424_v39  ;;  %v1132_v21 = vmax.f32 %v1116_v40, 0.0  ;;  %v1119_v10 = vadd.f32 %v11917_v47, %v13828_v6 }
 0x20a   : > { %v1457_v19 = vpack.c.bf16 %v1425_v55, %v1425_v55  ;;  %v11920_v22 = vadd.f32 %v13873_v44, %v13871_v43  ;;  %v11921_v15 = vadd.f32 %v13879_v51, %v13877_v50  ;;  %v1458_v23 = vpack.c.bf16 %v1426_v2, %v1426_v2 }
 0x20b   : > { %v1122_v11 = vadd.f32 %v11919_v13, %v13828_v6  ;;  %v1117_v37 = vadd.f32 %v11918_v58, %v13828_v6  ;;  %v11922_v38 = vadd.f32 %v1073_v57, %v13887_v56  ;;  %v1223_v28 = vcombine.high %v1221_v12, %v1221_v12 }
 0x20c   : > { %v1120_v26 = vadd.f32 %v11920_v22, %v13828_v6  ;;  %v1123_v27 = vadd.f32 %v11921_v15, %v13828_v6  ;;  %v13944_v29 = vunpack.c.l.b16 %v1456_v18  ;;  %v13946_v30 = vunpack.c.l.b16 %v1457_v19 }
 0x20d   : > { %v1138_v25 = vmax.f32 %v1122_v11, 0.0  ;;  %v1121_v43 = vadd.f32 %v11922_v38, %v13828_v6  ;;  %v10706_v44 = vrot.slane %v1189_v7, 9  ;;  %v1135_v50 = vmax.f32 %v1119_v10, 0.0 }
 0x20e   : > { %v1136_v31 = vmax.f32 %v1120_v26, 0.0  ;;  %v1139_v32 = vmax.f32 %v1123_v27, 0.0  ;;  %v1133_v33 = vmax.f32 %v1117_v37, 0.0  ;;  %v10714_v56 = vrot.slane %v1223_v28, 9 }
 0x20f   : > { %v1146_v51 = vmax.f32 %v1134_v9, %v1138_v25  ;;  %v1137_v35 = vmax.f32 %v1121_v43, 0.0  ;;  %v13949_v57 = vunpack.c.l.b16 %v1458_v23  ;;  %v13956_v55 = vmax.f32 %v1189_v7, %v10706_v44 }
 0x210   : > { %v1144_v12 = vmax.f32 %v1132_v21, %v1136_v31  ;;  %v1147_v39 = vmax.f32 %v1135_v50, %v1139_v32  ;;  %v13960_v19 = vmax.f32 %v1223_v28, %v10714_v56  ;;  %v13962_v10 = vunpack.c.l.b16 %v1466_v63 }
 0x211   : > { %v1258_v36 = vcombine.high %v1146_v51, %v1146_v51  ;;  %v1265_v8 = vrot.slane %v1146_v51, %v13839_v48  ;;  %v13954_v6 = vmax.f32 %v1133_v33, %v1137_v35  ;;  %v1459_v25 = vpack.c.bf16 %v13956_v55, %v13956_v55 }
 0x212   : > { %v1224_v13 = vcombine.high %v1144_v12, %v1144_v12  ;;  %v1231_v18 = vrot.slane %v1144_v12, %v13839_v48  ;;  %v1275_v35 = vcombine.high %v1147_v39, %v1147_v39 }
 0x213   : > { %v1272_v2 = vrot.slane %v1258_v36, %v13839_v48  ;;  %v1273_v58 = vcombine.high %v1265_v8, %v1265_v8  ;;  %v10723_v9 = vrot.slane %v1265_v8, 9 }
 0x214   : > { %v1238_v7 = vrot.slane %v1224_v13, %v13839_v48  ;;  %v1239_v37 = vcombine.high %v1231_v18, %v1231_v18  ;;  %v10715_v38 = vrot.slane %v1231_v18, 9 }
 0x215   : > { %v1274_v11 = vcombine.high %v1272_v2, %v1272_v2  ;;  %v10724_v22 = vrot.slane %v1273_v58, 9  ;;  %v10725_v15 = vrot.slane %v1272_v2, 9  ;;  %v1444_v23 = vmax.f32 %v1265_v8, %v10723_v9 }
 0x216   : > { %v1240_v63 = vcombine.high %v1238_v7, %v1238_v7  ;;  %v10716_v44 = vrot.slane %v1239_v37, 9  ;;  %v10717_v50 = vrot.slane %v1238_v7, 9  ;;  %v1436_v51 = vmax.f32 %v1231_v18, %v10715_v38 }
 0x217   : > { %v10726_v26 = vrot.slane %v1274_v11, 9  ;;  %v1445_v27 = vmax.f32 %v1273_v58, %v10724_v22  ;;  %v1446_v43 = vmax.f32 %v1272_v2, %v10725_v15  ;;  %v1476_v28 = vpack.c.bf16 %v1444_v23, %v1444_v23 }
 0x218   : > { %v10718_v56 = vrot.slane %v1240_v63, 9  ;;  %v1437_v36 = vmax.f32 %v1239_v37, %v10716_v44  ;;  %v1438_v8 = vmax.f32 %v1238_v7, %v10717_v50  ;;  %v1468_v12 = vpack.c.bf16 %v1436_v51, %v1436_v51 }
 0x219   : > { %v1447_v31 = vmax.f32 %v1274_v11, %v10726_v26  ;;  %v1477_v32 = vpack.c.bf16 %v1445_v27, %v1445_v27  ;;  %v1478_v33 = vpack.c.bf16 %v1446_v43, %v1446_v43  ;;  %v13968_v13 = vunpack.c.l.b16 %v1476_v28 }
 0x21a   : > { %v1439_v58 = vmax.f32 %v1240_v63, %v10718_v56  ;;  %v1469_v22 = vpack.c.bf16 %v1437_v36, %v1437_v36  ;;  %v1470_v15 = vpack.c.bf16 %v1438_v8, %v1438_v8  ;;  %v1282_v18 = vrot.slane %v1147_v39, %v13839_v48 }
 0x21b   : > { %v1479_v9 = vpack.c.bf16 %v1447_v31, %v1447_v31  ;;  %v13970_v0 = vunpack.c.l.b16 %v1477_v32  ;;  %v13972_v2 = vunpack.c.l.b16 %v1478_v33  ;;  %v1530_v38 = vunpack.c.l.b16 %v1468_v12 }
 0x21c   : > { %v1471_v37 = vpack.c.bf16 %v1439_v58, %v1439_v58  ;;  %v13979_v26 = vunpack.c.l.b16 %v1469_v22  ;;  %v1289_v27 = vrot.slane %v1275_v35, %v13839_v48  ;;  %v1241_v43 = vcombine.high %v13954_v6, %v13954_v6 }
 0x21d   : > { %v13975_v11 = vunpack.c.l.b16 %v1479_v9  ;;  %v1667_v23 = vrot.slane %v13970_v0, 7  ;;  %v1592_v28 = vrot.slane %v13968_v13, 7  ;;  %v1594_v63 = vrot.slane %v13970_v0, 6 }
 0x21e   : > { %v13987_v44 = vunpack.c.l.b16 %v1470_v15  ;;  %v1669_v50 = vrot.slane %v13972_v2, 6  ;;  %v1580_v31 = vrot.slane %v13979_v26, 6  ;;  %v1290_v32 = vcombine.high %v1282_v18, %v1282_v18 }
 0x21f   : > { %v13995_v35 = vsel %vm1565_vm5, %v1667_v23, %v13968_v13  ;;  %v13997_v56 = vunpack.c.l.b16 %v1471_v37  ;;  %v1579_v36 = vrot.slane %v1530_v38, 7  ;;  %v1653_v12 = vrot.slane %v13979_v26, 7 }
 0x220   : > { %v1582_v8 = vrot.slane %v13987_v44, 5  ;;  %v1655_v9 = vrot.slane %v13987_v44, 6  ;;  %v10727_v58 = vrot.slane %v1282_v18, 9  ;;  %v1718_v22 = vrot.slane %v13987_v44, 7 }
 0x221   : > { %v10728_v15 = vrot.slane %v1290_v32, 9  ;;  %v10729_v7 = vrot.slane %v1289_v27, 9  ;;  %v1248_v33 = vrot.slane %v13954_v6, %v13839_v48  ;;  %v1581_v23 = vsel %vm1547_vm3, %v1580_v31, %v1579_v36 }
 0x222   : > { %v14006_v37 = vcombine.high %v1289_v27, %v1289_v27  ;;  %v1448_v21 = vmax.f32 %v1282_v18, %v10727_v58  ;;  %v1255_v16 = vrot.slane %v1241_v43, %v13839_v48  ;;  %v14011_v51 = vsel %vm1565_vm5, %v1653_v12, %v1530_v38 }
 0x223   : > { %v1449_v47 = vmax.f32 %v1290_v32, %v10728_v15  ;;  %v1450_v17 = vmax.f32 %v1289_v27, %v10729_v7  ;;  %v1256_v40 = vcombine.high %v1248_v33, %v1248_v33  ;;  %v10719_v24 = vrot.slane %v1248_v33, 9 }
 0x224   : > { %v1480_v6 = vpack.c.bf16 %v1448_v21, %v1448_v21  ;;  %v10721_v39 = vrot.slane %v1255_v16, 9  ;;  %v14013_v31 = vcombine.high %v1255_v16, %v1255_v16  ;;  %v1467_v43 = vpack.c.bf16 %v13960_v19, %v13960_v19 }
 0x225   : > { %v10720_v36 = vrot.slane %v1256_v40, 9  ;;  %v1440_v18 = vmax.f32 %v1248_v33, %v10719_v24  ;;  %v14018_v7 = vsel %vm1550_vm4, %v1582_v8, %v1581_v23  ;;  %v1481_v27 = vpack.c.bf16 %v1449_v47, %v1449_v47 }
 0x226   : > { %v1482_v32 = vpack.c.bf16 %v1450_v17, %v1450_v17  ;;  %v1442_v58 = vmax.f32 %v1255_v16, %v10721_v39  ;;  %v14020_v15 = vunpack.c.l.b16 %v1480_v6  ;;  %v1626_v21 = vsel %vm1565_vm5, %v1625_v20, %v13875_v49 }
 0x227   : > { %v1441_v38 = vmax.f32 %v1256_v40, %v10720_v36  ;;  %v1472_v12 = vpack.c.bf16 %v1440_v18, %v1440_v18  ;;  %v1522_v24 = vunpack.c.l.b16 %v1459_v25  ;;  %v1627_v19 = vrot.slane %v13891_v60, 6 }
 0x228   : > { %v1474_v45 = vpack.c.bf16 %v1442_v58, %v1442_v58  ;;  %v1629_v47 = vrot.slane %v13902_v14, 5  ;;  %v10722_v17 = vrot.slane %v14013_v31, 9  ;;  %v14034_v40 = vunpack.c.l.b16 %v1467_v43 }
 0x229   : > { %v1473_v16 = vpack.c.bf16 %v1441_v38, %v1441_v38  ;;  %v14032_v39 = vunpack.c.l.b16 %v1472_v12  ;;  %v14036_v33 = vunpack.c.l.b16 %v1481_v27  ;;  %v14038_v8 = vunpack.c.l.b16 %v1482_v32 }
 0x22a   : > { %v1628_v49 = vsel %vm1547_vm3, %v1627_v19, %v1626_v21  ;;  %v1631_v20 = vrot.slane %v13944_v29, 4  ;;  %v1600_v55 = vrot.slane %v14020_v15, 3  ;;  %v14043_v25 = vunpack.c.l.b16 %v1474_v45 }
 0x22b   : > { %v1630_v23 = vsel %vm1550_vm4, %v1629_v47, %v1628_v49  ;;  %v1633_v6 = vrot.slane %v13946_v30, 3  ;;  %v14047_v36 = vunpack.c.l.b16 %v1473_v16  ;;  %v1722_v18 = vrot.slane %v14032_v39, 5 }
 0x22c   : > { %v1632_v43 = vsel %vm1553_vm6, %v1631_v20, %v1630_v23  ;;  %v1635_v27 = vrot.slane %v13949_v57, 2  ;;  %v1637_v58 = vrot.slane %v1522_v24, 1  ;;  %v1640_v45 = vsel %vm1565_vm5, %v1639_v5, %v13869_v42 }
 0x22d   : > { %v1634_v32 = vsel %vm1556_vm7, %v1633_v6, %v1632_v43  ;;  %v1641_v38 = vrot.slane %v13883_v54, 6  ;;  %v1643_v21 = vrot.slane %v13894_v62, 5  ;;  %v1645_v19 = vrot.slane %v13922_v46, 4 }
 0x22e   : > { %v1636_v12 = vsel %vm1559_vm8, %v1635_v27, %v1634_v32  ;;  %v1647_v47 = vrot.slane %v13926_v52, 3  ;;  %v1649_v20 = vrot.slane %v13962_v10, 2  ;;  %v1651_v23 = vrot.slane %v14034_v40, 1 }
 0x22f   : > { %v1638_v16 = vsel %vm1562_vm9, %v1637_v58, %v1636_v12  ;;  %v1642_v49 = vsel %vm1547_vm3, %v1641_v38, %v1640_v45  ;;  %v1566_v6 = vsel %vm1565_vm5, %v1564_v61, %v1522_v24  ;;  %v1693_v43 = vsel %vm1565_vm5, %v1692_v1, %v13889_v59 }
 0x230   : > { %v1644_v5 = vsel %vm1550_vm4, %v1643_v21, %v1642_v49  ;;  %v1694_v27 = vrot.slane %v13902_v14, 6  ;;  %v1568_v58 = vsel %vm1547_vm3, %v1567_v3, %v1566_v6  ;;  %v1696_v45 = vrot.slane %v13944_v29, 5 }
 0x231   : > { %v1646_v32 = vsel %vm1553_vm6, %v1645_v19, %v1644_v5  ;;  %v1698_v38 = vrot.slane %v13946_v30, 4  ;;  %v14085_v60 = vsel %vm1550_vm4, %v1569_v4, %v1568_v58  ;;  %v1700_v61 = vrot.slane %v13949_v57, 3 }
 0x232   : > { %v1648_v12 = vsel %vm1556_vm7, %v1647_v47, %v1646_v32  ;;  %v1695_v59 = vsel %vm1547_vm3, %v1694_v27, %v1693_v43  ;;  %v1702_v3 = vrot.slane %v1522_v24, 2  ;;  %v1704_v19 = vrot.slane %v13869_v42, 1 }
 0x233   : > { %v1650_v1 = vsel %vm1559_vm8, %v1649_v20, %v1648_v12  ;;  %v1697_v21 = vsel %vm1550_vm4, %v1696_v45, %v1695_v59  ;;  %v1706_v5 = vrot.slane %v13883_v54, 7  ;;  %v1708_v4 = vrot.slane %v13894_v62, 6 }
 0x234   : > { %v1652_v49 = vsel %vm1562_vm9, %v1651_v23, %v1650_v1  ;;  %v1699_v47 = vsel %vm1553_vm6, %v1698_v38, %v1697_v21  ;;  %v1710_v27 = vrot.slane %v13922_v46, 5  ;;  %v1712_v20 = vrot.slane %v13926_v52, 4 }
 0x235   : > { %v1681_v6 = vpack.c.b16 %v1652_v49, %v1638_v16  ;;  %v1701_v43 = vsel %vm1556_vm7, %v1700_v61, %v1699_v47  ;;  %v1707_v42 = vsel %vm1565_vm5, %v1706_v5, %v13881_v53  ;;  %v1714_v24 = vrot.slane %v13962_v10, 3 }
 0x236   : > { %v1703_v32 = vsel %vm1559_vm8, %v1702_v3, %v1701_v43  ;;  %v1716_v23 = vrot.slane %v14034_v40, 2  ;;  %v1709_v16 = vsel %vm1547_vm3, %v1708_v4, %v1707_v42  ;;  %v10730_v58 = vrot.slane %v14006_v37, 9 }
 0x237   : > { %1683 = vrot.lane.b32.xlu0 %v1681_v6, %s13331_s23  ;;  %v1705_v54 = vsel %vm1562_vm9, %v1704_v19, %v1703_v32  ;;  %v1443_v45 = vmax.f32 %v14013_v31, %v10722_v17  ;;  %v1711_v38 = vsel %vm1550_vm4, %v1710_v27, %v1709_v16  ;;  %v1656_v53 = vsel %vm1547_vm3, %v1655_v9, %v14011_v51 }
 0x238   : > { %v1657_v40 = vrot.slane %v13997_v56, 5  ;;  %v1659_v12 = vrot.slane %v14032_v39, 4  ;;  %v1713_v59 = vsel %vm1553_vm6, %v1712_v20, %v1711_v38  ;;  %v1451_v61 = vmax.f32 %v14006_v37, %v10730_v58 }
 0x239   : > { %v1475_v1 = vpack.c.bf16 %v1443_v45, %v1443_v45  ;;  %v1661_v21 = vrot.slane %v14047_v36, 3  ;;  %v1715_v31 = vsel %vm1556_vm7, %v1714_v24, %v1713_v59  ;;  %v1663_v3 = vrot.slane %v14043_v25, 2 }
 0x23a   : > { %v1658_v17 = vsel %vm1550_vm4, %v1657_v40, %v1656_v53  ;;  %v1670_v51 = vsel %vm1547_vm3, %v1669_v50, %v13995_v35  ;;  %v1717_v9 = vsel %vm1559_vm8, %v1716_v23, %v1715_v31  ;;  %v1483_v19 = vpack.c.bf16 %v1451_v61, %v1451_v61 }
 0x23b   : > { %v1537_v49 = vunpack.c.l.b16 %v1475_v1  ;;  %v1660_v37 = vsel %vm1553_vm6, %v1659_v12, %v1658_v17  ;;  %v1744_v47 = vpack.c.b16 %v1717_v9, %v1705_v54  ;;  %v1671_v4 = vrot.slane %v13975_v11, 5 }
 0x23c   : > { %v1662_v5 = vsel %vm1556_vm7, %v1661_v21, %v1660_v37  ;;  %v1673_v6 = vrot.slane %v14020_v15, 4  ;;  %v1624_v43 = vunpack.c.l.b16 %v1483_v19  ;;  %v1675_v32 = vrot.slane %v14036_v33, 3 }
 0x23d   : > { %v1664_v27 = vsel %vm1559_vm8, %v1663_v3, %v1662_v5  ;;  %v1665_v20 = vrot.slane %v1537_v49, 1  ;;  %1746 = vrot.lane.b32.xlu1 %v1744_v47, %s13332_s4  ;;  %v1672_v50 = vsel %vm1550_vm4, %v1671_v4, %v1670_v51  ;;  %v1677_v35 = vrot.slane %v14038_v8, 2 }
 0x23e   : > { %v1593_v42 = vsel %vm1565_vm5, %v1592_v28, %v1537_v49  ;;  %v1719_v24 = vsel %vm1565_vm5, %v1718_v22, %v13979_v26  ;;  %v1674_v54 = vsel %vm1553_vm6, %v1673_v6, %v1672_v50  ;;  %v1679_v16 = vrot.slane %v1624_v43, 1 }
 0x23f   : > { %v1666_v23 = vsel %vm1562_vm9, %v1665_v20, %v1664_v27  ;;  %v1595_v58 = vsel %vm1547_vm3, %v1594_v63, %v1593_v42  ;;  %v1676_v45 = vsel %vm1556_vm7, %v1675_v32, %v1674_v54  ;;  %v15134_v38 = vrot.slane %v13972_v2, 5 }
 0x240   : > { %v1720_v44 = vrot.slane %v13997_v56, 6  ;;  %v1724_v26 = vrot.slane %v14047_v36, 4  ;;  %v1678_v22 = vsel %vm1559_vm8, %v1677_v35, %v1676_v45  ;;  %v1726_v53 = vrot.slane %v14043_v25, 3 }
 0x241   : > { %v1597_v28 = vsel %vm1550_vm4, %v15134_v38, %v1595_v58  ;;  %v1728_v40 = vrot.slane %v1537_v49, 2  ;;  %v1730_v12 = vrot.slane %v13968_v13, 1  ;;  %v1680_v59 = vsel %vm1562_vm9, %v1679_v16, %v1678_v22 }
 0x242   : > { %v1721_v63 = vsel %vm1547_vm3, %v1720_v44, %v1719_v24  ;;  %v15135_v61 = vrot.slane %v13972_v2, 7  ;;  %v1734_v21 = vrot.slane %v13975_v11, 6  ;;  %v1682_v31 = vpack.c.b16 %v1680_v59, %v1666_v23 }
 0x243   : > { %v1723_v17 = vsel %vm1550_vm4, %v1722_v18, %v1721_v63  ;;  %v1736_v3 = vrot.slane %v14020_v15, 5  ;;  %v1738_v13 = vrot.slane %v14036_v33, 4  ;;  %v1740_v2 = vrot.slane %v14038_v8, 3 }
 0x244   : > { %v1733_v1 = vsel %vm1565_vm5, %v15135_v61, %v13970_v0  ;;  %v1725_v51 = vsel %vm1553_vm6, %v1724_v26, %v1723_v17  ;;  %v1742_v19 = vrot.slane %v1624_v43, 2  ;;  %1685 = vrot.lane.b32.xlu0 %v1682_v31, %s13331_s23  ;;  %v15136_v18 = vrot.slane %v13902_v14, 4 }
 0x245   : > { %v1735_v9 = vsel %vm1547_vm3, %v1734_v21, %v1733_v1  ;;  %v1727_v0 = vsel %vm1556_vm7, %v1726_v53, %v1725_v51  ;;  %v15137_v47 = vrot.slane %v13894_v62, 4  ;;  %v15138_v43 = vrot.slane %v13944_v29, 3 }
 0x246   : > { %v1737_v49 = vsel %vm1550_vm4, %v1736_v3, %v1735_v9  ;;  %v1554_v37 = vsel %vm1553_vm6, %v15136_v18, %v13919_v41  ;;  %v1729_v4 = vsel %vm1559_vm8, %v1728_v40, %v1727_v0  ;;  %v15139_v20 = vrot.slane %v13922_v46, 3 }
 0x247   : > { %v1572_v5 = vsel %vm1553_vm6, %v15137_v47, %v14085_v60  ;;  %v1739_v6 = vsel %vm1553_vm6, %v1738_v13, %v1737_v49  ;;  %v1557_v27 = vsel %vm1556_vm7, %v15138_v43, %v1554_v37  ;;  %v1731_v14 = vsel %vm1562_vm9, %v1730_v12, %v1729_v4 }
 0x248   : > { %v1574_v32 = vsel %vm1556_vm7, %v15139_v20, %v1572_v5  ;;  %v1741_v41 = vsel %vm1556_vm7, %v1740_v2, %v1739_v6  ;;  %v15140_v62 = vrot.slane %v13946_v30, 2  ;;  %v15141_v50 = vrot.slane %v13926_v52, 2  ;;  %v10732_v52 = vld [vmem:[%s14211_s22 + $0x8] sm:$0xff] }
 0x249   : > { %v1586_v29 = vrot.slane %v14032_v39, 3  ;;  %v1743_v42 = vsel %vm1559_vm8, %v1742_v19, %v1741_v41  ;;  %v15142_v46 = vrot.slane %v13949_v57, 1  ;;  %v15145_v30 = vrot.slane %v13962_v10, 1 }
 0x24a   : > { %v1560_v60 = vsel %vm1559_vm8, %v15140_v62, %v1557_v27  ;;  %v1576_v35 = vsel %vm1559_vm8, %v15141_v50, %v1574_v32  ;;  %v1588_v54 = vrot.slane %v14047_v36, 2  ;;  %v1745_v57 = vpack.c.b16 %v1743_v42, %v1731_v14 }
 0x24b   : > { %v1563_v24 = vsel %vm1562_vm9, %v15142_v46, %v1560_v60  ;;  %v1578_v39 = vsel %vm1562_vm9, %v15145_v30, %v1576_v35  ;;  %v15146_v58 = vrot.slane %v13997_v56, 4  ;;  %v1602_v38 = vrot.slane %v14036_v33, 2 }
 0x24c   : > { %v1606_v16 = vpack.c.b16 %v1578_v39, %v1563_v24  ;;  %v1590_v44 = vrot.slane %v14043_v25, 1  ;;  %v15147_v10 = vrot.slane %v13975_v11, 4  ;;  %v1604_v36 = vrot.slane %v14038_v8, 1  ;;  %1748 = vrot.lane.b32.xlu1 %v1745_v57, %s13332_s4 }
 0x24d   : > { %v1585_v45 = vsel %vm1553_vm6, %v15146_v58, %v14018_v7 }
 0x24e   : > { %v1587_v26 = vsel %vm1556_vm7, %v1586_v29, %v1585_v45  ;;  %v1599_v22 = vsel %vm1553_vm6, %v15147_v10, %v1597_v28  ;;  %v1616_v56 = vsel %vm14207_vm12, %v1606_v16, %v10732_v52  ;;  %v10734_v28 = vld [vmem:[%s14211_s22 + $0x98] sm:$0xff] }
 0x24f   : > { %v1589_v7 = vsel %vm1559_vm8, %v1588_v54, %v1587_v26  ;;  %v1601_v33 = vsel %vm1556_vm7, %v1600_v55, %v1599_v22  ;;  %10733 = vst [vmem:[%s14211_s22 + $0x8] sm:$0xff] %v1616_v56 }
 0x250   : > { %v1591_v11 = vsel %vm1562_vm9, %v1590_v44, %v1589_v7  ;;  %v1603_v25 = vsel %vm1559_vm8, %v1602_v38, %v1601_v33 }
 0x251   : > { %v1605_v8 = vsel %vm1562_vm9, %v1604_v36, %v1603_v25 }
 0x252   : > { %v1607_v53 = vpack.c.b16 %v1605_v8, %v1591_v11 }
 0x254   : > { %v1619_v40 = vsel %vm14207_vm12, %v1607_v53, %v10734_v28 }
 0x255   : > { %10735 = vst [vmem:[%s14211_s22 + $0x98] sm:$0xff] %v1619_v40 }
 0x2a9   : > { %v1684_v15 = vpop.permute.xlu0 %1683 }
 0x2aa   : > { %10736 = vst.msk [vmem:[%s14211_s22 + $0x8] sm:$0xff] %vm1689_vm13, %v1684_v15 }
 0x2af   : > { %v1747_v55 = vpop.permute.xlu1 %1746 }
 0x2b1   : > { %v10738_v12 = vld [vmem:[%s14211_s22 + $0x8] sm:$0xff] }
 0x2b2   : > { %v1756_v59 = vsel %vm1754_vm2, %v1747_v55, %v10738_v12 }
 0x2b3   : > { %10739 = vst [vmem:[%s14211_s22 + $0x8] sm:$0xff] %v1756_v59 }
 0x2b6   : > { %v1686_v63 = vpop.permute.xlu0 %1685 }
 0x2b7   : > { %10737 = vst.msk [vmem:[%s14211_s22 + $0x98] sm:$0xff] %vm1689_vm13, %v1686_v63 }
 0x2ba   :  { %504 = sbr.rel (!%p502_p8) target bundleno = 246 (0xf6), region = 134 }
 0x2be   : > { %v1749_v61 = vpop.permute.xlu1 %1748  ;;  %v10740_v1 = vld [vmem:[%s14211_s22 + $0x98] sm:$0xff] }
 0x2bf   : > { %v1759_v21 = vsel %vm1754_vm2, %v1749_v61, %v10740_v1 }
 0x2c0   : > { %10741 = vst [vmem:[%s14211_s22 + $0x98] sm:$0xff] %v1759_v21 }
 0x2c1 LB: > { %v12091_v31 = vld [vmem:[%s15115_s3 + $0x30] sm:$0xff]   ;;  %v12092_v17 = vld [vmem:[%s15115_s3] sm:$0xff]   ;;  %v12093_v3 = vld [vmem:[%s15115_s3 + $0x38] sm:$0xff]   ;;  %s11671_s2 = sshll.u32 %s13314_s18, 4  ;;  %vm2464_vm1 = vcmask 519168   ;;  %s10841_s12 = sshll.u32 %s13314_s18, 3  ;;  %s13314_s18 = sphi %s14253_s18, %s1766_s18  }
 0x2c2   : > { %11845 = vmatprep.subr.bf16.mxu1 %v12091_v31  ;;  %11865 = vmatprep.subr.bf16.mxu0 %v12092_v17  ;;  %v12094_v13 = vld [vmem:[%s15115_s3 + $0x8] sm:$0xff]   ;;  %v12095_v51 = vld [vmem:[%s15115_s3 + $0x40] sm:$0xff]   ;;  %v12096_v9 = vld [vmem:[%s15115_s3 + $0x10] sm:$0xff]   ;;  %s14286_s20 = scalar_lea.vmem [#allocation2], %s11671_s2  ;;  %vm2549_vm10 = vsmask.f32 3328 }
 0x2c3   : > { %11846 = vmatpush3.bf16.msra.mxu1 %v12091_v31  ;;  %11866 = vmatpush3.bf16.msra.mxu0 %v12092_v17  ;;  %v12097_v2 = vld [vmem:[%s15115_s3 + $0x48] sm:$0xff]   ;;  %v12098_v19 = vld [vmem:[%s15115_s3 + $0x18] sm:$0xff]   ;;  %v12099_v0 = vld [vmem:[%s15115_s3 + $0x50] sm:$0xff]   ;;  %s14407_s9 = scalar_lea.vmem [#allocation3], %s10841_s12  ;;  %s13333_s2 = smov 64   ;;  %vm2518_vm14 = vcmask 1043968  }
 0x2c4   : > { %11847 = vmatprep.subr.bf16.mxu1 %v12093_v3  ;;  %11867 = vmatprep.subr.bf16.mxu0 %v12094_v13  ;;  %v12100_v37 = vld [vmem:[%s15115_s3 + $0x20] sm:$0xff]   ;;  %v12101_v47 = vld [vmem:[%s15115_s3 + $0x58] sm:$0xff]   ;;  %v12102_v5 = vld [vmem:[%s15115_s3 + $0x28] sm:$0xff]   ;;  %s1766_s18 = sadd.s32 1, %s13314_s18  }
 0x2c5   : > { %v12103_v4 = vld [vmem:[%s15115_s3 + $0x60] sm:$0xff]   ;;  %v12104_v43 = vld [vmem:[%s15115_s3 + $0x68] sm:$0xff]   ;;  %v12105_v32 = vld [vmem:[%s15115_s3 + $0x70] sm:$0xff]   ;;  %p1763_p9 = scmp.ge.s32.totalorder %s1766_s18, 8  }
 0x2c6   : > { %v12106_v41 = vld [vmem:[%s15115_s3 + $0x78] sm:$0xff]   ;;  %v12107_v62 = vld [vmem:[%s15115_s3 + $0x80] sm:$0xff]   ;;  %v12108_v60 = vld [vmem:[%s15115_s3 + $0x88] sm:$0xff]   ;;  %s13336_s3 = smov (%p1763_p9), [#allocation19]  }
 0x2c7   : > { %11848 = vmatpush3.bf16.msra.mxu1 %v12093_v3  ;;  %11868 = vmatpush3.bf16.msra.mxu0 %v12094_v13  ;;  %v10746_v49 = vld [vmem:[%s14286_s20 + $0x8] sm:$0xff]  ;;  %v1770_v18 = vld [vmem:[%s14286_s20] sm:$0xff]  ;;  %v10747_v6 = vld [vmem:[%s14286_s20 + $0x10] sm:$0xff]  ;;  %s10555_s18 = sshll.u32 (%p1763_p9), %s13336_s3, 4  ;;  %s10556_s18 = int_to_ptr.vmem [resolvable:$true] %s10555_s18 }
 0x2c8   : > { %11849 = vmatprep.subr.bf16.mxu1 %v12095_v51  ;;  %11869 = vmatprep.subr.bf16.mxu0 %v12096_v9  ;;  %v10748_v27 = vld [vmem:[%s14286_s20 + $0x98] sm:$0xff]  ;;  %v1772_v20 = vld [vmem:[%s14286_s20 + $0x90] sm:$0xff]  ;;  %v10749_v14 = vld [vmem:[%s14286_s20 + $0xa0] sm:$0xff]  ;;  %s13266_s10 = scalar_lea.vmem (%p1763_p9), %s10556_s18, 32  ;;  %p13271_p11 = scmp.lt.s32.totalorder (%p1763_p9), %s10556_s18, %s10556_s18 }
 0x2c9   : > { %11857 = vmatprep.mubr.msk.bf16.mxu1 %vm139_vm0, %v10746_v49  ;;  %11877 = vmatprep.mubr.msk.bf16.mxu0 %vm139_vm0, %v1770_v18  ;;  %v10787_v50 = vld [vmem:[%s14286_s20 + $0xa8] sm:$0xff]  ;;  %v10785_v35 = vld [vmem:[%s14286_s20 + $0x18] sm:$0xff]  ;;  %v10810_v10 = vld [vmem:[#allocation8] ss:$0 sm:$0xff]  ;;  %p13267_p10 = scmp.ne.s32.totalorder (%p1763_p9), %s10556_s18, %s13266_s10  ;;  %p13272_p12 = scmp.lt.s32.totalorder (%p1763_p9), %s13266_s10, %s13266_s10 }
 0x2ca   : > { %vm14403_vm12 = vmand %vm2464_vm1, %vm2549_vm10 }
 0x2cb   : > { %11850 = vmatpush3.bf16.msra.mxu1 %v12095_v51  ;;  %11870 = vmatpush3.bf16.msra.mxu0 %v12096_v9  ;;  %vm14436_vm13 = vmand %vm2464_vm1, %vm1613_vm11  ;;  %p13273_p13 = por (%p1763_p9), %p13272_p12, %p13271_p11 }
 0x2cc   : > { %11851 = vmatprep.subr.bf16.mxu1 %v12097_v2  ;;  %11871 = vmatprep.subr.bf16.mxu0 %v12098_v19 }
 0x2cd   :  { %p13274_p0 = pnand (%p1763_p9), %p13273_p13, %p13267_p10 }
 0x2cf   : > { %11852 = vmatpush3.bf16.msra.mxu1 %v12097_v2  ;;  %11872 = vmatpush3.bf16.msra.mxu0 %v12098_v19 }
 0x2d0   : > { %11853 = vmatprep.subr.bf16.mxu1 %v12099_v0  ;;  %11873 = vmatprep.subr.bf16.mxu0 %v12100_v37 }
 0x2d3   : > { %11854 = vmatpush3.bf16.msra.mxu1 %v12099_v0  ;;  %11874 = vmatpush3.bf16.msra.mxu0 %v12100_v37 }
 0x2d4   : > { %11855 = vmatprep.subr.bf16.mxu1 %v12101_v47  ;;  %11875 = vmatprep.subr.bf16.mxu0 %v12102_v5 }
 0x2d7   : > { %11856 = vmatpush3.bf16.msra.mxu1 %v12101_v47  ;;  %11876 = vmatpush3.bf16.msra.mxu0 %v12102_v5 }
 0x2d8   : > { %11939 = vmatprep.subr.bf16.mxu1 %v12103_v4  ;;  %11885 = vmatprep.subr.bf16.mxu0 %v12103_v4 }
 0x2da   : > { %11858 = vmatmul.mubr.msk.bf16.vlgmr.msra.gmra.mrb[0].mxu1 %vm139_vm0, %v10747_v6  ;;  %11878 = vmatmul.mubr.msk.bf16.vlgmr.msra.gmra.mrb[0].mxu0 %vm139_vm0, %v10746_v49 }
 0x2db   : > { %11945 = vmatpush3.bf16.msra.mxu1 %v12103_v4  ;;  %11886 = vmatpush3.bf16.msra.mxu0 %v12103_v4 }
 0x2dc   : > { %11940 = vmatprep.subr.bf16.mxu1 %v12104_v43  ;;  %11887 = vmatprep.subr.bf16.mxu0 %v12104_v43 }
 0x2dd   : > { %11861 = vmatprep.mubr.msk.bf16.mxu1 %vm139_vm0, %v10748_v27  ;;  %11881 = vmatprep.mubr.msk.bf16.mxu0 %vm139_vm0, %v1772_v20 }
 0x2df   : > { %11946 = vmatpush3.bf16.msra.mxu1 %v12104_v43  ;;  %11888 = vmatpush3.bf16.msra.mxu0 %v12104_v43 }
 0x2e0   : > { %11941 = vmatprep.subr.bf16.mxu1 %v12105_v32  ;;  %11889 = vmatprep.subr.bf16.mxu0 %v12105_v32 }
 0x2e2   : > { %11862 = vmatmul.mubr.msk.bf16.gmra.mrb[4].mxu1 %vm139_vm0, %v10749_v14  ;;  %11882 = vmatmul.mubr.msk.bf16.gmra.mrb[4].mxu0 %vm139_vm0, %v10748_v27 }
 0x2e3   : > { %11947 = vmatpush3.bf16.msra.mxu1 %v12105_v32  ;;  %11890 = vmatpush3.bf16.msra.mxu0 %v12105_v32 }
 0x2e4   : > { %11942 = vmatprep.subr.bf16.mxu1 %v12106_v41  ;;  %11891 = vmatprep.subr.bf16.mxu0 %v12106_v41 }
 0x2e5   : > { %11897 = vmatprep.mubr.msk.bf16.mxu0 %vm139_vm0, %v10747_v6  ;;  %11901 = vmatprep.mubr.msk.bf16.mxu1 %vm139_vm0, %v10749_v14 }
 0x2e7   : > { %11948 = vmatpush3.bf16.msra.mxu1 %v12106_v41  ;;  %11892 = vmatpush3.bf16.msra.mxu0 %v12106_v41 }
 0x2e8   : > { %11943 = vmatprep.subr.bf16.mxu1 %v12107_v62  ;;  %11893 = vmatprep.subr.bf16.mxu0 %v12107_v62 }
 0x2eb   : > { %11949 = vmatpush3.bf16.msra.mxu1 %v12107_v62  ;;  %11894 = vmatpush3.bf16.msra.mxu0 %v12107_v62 }
 0x2ec   : > { %11944 = vmatprep.subr.bf16.mxu1 %v12108_v60  ;;  %11895 = vmatprep.subr.bf16.mxu0 %v12108_v60 }
 0x2ef   : > { %11950 = vmatpush3.bf16.msra.mxu1 %v12108_v60  ;;  %11896 = vmatpush3.bf16.msra.mxu0 %v12108_v60 }
 0x2f2   : > { %11902 = vmatmul.mubr.msk.bf16.vlgmr.msra.gmra.mrb[8].mxu1 %vm139_vm0, %v10787_v50  ;;  %11898 = vmatmul.mubr.msk.bf16.vlgmr.msra.gmra.mrb[0].mxu0 %vm139_vm0, %v10785_v35  ;;  %vm2705_vm0 = vcmask (%p1763_p9), 523264  }
 0x3ad   : > { %v11859_v29 = vpop.f32.mrb[0].mxu1 }
 0x3ae   : > { %v1888_v42 = vpop.f32.mrb[1].mxu1 }
 0x3af   : > { %v11860_v46 = vpop.f32.mrb[2].mxu1 }
 0x3b0   : > { %v1891_v24 = vpop.f32.mrb[3].mxu1 }
 0x3b5   : > { %v11863_v23 = vpop.f32.mrb[4].mxu1  ;;  %v11883_v52 = vpop.f32.mrb[4].mxu0 }
 0x3b6   : > { %v1904_v30 = vpop.f32.mrb[5].mxu1  ;;  %v2026_v39 = vadd.f32 %v11883_v52, %v11863_v23  ;;  %v2017_v54 = vpop.f32.mrb[5].mxu0 }
 0x3b7   : > { %v11864_v57 = vpop.f32.mrb[6].mxu1  ;;  %v2018_v16 = vadd.f32 %v2017_v54, %v1904_v30  ;;  %v11884_v58 = vpop.f32.mrb[6].mxu0 }
 0x3b8   : > { %v1907_v45 = vpop.f32.mrb[7].mxu1  ;;  %v2029_v38 = vadd.f32 %v11884_v58, %v11864_v57  ;;  %v2020_v44 = vpop.f32.mrb[7].mxu0 }
 0x3b9   : > { %v2021_v26 = vadd.f32 %v2020_v44, %v1907_v45 }
 0x3c5   : > { %v11903_v22 = vpop.f32.mrb[8].mxu1  ;;  %v11899_v36 = vpop.f32.mrb[0].mxu0 }
 0x3c6   : > { %v2171_v56 = vadd.f32 %v11903_v22, %v2026_v39  ;;  %v2150_v7 = vpop.f32.mrb[9].mxu1  ;;  %v11951_v33 = vadd.f32 %v11899_v36, %v11859_v29  ;;  %v2134_v11 = vpop.f32.mrb[1].mxu0 }
 0x3c7   : > { %v2169_v25 = vadd.f32 %v2150_v7, %v2018_v16  ;;  %v11904_v28 = vpop.f32.mrb[10].mxu1  ;;  %v11952_v53 = vadd.f32 %v2134_v11, %v1888_v42  ;;  %v11900_v40 = vpop.f32.mrb[2].mxu0 }
 0x3c8   : > { %v2186_v8 = vadd.f32 %v10810_v10, %v2171_v56  ;;  %v2172_v15 = vadd.f32 %v11904_v28, %v2029_v38  ;;  %v2153_v55 = vpop.f32.mrb[11].mxu1  ;;  %v2182_v12 = vadd.f32 %v11951_v33, %v10810_v10  ;;  %v11953_v63 = vadd.f32 %v11900_v40, %v11860_v46  ;;  %v2137_v61 = vpop.f32.mrb[3].mxu0 }
 0x3c9   : > { %v2184_v59 = vadd.f32 %v10810_v10, %v2169_v25  ;;  %v2170_v1 = vadd.f32 %v2153_v55, %v2021_v26  ;;  %v2180_v31 = vadd.f32 %v11952_v53, %v10810_v10  ;;  %v11954_v3 = vadd.f32 %v2137_v61, %v1891_v24 }
 0x3ca   : > { %v2194_v21 = vmax.f32 %v2186_v8, 0.0  ;;  %v2187_v17 = vadd.f32 %v10810_v10, %v2172_v15  ;;  %v2190_v13 = vmax.f32 %v2182_v12, 0.0  ;;  %v2183_v9 = vadd.f32 %v11953_v63, %v10810_v10 }
 0x3cb   : > { %v2192_v51 = vmax.f32 %v2184_v59, 0.0  ;;  %v2185_v2 = vadd.f32 %v10810_v10, %v2170_v1  ;;  %v2188_v19 = vmax.f32 %v2180_v31, 0.0  ;;  %v2181_v49 = vadd.f32 %v11954_v3, %v10810_v10 }
 0x3cc   : > { %v2195_v0 = vmax.f32 %v2187_v17, 0.0  ;;  %v2191_v37 = vmax.f32 %v2183_v9, 0.0 }
 0x3cd   : > { %v2198_v18 = vmax.f32 %v2192_v51, %v2194_v21  ;;  %v2193_v47 = vmax.f32 %v2185_v2, 0.0  ;;  %v2196_v5 = vmax.f32 %v2188_v19, %v2190_v13  ;;  %v2189_v4 = vmax.f32 %v2181_v49, 0.0 }
 0x3cf   : > { %v2238_v6 = vcombine.high %v2198_v18, %v2198_v18  ;;  %v2245_v43 = vrot.slane %v2198_v18, %v13839_v48  ;;  %v2199_v27 = vmax.f32 %v2193_v47, %v2195_v0  ;;  %v2204_v20 = vcombine.high %v2196_v5, %v2196_v5 }
 0x3d0   : > { %v2211_v32 = vrot.slane %v2196_v5, %v13839_v48  ;;  %v2197_v14 = vmax.f32 %v2189_v4, %v2191_v37 }
 0x3d1   : > { %v2252_v41 = vrot.slane %v2238_v6, %v13839_v48  ;;  %v2253_v62 = vcombine.high %v2245_v43, %v2245_v43  ;;  %v10819_v60 = vrot.slane %v2245_v43, 9  ;;  %v2218_v50 = vrot.slane %v2204_v20, %v13839_v48 }
 0x3d2   : > { %v2219_v35 = vcombine.high %v2211_v32, %v2211_v32  ;;  %v2221_v29 = vcombine.high %v2197_v14, %v2197_v14  ;;  %v2255_v42 = vcombine.high %v2199_v27, %v2199_v27  ;;  %v2228_v57 = vrot.slane %v2197_v14, %v13839_v48 }
 0x3d3   : > { %v2254_v46 = vcombine.high %v2252_v41, %v2252_v41  ;;  %v10820_v24 = vrot.slane %v2253_v62, 9  ;;  %v10821_v23 = vrot.slane %v2252_v41, 9  ;;  %v14339_v52 = vmax.f32 %v2245_v43, %v10819_v60 }
 0x3d4   : > { %v2220_v30 = vcombine.high %v2218_v50, %v2218_v50  ;;  %v10812_v39 = vrot.slane %v2219_v35, 9  ;;  %v10813_v54 = vrot.slane %v2218_v50, 9  ;;  %v10811_v16 = vrot.slane %v2211_v32, 9 }
 0x3d5   : > { %v10822_v58 = vrot.slane %v2254_v46, 9  ;;  %v2345_v45 = vmax.f32 %v2253_v62, %v10820_v24  ;;  %v2346_v38 = vmax.f32 %v2252_v41, %v10821_v23  ;;  %v11681_v10 = vpack.c.bf16 %v14339_v52, %v14339_v52 }
 0x3d6   : > { %v2337_v44 = vmax.f32 %v2219_v35, %v10812_v39  ;;  %v2338_v26 = vmax.f32 %v2218_v50, %v10813_v54  ;;  %v2235_v22 = vrot.slane %v2221_v29, %v13839_v48  ;;  %v10814_v36 = vrot.slane %v2220_v30, 9 }
 0x3d7   : > { %v14345_v56 = vmax.f32 %v2254_v46, %v10822_v58  ;;  %v11682_v7 = vpack.c.bf16 %v2345_v45, %v2345_v45  ;;  %v11683_v33 = vpack.c.bf16 %v2346_v38, %v2346_v38  ;;  %v2236_v28 = vcombine.high %v2228_v57, %v2228_v57 }
 0x3d8   : > { %v11675_v11 = vpack.c.bf16 %v2337_v44, %v2337_v44  ;;  %v11676_v25 = vpack.c.bf16 %v2338_v26, %v2338_v26  ;;  %v10815_v8 = vrot.slane %v2228_v57, 9  ;;  %v10817_v15 = vrot.slane %v2235_v22, 9 }
 0x3d9   : > { %v11684_v53 = vpack.c.bf16 %v14345_v56, %v14345_v56  ;;  %v14349_v40 = vunpack.c.l.b16 %v11683_v33  ;;  %v2262_v55 = vrot.slane %v2199_v27, %v13839_v48  ;;  %v14354_v59 = vunpack.c.l.b16 %v11682_v7 }
 0x3da   : > { %v14352_v12 = vunpack.c.l.b16 %v11676_v25  ;;  %v14357_v63 = vrot.slane %v2255_v42, %v13839_v48  ;;  %v2237_v61 = vcombine.high %v2235_v22, %v2235_v22  ;;  %v2340_v21 = vmax.f32 %v2228_v57, %v10815_v8 }
 0x3db   : > { %v2447_v1 = vrot.slane %v14349_v40, 5  ;;  %v2270_v31 = vcombine.high %v2262_v55, %v2262_v55  ;;  %v10823_v17 = vrot.slane %v2262_v55, 9  ;;  %v10816_v13 = vrot.slane %v2236_v28, 9 }
 0x3dc   : > { %v10825_v3 = vrot.slane %v14357_v63, 9  ;;  %v10818_v51 = vrot.slane %v2237_v61, 9  ;;  %v2336_v9 = vmax.f32 %v2211_v32, %v10811_v16  ;;  %v2533_v2 = vrot.slane %v14349_v40, 7 }
 0x3dd   : > { %v2348_v19 = vmax.f32 %v2262_v55, %v10823_v17  ;;  %v2339_v0 = vmax.f32 %v2220_v30, %v10814_v36  ;;  %v2342_v49 = vmax.f32 %v2235_v22, %v10817_v15  ;;  %v10824_v18 = vrot.slane %v2270_v31, 9 }
 0x3de   : > { %v14363_v37 = vmax.f32 %v14357_v63, %v10825_v3  ;;  %v2341_v47 = vmax.f32 %v2236_v28, %v10816_v13  ;;  %v11674_v5 = vpack.c.bf16 %v2336_v9, %v2336_v9  ;;  %v2343_v6 = vmax.f32 %v2237_v61, %v10818_v51 }
 0x3df   : > { %v11685_v4 = vpack.c.bf16 %v2348_v19, %v2348_v19  ;;  %v11677_v43 = vpack.c.bf16 %v2339_v0, %v2339_v0  ;;  %v11678_v27 = vpack.c.bf16 %v2340_v21, %v2340_v21  ;;  %v11680_v14 = vpack.c.bf16 %v2342_v49, %v2342_v49 }
 0x3e0   : > { %v11679_v20 = vpack.c.bf16 %v2341_v47, %v2341_v47  ;;  %v2411_v41 = vunpack.c.l.b16 %v11674_v5  ;;  %v2412_v62 = vunpack.c.l.b16 %v11675_v11  ;;  %v2429_v35 = vrot.slane %v14352_v12, 5 }
 0x3e1   : > { %v14365_v32 = vunpack.c.l.b16 %v11685_v4  ;;  %v2414_v60 = vunpack.c.l.b16 %v11677_v43  ;;  %v2415_v50 = vunpack.c.l.b16 %v11678_v27  ;;  %v2417_v42 = vunpack.c.l.b16 %v11680_v14 }
 0x3e2   : > { %v2416_v29 = vunpack.c.l.b16 %v11679_v20  ;;  %v2425_v46 = vrot.slane %v2411_v41, 7  ;;  %v2426_v24 = vrot.slane %v2412_v62, 6  ;;  %v2349_v23 = vmax.f32 %v2270_v31, %v10824_v18 }
 0x3e3   : > { %v2451_v30 = vrot.slane %v14365_v32, 3  ;;  %v2537_v39 = vrot.slane %v14365_v32, 5  ;;  %v2432_v54 = vrot.slane %v2414_v60, 4  ;;  %v2435_v16 = vrot.slane %v2415_v50, 3 }
 0x3e4   : > { %v2428_v57 = vsel %vm1547_vm3, %v2426_v24, %v2425_v46  ;;  %v2438_v58 = vrot.slane %v2416_v29, 2  ;;  %v11688_v45 = vpack.c.bf16 %v2343_v6, %v2343_v6  ;;  %v2481_v44 = vrot.slane %v2412_v62, 7 }
 0x3e5   : > { %v2431_v38 = vsel %vm1550_vm4, %v2429_v35, %v2428_v57  ;;  %v2484_v26 = vrot.slane %v14352_v12, 6  ;;  %v2486_v22 = vrot.slane %v2414_v60, 5  ;;  %v2441_v7 = vrot.slane %v2417_v42, 1  ;;  %v12111_v35 = vld [vmem:[#allocation10 + $0x68] sm:$0xff] (%p1763_p9)  }
 0x3e6   : > { %v2434_v36 = vsel %vm1553_vm6, %v2432_v54, %v2431_v38  ;;  %v2479_v33 = vunpack.c.l.b16 %v11688_v45  ;;  %v2488_v11 = vrot.slane %v2415_v50, 4  ;;  %v2483_v28 = vsel %vm1565_vm5, %v2481_v44, %v2411_v41 }
 0x3e7   : > { %v2437_v25 = vsel %vm1556_vm7, %v2435_v16, %v2434_v36  ;;  %v2490_v8 = vrot.slane %v2416_v29, 3  ;;  %v2521_v15 = vrot.slane %v14352_v12, 7  ;;  %v2485_v61 = vsel %vm1547_vm3, %v2484_v26, %v2483_v28 }
 0x3e8   : > { %v2440_v55 = vsel %vm1559_vm8, %v2438_v58, %v2437_v25  ;;  %v2492_v21 = vrot.slane %v2417_v42, 2  ;;  %v2523_v31 = vrot.slane %v2414_v60, 6  ;;  %v2487_v3 = vsel %vm1550_vm4, %v2486_v22, %v2485_v61 }
 0x3e9   : > { %v14381_v17 = vsel %vm1562_vm9, %v2441_v7, %v2440_v55  ;;  %v2522_v13 = vsel %vm1565_vm5, %v2521_v15, %v2412_v62  ;;  %v2525_v51 = vrot.slane %v2415_v50, 5  ;;  %v2489_v9 = vsel %vm1553_vm6, %v2488_v11, %v2487_v3 }
 0x3ea   : > { %v2494_v19 = vrot.slane %v2479_v33, 1  ;;  %v2524_v12 = vsel %vm1547_vm3, %v2523_v31, %v2522_v13  ;;  %v2527_v0 = vrot.slane %v2416_v29, 4  ;;  %v2491_v49 = vsel %vm1556_vm7, %v2490_v8, %v2489_v9 }
 0x3eb   : > { %v2526_v18 = vsel %vm1550_vm4, %v2525_v51, %v2524_v12  ;;  %v2529_v47 = vrot.slane %v2417_v42, 3  ;;  %v2531_v5 = vrot.slane %v2479_v33, 2  ;;  %v2493_v4 = vsel %vm1559_vm8, %v2492_v21, %v2491_v49 }
 0x3ec   : > { %v2528_v6 = vsel %vm1553_vm6, %v2527_v0, %v2526_v18  ;;  %v2271_v43 = vcombine.high %v14357_v63, %v14357_v63  ;;  %v11686_v27 = vpack.c.bf16 %v2349_v23, %v2349_v23  ;;  %v2495_v20 = vsel %vm1562_vm9, %v2494_v19, %v2493_v4  ;;  %v10850_v63 = vld [vmem:[%s14407_s9 + $0xc] sm:$0xf]  ;;  %v10852_v4 = vld [vmem:[%s14407_s9 + $0x5c] sm:$0xf] }
 0x3ed   : > { %v2530_v14 = vsel %vm1556_vm7, %v2529_v47, %v2528_v6  ;;  %v11687_v41 = vpack.c.bf16 %v14363_v37, %v14363_v37  ;;  %v2418_v62 = vunpack.c.l.b16 %v11681_v10  ;;  %v2510_v60 = vpack.c.b16 %v2495_v20, %v2495_v20 }
 0x3ee   : > { %v2532_v50 = vsel %vm1559_vm8, %v2531_v5, %v2530_v14  ;;  %v10826_v29 = vrot.slane %v2271_v43, 9  ;;  %v2421_v52 = vunpack.c.l.b16 %v11684_v53  ;;  %v2423_v37 = vunpack.c.l.b16 %v11686_v27 }
 0x3ef   : > { %v2545_v10 = vpack.c.b16 %v2532_v50, %v2532_v50  ;;  %v2424_v42 = vunpack.c.l.b16 %v11687_v41  ;;  %v2444_v46 = vrot.slane %v2418_v62, 7  ;;  %2512 = vrot.lane.b32.xlu0 %v2510_v60, %s13333_s2  ;;  %v2445_v23 = vrot.slane %v14354_v59, 6  ;;  %v12109_v60 = vld [vmem:[#allocation10 + $0x60] sm:$0xff] (%p1763_p9)  }
 0x3f0   : > { %v2351_v24 = vmax.f32 %v2271_v43, %v10826_v29  ;;  %v2496_v54 = vrot.slane %v14354_v59, 7  ;;  %v2498_v57 = vrot.slane %v14349_v40, 6  ;;  %v2457_v16 = vpack.c.b16 %v14381_v17, %v14381_v17  ;;  %v10844_v43 = vld [vmem:[%s14407_s9 + $0x58] sm:$0xf]  ;;  %v12113_v29 = vld [vmem:[#allocation10 + $0x70] sm:$0xff] (%p1763_p9)  }
 0x3f1   : > { %v2552_v56 = vsel %vm14403_vm12, %v2545_v10, %v10850_v63  ;;  %v2453_v53 = vrot.slane %v2423_v37, 2  ;;  %v2500_v58 = vrot.slane %v2421_v52, 5  ;;  %v2446_v45 = vsel %vm1547_vm3, %v2445_v23, %v2444_v46  ;;  %v12110_v50 = vld [vmem:[#allocation10] sm:$0xff] (%p1763_p9)   ;;  %v12112_v63 = vld [vmem:[#allocation10 + $0x8] sm:$0xff] (%p1763_p9)   ;;  %v12115_v10 = vld [vmem:[#allocation10 + $0x78] sm:$0xff] (%p1763_p9)  }
 0x3f2   : > { %10851 = vst [vmem:[%s14407_s9 + $0xc] sm:$0xf] %v2552_v56  ;;  %v2455_v38 = vrot.slane %v2424_v42, 1  ;;  %v11689_v44 = vpack.c.bf16 %v2351_v24, %v2351_v24  ;;  %v2497_v26 = vsel %vm1565_vm5, %v2496_v54, %v2418_v62  ;;  %v2448_v22 = vsel %vm1550_vm4, %v2447_v1, %v2446_v45  ;;  %v10842_v1 = vld [vmem:[%s14407_s9 + $0x8] sm:$0xf]  ;;  %v12118_v46 = vld [vmem:[#allocation10 + $0x20] sm:$0xff] (%p1763_p9)  }
 0x3f3   : > { %v2499_v36 = vsel %vm1547_vm3, %v2498_v57, %v2497_v26  ;;  %v2502_v7 = vrot.slane %v14365_v32, 4  ;;  %v2504_v33 = vrot.slane %v2423_v37, 3  ;;  %v2534_v28 = vsel %vm1565_vm5, %v2533_v2, %v14354_v59  ;;  %v12119_v24 = vld [vmem:[#allocation10 + $0x88] sm:$0xff] (%p1763_p9)   ;;  %v12121_v54 = vld [vmem:[#allocation10 + $0x90] sm:$0xff] (%p1763_p9)   ;;  %v12125_v26 = vld [vmem:[#allocation10 + $0xa0] sm:$0xff] (%p1763_p9)  }
 0x3f4   : > { %v2480_v11 = vunpack.c.l.b16 %v11689_v44  ;;  %v2501_v25 = vsel %vm1550_vm4, %v2500_v58, %v2499_v36  ;;  %v2535_v8 = vrot.slane %v2421_v52, 6  ;;  %v2506_v61 = vrot.slane %v2424_v42, 2  ;;  %v12120_v23 = vld [vmem:[#allocation10 + $0x28] sm:$0xff] (%p1763_p9)   ;;  %v12122_v57 = vld [vmem:[#allocation10 + $0x30] sm:$0xff] (%p1763_p9)   ;;  %v12124_v44 = vld [vmem:[#allocation10 + $0x38] sm:$0xff] (%p1763_p9)  }
 0x3f5   : > { %v2503_v55 = vsel %vm1553_vm6, %v2502_v7, %v2501_v25  ;;  %v2539_v21 = vrot.slane %v2423_v37, 4  ;;  %v2449_v31 = vrot.slane %v2421_v52, 4  ;;  %v2541_v59 = vrot.slane %v2424_v42, 3  ;;  %v12114_v52 = vld [vmem:[#allocation10 + $0x10] sm:$0xff] (%p1763_p9)   ;;  %v12116_v37 = vld [vmem:[#allocation10 + $0x18] sm:$0xff] (%p1763_p9)   ;;  %v12117_v42 = vld [vmem:[#allocation10 + $0x80] sm:$0xff] (%p1763_p9)  }
 0x3f6   : > { %v2505_v17 = vsel %vm1556_vm7, %v2504_v33, %v2503_v55  ;;  %v2508_v3 = vrot.slane %v2480_v11, 1  ;;  %v2536_v40 = vsel %vm1547_vm3, %v2535_v8, %v2534_v28  ;;  %v2468_v9 = vsel %vm14436_vm13, %v2457_v16, %v10842_v1  ;;  %v12127_v36 = vld [vmem:[#allocation10 + $0xa8] sm:$0xff] (%p1763_p9)   ;;  %v12129_v33 = vld [vmem:[#allocation10 + $0xb0] sm:$0xff] (%p1763_p9)   ;;  %v12131_v25 = vld [vmem:[#allocation10 + $0xb8] sm:$0xff] (%p1763_p9)  }
 0x3f7   : > { %v2507_v2 = vsel %vm1559_vm8, %v2506_v61, %v2505_v17  ;;  %v2538_v13 = vsel %vm1550_vm4, %v2537_v39, %v2536_v40  ;;  %v2450_v51 = vsel %vm1553_vm6, %v2449_v31, %v2448_v22  ;;  %v2543_v0 = vrot.slane %v2480_v11, 2  ;;  %10843 = vst [vmem:[%s14407_s9 + $0x8] sm:$0xf] %v2468_v9  ;;  %v12126_v22 = vld [vmem:[#allocation10 + $0x40] sm:$0xff] (%p1763_p9)   ;;  %v12128_v7 = vld [vmem:[#allocation10 + $0x48] sm:$0xff] (%p1763_p9)   ;;  %v12130_v11 = vld [vmem:[#allocation10 + $0x50] sm:$0xff] (%p1763_p9)  }
 0x3f8   : > { %v2509_v19 = vsel %vm1562_vm9, %v2508_v3, %v2507_v2  ;;  %v2540_v12 = vsel %vm1553_vm6, %v2539_v21, %v2538_v13  ;;  %v2452_v49 = vsel %vm1556_vm7, %v2451_v30, %v2450_v51  ;;  %v15152_v62 = vmov (%p1763_p9), 0   ;;  %v12132_v28 = vld [vmem:[#allocation10 + $0x58] sm:$0xff] (%p1763_p9)   ;;  %v12137_v8 = vld [vmem:[#allocation10 + $0xc0] sm:$0xff] (%p1763_p9)   ;;  %v12139_v40 = vld [vmem:[#allocation10 + $0xc8] sm:$0xff] (%p1763_p9)  }
 0x3f9   : > { %v2511_v18 = vpack.c.b16 %v2509_v19, %v2509_v19  ;;  %v2542_v39 = vsel %vm1556_vm7, %v2541_v59, %v2540_v12  ;;  %v2454_v47 = vsel %vm1559_vm8, %v2453_v53, %v2452_v49  ;;  %2712 = vmatprep.subr.bf16.mxu0 (%p1763_p9), %v15152_v62  ;;  %2857 = vmatprep.subr.bf16.mxu1 (%p1763_p9), %v15152_v62  ;;  %v12138_v31 = vld [vmem:[#allocation10 + $0x60] sm:$0xff] (%p1763_p9)   ;;  %v12140_v59 = vld [vmem:[#allocation10 + $0x68] sm:$0xff] (%p1763_p9)   ;;  %v12141_v51 = vld [vmem:[#allocation10 + $0xd0] sm:$0xff] (%p1763_p9)  }
 0x3fa   : > { %v2544_v5 = vsel %vm1559_vm8, %v2543_v0, %v2542_v39  ;;  %v2456_v6 = vsel %vm1562_vm9, %v2455_v38, %v2454_v47  ;;  %2713 = vmatpush1.bf16.msra.mxu0 (%p1763_p9), %v12109_v60  ;;  %2858 = vmatpush1.bf16.msra.mxu1 (%p1763_p9), %v12110_v50  ;;  %v12123_v38 = vld [vmem:[#allocation10 + $0x98] sm:$0xff] (%p1763_p9)   ;;  %v12142_v12 = vld [vmem:[#allocation10 + $0x70] sm:$0xff] (%p1763_p9)   ;;  %v12145_v47 = vld [vmem:[#allocation10 + $0xe0] sm:$0xff] (%p1763_p9)  }
 0x3fb   : > { %v2546_v27 = vpack.c.b16 %v2544_v5, %v2544_v5  ;;  %2514 = vrot.lane.b32.xlu0 %v2511_v18, %s13333_s2  ;;  %v2458_v32 = vpack.c.b16 %v2456_v6, %v2456_v6  ;;  %2714 = vmatprep.subr.bf16.mxu0 (%p1763_p9), %v15152_v62  ;;  %v12143_v18 = vld [vmem:[#allocation10 + $0xd8] sm:$0xff] (%p1763_p9)   ;;  %v12146_v5 = vld [vmem:[#allocation10 + $0x80] sm:$0xff] (%p1763_p9)   ;;  %v12148_v6 = vld [vmem:[#allocation10 + $0x88] sm:$0xff] (%p1763_p9)  }
 0x3fc   :  { %2859 = vmatprep.subr.bf16.mxu1 (%p1763_p9), %v15152_v62  ;;  %v12144_v39 = vld [vmem:[#allocation10 + $0x78] sm:$0xff] (%p1763_p9)   ;;  %v12157_v60 = vld [vmem:[#allocation10 + $0xa8] sm:$0xff] (%p1763_p9)   ;;  %v12161_v50 = vld [vmem:[#allocation10 + $0x110] sm:$0xff] (%p1763_p9)  }
 0x3fd   : > { %v2555_v30 = vsel %vm14403_vm12, %v2546_v27, %v10852_v4  ;;  %v2471_v20 = vsel %vm14436_vm13, %v2458_v32, %v10844_v43  ;;  %v12147_v4 = vld [vmem:[#allocation10 + $0xe8] sm:$0xff] (%p1763_p9)   ;;  %v12149_v43 = vld [vmem:[#allocation10 + $0xf0] sm:$0xff] (%p1763_p9)   ;;  %v12151_v32 = vld [vmem:[#allocation10 + $0xf8] sm:$0xff] (%p1763_p9)  }
 0x3fe   : > { %10853 = vst [vmem:[%s14407_s9 + $0x5c] sm:$0xf] %v2555_v30  ;;  %10845 = vst [vmem:[%s14407_s9 + $0x58] sm:$0xf] %v2471_v20  ;;  %2715 = vmatpush1.bf16.msra.mxu0 (%p1763_p9), %v12111_v35  ;;  %2860 = vmatpush1.bf16.msra.mxu1 (%p1763_p9), %v12112_v63  ;;  %v12150_v27 = vld [vmem:[#allocation10 + $0x90] sm:$0xff] (%p1763_p9)   ;;  %v12152_v30 = vld [vmem:[#allocation10 + $0x98] sm:$0xff] (%p1763_p9)  }
 0x3ff   :  { %2716 = vmatprep.subr.bf16.mxu0 (%p1763_p9), %v15152_v62  ;;  %2861 = vmatprep.subr.bf16.mxu1 (%p1763_p9), %v15152_v62  ;;  %v12153_v20 = vld [vmem:[#allocation10 + $0x100] sm:$0xff] (%p1763_p9)   ;;  %v12162_v35 = vld [vmem:[#allocation10 + $0xb0] sm:$0xff] (%p1763_p9)   ;;  %v12163_v63 = vld [vmem:[#allocation10 + $0x118] sm:$0xff] (%p1763_p9)  }
 0x402   :  { %2717 = vmatpush1.bf16.msra.mxu0 (%p1763_p9), %v12113_v29  ;;  %2862 = vmatpush1.bf16.msra.mxu1 (%p1763_p9), %v12114_v52  ;;  %v12164_v29 = vld [vmem:[#allocation10 + $0xb8] sm:$0xff] (%p1763_p9)   ;;  %v12169_v52 = vld [vmem:[#allocation10] sm:$0xff] (%p1763_p9)  }
 0x403   :  { %2718 = vmatprep.subr.bf16.mxu0 (%p1763_p9), %v15152_v62  ;;  %2863 = vmatprep.subr.bf16.mxu1 (%p1763_p9), %v15152_v62 }
 0x406   :  { %2719 = vmatpush1.bf16.msra.mxu0 (%p1763_p9), %v12115_v10  ;;  %2864 = vmatpush1.bf16.msra.mxu1 (%p1763_p9), %v12116_v37 }
 0x407   :  { %2720 = vmatprep.subr.bf16.mxu0 (%p1763_p9), %v15152_v62  ;;  %2865 = vmatprep.subr.bf16.mxu1 (%p1763_p9), %v15152_v62 }
 0x40a   :  { %2721 = vmatpush1.bf16.msra.mxu0 (%p1763_p9), %v12117_v42  ;;  %2866 = vmatpush1.bf16.msra.mxu1 (%p1763_p9), %v12118_v46 }
 0x40b   :  { %2722 = vmatprep.subr.bf16.mxu0 (%p1763_p9), %v15152_v62  ;;  %2867 = vmatprep.subr.bf16.mxu1 (%p1763_p9), %v15152_v62 }
 0x40e   :  { %2723 = vmatpush1.bf16.msra.mxu0 (%p1763_p9), %v12119_v24  ;;  %2868 = vmatpush1.bf16.msra.mxu1 (%p1763_p9), %v12120_v23  ;;  %v12170_v24 = vld [vmem:[#allocation10 + $0xc0] sm:$0xff] (%p1763_p9)  }
 0x40f   :  { %2724 = vmatprep.subr.bf16.mxu0 (%p1763_p9), %v15152_v62  ;;  %2869 = vmatprep.subr.bf16.mxu1 (%p1763_p9), %v15152_v62 }
 0x412   :  { %2725 = vmatpush1.bf16.msra.mxu0 (%p1763_p9), %v12121_v54  ;;  %2870 = vmatpush1.bf16.msra.mxu1 (%p1763_p9), %v12122_v57  ;;  %v12171_v57 = vld [vmem:[#allocation10 + $0x8] sm:$0xff] (%p1763_p9)  }
 0x413   :  { %2726 = vmatprep.subr.bf16.mxu0 (%p1763_p9), %v15152_v62  ;;  %2871 = vmatprep.subr.bf16.mxu1 (%p1763_p9), %v15152_v62 }
 0x416   :  { %2727 = vmatpush1.bf16.msra.mxu0 (%p1763_p9), %v12123_v38  ;;  %2872 = vmatpush1.bf16.msra.mxu1 (%p1763_p9), %v12124_v44  ;;  %v12176_v38 = vld [vmem:[#allocation10 + $0xd0] sm:$0xff] (%p1763_p9)  }
 0x417   :  { %2728 = vmatprep.subr.bf16.mxu0 (%p1763_p9), %v15152_v62  ;;  %2873 = vmatprep.subr.bf16.mxu1 (%p1763_p9), %v15152_v62 }
 0x41a   :  { %2729 = vmatpush1.bf16.msra.mxu0 (%p1763_p9), %v12125_v26  ;;  %2874 = vmatpush1.bf16.msra.mxu1 (%p1763_p9), %v12126_v22  ;;  %v12177_v26 = vld [vmem:[#allocation10 + $0x18] sm:$0xff] (%p1763_p9)  }
 0x41b   :  { %2730 = vmatprep.subr.bf16.mxu0 (%p1763_p9), %v15152_v62  ;;  %2875 = vmatprep.subr.bf16.mxu1 (%p1763_p9), %v15152_v62  ;;  %v12178_v22 = vld [vmem:[#allocation10 + $0xd8] sm:$0xff] (%p1763_p9)  }
 0x41e   :  { %2731 = vmatpush1.bf16.msra.mxu0 (%p1763_p9), %v12127_v36  ;;  %2876 = vmatpush1.bf16.msra.mxu1 (%p1763_p9), %v12128_v7  ;;  %v12179_v36 = vld [vmem:[#allocation10 + $0x20] sm:$0xff] (%p1763_p9)  }
 0x41f   :  { %2732 = vmatprep.subr.bf16.mxu0 (%p1763_p9), %v15152_v62  ;;  %2877 = vmatprep.subr.bf16.mxu1 (%p1763_p9), %v15152_v62  ;;  %v12180_v7 = vld [vmem:[#allocation10 + $0xe0] sm:$0xff] (%p1763_p9)  }
 0x422   :  { %2733 = vmatpush1.bf16.msra.mxu0 (%p1763_p9), %v12129_v33  ;;  %2878 = vmatpush1.bf16.msra.mxu1 (%p1763_p9), %v12130_v11  ;;  %v12181_v33 = vld [vmem:[#allocation10 + $0x28] sm:$0xff] (%p1763_p9)  }
 0x423   :  { %2734 = vmatprep.subr.bf16.mxu0 (%p1763_p9), %v15152_v62  ;;  %2879 = vmatprep.subr.bf16.mxu1 (%p1763_p9), %v15152_v62  ;;  %v12182_v11 = vld [vmem:[#allocation10 + $0xe8] sm:$0xff] (%p1763_p9)  }
 0x426   :  { %2735 = vmatpush1.bf16.msra.mxu0 (%p1763_p9), %v12131_v25  ;;  %2880 = vmatpush1.bf16.msra.mxu1 (%p1763_p9), %v12132_v28  ;;  %v12183_v25 = vld [vmem:[#allocation10 + $0x30] sm:$0xff] (%p1763_p9)  }
 0x427   :  { %3032 = vmatprep.subr.bf16.mxu0 (%p1763_p9), %v15152_v62  ;;  %3656 = vmatprep.subr.bf16.mxu1 (%p1763_p9), %v15152_v62  ;;  %v12184_v28 = vld [vmem:[#allocation10 + $0xf0] sm:$0xff] (%p1763_p9)  }
 0x461   : > { %v2513_v14 = vpop.permute.xlu0 %2512 }
 0x462   : > { %10848 = vst.msk [vmem:[%s14407_s9 + $0x8] sm:$0xf] %vm2518_vm14, %v2513_v14  ;;  %v12154_v14 = vld [vmem:[#allocation10 + $0xa0] sm:$0xff] (%p1763_p9)  }
 0x468   :  { %1765 = sbr.rel (!%p1763_p9) target bundleno = 705 (0x2c1), region = 145 }
 0x46d   : > { %v2515_v41 = vpop.permute.xlu0 %2514 }
 0x46e   : > { %10849 = vst.msk [vmem:[%s14407_s9 + $0x58] sm:$0xf] %vm2518_vm14, %v2515_v41  ;;  %v12156_v41 = vld [vmem:[#allocation10 + $0x108] sm:$0xff] (%p1763_p9)  }
 0x475   :  { %v2586_v16 = vld [vmem:[#allocation3 + $0x8] sm:$0xff]  ;;  %v14489_v56 = vld [vmem:[#allocation3 + $0x10] sm:$0xff]  ;;  %v2557_v53 = vld [vmem:[#allocation3] sm:$0xff] }
 0x476   :  { %v10855_v58 = vcombine.high %v2586_v16, %v14489_v56  ;;  %v10873_v45 = vcombine.high %v2557_v53, %v2586_v16  ;;  %v10854_v15 = vcombine.low %v2586_v16, %v14489_v56  ;;  %v2588_v1 = vld [vmem:[#allocation3 + $0x58] sm:$0xff]  ;;  %v14505_v55 = vld [vmem:[#allocation3 + $0x60] sm:$0xff]  ;;  %v10872_v61 = vcombine.low %v2557_v53, %v2586_v16  ;;  %v2559_v21 = vld [vmem:[#allocation3 + $0x50] sm:$0xff] }
 0x477   :  { %v10857_v17 = vcombine.high %v2588_v1, %v14505_v55  ;;  %v10875_v3 = vcombine.high %v2559_v21, %v2588_v1  ;;  %v10856_v2 = vcombine.low %v2588_v1, %v14505_v55  ;;  %v14515_v13 = vld [vmem:[#allocation3 + $0x18] sm:$0xff]  ;;  %v10874_v9 = vcombine.low %v2559_v21, %v2588_v1  ;;  %v14517_v19 = vld [vmem:[#allocation3 + $0x20] sm:$0xff]  ;;  %v2910_v37 = vld [vmem:[#allocation3 + $0x68] sm:$0xff] }
 0x478   :  { %10870 = vmatprep.mubr.msk.bf16.mxu0 %vm2705_vm0, %v10855_v58  ;;  %10888 = vmatprep.mubr.msk.bf16.mxu1 %vm2705_vm0, %v10873_v45  ;;  %v14523_v0 = vcombine.high %v14489_v56, %v14515_v13  ;;  %v10922_v49 = vcombine.high %v14515_v13, %v14517_v19  ;;  %v14550_v10 = vcombine.low %v14489_v56, %v14515_v13  ;;  %v14554_v46 = vld [vmem:[#allocation3 + $0x70] sm:$0xff]  ;;  %v12172_v16 = vld [vmem:[#allocation10 + $0xc8] sm:$0xff]   ;;  %v12175_v53 = vld [vmem:[#allocation10 + $0x10] sm:$0xff]  }
 0x479   :  { %2745 = vmatmul.mubr.bf16.vlgmr.msra.gmra.mrb[0].mxu0 %v10854_v15  ;;  %2890 = vmatmul.mubr.bf16.vlgmr.msra.gmra.mrb[0].mxu1 %v10872_v61  ;;  %v10921_v42 = vcombine.low %v14515_v13, %v14517_v19  ;;  %v14559_v23 = vcombine.high %v14505_v55, %v2910_v37  ;;  %v10924_v54 = vcombine.high %v2910_v37, %v14554_v46  ;;  %v14572_v45 = vld [vmem:[#allocation3 + $0x28] sm:$0xff]  ;;  %v12187_v1 = vld [vmem:[#allocation10 + $0x40] sm:$0xff]   ;;  %v12189_v61 = vld [vmem:[#allocation10 + $0x48] sm:$0xff]  }
 0x47a   :  { %3033 = vmatpush1.bf16.msra.mxu0 %v12137_v8  ;;  %3657 = vmatpush1.bf16.msra.mxu1 %v12138_v31  ;;  %v14568_v56 = vcombine.low %v14505_v55, %v2910_v37  ;;  %v10923_v58 = vcombine.low %v2910_v37, %v14554_v46  ;;  %v14579_v44 = vcombine.high %v14517_v19, %v14572_v45  ;;  %v12185_v8 = vld [vmem:[#allocation10 + $0x38] sm:$0xff]   ;;  %v12188_v55 = vld [vmem:[#allocation10 + $0x100] sm:$0xff]   ;;  %v12190_v21 = vld [vmem:[#allocation10 + $0x108] sm:$0xff]  }
 0x47b   :  { %3034 = vmatprep.subr.bf16.mxu0 %v15152_v62  ;;  %3658 = vmatprep.subr.bf16.mxu1 %v15152_v62  ;;  %v12186_v15 = vld [vmem:[#allocation10 + $0xf8] sm:$0xff]   ;;  %v12193_v31 = vld [vmem:[#allocation10 + $0x50] sm:$0xff]   ;;  %v14607_v13 = vld [vmem:[#allocation3 + $0x78] sm:$0xff] }
 0x47c   :  { %10871 = vmatprep.mubr.msk.bf16.mxu0 %vm2705_vm0, %v10857_v17  ;;  %10889 = vmatprep.mubr.msk.bf16.mxu1 %vm2705_vm0, %v10875_v3  ;;  %v12194_v17 = vld [vmem:[#allocation10 + $0x110] sm:$0xff]   ;;  %v12195_v3 = vld [vmem:[#allocation10 + $0x58] sm:$0xff]  }
 0x47d   :  { %v12224_v37 = vld [vmem:[#allocation10 + $0x58] sm:$0xff]  }
 0x47e   :  { %3035 = vmatpush1.bf16.msra.mxu0 %v12139_v40  ;;  %3659 = vmatpush1.bf16.msra.mxu1 %v12140_v59  ;;  %v12196_v40 = vld [vmem:[#allocation10 + $0x118] sm:$0xff]   ;;  %v12199_v59 = vld [vmem:[#allocation10 + $0x60] sm:$0xff]  }
 0x47f   :  { %3036 = vmatprep.subr.bf16.mxu0 %v15152_v62  ;;  %3660 = vmatprep.subr.bf16.mxu1 %v15152_v62 }
 0x481   :  { %2753 = vmatmul.mubr.bf16.gmra.mrb[4].mxu0 %v10856_v2  ;;  %2898 = vmatmul.mubr.bf16.gmra.mrb[4].mxu1 %v10874_v9  ;;  %v14605_v2 = vcombine.low %v14517_v19, %v14572_v45  ;;  %v12201_v9 = vld [vmem:[#allocation10 + $0x68] sm:$0xff]  }
 0x482   :  { %3037 = vmatpush1.bf16.msra.mxu0 %v12141_v51  ;;  %3661 = vmatpush1.bf16.msra.mxu1 %v12142_v12  ;;  %v12200_v51 = vld [vmem:[#allocation10] sm:$0xff]   ;;  %v14614_v12 = vcombine.high %v14554_v46, %v14607_v13  ;;  %v12203_v19 = vld [vmem:[#allocation10 + $0x8] sm:$0xff]  }
 0x483   :  { %3038 = vmatprep.subr.bf16.mxu0 %v15152_v62  ;;  %3662 = vmatprep.subr.bf16.mxu1 %v15152_v62 }
 0x484   :  { %10906 = vmatprep.mubr.msk.bf16.mxu0 %vm2705_vm0, %v14523_v0  ;;  %10937 = vmatprep.mubr.msk.bf16.mxu1 %vm2705_vm0, %v10922_v49  ;;  %v14627_v49 = vcombine.low %v14554_v46, %v14607_v13  ;;  %v12227_v46 = vld [vmem:[#allocation10 + $0xc0] sm:$0xff]  }
 0x486   :  { %3039 = vmatpush1.bf16.msra.mxu0 %v12143_v18  ;;  %3663 = vmatpush1.bf16.msra.mxu1 %v12144_v39  ;;  %v12205_v18 = vld [vmem:[#allocation10 + $0x70] sm:$0xff]  }
 0x487   :  { %3040 = vmatprep.subr.bf16.mxu0 %v15152_v62  ;;  %3664 = vmatprep.subr.bf16.mxu1 %v15152_v62  ;;  %v12206_v39 = vld [vmem:[#allocation10 + $0x10] sm:$0xff]  }
 0x48a   :  { %3041 = vmatpush1.bf16.msra.mxu0 %v12145_v47  ;;  %3665 = vmatpush1.bf16.msra.mxu1 %v12146_v5  ;;  %v12207_v5 = vld [vmem:[#allocation10 + $0x78] sm:$0xff]  }
 0x48b   :  { %3042 = vmatprep.subr.bf16.mxu0 %v15152_v62  ;;  %3666 = vmatprep.subr.bf16.mxu1 %v15152_v62 }
 0x48e   :  { %3043 = vmatpush1.bf16.msra.mxu0 %v12147_v4  ;;  %3667 = vmatpush1.bf16.msra.mxu1 %v12148_v6  ;;  %v12208_v4 = vld [vmem:[#allocation10 + $0x18] sm:$0xff]   ;;  %v12209_v6 = vld [vmem:[#allocation10 + $0x80] sm:$0xff]  }
 0x48f   :  { %3044 = vmatprep.subr.bf16.mxu0 %v15152_v62  ;;  %3668 = vmatprep.subr.bf16.mxu1 %v15152_v62 }
 0x492   :  { %3045 = vmatpush1.bf16.msra.mxu0 %v12149_v43  ;;  %3669 = vmatpush1.bf16.msra.mxu1 %v12150_v27  ;;  %v12210_v43 = vld [vmem:[#allocation10 + $0x20] sm:$0xff]   ;;  %v12211_v27 = vld [vmem:[#allocation10 + $0x88] sm:$0xff]  }
 0x493   :  { %3046 = vmatprep.subr.bf16.mxu0 %v15152_v62  ;;  %3670 = vmatprep.subr.bf16.mxu1 %v15152_v62 }
 0x496   :  { %3047 = vmatpush1.bf16.msra.mxu0 %v12151_v32  ;;  %3671 = vmatpush1.bf16.msra.mxu1 %v12152_v30  ;;  %v12212_v32 = vld [vmem:[#allocation10 + $0x28] sm:$0xff]   ;;  %v12213_v30 = vld [vmem:[#allocation10 + $0x90] sm:$0xff]  }
 0x497   :  { %3048 = vmatprep.subr.bf16.mxu0 %v15152_v62  ;;  %3672 = vmatprep.subr.bf16.mxu1 %v15152_v62 }
 0x49a   :  { %3049 = vmatpush1.bf16.msra.mxu0 %v12153_v20  ;;  %3673 = vmatpush1.bf16.msra.mxu1 %v12154_v14  ;;  %v12214_v20 = vld [vmem:[#allocation10 + $0x30] sm:$0xff]   ;;  %v12215_v14 = vld [vmem:[#allocation10 + $0x98] sm:$0xff]  }
 0x49b   :  { %3050 = vmatprep.subr.bf16.mxu0 %v15152_v62  ;;  %3674 = vmatprep.subr.bf16.mxu1 %v15152_v62 }
 0x49e   :  { %3051 = vmatpush1.bf16.msra.mxu0 %v12156_v41  ;;  %3675 = vmatpush1.bf16.msra.mxu1 %v12157_v60  ;;  %v12216_v41 = vld [vmem:[#allocation10 + $0x38] sm:$0xff]   ;;  %v12217_v60 = vld [vmem:[#allocation10 + $0xa0] sm:$0xff]  }
 0x49f   :  { %3052 = vmatprep.subr.bf16.mxu0 %v15152_v62  ;;  %3676 = vmatprep.subr.bf16.mxu1 %v15152_v62 }
 0x4a2   :  { %3053 = vmatpush1.bf16.msra.mxu0 %v12161_v50  ;;  %3677 = vmatpush1.bf16.msra.mxu1 %v12162_v35  ;;  %v12218_v50 = vld [vmem:[#allocation10 + $0x40] sm:$0xff]   ;;  %v12219_v35 = vld [vmem:[#allocation10 + $0xa8] sm:$0xff]  }
 0x4a3   :  { %3054 = vmatprep.subr.bf16.mxu0 %v15152_v62  ;;  %3678 = vmatprep.subr.bf16.mxu1 %v15152_v62 }
 0x4a6   :  { %3055 = vmatpush1.bf16.msra.mxu0 %v12163_v63  ;;  %3679 = vmatpush1.bf16.msra.mxu1 %v12164_v29  ;;  %v12220_v63 = vld [vmem:[#allocation10 + $0x48] sm:$0xff]   ;;  %v12221_v29 = vld [vmem:[#allocation10 + $0xb0] sm:$0xff]  }
 0x4a7   :  { %3801 = vmatprep.subr.bf16.mxu0 %v15152_v62  ;;  %3975 = vmatprep.subr.bf16.mxu1 %v15152_v62 }
 0x4a9   :  { %3065 = vmatmul.mubr.bf16.vlgmr.msra.gmra.mrb[8].mxu0 %v14550_v10  ;;  %3689 = vmatmul.mubr.bf16.vlgmr.msra.gmra.mrb[8].mxu1 %v10921_v42  ;;  %v14655_v42 = vld [vmem:[#allocation3 + $0x80] sm:$0xff] }
 0x4aa   :  { %3802 = vmatpush1.bf16.msra.mxu0 %v12169_v52  ;;  %3976 = vmatpush1.bf16.msra.mxu1 %v12170_v24  ;;  %v12222_v52 = vld [vmem:[#allocation10 + $0x50] sm:$0xff]  }
 0x4ab   :  { %3803 = vmatprep.subr.bf16.mxu0 %v15152_v62  ;;  %3977 = vmatprep.subr.bf16.mxu1 %v15152_v62 }
 0x4ac   :  { %10907 = vmatprep.mubr.msk.bf16.mxu0 %vm2705_vm0, %v14559_v23  ;;  %10938 = vmatprep.mubr.msk.bf16.mxu1 %vm2705_vm0, %v10924_v54  ;;  %v12229_v54 = vld [vmem:[#allocation10 + $0xc8] sm:$0xff]  }
 0x4ae   :  { %3804 = vmatpush1.bf16.msra.mxu0 %v12171_v57  ;;  %3978 = vmatpush1.bf16.msra.mxu1 %v12172_v16  ;;  %v10991_v57 = vcombine.high %v14607_v13, %v14655_v42  ;;  %v12230_v16 = vld [vmem:[#allocation10 + $0x68] sm:$0xff]  }
 0x4af   :  { %3805 = vmatprep.subr.bf16.mxu0 %v15152_v62  ;;  %3979 = vmatprep.subr.bf16.mxu1 %v15152_v62 }
 0x4b1   :  { %3073 = vmatmul.mubr.bf16.gmra.mrb[12].mxu0 %v14568_v56  ;;  %3697 = vmatmul.mubr.bf16.gmra.mrb[12].mxu1 %v10923_v58  ;;  %v14670_v58 = vld [vmem:[#allocation3 + $0x40] sm:$0xff] }
 0x4b2   :  { %3806 = vmatpush1.bf16.msra.mxu0 %v12175_v53  ;;  %3980 = vmatpush1.bf16.msra.mxu1 %v12176_v38  ;;  %v12231_v53 = vld [vmem:[#allocation10 + $0xd0] sm:$0xff]   ;;  %v10990_v38 = vcombine.low %v14607_v13, %v14655_v42 }
 0x4b3   :  { %3807 = vmatprep.subr.bf16.mxu0 %v15152_v62  ;;  %3981 = vmatprep.subr.bf16.mxu1 %v15152_v62  ;;  %v4796_v13 = vld [vmem:[#allocation3 + $0x88] sm:$0xff] }
 0x4b4   :  { %10955 = vmatprep.mubr.msk.bf16.mxu0 %vm2705_vm0, %v14523_v0  ;;  %10973 = vmatprep.mubr.msk.bf16.mxu1 %vm2705_vm0, %v14579_v44  ;;  %v14618_v0 = vld [vmem:[#allocation3 + $0x30] sm:$0xff] }
 0x4b5   :  { %v10989_v47 = vcombine.high %v14572_v45, %v14618_v0  ;;  %v10988_v24 = vcombine.low %v14572_v45, %v14618_v0  ;;  %v12232_v45 = vld [vmem:[#allocation10 + $0x70] sm:$0xff]  }
 0x4b6   :  { %3808 = vmatpush1.bf16.msra.mxu0 %v12177_v26  ;;  %3982 = vmatpush1.bf16.msra.mxu1 %v12178_v22  ;;  %v12234_v22 = vld [vmem:[#allocation10 + $0x78] sm:$0xff]  }
 0x4b7   :  { %3809 = vmatprep.subr.bf16.mxu0 %v15152_v62  ;;  %3983 = vmatprep.subr.bf16.mxu1 %v15152_v62 }
 0x4ba   :  { %3810 = vmatpush1.bf16.msra.mxu0 %v12179_v36  ;;  %3984 = vmatpush1.bf16.msra.mxu1 %v12180_v7  ;;  %v12235_v7 = vld [vmem:[#allocation10 + $0xe0] sm:$0xff]  }
 0x4bb   :  { %3811 = vmatprep.subr.bf16.mxu0 %v15152_v62  ;;  %3985 = vmatprep.subr.bf16.mxu1 %v15152_v62 }
 0x4be   :  { %3812 = vmatpush1.bf16.msra.mxu0 %v12181_v33  ;;  %3986 = vmatpush1.bf16.msra.mxu1 %v12182_v11  ;;  %v12236_v33 = vld [vmem:[#allocation10 + $0x80] sm:$0xff]   ;;  %v12237_v11 = vld [vmem:[#allocation10 + $0xe8] sm:$0xff]  }
 0x4bf   :  { %3813 = vmatprep.subr.bf16.mxu0 %v15152_v62  ;;  %3987 = vmatprep.subr.bf16.mxu1 %v15152_v62 }
 0x4c2   :  { %3814 = vmatpush1.bf16.msra.mxu0 %v12183_v25  ;;  %3988 = vmatpush1.bf16.msra.mxu1 %v12184_v28  ;;  %v12238_v25 = vld [vmem:[#allocation10 + $0x88] sm:$0xff]   ;;  %v12239_v28 = vld [vmem:[#allocation10 + $0xf0] sm:$0xff]  }
 0x4c3   :  { %3815 = vmatprep.subr.bf16.mxu0 %v15152_v62  ;;  %3989 = vmatprep.subr.bf16.mxu1 %v15152_v62 }
 0x4c6   :  { %3816 = vmatpush1.bf16.msra.mxu0 %v12185_v8  ;;  %3990 = vmatpush1.bf16.msra.mxu1 %v12186_v15  ;;  %v12240_v8 = vld [vmem:[#allocation10 + $0x90] sm:$0xff]   ;;  %v12241_v15 = vld [vmem:[#allocation10 + $0xf8] sm:$0xff]  }
 0x4c7   :  { %3817 = vmatprep.subr.bf16.mxu0 %v15152_v62  ;;  %3991 = vmatprep.subr.bf16.mxu1 %v15152_v62 }
 0x4ca   :  { %3818 = vmatpush1.bf16.msra.mxu0 %v12187_v1  ;;  %3992 = vmatpush1.bf16.msra.mxu1 %v12188_v55  ;;  %v12242_v1 = vld [vmem:[#allocation10 + $0x98] sm:$0xff]   ;;  %v12243_v55 = vld [vmem:[#allocation10 + $0x100] sm:$0xff]  }
 0x4cb   :  { %3819 = vmatprep.subr.bf16.mxu0 %v15152_v62  ;;  %3993 = vmatprep.subr.bf16.mxu1 %v15152_v62 }
 0x4ce   :  { %3820 = vmatpush1.bf16.msra.mxu0 %v12189_v61  ;;  %3994 = vmatpush1.bf16.msra.mxu1 %v12190_v21  ;;  %v12244_v61 = vld [vmem:[#allocation10 + $0xa0] sm:$0xff]   ;;  %v12245_v21 = vld [vmem:[#allocation10 + $0x108] sm:$0xff]  }
 0x4cf   :  { %3821 = vmatprep.subr.bf16.mxu0 %v15152_v62  ;;  %3995 = vmatprep.subr.bf16.mxu1 %v15152_v62 }
 0x4d2   :  { %3822 = vmatpush1.bf16.msra.mxu0 %v12193_v31  ;;  %3996 = vmatpush1.bf16.msra.mxu1 %v12194_v17  ;;  %v12246_v31 = vld [vmem:[#allocation10 + $0xa8] sm:$0xff]   ;;  %v12249_v17 = vld [vmem:[#allocation10 + $0x110] sm:$0xff]  }
 0x4d3   :  { %3823 = vmatprep.subr.bf16.mxu0 %v15152_v62  ;;  %3997 = vmatprep.subr.bf16.mxu1 %v15152_v62 }
 0x4d6   :  { %3824 = vmatpush1.bf16.msra.mxu0 %v12195_v3  ;;  %3998 = vmatpush1.bf16.msra.mxu1 %v12196_v40  ;;  %v12250_v3 = vld [vmem:[#allocation10 + $0xb0] sm:$0xff]   ;;  %v12251_v40 = vld [vmem:[#allocation10 + $0x118] sm:$0xff]  }
 0x4d7   :  { %4598 = vmatprep.subr.bf16.mxu0 %v15152_v62  ;;  %4743 = vmatprep.subr.bf16.mxu1 %v15152_v62 }
 0x4d9   :  { %3834 = vmatmul.mubr.bf16.vlgmr.msra.gmra.mrb[16].mxu0 %v14550_v10  ;;  %4008 = vmatmul.mubr.bf16.vlgmr.msra.gmra.mrb[16].mxu1 %v14605_v2  ;;  %v12223_v10 = vld [vmem:[#allocation10 + $0xb8] sm:$0xff]  }
 0x4da   :  { %4599 = vmatpush1.bf16.msra.mxu0 %v12199_v59  ;;  %4744 = vmatpush1.bf16.msra.mxu1 %v12200_v51  ;;  %v12252_v59 = vld [vmem:[#allocation10 + $0xb8] sm:$0xff]  }
 0x4db   :  { %4600 = vmatprep.subr.bf16.mxu0 %v15152_v62  ;;  %4745 = vmatprep.subr.bf16.mxu1 %v15152_v62  ;;  %v14706_v51 = vld [vmem:[#allocation3 + $0x90] sm:$0xff] }
 0x4dc   :  { %10956 = vmatprep.mubr.msk.bf16.mxu0 %vm2705_vm0, %v14559_v23  ;;  %10974 = vmatprep.mubr.msk.bf16.mxu1 %vm2705_vm0, %v14614_v12  ;;  %v12228_v23 = vld [vmem:[#allocation10 + $0x60] sm:$0xff]  }
 0x4de   :  { %4601 = vmatpush1.bf16.msra.mxu0 %v12201_v9  ;;  %4746 = vmatpush1.bf16.msra.mxu1 %v12203_v19  ;;  %v12258_v19 = vld [vmem:[#allocation10 + $0xc0] sm:$0xff]  }
 0x4df   :  { %4602 = vmatprep.subr.bf16.mxu0 %v15152_v62  ;;  %4747 = vmatprep.subr.bf16.mxu1 %v15152_v62 }
 0x4e1   :  { %3842 = vmatmul.mubr.bf16.gmra.mrb[20].mxu0 %v14568_v56  ;;  %4016 = vmatmul.mubr.bf16.gmra.mrb[20].mxu1 %v14627_v49  ;;  %v14666_v56 = vld [vmem:[#allocation3 + $0x38] sm:$0xff] }
 0x4e2   :  { %4603 = vmatpush1.bf16.msra.mxu0 %v12205_v18  ;;  %4748 = vmatpush1.bf16.msra.mxu1 %v12206_v39  ;;  %v14680_v26 = vcombine.high %v14618_v0, %v14666_v56  ;;  %v11056_v36 = vcombine.high %v14666_v56, %v14670_v58  ;;  %v14710_v9 = vcombine.low %v14618_v0, %v14666_v56  ;;  %v12260_v0 = vld [vmem:[#allocation10 + $0xc8] sm:$0xff]  }
 0x4e3   :  { %4604 = vmatprep.subr.bf16.mxu0 %v15152_v62  ;;  %4749 = vmatprep.subr.bf16.mxu1 %v15152_v62  ;;  %v14717_v18 = vcombine.high %v14655_v42, %v4796_v13  ;;  %v11058_v39 = vcombine.high %v4796_v13, %v14706_v51 }
 0x4e4   :  { %11004 = vmatprep.mubr.msk.bf16.mxu0 %vm2705_vm0, %v10989_v47  ;;  %11022 = vmatprep.mubr.msk.bf16.mxu1 %vm2705_vm0, %v14579_v44  ;;  %v12233_v44 = vld [vmem:[#allocation10 + $0xd8] sm:$0xff]   ;;  %v12261_v47 = vld [vmem:[#allocation10 + $0x10] sm:$0xff]  }
 0x4e6   :  { %4605 = vmatpush1.bf16.msra.mxu0 %v12207_v5  ;;  %4750 = vmatpush1.bf16.msra.mxu1 %v12208_v4  ;;  %v14725_v5 = vld [vmem:[#allocation3 + $0x48] sm:$0xff]  ;;  %v14728_v4 = vcombine.low %v14655_v42, %v4796_v13 }
 0x4e7   :  { %4606 = vmatprep.subr.bf16.mxu0 %v15152_v62  ;;  %4751 = vmatprep.subr.bf16.mxu1 %v15152_v62 }
 0x4ea   :  { %4607 = vmatpush1.bf16.msra.mxu0 %v12209_v6  ;;  %4752 = vmatpush1.bf16.msra.mxu1 %v12210_v43  ;;  %v11057_v6 = vcombine.low %v4796_v13, %v14706_v51  ;;  %v12262_v43 = vld [vmem:[#allocation10 + $0xd0] sm:$0xff]  }
 0x4eb   :  { %4608 = vmatprep.subr.bf16.mxu0 %v15152_v62  ;;  %4753 = vmatprep.subr.bf16.mxu1 %v15152_v62 }
 0x4ee   :  { %4609 = vmatpush1.bf16.msra.mxu0 %v12211_v27  ;;  %4754 = vmatpush1.bf16.msra.mxu1 %v12212_v32  ;;  %v12263_v27 = vld [vmem:[#allocation10 + $0x18] sm:$0xff]   ;;  %v11092_v32 = vcombine.high %v14670_v58, %v14725_v5 }
 0x4ef   :  { %4610 = vmatprep.subr.bf16.mxu0 %v15152_v62  ;;  %4755 = vmatprep.subr.bf16.mxu1 %v15152_v62 }
 0x4f2   :  { %4611 = vmatpush1.bf16.msra.mxu0 %v12213_v30  ;;  %4756 = vmatpush1.bf16.msra.mxu1 %v12214_v20  ;;  %v12265_v30 = vld [vmem:[#allocation10 + $0xd8] sm:$0xff]   ;;  %v12267_v20 = vld [vmem:[#allocation10 + $0x20] sm:$0xff]  }
 0x4f3   :  { %4612 = vmatprep.subr.bf16.mxu0 %v15152_v62  ;;  %4757 = vmatprep.subr.bf16.mxu1 %v15152_v62 }
 0x4f6   :  { %4613 = vmatpush1.bf16.msra.mxu0 %v12215_v14  ;;  %4758 = vmatpush1.bf16.msra.mxu1 %v12216_v41  ;;  %v12268_v14 = vld [vmem:[#allocation10 + $0xe0] sm:$0xff]   ;;  %v12269_v41 = vld [vmem:[#allocation10 + $0x28] sm:$0xff]  }
 0x4f7   :  { %4614 = vmatprep.subr.bf16.mxu0 %v15152_v62  ;;  %4759 = vmatprep.subr.bf16.mxu1 %v15152_v62 }
 0x4fa   :  { %4615 = vmatpush1.bf16.msra.mxu0 %v12217_v60  ;;  %4760 = vmatpush1.bf16.msra.mxu1 %v12218_v50  ;;  %v12270_v60 = vld [vmem:[#allocation10 + $0xe8] sm:$0xff]  }
 0x4fb   :  { %4616 = vmatprep.subr.bf16.mxu0 %v15152_v62  ;;  %4761 = vmatprep.subr.bf16.mxu1 %v15152_v62 }
 0x4fe   :  { %4617 = vmatpush1.bf16.msra.mxu0 %v12219_v35  ;;  %4762 = vmatpush1.bf16.msra.mxu1 %v12220_v63  ;;  %v12271_v35 = vld [vmem:[#allocation10 + $0x30] sm:$0xff]  }
 0x4ff   :  { %4618 = vmatprep.subr.bf16.mxu0 %v15152_v62  ;;  %4763 = vmatprep.subr.bf16.mxu1 %v15152_v62 }
 0x502   :  { %4619 = vmatpush1.bf16.msra.mxu0 %v12221_v29  ;;  %4764 = vmatpush1.bf16.msra.mxu1 %v12222_v52 }
 0x503   :  { %4620 = vmatprep.subr.bf16.mxu0 %v15152_v62  ;;  %4765 = vmatprep.subr.bf16.mxu1 %v15152_v62 }
 0x506   :  { %4621 = vmatpush1.bf16.msra.mxu0 %v12223_v10  ;;  %4766 = vmatpush1.bf16.msra.mxu1 %v12224_v37 }
 0x507   :  { %4917 = vmatprep.subr.bf16.mxu0 %v15152_v62  ;;  %5540 = vmatprep.subr.bf16.mxu1 %v15152_v62 }
 0x509   :  { %4631 = vmatmul.mubr.bf16.vlgmr.msra.gmra.mrb[24].mxu0 %v10988_v24  ;;  %4776 = vmatmul.mubr.bf16.vlgmr.msra.gmra.mrb[24].mxu1 %v14605_v2  ;;  %v12255_v2 = vld [vmem:[#allocation10] sm:$0xff]   ;;  %v12272_v24 = vld [vmem:[#allocation10 + $0xf0] sm:$0xff]  }
 0x50a   :  { %4918 = vmatpush1.bf16.msra.mxu0 %v12227_v46  ;;  %5541 = vmatpush1.bf16.msra.mxu1 %v12228_v23 }
 0x50b   :  { %4919 = vmatprep.subr.bf16.mxu0 %v15152_v62  ;;  %5542 = vmatprep.subr.bf16.mxu1 %v15152_v62 }
 0x50c   :  { %11005 = vmatprep.mubr.msk.bf16.mxu0 %vm2705_vm0, %v10991_v57  ;;  %11023 = vmatprep.mubr.msk.bf16.mxu1 %vm2705_vm0, %v14614_v12  ;;  %v11055_v12 = vcombine.low %v14666_v56, %v14670_v58  ;;  %v12273_v57 = vld [vmem:[#allocation10 + $0x38] sm:$0xff]   ;;  %v12275_v56 = vld [vmem:[#allocation10 + $0x40] sm:$0xff]  }
 0x50e   :  { %4920 = vmatpush1.bf16.msra.mxu0 %v12229_v54  ;;  %5543 = vmatpush1.bf16.msra.mxu1 %v12230_v16  ;;  %v12274_v16 = vld [vmem:[#allocation10 + $0xf8] sm:$0xff]  }
 0x50f   :  { %4921 = vmatprep.subr.bf16.mxu0 %v15152_v62  ;;  %5544 = vmatprep.subr.bf16.mxu1 %v15152_v62 }
 0x511   :  { %4639 = vmatmul.mubr.bf16.gmra.mrb[28].mxu0 %v10990_v38  ;;  %4784 = vmatmul.mubr.bf16.gmra.mrb[28].mxu1 %v14627_v49  ;;  %v12259_v49 = vld [vmem:[#allocation10 + $0x8] sm:$0xff]  }
 0x512   :  { %4922 = vmatpush1.bf16.msra.mxu0 %v12231_v53  ;;  %5545 = vmatpush1.bf16.msra.mxu1 %v12232_v45 }
 0x513   :  { %4923 = vmatprep.subr.bf16.mxu0 %v15152_v62  ;;  %5546 = vmatprep.subr.bf16.mxu1 %v15152_v62 }
 0x514   :  { %11040 = vmatprep.mubr.msk.bf16.mxu0 %vm2705_vm0, %v14680_v26  ;;  %11071 = vmatprep.mubr.msk.bf16.mxu1 %vm2705_vm0, %v11056_v36  ;;  %v12276_v36 = vld [vmem:[#allocation10 + $0x100] sm:$0xff]  }
 0x516   :  { %4924 = vmatpush1.bf16.msra.mxu0 %v12233_v44  ;;  %5547 = vmatpush1.bf16.msra.mxu1 %v12234_v22 }
 0x517   :  { %4925 = vmatprep.subr.bf16.mxu0 %v15152_v62  ;;  %5548 = vmatprep.subr.bf16.mxu1 %v15152_v62 }
 0x51a   :  { %4926 = vmatpush1.bf16.msra.mxu0 %v12235_v7  ;;  %5549 = vmatpush1.bf16.msra.mxu1 %v12236_v33 }
 0x51b   :  { %4927 = vmatprep.subr.bf16.mxu0 %v15152_v62  ;;  %5550 = vmatprep.subr.bf16.mxu1 %v15152_v62 }
 0x51e   :  { %4928 = vmatpush1.bf16.msra.mxu0 %v12237_v11  ;;  %5551 = vmatpush1.bf16.msra.mxu1 %v12238_v25  ;;  %v12277_v11 = vld [vmem:[#allocation10 + $0x48] sm:$0xff]  }
 0x51f   :  { %4929 = vmatprep.subr.bf16.mxu0 %v15152_v62  ;;  %5552 = vmatprep.subr.bf16.mxu1 %v15152_v62 }
 0x522   :  { %4930 = vmatpush1.bf16.msra.mxu0 %v12239_v28  ;;  %5553 = vmatpush1.bf16.msra.mxu1 %v12240_v8  ;;  %v12278_v8 = vld [vmem:[#allocation10 + $0x108] sm:$0xff]  }
 0x523   :  { %4931 = vmatprep.subr.bf16.mxu0 %v15152_v62  ;;  %5554 = vmatprep.subr.bf16.mxu1 %v15152_v62 }
 0x526   :  { %4932 = vmatpush1.bf16.msra.mxu0 %v12241_v15  ;;  %5555 = vmatpush1.bf16.msra.mxu1 %v12242_v1  ;;  %v12280_v15 = vld [vmem:[#allocation10 + $0x50] sm:$0xff]  }
 0x527   :  { %4933 = vmatprep.subr.bf16.mxu0 %v15152_v62  ;;  %5556 = vmatprep.subr.bf16.mxu1 %v15152_v62  ;;  %v12282_v1 = vld [vmem:[#allocation10 + $0x110] sm:$0xff]  }
 0x52a   :  { %4934 = vmatpush1.bf16.msra.mxu0 %v12243_v55  ;;  %5557 = vmatpush1.bf16.msra.mxu1 %v12244_v61  ;;  %v12283_v55 = vld [vmem:[#allocation10 + $0x58] sm:$0xff]  }
 0x52b   :  { %4935 = vmatprep.subr.bf16.mxu0 %v15152_v62  ;;  %5558 = vmatprep.subr.bf16.mxu1 %v15152_v62  ;;  %v12284_v61 = vld [vmem:[#allocation10 + $0x118] sm:$0xff]  }
 0x52e   :  { %4936 = vmatpush1.bf16.msra.mxu0 %v12245_v21  ;;  %5559 = vmatpush1.bf16.msra.mxu1 %v12246_v31  ;;  %v5738_v21 = vld [vmem:[#allocation3 + $0x98] sm:$0xff] }
 0x52f   :  { %4937 = vmatprep.subr.bf16.mxu0 %v15152_v62  ;;  %5560 = vmatprep.subr.bf16.mxu1 %v15152_v62  ;;  %v12291_v31 = vld [vmem:[#allocation13 + $0x4] ss:$16 sps:$4 sm:$0xff]   ;;  %v11094_v13 = vcombine.high %v14706_v51, %v5738_v21 }
 0x532   :  { %4938 = vmatpush1.bf16.msra.mxu0 %v12249_v17  ;;  %5561 = vmatpush1.bf16.msra.mxu1 %v12250_v3  ;;  %v12294_v17 = vld [vmem:[#allocation13 + $0xc] ss:$16 sps:$4 sm:$0xff]   ;;  %v12289_v3 = vld [vmem:[#allocation13] ss:$16 sps:$4 sm:$0xff]  }
 0x533   :  { %4939 = vmatprep.subr.bf16.mxu0 %v15152_v62  ;;  %5562 = vmatprep.subr.bf16.mxu1 %v15152_v62 }
 0x536   :  { %4940 = vmatpush1.bf16.msra.mxu0 %v12251_v40  ;;  %5563 = vmatpush1.bf16.msra.mxu1 %v12252_v59  ;;  %v11091_v40 = vcombine.low %v14670_v58, %v14725_v5  ;;  %v12292_v59 = vld [vmem:[#allocation13 + $0x8] ss:$16 sps:$4 sm:$0xff]   ;;  %v12303_v58 = vld [vmem:[#allocation13 + $0x44] ss:$16 sps:$4 sm:$0xff]   ;;  %v12307_v5 = vld [vmem:[#allocation13 + $0x60] ss:$16 sps:$4 sm:$0xff]  }
 0x537   :  { %5685 = vmatprep.subr.bf16.mxu0 %v15152_v62  ;;  %5859 = vmatprep.subr.bf16.mxu1 %v15152_v62 }
 0x539   :  { %4950 = vmatmul.mubr.bf16.vlgmr.msra.gmra.mrb[32].mxu0 %v14710_v9  ;;  %5573 = vmatmul.mubr.bf16.vlgmr.msra.gmra.mrb[32].mxu1 %v11055_v12  ;;  %v12300_v12 = vld [vmem:[#allocation13 + $0x2c] ss:$16 sps:$4 sm:$0xff]  }
 0x53a   :  { %5686 = vmatpush1.bf16.msra.mxu0 %v12255_v2  ;;  %5860 = vmatpush1.bf16.msra.mxu1 %v12258_v19  ;;  %v12297_v2 = vld [vmem:[#allocation13 + $0x24] ss:$16 sps:$4 sm:$0xff]   ;;  %v12298_v19 = vld [vmem:[#allocation13 + $0x28] ss:$16 sps:$4 sm:$0xff]  }
 0x53b   :  { %5687 = vmatprep.subr.bf16.mxu0 %v15152_v62  ;;  %5861 = vmatprep.subr.bf16.mxu1 %v15152_v62 }
 0x53c   :  { %11041 = vmatprep.mubr.msk.bf16.mxu0 %vm2705_vm0, %v14717_v18  ;;  %11072 = vmatprep.mubr.msk.bf16.mxu1 %vm2705_vm0, %v11058_v39  ;;  %v12301_v39 = vld [vmem:[#allocation13 + $0x40] ss:$16 sps:$4 sm:$0xff]  }
 0x53e   :  { %5688 = vmatpush1.bf16.msra.mxu0 %v12259_v49  ;;  %5862 = vmatpush1.bf16.msra.mxu1 %v12260_v0  ;;  %v12306_v49 = vld [vmem:[#allocation13 + $0x4c] ss:$16 sps:$4 sm:$0xff]   ;;  %v11093_v0 = vcombine.low %v14706_v51, %v5738_v21  ;;  %v12313_v51 = vld [vmem:[#allocation13 + $0x80] ss:$16 sps:$4 sm:$0xff]  }
 0x53f   :  { %5689 = vmatprep.subr.bf16.mxu0 %v15152_v62  ;;  %5863 = vmatprep.subr.bf16.mxu1 %v15152_v62 }
 0x541   :  { %4958 = vmatmul.mubr.bf16.gmra.mrb[36].mxu0 %v14728_v4  ;;  %5581 = vmatmul.mubr.bf16.gmra.mrb[36].mxu1 %v11057_v6  ;;  %v12310_v6 = vld [vmem:[#allocation13 + $0x68] ss:$16 sps:$4 sm:$0xff]  }
 0x542   :  { %5690 = vmatpush1.bf16.msra.mxu0 %v12261_v47  ;;  %5864 = vmatpush1.bf16.msra.mxu1 %v12262_v43  ;;  %v12309_v47 = vld [vmem:[#allocation13 + $0x64] ss:$16 sps:$4 sm:$0xff]  }
 0x543   :  { %5691 = vmatprep.subr.bf16.mxu0 %v15152_v62  ;;  %5865 = vmatprep.subr.bf16.mxu1 %v15152_v62  ;;  %v12315_v43 = vld [vmem:[#allocation13 + $0x84] ss:$16 sps:$4 sm:$0xff]  }
 0x544   :  { %11089 = vmatprep.mubr.msk.bf16.mxu0 %vm2705_vm0, %v14680_v26  ;;  %11107 = vmatprep.mubr.msk.bf16.mxu1 %vm2705_vm0, %v11092_v32  ;;  %v12316_v32 = vld [vmem:[#allocation13 + $0x88] ss:$16 sps:$4 sm:$0xff]  }
 0x546   :  { %5692 = vmatpush1.bf16.msra.mxu0 %v12263_v27  ;;  %5866 = vmatpush1.bf16.msra.mxu1 %v12265_v30  ;;  %v12318_v27 = vld [vmem:[#allocation13 + $0x8c] ss:$16 sps:$4 sm:$0xff]   ;;  %v12321_v30 = vld [vmem:[#allocation13 + $0xa4] ss:$16 sps:$4 sm:$0xff]  }
 0x547   :  { %5693 = vmatprep.subr.bf16.mxu0 %v15152_v62  ;;  %5867 = vmatprep.subr.bf16.mxu1 %v15152_v62 }
 0x54a   :  { %5694 = vmatpush1.bf16.msra.mxu0 %v12267_v20  ;;  %5868 = vmatpush1.bf16.msra.mxu1 %v12268_v14  ;;  %v12324_v20 = vld [vmem:[#allocation13 + $0xac] ss:$16 sps:$4 sm:$0xff]   ;;  %v12319_v14 = vld [vmem:[#allocation13 + $0xa0] ss:$16 sps:$4 sm:$0xff]  }
 0x54b   :  { %5695 = vmatprep.subr.bf16.mxu0 %v15152_v62  ;;  %5869 = vmatprep.subr.bf16.mxu1 %v15152_v62 }
 0x54c   :  { %v2746_v50 = vpop.f32.mrb[0].mxu0  ;;  %v2891_v63 = vpop.f32.mrb[0].mxu1 }
 0x54d   :  { %v2748_v29 = vpop.f32.mrb[1].mxu0  ;;  %v14746_v52 = vadd.f32 %v2891_v63, %v2746_v50  ;;  %v2893_v10 = vpop.f32.mrb[1].mxu1  ;;  %v12327_v50 = vld [vmem:[#allocation13 + $0xc4] ss:$16 sps:$4 sm:$0xff]  }
 0x54e   :  { %v2749_v37 = vpop.f32.mrb[2].mxu0  ;;  %5696 = vmatpush1.bf16.msra.mxu0 %v12269_v41  ;;  %v2894_v42 = vpop.f32.mrb[2].mxu1  ;;  %5870 = vmatpush1.bf16.msra.mxu1 %v12270_v60  ;;  %v12322_v41 = vld [vmem:[#allocation13 + $0xa8] ss:$16 sps:$4 sm:$0xff]  }
 0x54f   :  { %v2751_v46 = vpop.f32.mrb[3].mxu0  ;;  %5697 = vmatprep.subr.bf16.mxu0 %v15152_v62  ;;  %v14749_v23 = vadd.f32 %v2894_v42, %v2749_v37  ;;  %v2896_v54 = vpop.f32.mrb[3].mxu1  ;;  %5871 = vmatprep.subr.bf16.mxu1 %v15152_v62 }
 0x552   :  { %5698 = vmatpush1.bf16.msra.mxu0 %v12271_v35  ;;  %5872 = vmatpush1.bf16.msra.mxu1 %v12272_v24  ;;  %v12330_v35 = vld [vmem:[#allocation13 + $0xcc] ss:$16 sps:$4 sm:$0xff]  }
 0x553   :  { %5699 = vmatprep.subr.bf16.mxu0 %v15152_v62  ;;  %5873 = vmatprep.subr.bf16.mxu1 %v15152_v62 }
 0x554   :  { %v2754_v53 = vpop.f32.mrb[4].mxu0  ;;  %v2899_v38 = vpop.f32.mrb[4].mxu1 }
 0x555   :  { %v2756_v45 = vpop.f32.mrb[5].mxu0  ;;  %v14754_v44 = vadd.f32 %v2899_v38, %v2754_v53  ;;  %v2901_v22 = vpop.f32.mrb[5].mxu1 }
 0x556   :  { %5700 = vmatpush1.bf16.msra.mxu0 %v12273_v57  ;;  %v2757_v26 = vpop.f32.mrb[6].mxu0  ;;  %5874 = vmatpush1.bf16.msra.mxu1 %v12274_v16  ;;  %v2902_v33 = vpop.f32.mrb[6].mxu1  ;;  %v12325_v16 = vld [vmem:[#allocation13 + $0xc0] ss:$16 sps:$4 sm:$0xff]   ;;  %v12336_v45 = vld [vmem:[#allocation13 + $0xec] ss:$16 sps:$4 sm:$0xff]  }
 0x557   :  { %5701 = vmatprep.subr.bf16.mxu0 %v15152_v62  ;;  %v2759_v7 = vpop.f32.mrb[7].mxu0  ;;  %5875 = vmatprep.subr.bf16.mxu1 %v15152_v62  ;;  %v14758_v25 = vadd.f32 %v2902_v33, %v2757_v26  ;;  %v2904_v28 = vpop.f32.mrb[7].mxu1  ;;  %v12331_v26 = vld [vmem:[#allocation13 + $0xe0] ss:$16 sps:$4 sm:$0xff]  }
 0x558   :  { %v12334_v7 = vld [vmem:[#allocation13 + $0xe8] ss:$16 sps:$4 sm:$0xff]   ;;  %v12339_v28 = vld [vmem:[#allocation13 + $0x104] ss:$16 sps:$4 sm:$0xff]  }
 0x55a   :  { %5702 = vmatpush1.bf16.msra.mxu0 %v12275_v56  ;;  %5876 = vmatpush1.bf16.msra.mxu1 %v12276_v36  ;;  %v12328_v56 = vld [vmem:[#allocation13 + $0xc8] ss:$16 sps:$4 sm:$0xff]  }
 0x55b   :  { %5703 = vmatprep.subr.bf16.mxu0 %v15152_v62  ;;  %5877 = vmatprep.subr.bf16.mxu1 %v15152_v62 }
 0x55e   :  { %5704 = vmatpush1.bf16.msra.mxu0 %v12277_v11  ;;  %5878 = vmatpush1.bf16.msra.mxu1 %v12278_v8  ;;  %v12342_v8 = vld [vmem:[#allocation13 + $0x10c] ss:$16 sps:$4 sm:$0xff]  }
 0x55f   :  { %5705 = vmatprep.subr.bf16.mxu0 %v15152_v62  ;;  %5879 = vmatprep.subr.bf16.mxu1 %v15152_v62 }
 0x562   :  { %5706 = vmatpush1.bf16.msra.mxu0 %v12280_v15  ;;  %5880 = vmatpush1.bf16.msra.mxu1 %v12282_v1 }
 0x563   :  { %5707 = vmatprep.subr.bf16.mxu0 %v15152_v62  ;;  %5881 = vmatprep.subr.bf16.mxu1 %v15152_v62  ;;  %v12295_v62 = vld [vmem:[#allocation13 + $0x20] ss:$16 sps:$4 sm:$0xff]  }
 0x566   :  { %5708 = vmatpush1.bf16.msra.mxu0 %v12283_v55  ;;  %5882 = vmatpush1.bf16.msra.mxu1 %v12284_v61 }
 0x567   :  { %9541 = vmatprep.subr.bf16.mxu0 %v12291_v31  ;;  %9869 = vmatprep.subr.bf16.mxu1 %v12294_v17 }
 0x569   :  { %5718 = vmatmul.mubr.bf16.vlgmr.msra.gmra.mrb[40].mxu0 %v14710_v9  ;;  %5892 = vmatmul.mubr.bf16.vlgmr.msra.gmra.mrb[40].mxu1 %v11091_v40  ;;  %v12304_v9 = vld [vmem:[#allocation13 + $0x48] ss:$16 sps:$4 sm:$0xff]  }
 0x56a   :  { %11090 = vmatprep.mubr.msk.bf16.mxu0 %vm2705_vm0, %v14717_v18  ;;  %11108 = vmatprep.mubr.msk.bf16.mxu1 %vm2705_vm0, %v11094_v13  ;;  %v12312_v18 = vld [vmem:[#allocation13 + $0x6c] ss:$16 sps:$4 sm:$0xff]   ;;  %v12337_v13 = vld [vmem:[#allocation13 + $0x100] ss:$16 sps:$4 sm:$0xff]  }
 0x56b   :  { %9542 = vmatpush1.bf16.msra.mxu0 %v12289_v3  ;;  %9870 = vmatpush1.bf16.msra.mxu1 %v12292_v59 }
 0x56c   :  { %9543 = vmatprep.subr.bf16.mxu0 %v12297_v2  ;;  %9871 = vmatprep.subr.bf16.mxu1 %v12300_v12  ;;  %v12340_v12 = vld [vmem:[#allocation13 + $0x108] ss:$16 sps:$4 sm:$0xff]  }
 0x56f   :  { %9544 = vmatpush1.bf16.msra.mxu0 %v12295_v62  ;;  %9872 = vmatpush1.bf16.msra.mxu1 %v12298_v19 }
 0x570   :  { %9545 = vmatprep.subr.bf16.mxu0 %v12303_v58  ;;  %9873 = vmatprep.subr.bf16.mxu1 %v12306_v49  ;;  %v12345_v58 = vld [vmem:[#allocation13 + $0x124] ss:$16 sps:$4 sm:$0xff]   ;;  %v12348_v49 = vld [vmem:[#allocation13 + $0x12c] ss:$16 sps:$4 sm:$0xff]  }
 0x571   :  { %5726 = vmatmul.mubr.bf16.gmra.mrb[44].mxu0 %v14728_v4  ;;  %5900 = vmatmul.mubr.bf16.gmra.mrb[44].mxu1 %v11093_v0  ;;  %v14775_v4 = vld [vmem:[#allocation11] ss:$0 sm:$0xff] }
 0x573   :  { %9546 = vmatpush1.bf16.msra.mxu0 %v12301_v39  ;;  %9874 = vmatpush1.bf16.msra.mxu1 %v12304_v9 }
 0x574   :  { %9547 = vmatprep.subr.bf16.mxu0 %v12309_v47  ;;  %9875 = vmatprep.subr.bf16.mxu1 %v12312_v18 }
 0x577   :  { %9548 = vmatpush1.bf16.msra.mxu0 %v12307_v5  ;;  %9876 = vmatpush1.bf16.msra.mxu1 %v12310_v6 }
 0x578   :  { %9549 = vmatprep.subr.bf16.mxu0 %v12315_v43  ;;  %9877 = vmatprep.subr.bf16.mxu1 %v12318_v27  ;;  %v12346_v27 = vld [vmem:[#allocation13 + $0x128] ss:$16 sps:$4 sm:$0xff]  }
 0x57b   :  { %9550 = vmatpush1.bf16.msra.mxu0 %v12313_v51  ;;  %9878 = vmatpush1.bf16.msra.mxu1 %v12316_v32  ;;  %v12351_v51 = vld [vmem:[#allocation13 + $0x144] ss:$16 sps:$4 sm:$0xff]  }
 0x57c   :  { %v3066_v60 = vpop.f32.mrb[8].mxu0  ;;  %9551 = vmatprep.subr.bf16.mxu0 %v12321_v30  ;;  %v14778_v29 = vpop.f32.mrb[8].mxu1  ;;  %9879 = vmatprep.subr.bf16.mxu1 %v12324_v20  ;;  %v13335_v30 = vmov 1935823168  }
 0x57d   :  { %v3081_v63 = vadd.f32 %v3066_v60, %v14746_v52  ;;  %v3068_v10 = vpop.f32.mrb[9].mxu0  ;;  %v3692_v37 = vpop.f32.mrb[9].mxu1  ;;  %v12333_v52 = vld [vmem:[#allocation13 + $0xe4] ss:$16 sps:$4 sm:$0xff]   ;;  %v3217_v20 = vunpack.c.l.s4 %v13335_v30  ;;  %v12354_v60 = vld [vmem:[#allocation13 + $0x14c] ss:$16 sps:$4 sm:$0xff]  }
 0x57e   :  { %v3069_v42 = vpop.f32.mrb[10].mxu0  ;;  %v14782_v54 = vpop.f32.mrb[10].mxu1 }
 0x57f   :  { %v3092_v46 = vadd.f32 %v14775_v4, %v3081_v63  ;;  %v3082_v24 = vadd.f32 %v3069_v42, %v14749_v23  ;;  %v3071_v57 = vpop.f32.mrb[11].mxu0  ;;  %9552 = vmatpush1.bf16.msra.mxu0 %v12319_v14  ;;  %v3695_v53 = vpop.f32.mrb[11].mxu1  ;;  %9880 = vmatpush1.bf16.msra.mxu1 %v12322_v41  ;;  %v13334_v23 = vmov 1966171168  }
 0x580   :  { %9553 = vmatprep.subr.bf16.mxu0 %v12327_v50  ;;  %9881 = vmatprep.subr.bf16.mxu1 %v12330_v35  ;;  %v3189_v33 = vunpack.c.l.s4 %v13334_v23  ;;  %v12349_v57 = vld [vmem:[#allocation13 + $0x140] ss:$16 sps:$4 sm:$0xff]  }
 0x581   :  { %v3093_v38 = vadd.f32 %v14775_v4, %v3082_v24  ;;  %v3096_v22 = vmax.f32 %v3092_v46, 0.0 }
 0x582   :  { %v3190_v62 = vunpack.c.0.s8 %v3189_v33 }
 0x583   :  { %v3097_v36 = vmax.f32 %v3093_v38, 0.0  ;;  %9554 = vmatpush1.bf16.msra.mxu0 %v12325_v16  ;;  %9882 = vmatpush1.bf16.msra.mxu1 %v12328_v56  ;;  %v12352_v16 = vld [vmem:[#allocation13 + $0x148] ss:$16 sps:$4 sm:$0xff]  }
 0x584   :  { %v3074_v11 = vpop.f32.mrb[12].mxu0  ;;  %9555 = vmatprep.subr.bf16.mxu0 %v12333_v52  ;;  %v14786_v61 = vpop.f32.mrb[12].mxu1  ;;  %9883 = vmatprep.subr.bf16.mxu1 %v12336_v45  ;;  %v14796_v32 = vsub.s32 %v3190_v62, %v13831_v34  ;;  %v12357_v52 = vld [vmem:[#allocation13 + $0x164] ss:$16 sps:$4 sm:$0xff]   ;;  %v12360_v45 = vld [vmem:[#allocation13 + $0x16c] ss:$16 sps:$4 sm:$0xff]  }
 0x585   :  { %v3100_v15 = vmax.f32 %v3096_v22, %v3097_v36  ;;  %v3083_v1 = vadd.f32 %v3074_v11, %v14754_v44  ;;  %v3076_v55 = vpop.f32.mrb[13].mxu0  ;;  %v3700_v31 = vpop.f32.mrb[13].mxu1  ;;  %v3218_v22 = vunpack.c.0.s8 %v3217_v20 }
 0x586   :  { %v3077_v21 = vpop.f32.mrb[14].mxu0  ;;  %v14790_v2 = vpop.f32.mrb[14].mxu1  ;;  %v12363_v31 = vld [vmem:[#allocation13 + $0x184] ss:$16 sps:$4 sm:$0xff]  }
 0x587   :  { %v3104_v17 = vcombine.high %v3100_v15, %v3100_v15  ;;  %v3111_v3 = vrot.slane %v3100_v15, %v13839_v48  ;;  %v3084_v40 = vadd.f32 %v3077_v21, %v14758_v25  ;;  %v3079_v59 = vpop.f32.mrb[15].mxu0  ;;  %9556 = vmatpush1.bf16.msra.mxu0 %v12331_v26  ;;  %v3094_v44 = vadd.f32 %v14775_v4, %v3083_v1  ;;  %v3703_v19 = vpop.f32.mrb[15].mxu1  ;;  %v12343_v25 = vld [vmem:[#allocation13 + $0x120] ss:$16 sps:$4 sm:$0xff]  }
 0x588   :  { %9884 = vmatpush1.bf16.msra.mxu1 %v12334_v7  ;;  %9557 = vmatprep.subr.bf16.mxu0 %v12339_v28  ;;  %v12355_v28 = vld [vmem:[#allocation13 + $0x160] ss:$16 sps:$4 sm:$0xff]  }
 0x589   :  { %v3118_v39 = vrot.slane %v3104_v17, %v13839_v48  ;;  %v3119_v0 = vcombine.high %v3111_v3, %v3111_v3  ;;  %v10909_v9 = vrot.slane %v3111_v3, 9  ;;  %9885 = vmatprep.subr.bf16.mxu1 %v12342_v8  ;;  %v3095_v47 = vadd.f32 %v14775_v4, %v3084_v40  ;;  %v12358_v8 = vld [vmem:[#allocation13 + $0x168] ss:$16 sps:$4 sm:$0xff]   ;;  %v12366_v17 = vld [vmem:[#allocation13 + $0x18c] ss:$16 sps:$4 sm:$0xff]  }
 0x58a   :  { %v3098_v14 = vmax.f32 %v3094_v44, 0.0  ;;  %v14805_v40 = vsub.s32 %v3218_v22, %v13831_v34 }
 0x58b   :  { %v3120_v18 = vcombine.high %v3118_v39, %v3118_v39  ;;  %v10910_v5 = vrot.slane %v3119_v0, 9  ;;  %v10911_v6 = vrot.slane %v3118_v39, 9  ;;  %v3170_v43 = vmax.f32 %v3111_v3, %v10909_v9  ;;  %9558 = vmatpush1.bf16.msra.mxu0 %v12337_v13 }
 0x58c   :  { %v3099_v41 = vmax.f32 %v3095_v47, 0.0  ;;  %9886 = vmatpush1.bf16.msra.mxu1 %v12340_v12  ;;  %9559 = vmatprep.subr.bf16.mxu0 %v12345_v58 }
 0x58d   :  { %v10912_v50 = vrot.slane %v3120_v18, 9  ;;  %v3171_v35 = vmax.f32 %v3119_v0, %v10910_v5  ;;  %v3172_v63 = vmax.f32 %v3118_v39, %v10911_v6  ;;  %v3178_v10 = vpack.c.bf16 %v3170_v43, %v3170_v43  ;;  %9887 = vmatprep.subr.bf16.mxu1 %v12348_v49  ;;  %v12361_v49 = vld [vmem:[#allocation13 + $0x180] ss:$16 sps:$4 sm:$0xff]   ;;  %v12364_v39 = vld [vmem:[#allocation13 + $0x188] ss:$16 sps:$4 sm:$0xff]  }
 0x58e   :  { %v3101_v37 = vmax.f32 %v3098_v14, %v3099_v41  ;;  %v12372_v5 = vld [vmem:[#allocation13 + $0x1ac] ss:$16 sps:$4 sm:$0xff]  }
 0x58f   :  { %v3173_v42 = vmax.f32 %v3120_v18, %v10912_v50  ;;  %v3179_v46 = vpack.c.bf16 %v3171_v35, %v3171_v35  ;;  %v3180_v24 = vpack.c.bf16 %v3172_v63, %v3172_v63  ;;  %9560 = vmatpush1.bf16.msra.mxu0 %v12343_v25  ;;  %v3194_v26 = vrot.slane %v3178_v10, %v14796_v32  ;;  %v12369_v18 = vld [vmem:[#allocation13 + $0x1a4] ss:$16 sps:$4 sm:$0xff]  }
 0x590   :  { %v3121_v56 = vcombine.high %v3101_v37, %v3101_v37  ;;  %v3128_v53 = vrot.slane %v3101_v37, %v13839_v48  ;;  %9888 = vmatpush1.bf16.msra.mxu1 %v12346_v27  ;;  %9561 = vmatprep.subr.bf16.mxu0 %v12351_v51  ;;  %v12367_v27 = vld [vmem:[#allocation13 + $0x1a0] ss:$16 sps:$4 sm:$0xff]   ;;  %v12370_v37 = vld [vmem:[#allocation13 + $0x1a8] ss:$16 sps:$4 sm:$0xff]  }
 0x591   :  { %v3181_v38 = vpack.c.bf16 %v3173_v42, %v3173_v42  ;;  %9889 = vmatprep.subr.bf16.mxu1 %v12354_v60  ;;  %v3274_v33 = vrot.slane %v3179_v46, %v14796_v32  ;;  %v3353_v11 = vrot.slane %v3180_v24, %v14796_v32  ;;  %v3201_v3 = vrot.slane %v3194_v26, %v14796_v32  ;;  %v12375_v42 = vld [vmem:[#allocation13 + $0x1c4] ss:$16 sps:$4 sm:$0xff]  }
 0x592   :  { %v3135_v36 = vrot.slane %v3121_v56, %v13839_v48  ;;  %v3136_v7 = vcombine.high %v3128_v53, %v3128_v53  ;;  %v10913_v23 = vrot.slane %v3128_v53, 9  ;;  %v12381_v26 = vld [vmem:[#allocation13 + $0x1e4] ss:$16 sps:$4 sm:$0xff]  }
 0x593   :  { %9562 = vmatpush1.bf16.msra.mxu0 %v12349_v57  ;;  %v3432_v59 = vrot.slane %v3181_v38, %v14796_v32  ;;  %v3281_v19 = vrot.slane %v3274_v33, %v14796_v32  ;;  %v3360_v58 = vrot.slane %v3353_v11, %v14796_v32  ;;  %v3222_v6 = vrot.slane %v3201_v3, %v14805_v40  ;;  %v12373_v57 = vld [vmem:[#allocation13 + $0x1c0] ss:$16 sps:$4 sm:$0xff]   ;;  %v12376_v38 = vld [vmem:[#allocation13 + $0x1c8] ss:$16 sps:$4 sm:$0xff]  }
 0x594   :  { %v3137_v15 = vcombine.high %v3135_v36, %v3135_v36  ;;  %v10914_v1 = vrot.slane %v3136_v7, 9  ;;  %v10915_v55 = vrot.slane %v3135_v36, 9  ;;  %v3174_v21 = vmax.f32 %v3128_v53, %v10913_v23  ;;  %9890 = vmatpush1.bf16.msra.mxu1 %v12352_v16  ;;  %9563 = vmatprep.subr.bf16.mxu0 %v12357_v52  ;;  %v12378_v16 = vld [vmem:[#allocation13 + $0x1cc] ss:$16 sps:$4 sm:$0xff]   ;;  %v12382_v3 = vld [vmem:[#allocation13 + $0x1e8] ss:$16 sps:$4 sm:$0xff]  }
 0x595   :  { %9891 = vmatprep.subr.bf16.mxu1 %v12360_v45  ;;  %v3439_v43 = vrot.slane %v3432_v59, %v14796_v32  ;;  %v3302_v41 = vrot.slane %v3281_v19, %v14805_v40  ;;  %v3381_v60 = vrot.slane %v3360_v58, %v14805_v40  ;;  %v3229_v46 = vrot.slane %v3222_v6, %v14805_v40  ;;  %v12387_v59 = vld [vmem:[#allocation13 + $0x204] ss:$16 sps:$4 sm:$0xff]  }
 0x596   :  { %v10916_v13 = vrot.slane %v3137_v15, 9  ;;  %v3175_v12 = vmax.f32 %v3136_v7, %v10914_v1  ;;  %v3176_v62 = vmax.f32 %v3135_v36, %v10915_v55  ;;  %v3182_v44 = vpack.c.bf16 %v3174_v21, %v3174_v21  ;;  %v12384_v1 = vld [vmem:[#allocation13 + $0x1ec] ss:$16 sps:$4 sm:$0xff]  }
 0x597   :  { %9564 = vmatpush1.bf16.msra.mxu0 %v12355_v28  ;;  %v3460_v24 = vrot.slane %v3439_v43, %v14805_v40  ;;  %v3309_v22 = vrot.slane %v3302_v41, %v14805_v40  ;;  %v3388_v36 = vrot.slane %v3381_v60, %v14805_v40  ;;  %v3244_v28 = vunpack.c.l.b16 %v3229_v46 }
 0x598   :  { %v3177_v0 = vmax.f32 %v3137_v15, %v10916_v13  ;;  %v3183_v9 = vpack.c.bf16 %v3175_v12, %v3175_v12  ;;  %v3184_v25 = vpack.c.bf16 %v3176_v62, %v3176_v62  ;;  %v3208_v47 = vrot.slane %v3182_v44, %v14796_v32  ;;  %9892 = vmatpush1.bf16.msra.mxu1 %v12358_v8  ;;  %v12379_v15 = vld [vmem:[#allocation13 + $0x1e0] ss:$16 sps:$4 sm:$0xff]  }
 0x599   :  { %9565 = vmatprep.subr.bf16.mxu0 %v12363_v31  ;;  %9893 = vmatprep.subr.bf16.mxu1 %v12366_v17  ;;  %v3467_v8 = vrot.slane %v3460_v24, %v14805_v40  ;;  %v3324_v13 = vunpack.c.l.b16 %v3309_v22  ;;  %v3403_v12 = vunpack.c.l.b16 %v3388_v36 }
 0x59a   :  { %v3185_v51 = vpack.c.bf16 %v3177_v0, %v3177_v0  ;;  %v3215_v30 = vrot.slane %v3208_v47, %v14796_v32  ;;  %v3288_v20 = vrot.slane %v3183_v9, %v14796_v32  ;;  %v3367_v14 = vrot.slane %v3184_v25, %v14796_v32 }
 0x59b   :  { %9566 = vmatpush1.bf16.msra.mxu0 %v12361_v49  ;;  %v3482_v0 = vunpack.c.l.b16 %v3467_v8 }
 0x59c   :  { %v3236_v50 = vrot.slane %v3215_v30, %v14805_v40  ;;  %v3295_v35 = vrot.slane %v3288_v20, %v14796_v32  ;;  %v3374_v63 = vrot.slane %v3367_v14, %v14796_v32  ;;  %v3446_v10 = vrot.slane %v3185_v51, %v14796_v32  ;;  %9894 = vmatpush1.bf16.msra.mxu1 %v12364_v39  ;;  %v12390_v39 = vld [vmem:[#allocation13 + $0x20c] ss:$16 sps:$4 sm:$0xff]  }
 0x59d   :  { %9567 = vmatprep.subr.bf16.mxu0 %v12369_v18  ;;  %9895 = vmatprep.subr.bf16.mxu1 %v12372_v5 }
 0x59e   :  { %v3243_v56 = vrot.slane %v3236_v50, %v14805_v40  ;;  %v3316_v53 = vrot.slane %v3295_v35, %v14805_v40  ;;  %v3395_v52 = vrot.slane %v3374_v63, %v14805_v40  ;;  %v3453_v45 = vrot.slane %v3446_v10, %v14796_v32 }
 0x59f   :  { %9568 = vmatpush1.bf16.msra.mxu0 %v12367_v27 }
 0x5a0   :  { %v3245_v7 = vunpack.c.l.b16 %v3243_v56  ;;  %v3323_v23 = vrot.slane %v3316_v53, %v14805_v40  ;;  %v3402_v33 = vrot.slane %v3395_v52, %v14805_v40  ;;  %v3474_v11 = vrot.slane %v3453_v45, %v14805_v40  ;;  %9896 = vmatpush1.bf16.msra.mxu1 %v12370_v37  ;;  %9569 = vmatprep.subr.bf16.mxu0 %v12375_v42 }
 0x5a1   :  { %9897 = vmatprep.subr.bf16.mxu1 %v12378_v16 }
 0x5a2   :  { %v3246_v55 = vrot.slane %v3245_v7, 7  ;;  %v3325_v21 = vunpack.c.l.b16 %v3323_v23  ;;  %v3404_v31 = vunpack.c.l.b16 %v3402_v33  ;;  %v3481_v17 = vrot.slane %v3474_v11, %v14805_v40 }
 0x5a3   :  { %9570 = vmatpush1.bf16.msra.mxu0 %v12373_v57 }
 0x5a4   :  { %v3248_v62 = vsel %vm1565_vm5, %v3246_v55, %v3244_v28  ;;  %v3326_v44 = vrot.slane %v3325_v21, 7  ;;  %v3405_v19 = vrot.slane %v3404_v31, 7  ;;  %v3483_v58 = vunpack.c.l.b16 %v3481_v17  ;;  %9898 = vmatpush1.bf16.msra.mxu1 %v12376_v38  ;;  %9571 = vmatprep.subr.bf16.mxu0 %v12381_v26 }
 0x5a5   :  { %v3249_v49 = vpack.c.b16 %v3248_v62, %v3248_v62  ;;  %9899 = vmatprep.subr.bf16.mxu1 %v12384_v1 }
 0x5a6   :  { %v3327_v9 = vsel %vm1565_vm5, %v3326_v44, %v3324_v13  ;;  %v3406_v25 = vsel %vm1565_vm5, %v3405_v19, %v3403_v12  ;;  %v3484_v47 = vrot.slane %v3483_v58, 7 }
 0x5a7   :  { %v3256_v18 = vrot.slane %v3249_v49, %v14796_v32  ;;  %v3328_v5 = vpack.c.b16 %v3327_v9, %v3327_v9  ;;  %v3407_v6 = vpack.c.b16 %v3406_v25, %v3406_v25  ;;  %9572 = vmatpush1.bf16.msra.mxu0 %v12379_v15 }
 0x5a8   :  { %v3485_v43 = vsel %vm1565_vm5, %v3484_v47, %v3482_v0  ;;  %9900 = vmatpush1.bf16.msra.mxu1 %v12382_v3  ;;  %9582 = vmatprep.subr.bf16.mxu0 %v12387_v59 }
 0x5a9   :  { %10917 = vst.sshfl [vmem:[#allocation4] sm:$0x1 pattern:$0x73625140] %v3256_v18  ;;  %v3335_v27 = vrot.slane %v3328_v5, %v14796_v32  ;;  %v3414_v51 = vrot.slane %v3407_v6, %v14796_v32  ;;  %v3486_v30 = vpack.c.b16 %v3485_v43, %v3485_v43  ;;  %9910 = vmatprep.subr.bf16.mxu1 %v12390_v39 }
 0x5ab   :  { %10918 = vst.sshfl [vmem:[#allocation4 + $0x1] sm:$0x1 pattern:$0x73625140] %v3335_v27  ;;  %v3493_v20 = vrot.slane %v3486_v30, %v14796_v32 }
 0x5ac   :  { %10919 = vst.sshfl [vmem:[#allocation4 + $0x2] sm:$0x1 pattern:$0x73625140] %v3414_v51  ;;  %v3835_v14 = vpop.f32.mrb[16].mxu0  ;;  %v4009_v60 = vpop.f32.mrb[16].mxu1 }
 0x5ad   :  { %10920 = vst.sshfl [vmem:[#allocation4 + $0x3] sm:$0x1 pattern:$0x73625140] %v3493_v20  ;;  %v3836_v41 = vadd.f32 %v3835_v14, %v14778_v29  ;;  %v3837_v50 = vpop.f32.mrb[17].mxu0  ;;  %v4011_v35 = vpop.f32.mrb[17].mxu1 }
 0x5ae   :  { %v3838_v63 = vpop.f32.mrb[18].mxu0  ;;  %v4012_v42 = vpop.f32.mrb[18].mxu1 }
 0x5af   :  { %v4024_v10 = vadd.f32 %v4009_v60, %v3836_v41  ;;  %v3839_v37 = vadd.f32 %v3838_v63, %v14782_v54  ;;  %v3840_v46 = vpop.f32.mrb[19].mxu0  ;;  %v4014_v24 = vpop.f32.mrb[19].mxu1 }
 0x5b1   :  { %v4035_v57 = vadd.f32 %v14775_v4, %v4024_v10  ;;  %v4025_v16 = vadd.f32 %v4012_v42, %v3839_v37 }
 0x5b3   :  { %v4036_v56 = vadd.f32 %v14775_v4, %v4025_v16  ;;  %v4039_v53 = vmax.f32 %v4035_v57, 0.0 }
 0x5b4   :  { %v3843_v52 = vpop.f32.mrb[20].mxu0  ;;  %v4017_v38 = vpop.f32.mrb[20].mxu1 }
 0x5b5   :  { %v4040_v45 = vmax.f32 %v4036_v56, 0.0  ;;  %v3844_v29 = vadd.f32 %v3843_v52, %v14786_v61  ;;  %v3845_v26 = vpop.f32.mrb[21].mxu0  ;;  %v4019_v22 = vpop.f32.mrb[21].mxu1 }
 0x5b6   :  { %v3846_v36 = vpop.f32.mrb[22].mxu0  ;;  %v4020_v33 = vpop.f32.mrb[22].mxu1 }
 0x5b7   :  { %v4043_v7 = vmax.f32 %v4039_v53, %v4040_v45  ;;  %v4026_v23 = vadd.f32 %v4017_v38, %v3844_v29  ;;  %v3847_v54 = vadd.f32 %v3846_v36, %v14790_v2  ;;  %v3848_v11 = vpop.f32.mrb[23].mxu0  ;;  %v4022_v28 = vpop.f32.mrb[23].mxu1 }
 0x5b9   :  { %v4047_v8 = vcombine.high %v4043_v7, %v4043_v7  ;;  %v4054_v15 = vrot.slane %v4043_v7, %v13839_v48  ;;  %v4027_v1 = vadd.f32 %v4020_v33, %v3847_v54  ;;  %v4037_v55 = vadd.f32 %v14775_v4, %v4026_v23 }
 0x5bb   :  { %v4061_v21 = vrot.slane %v4047_v8, %v13839_v48  ;;  %v4062_v61 = vcombine.high %v4054_v15, %v4054_v15  ;;  %v10976_v31 = vrot.slane %v4054_v15, 9  ;;  %v4038_v17 = vadd.f32 %v14775_v4, %v4027_v1 }
 0x5bc   :  { %v4041_v2 = vmax.f32 %v4037_v55, 0.0 }
 0x5bd   :  { %v4063_v3 = vcombine.high %v4061_v21, %v4061_v21  ;;  %v10977_v59 = vrot.slane %v4062_v61, 9  ;;  %v10978_v13 = vrot.slane %v4061_v21, 9  ;;  %v4113_v12 = vmax.f32 %v4054_v15, %v10976_v31 }
 0x5be   :  { %v4042_v62 = vmax.f32 %v4038_v17, 0.0 }
 0x5bf   :  { %v10979_v44 = vrot.slane %v4063_v3, 9  ;;  %v4114_v19 = vmax.f32 %v4062_v61, %v10977_v59  ;;  %v4115_v58 = vmax.f32 %v4061_v21, %v10978_v13  ;;  %v4121_v49 = vpack.c.bf16 %v4113_v12, %v4113_v12 }
 0x5c0   :  { %v4044_v39 = vmax.f32 %v4041_v2, %v4042_v62 }
 0x5c1   :  { %v4116_v0 = vmax.f32 %v4063_v3, %v10979_v44  ;;  %v4122_v9 = vpack.c.bf16 %v4114_v19, %v4114_v19  ;;  %v4123_v25 = vpack.c.bf16 %v4115_v58, %v4115_v58  ;;  %v4137_v4 = vrot.slane %v4121_v49, %v14796_v32 }
 0x5c2   :  { %v4064_v47 = vcombine.high %v4044_v39, %v4044_v39  ;;  %v4071_v18 = vrot.slane %v4044_v39, %v13839_v48 }
 0x5c3   :  { %v4124_v5 = vpack.c.bf16 %v4116_v0, %v4116_v0  ;;  %v4216_v51 = vrot.slane %v4122_v9, %v14796_v32  ;;  %v4295_v30 = vrot.slane %v4123_v25, %v14796_v32  ;;  %v4144_v50 = vrot.slane %v4137_v4, %v14796_v32 }
 0x5c4   :  { %v4078_v6 = vrot.slane %v4064_v47, %v13839_v48  ;;  %v4079_v43 = vcombine.high %v4071_v18, %v4071_v18  ;;  %v10980_v27 = vrot.slane %v4071_v18, 9 }
 0x5c5   :  { %v4374_v35 = vrot.slane %v4124_v5, %v14796_v32  ;;  %v4223_v46 = vrot.slane %v4216_v51, %v14796_v32  ;;  %v4302_v24 = vrot.slane %v4295_v30, %v14796_v32  ;;  %v4165_v52 = vrot.slane %v4144_v50, %v14805_v40 }
 0x5c6   :  { %v4080_v20 = vcombine.high %v4078_v6, %v4078_v6  ;;  %v10981_v14 = vrot.slane %v4079_v43, 9  ;;  %v10982_v41 = vrot.slane %v4078_v6, 9  ;;  %v4117_v60 = vmax.f32 %v4071_v18, %v10980_v27 }
 0x5c7   :  { %v4381_v45 = vrot.slane %v4374_v35, %v14796_v32  ;;  %v4244_v36 = vrot.slane %v4223_v46, %v14805_v40  ;;  %v4323_v7 = vrot.slane %v4302_v24, %v14805_v40  ;;  %v4172_v28 = vrot.slane %v4165_v52, %v14805_v40 }
 0x5c8   :  { %v10983_v63 = vrot.slane %v4080_v20, 9  ;;  %v4118_v10 = vmax.f32 %v4079_v43, %v10981_v14  ;;  %v4119_v37 = vmax.f32 %v4078_v6, %v10982_v41  ;;  %v4125_v42 = vpack.c.bf16 %v4117_v60, %v4117_v60 }
 0x5c9   :  { %v4402_v8 = vrot.slane %v4381_v45, %v14805_v40  ;;  %v4251_v61 = vrot.slane %v4244_v36, %v14805_v40  ;;  %v4330_v31 = vrot.slane %v4323_v7, %v14805_v40  ;;  %v4187_v12 = vunpack.c.l.b16 %v4172_v28 }
 0x5ca   :  { %v4120_v57 = vmax.f32 %v4080_v20, %v10983_v63  ;;  %v4126_v16 = vpack.c.bf16 %v4118_v10, %v4118_v10  ;;  %v4127_v56 = vpack.c.bf16 %v4119_v37, %v4119_v37  ;;  %v4151_v53 = vrot.slane %v4125_v42, %v14796_v32 }
 0x5cb   :  { %v4409_v2 = vrot.slane %v4402_v8, %v14805_v40  ;;  %v4266_v49 = vunpack.c.l.b16 %v4251_v61  ;;  %v4345_v39 = vunpack.c.l.b16 %v4330_v31  ;;  %v12385_v8 = vld [vmem:[#allocation13 + $0x200] ss:$16 sps:$4 sm:$0xff]   ;;  %v12396_v61 = vld [vmem:[#allocation13 + $0x22c] ss:$16 sps:$4 sm:$0xff]  }
 0x5cc   :  { %v4128_v29 = vpack.c.bf16 %v4120_v57, %v4120_v57  ;;  %v4158_v38 = vrot.slane %v4151_v53, %v14796_v32  ;;  %v4230_v26 = vrot.slane %v4126_v16, %v14796_v32  ;;  %v4309_v22 = vrot.slane %v4127_v56, %v14796_v32  ;;  %v12391_v31 = vld [vmem:[#allocation13 + $0x220] ss:$16 sps:$4 sm:$0xff]  }
 0x5cd   :  { %v4424_v5 = vunpack.c.l.b16 %v4409_v2  ;;  %v12405_v2 = vld [vmem:[#allocation13 + $0x264] ss:$16 sps:$4 sm:$0xff]  }
 0x5ce   :  { %v4179_v23 = vrot.slane %v4158_v38, %v14805_v40  ;;  %v4237_v54 = vrot.slane %v4230_v26, %v14796_v32  ;;  %v4316_v33 = vrot.slane %v4309_v22, %v14796_v32  ;;  %v4388_v11 = vrot.slane %v4128_v29, %v14796_v32 }
 0x5d0   :  { %v4186_v15 = vrot.slane %v4179_v23, %v14805_v40  ;;  %v4258_v1 = vrot.slane %v4237_v54, %v14805_v40  ;;  %v4337_v55 = vrot.slane %v4316_v33, %v14805_v40  ;;  %v4395_v21 = vrot.slane %v4388_v11, %v14796_v32 }
 0x5d2   :  { %v4188_v17 = vunpack.c.l.b16 %v4186_v15  ;;  %v4265_v3 = vrot.slane %v4258_v1, %v14805_v40  ;;  %v4344_v59 = vrot.slane %v4337_v55, %v14805_v40  ;;  %v4416_v13 = vrot.slane %v4395_v21, %v14805_v40  ;;  %v12388_v15 = vld [vmem:[#allocation13 + $0x208] ss:$16 sps:$4 sm:$0xff]   ;;  %v12393_v21 = vld [vmem:[#allocation13 + $0x224] ss:$16 sps:$4 sm:$0xff]  }
 0x5d4   :  { %v4189_v62 = vrot.slane %v4188_v17, 7  ;;  %v4267_v44 = vunpack.c.l.b16 %v4265_v3  ;;  %v4346_v19 = vunpack.c.l.b16 %v4344_v59  ;;  %v4423_v58 = vrot.slane %v4416_v13, %v14805_v40  ;;  %v12394_v17 = vld [vmem:[#allocation13 + $0x228] ss:$16 sps:$4 sm:$0xff]   ;;  %v12399_v3 = vld [vmem:[#allocation13 + $0x244] ss:$16 sps:$4 sm:$0xff]  }
 0x5d5   :  { %v12402_v59 = vld [vmem:[#allocation13 + $0x24c] ss:$16 sps:$4 sm:$0xff]   ;;  %v12397_v13 = vld [vmem:[#allocation13 + $0x240] ss:$16 sps:$4 sm:$0xff]  }
 0x5d6   :  { %v4190_v0 = vsel %vm1565_vm5, %v4189_v62, %v4187_v12  ;;  %v4268_v9 = vrot.slane %v4267_v44, 7  ;;  %v4347_v25 = vrot.slane %v4346_v19, 7  ;;  %v4425_v47 = vunpack.c.l.b16 %v4423_v58  ;;  %v12400_v12 = vld [vmem:[#allocation13 + $0x248] ss:$16 sps:$4 sm:$0xff]   ;;  %v12408_v62 = vld [vmem:[#allocation13 + $0x26c] ss:$16 sps:$4 sm:$0xff]  }
 0x5d7   :  { %v4191_v18 = vpack.c.b16 %v4190_v0, %v4190_v0  ;;  %v12403_v44 = vld [vmem:[#allocation13 + $0x260] ss:$16 sps:$4 sm:$0xff]   ;;  %v12406_v19 = vld [vmem:[#allocation13 + $0x268] ss:$16 sps:$4 sm:$0xff]   ;;  %v12411_v58 = vld [vmem:[#allocation13 + $0x284] ss:$16 sps:$4 sm:$0xff]  }
 0x5d8   :  { %v4269_v4 = vsel %vm1565_vm5, %v4268_v9, %v4266_v49  ;;  %v4348_v6 = vsel %vm1565_vm5, %v4347_v25, %v4345_v39  ;;  %v4426_v43 = vrot.slane %v4425_v47, 7  ;;  %v12414_v49 = vld [vmem:[#allocation13 + $0x28c] ss:$16 sps:$4 sm:$0xff]   ;;  %v12409_v39 = vld [vmem:[#allocation13 + $0x280] ss:$16 sps:$4 sm:$0xff]  }
 0x5d9   :  { %v4198_v27 = vrot.slane %v4191_v18, %v14796_v32  ;;  %v4270_v51 = vpack.c.b16 %v4269_v4, %v4269_v4  ;;  %v4349_v30 = vpack.c.b16 %v4348_v6, %v4348_v6  ;;  %v12412_v0 = vld [vmem:[#allocation13 + $0x288] ss:$16 sps:$4 sm:$0xff]   ;;  %v12417_v9 = vld [vmem:[#allocation13 + $0x2a4] ss:$16 sps:$4 sm:$0xff]   ;;  %v12420_v25 = vld [vmem:[#allocation13 + $0x2ac] ss:$16 sps:$4 sm:$0xff]  }
 0x5da   :  { %v4427_v20 = vsel %vm1565_vm5, %v4426_v43, %v4424_v5  ;;  %v12415_v47 = vld [vmem:[#allocation13 + $0x2a0] ss:$16 sps:$4 sm:$0xff]   ;;  %v12418_v18 = vld [vmem:[#allocation13 + $0x2a8] ss:$16 sps:$4 sm:$0xff]   ;;  %v12423_v5 = vld [vmem:[#allocation13 + $0x2c4] ss:$16 sps:$4 sm:$0xff]  }
 0x5db   :  { %10984 = vst.sshfl [vmem:[#allocation4 + $0x4] sm:$0x1 pattern:$0x73625140] %v4198_v27  ;;  %v4277_v14 = vrot.slane %v4270_v51, %v14796_v32  ;;  %v4356_v41 = vrot.slane %v4349_v30, %v14796_v32  ;;  %v4428_v60 = vpack.c.b16 %v4427_v20, %v4427_v20  ;;  %v12426_v4 = vld [vmem:[#allocation13 + $0x2cc] ss:$16 sps:$4 sm:$0xff]  }
 0x5dc   :  { %v4632_v50 = vpop.f32.mrb[24].mxu0  ;;  %v4777_v10 = vpop.f32.mrb[24].mxu1  ;;  %v12421_v6 = vld [vmem:[#allocation13 + $0x2c0] ss:$16 sps:$4 sm:$0xff]   ;;  %v12424_v43 = vld [vmem:[#allocation13 + $0x2c8] ss:$16 sps:$4 sm:$0xff]  }
 0x5dd   :  { %10985 = vst.sshfl [vmem:[#allocation4 + $0x5] sm:$0x1 pattern:$0x73625140] %v4277_v14  ;;  %v4435_v35 = vrot.slane %v4428_v60, %v14796_v32  ;;  %v4634_v63 = vpop.f32.mrb[25].mxu0  ;;  %v14895_v42 = vadd.f32 %v4777_v10, %v4632_v50  ;;  %v4779_v46 = vpop.f32.mrb[25].mxu1 }
 0x5de   :  { %10986 = vst.sshfl [vmem:[#allocation4 + $0x6] sm:$0x1 pattern:$0x73625140] %v4356_v41  ;;  %v4635_v37 = vpop.f32.mrb[26].mxu0  ;;  %v4780_v57 = vpop.f32.mrb[26].mxu1 }
 0x5df   :  { %10987 = vst.sshfl [vmem:[#allocation4 + $0x7] sm:$0x1 pattern:$0x73625140] %v4435_v35  ;;  %v4637_v24 = vpop.f32.mrb[27].mxu0  ;;  %v14897_v16 = vadd.f32 %v4780_v57, %v4635_v37  ;;  %v4782_v56 = vpop.f32.mrb[27].mxu1 }
 0x5e0   :  { %v12429_v27 = vld [vmem:[#allocation13 + $0x2e4] ss:$16 sps:$4 sm:$0xff]   ;;  %v12432_v51 = vld [vmem:[#allocation13 + $0x2ec] ss:$16 sps:$4 sm:$0xff]   ;;  %v12427_v30 = vld [vmem:[#allocation13 + $0x2e0] ss:$16 sps:$4 sm:$0xff]  }
 0x5e1   :  { %v12430_v20 = vld [vmem:[#allocation13 + $0x2e8] ss:$16 sps:$4 sm:$0xff]   ;;  %v12435_v14 = vld [vmem:[#allocation13 + $0x304] ss:$16 sps:$4 sm:$0xff]   ;;  %v12438_v41 = vld [vmem:[#allocation13 + $0x30c] ss:$16 sps:$4 sm:$0xff]  }
 0x5e2   :  { %v12433_v60 = vld [vmem:[#allocation13 + $0x300] ss:$16 sps:$4 sm:$0xff]   ;;  %v12436_v50 = vld [vmem:[#allocation13 + $0x308] ss:$16 sps:$4 sm:$0xff]   ;;  %v12441_v35 = vld [vmem:[#allocation13 + $0x324] ss:$16 sps:$4 sm:$0xff]  }
 0x5e3   :  { %v12444_v63 = vld [vmem:[#allocation13 + $0x32c] ss:$16 sps:$4 sm:$0xff]  }
 0x5e4   :  { %v4640_v53 = vpop.f32.mrb[28].mxu0  ;;  %v4785_v45 = vpop.f32.mrb[28].mxu1  ;;  %v14916_v57 = vld [vmem:[#allocation11] ss:$0 sm:$0xff] }
 0x5e5   :  { %v4642_v52 = vpop.f32.mrb[29].mxu0  ;;  %v14901_v26 = vadd.f32 %v4785_v45, %v4640_v53  ;;  %v4787_v22 = vpop.f32.mrb[29].mxu1  ;;  %v12442_v45 = vld [vmem:[#allocation13 + $0x328] ss:$16 sps:$4 sm:$0xff]  }
 0x5e6   :  { %v14899_v29 = vld [vmem:[#allocation4] sm:$0xff]  ;;  %v4643_v38 = vpop.f32.mrb[30].mxu0  ;;  %v4788_v23 = vpop.f32.mrb[30].mxu1 }
 0x5e7   :  { %v6874_v36 = vrot.slane %v14899_v29, %v14796_v32  ;;  %v4645_v7 = vpop.f32.mrb[31].mxu0  ;;  %v14905_v54 = vadd.f32 %v4788_v23, %v4643_v38  ;;  %v4790_v33 = vpop.f32.mrb[31].mxu1  ;;  %v12439_v52 = vld [vmem:[#allocation13 + $0x320] ss:$16 sps:$4 sm:$0xff]   ;;  %v12450_v23 = vld [vmem:[#allocation13 + $0x34c] ss:$16 sps:$4 sm:$0xff]  }
 0x5e9   :  { %v6882_v11 = vcombine.high %v6874_v36, %v6874_v36  ;;  %v14909_v1 = vrot.slane %v6874_v36, %v14796_v32 }
 0x5eb   :  { %v6904_v28 = vrot.slane %v6882_v11, %v14796_v32 }
 0x5ed   :  { %9573 = vmatprep.mubr.bf16.mxu0 %v6904_v28  ;;  %9901 = vmatprep.mubr.bf16.mxu1 %v6904_v28  ;;  %v6914_v55 = vcombine.high %v6904_v28, %v6904_v28 }
 0x5ee   :  { %9574 = vmatmul.mubr.bf16.vlgmr.msra.gmra.mrb[48].mxu0 %v14909_v1  ;;  %9902 = vmatmul.mubr.bf16.vlgmr.msra.gmra.mrb[48].mxu1 %v14909_v1 }
 0x5ef   :  { %9583 = vmatpush1.bf16.msra.mxu0 %v12385_v8  ;;  %9911 = vmatpush1.bf16.msra.mxu1 %v12388_v15  ;;  %v12445_v8 = vld [vmem:[#allocation13 + $0x340] ss:$16 sps:$4 sm:$0xff]   ;;  %v12448_v15 = vld [vmem:[#allocation13 + $0x348] ss:$16 sps:$4 sm:$0xff]  }
 0x5f0   :  { %9614 = vmatprep.mubr.bf16.mxu0 %v6914_v55  ;;  %9942 = vmatprep.mubr.bf16.mxu1 %v6914_v55 }
 0x5f1   :  { %9584 = vmatprep.subr.bf16.mxu0 %v12393_v21  ;;  %9912 = vmatprep.subr.bf16.mxu1 %v12396_v61  ;;  %v12453_v21 = vld [vmem:[#allocation13 + $0x364] ss:$16 sps:$4 sm:$0xff]  }
 0x5f3   :  { %9585 = vmatpush1.bf16.msra.mxu0 %v12391_v31  ;;  %9913 = vmatpush1.bf16.msra.mxu1 %v12394_v17 }
 0x5f4   :  { %9586 = vmatprep.subr.bf16.mxu0 %v12399_v3  ;;  %9914 = vmatprep.subr.bf16.mxu1 %v12402_v59 }
 0x5f7   :  { %9587 = vmatpush1.bf16.msra.mxu0 %v12397_v13  ;;  %9915 = vmatpush1.bf16.msra.mxu1 %v12400_v12 }
 0x5f8   :  { %9588 = vmatprep.subr.bf16.mxu0 %v12405_v2  ;;  %9916 = vmatprep.subr.bf16.mxu1 %v12408_v62  ;;  %v12451_v2 = vld [vmem:[#allocation13 + $0x360] ss:$16 sps:$4 sm:$0xff]   ;;  %v12454_v62 = vld [vmem:[#allocation13 + $0x368] ss:$16 sps:$4 sm:$0xff]  }
 0x5fb   :  { %9589 = vmatpush1.bf16.msra.mxu0 %v12403_v44  ;;  %9917 = vmatpush1.bf16.msra.mxu1 %v12406_v19 }
 0x5fc   :  { %9590 = vmatprep.subr.bf16.mxu0 %v12411_v58  ;;  %9918 = vmatprep.subr.bf16.mxu1 %v12414_v49 }
 0x5ff   :  { %9591 = vmatpush1.bf16.msra.mxu0 %v12409_v39  ;;  %9919 = vmatpush1.bf16.msra.mxu1 %v12412_v0  ;;  %v12462_v0 = vld [vmem:[#allocation13 + $0x38c] ss:$16 sps:$4 sm:$0xff]  }
 0x600   :  { %9592 = vmatprep.subr.bf16.mxu0 %v12417_v9  ;;  %9920 = vmatprep.subr.bf16.mxu1 %v12420_v25 }
 0x603   :  { %9593 = vmatpush1.bf16.msra.mxu0 %v12415_v47  ;;  %9921 = vmatpush1.bf16.msra.mxu1 %v12418_v18 }
 0x604   :  { %9594 = vmatprep.subr.bf16.mxu0 %v12423_v5  ;;  %9922 = vmatprep.subr.bf16.mxu1 %v12426_v4 }
 0x607   :  { %9595 = vmatpush1.bf16.msra.mxu0 %v12421_v6  ;;  %9923 = vmatpush1.bf16.msra.mxu1 %v12424_v43 }
 0x608   :  { %9596 = vmatprep.subr.bf16.mxu0 %v12429_v27  ;;  %9924 = vmatprep.subr.bf16.mxu1 %v12432_v51 }
 0x60b   :  { %9597 = vmatpush1.bf16.msra.mxu0 %v12427_v30  ;;  %9925 = vmatpush1.bf16.msra.mxu1 %v12430_v20  ;;  %v12457_v20 = vld [vmem:[#allocation13 + $0x380] ss:$16 sps:$4 sm:$0xff]  }
 0x60c   :  { %9598 = vmatprep.subr.bf16.mxu0 %v12435_v14  ;;  %9926 = vmatprep.subr.bf16.mxu1 %v12438_v41  ;;  %v4951_v10 = vpop.f32.mrb[32].mxu0  ;;  %v14914_v24 = vpop.f32.mrb[32].mxu1  ;;  %v12460_v14 = vld [vmem:[#allocation13 + $0x388] ss:$16 sps:$4 sm:$0xff]  }
 0x60d   :  { %v4966_v37 = vadd.f32 %v4951_v10, %v14895_v42  ;;  %v4953_v46 = vpop.f32.mrb[33].mxu0  ;;  %v5576_v53 = vpop.f32.mrb[33].mxu1  ;;  %v12447_v42 = vld [vmem:[#allocation13 + $0x344] ss:$16 sps:$4 sm:$0xff]   ;;  %v12468_v10 = vld [vmem:[#allocation13 + $0x3ac] ss:$16 sps:$4 sm:$0xff]  }
 0x60e   :  { %v4954_v56 = vpop.f32.mrb[34].mxu0  ;;  %v14920_v7 = vpop.f32.mrb[34].mxu1 }
 0x60f   :  { %9599 = vmatpush1.bf16.msra.mxu0 %v12433_v60  ;;  %9927 = vmatpush1.bf16.msra.mxu1 %v12436_v50  ;;  %v4977_v38 = vadd.f32 %v14916_v57, %v4966_v37  ;;  %v4967_v22 = vadd.f32 %v4954_v56, %v14897_v16  ;;  %v4956_v36 = vpop.f32.mrb[35].mxu0  ;;  %v5579_v33 = vpop.f32.mrb[35].mxu1  ;;  %v12456_v16 = vld [vmem:[#allocation13 + $0x36c] ss:$16 sps:$4 sm:$0xff]  }
 0x610   :  { %9600 = vmatprep.subr.bf16.mxu0 %v12441_v35  ;;  %9928 = vmatprep.subr.bf16.mxu1 %v12444_v63  ;;  %v12466_v36 = vld [vmem:[#allocation13 + $0x3a8] ss:$16 sps:$4 sm:$0xff]  }
 0x611   :  { %v4981_v11 = vmax.f32 %v4977_v38, 0.0  ;;  %v4978_v28 = vadd.f32 %v14916_v57, %v4967_v22 }
 0x613   :  { %9601 = vmatpush1.bf16.msra.mxu0 %v12439_v52  ;;  %9929 = vmatpush1.bf16.msra.mxu1 %v12442_v45  ;;  %v4982_v55 = vmax.f32 %v4978_v28, 0.0  ;;  %v12463_v45 = vld [vmem:[#allocation13 + $0x3a0] ss:$16 sps:$4 sm:$0xff]   ;;  %v12474_v28 = vld [vmem:[#allocation13 + $0x3cc] ss:$16 sps:$4 sm:$0xff]  }
 0x614   :  { %9602 = vmatprep.subr.bf16.mxu0 %v12447_v42  ;;  %9930 = vmatprep.subr.bf16.mxu1 %v12450_v23  ;;  %v4959_v61 = vpop.f32.mrb[36].mxu0  ;;  %v14924_v59 = vpop.f32.mrb[36].mxu1  ;;  %v12471_v42 = vld [vmem:[#allocation13 + $0x3c4] ss:$16 sps:$4 sm:$0xff]  }
 0x615   :  { %v4985_v31 = vmax.f32 %v4981_v11, %v4982_v55  ;;  %v4968_v17 = vadd.f32 %v4959_v61, %v14901_v26  ;;  %v4961_v3 = vpop.f32.mrb[37].mxu0  ;;  %v5584_v12 = vpop.f32.mrb[37].mxu1  ;;  %v12459_v26 = vld [vmem:[#allocation13 + $0x384] ss:$16 sps:$4 sm:$0xff]  }
 0x616   :  { %v4962_v13 = vpop.f32.mrb[38].mxu0  ;;  %v14928_v39 = vpop.f32.mrb[38].mxu1 }
 0x617   :  { %9603 = vmatpush1.bf16.msra.mxu0 %v12445_v8  ;;  %9931 = vmatpush1.bf16.msra.mxu1 %v12448_v15  ;;  %v4989_v44 = vcombine.high %v4985_v31, %v4985_v31  ;;  %v4996_v19 = vrot.slane %v4985_v31, %v13839_v48  ;;  %v4979_v58 = vadd.f32 %v14916_v57, %v4968_v17  ;;  %v4964_v49 = vpop.f32.mrb[39].mxu0  ;;  %v5587_v25 = vpop.f32.mrb[39].mxu1  ;;  %v12469_v31 = vld [vmem:[#allocation13 + $0x3c0] ss:$16 sps:$4 sm:$0xff]  }
 0x618   :  { %9604 = vmatprep.subr.bf16.mxu0 %v12453_v21  ;;  %9932 = vmatprep.subr.bf16.mxu1 %v12456_v16  ;;  %v4969_v9 = vadd.f32 %v4962_v13, %v14905_v54  ;;  %v12465_v54 = vld [vmem:[#allocation13 + $0x3a4] ss:$16 sps:$4 sm:$0xff]   ;;  %v6867_v8 = vcombine.high %v14899_v29, %v14899_v29 }
 0x619   :  { %v5003_v47 = vrot.slane %v4989_v44, %v13839_v48  ;;  %v5004_v18 = vcombine.high %v4996_v19, %v4996_v19  ;;  %v11043_v5 = vrot.slane %v4996_v19, 9  ;;  %v4983_v4 = vmax.f32 %v4979_v58, 0.0  ;;  %v12477_v44 = vld [vmem:[#allocation13 + $0x3e4] ss:$16 sps:$4 sm:$0xff]  }
 0x61a   :  { %v4980_v6 = vadd.f32 %v14916_v57, %v4969_v9  ;;  %v14945_v58 = vrot.slane %v6867_v8, %v14796_v32  ;;  %v12492_v8 = vld [vmem:[#allocation13 + $0x42c] ss:$16 sps:$4 sm:$0xff]  }
 0x61b   :  { %9605 = vmatpush1.bf16.msra.mxu0 %v12451_v2  ;;  %9933 = vmatpush1.bf16.msra.mxu1 %v12454_v62  ;;  %v5005_v43 = vcombine.high %v5003_v47, %v5003_v47  ;;  %v11044_v27 = vrot.slane %v5004_v18, 9  ;;  %v11045_v51 = vrot.slane %v5003_v47, 9  ;;  %v5055_v30 = vmax.f32 %v4996_v19, %v11043_v5  ;;  %v12472_v2 = vld [vmem:[#allocation13 + $0x3c8] ss:$16 sps:$4 sm:$0xff]   ;;  %v12480_v19 = vld [vmem:[#allocation13 + $0x3ec] ss:$16 sps:$4 sm:$0xff]  }
 0x61c   :  { %9606 = vmatprep.subr.bf16.mxu0 %v12459_v26  ;;  %9934 = vmatprep.subr.bf16.mxu1 %v12462_v0  ;;  %v4984_v41 = vmax.f32 %v4980_v6, 0.0 }
 0x61d   :  { %v11046_v60 = vrot.slane %v5005_v43, 9  ;;  %v5056_v50 = vmax.f32 %v5004_v18, %v11044_v27  ;;  %v5057_v35 = vmax.f32 %v5003_v47, %v11045_v51  ;;  %v5063_v63 = vpack.c.bf16 %v5055_v30, %v5055_v30  ;;  %v12475_v18 = vld [vmem:[#allocation13 + $0x3e0] ss:$16 sps:$4 sm:$0xff]   ;;  %v12478_v27 = vld [vmem:[#allocation13 + $0x3e8] ss:$16 sps:$4 sm:$0xff]  }
 0x61e   :  { %v4986_v37 = vmax.f32 %v4983_v4, %v4984_v41  ;;  %v6883_v41 = vcombine.high %v14945_v58, %v14945_v58 }
 0x61f   :  { %v5058_v46 = vmax.f32 %v5005_v43, %v11046_v60  ;;  %v5064_v56 = vpack.c.bf16 %v5056_v50, %v5056_v50  ;;  %v5065_v53 = vpack.c.bf16 %v5057_v35, %v5057_v35  ;;  %v5079_v52 = vrot.slane %v5063_v63, %v14796_v32  ;;  %9607 = vmatpush1.bf16.msra.mxu0 %v12457_v20  ;;  %v12483_v20 = vld [vmem:[#allocation13 + $0x404] ss:$16 sps:$4 sm:$0xff]  }
 0x620   :  { %9935 = vmatpush1.bf16.msra.mxu1 %v12460_v14  ;;  %v5006_v38 = vcombine.high %v4986_v37, %v4986_v37  ;;  %v5013_v22 = vrot.slane %v4986_v37, %v13839_v48  ;;  %9608 = vmatprep.subr.bf16.mxu0 %v12465_v54  ;;  %v12486_v14 = vld [vmem:[#allocation13 + $0x40c] ss:$16 sps:$4 sm:$0xff]   ;;  %v6912_v37 = vcombine.high %v14909_v1, %v14909_v1  ;;  %v12489_v1 = vld [vmem:[#allocation13 + $0x424] ss:$16 sps:$4 sm:$0xff]  }
 0x621   :  { %v5066_v23 = vpack.c.bf16 %v5058_v46, %v5058_v46  ;;  %v5158_v33 = vrot.slane %v5064_v56, %v14796_v32  ;;  %v5237_v11 = vrot.slane %v5065_v53, %v14796_v32  ;;  %9936 = vmatprep.subr.bf16.mxu1 %v12468_v10  ;;  %v5086_v16 = vrot.slane %v5079_v52, %v14796_v32  ;;  %v12481_v46 = vld [vmem:[#allocation13 + $0x400] ss:$16 sps:$4 sm:$0xff]  }
 0x622   :  { %v5020_v15 = vrot.slane %v5006_v38, %v13839_v48  ;;  %v5021_v55 = vcombine.high %v5013_v22, %v5013_v22  ;;  %v11047_v21 = vrot.slane %v5013_v22, 9  ;;  %v12484_v38 = vld [vmem:[#allocation13 + $0x408] ss:$16 sps:$4 sm:$0xff]  }
 0x623   :  { %v5316_v61 = vrot.slane %v5066_v23, %v14796_v32  ;;  %9609 = vmatpush1.bf16.msra.mxu0 %v12463_v45  ;;  %v5165_v62 = vrot.slane %v5158_v33, %v14796_v32  ;;  %v5244_v29 = vrot.slane %v5237_v11, %v14796_v32  ;;  %v5107_v25 = vrot.slane %v5086_v16, %v14805_v40 }
 0x624   :  { %v5022_v17 = vcombine.high %v5020_v15, %v5020_v15  ;;  %v11048_v3 = vrot.slane %v5021_v55, 9  ;;  %v11049_v13 = vrot.slane %v5020_v15, 9  ;;  %v5059_v12 = vmax.f32 %v5013_v22, %v11047_v21  ;;  %9937 = vmatpush1.bf16.msra.mxu1 %v12466_v36  ;;  %9610 = vmatprep.subr.bf16.mxu0 %v12471_v42  ;;  %v12487_v21 = vld [vmem:[#allocation13 + $0x420] ss:$16 sps:$4 sm:$0xff]  }
 0x625   :  { %9938 = vmatprep.subr.bf16.mxu1 %v12474_v28  ;;  %v5323_v47 = vrot.slane %v5316_v61, %v14796_v32  ;;  %v5186_v51 = vrot.slane %v5165_v62, %v14805_v40  ;;  %v5265_v30 = vrot.slane %v5244_v29, %v14805_v40  ;;  %v5114_v63 = vrot.slane %v5107_v25, %v14805_v40  ;;  %v12498_v62 = vld [vmem:[#allocation13 + $0x44c] ss:$16 sps:$4 sm:$0xff]  }
 0x626   :  { %v11050_v49 = vrot.slane %v5022_v17, 9  ;;  %v5060_v26 = vmax.f32 %v5021_v55, %v11048_v3  ;;  %v5061_v0 = vmax.f32 %v5020_v15, %v11049_v13  ;;  %v5067_v9 = vpack.c.bf16 %v5059_v12, %v5059_v12  ;;  %v12490_v3 = vld [vmem:[#allocation13 + $0x428] ss:$16 sps:$4 sm:$0xff]   ;;  %v12495_v13 = vld [vmem:[#allocation13 + $0x444] ss:$16 sps:$4 sm:$0xff]  }
 0x627   :  { %9611 = vmatpush1.bf16.msra.mxu0 %v12469_v31  ;;  %v5344_v10 = vrot.slane %v5323_v47, %v14805_v40  ;;  %v5193_v22 = vrot.slane %v5186_v51, %v14805_v40  ;;  %v5272_v36 = vrot.slane %v5265_v30, %v14805_v40  ;;  %v14968_v42 = vrot.slane %v6883_v41, %v14796_v32 }
 0x628   :  { %v5062_v5 = vmax.f32 %v5022_v17, %v11050_v49  ;;  %v5068_v4 = vpack.c.bf16 %v5060_v26, %v5060_v26  ;;  %v5069_v6 = vpack.c.bf16 %v5061_v0, %v5061_v0  ;;  %v5093_v43 = vrot.slane %v5067_v9, %v14796_v32  ;;  %9939 = vmatpush1.bf16.msra.mxu1 %v12472_v2  ;;  %v12493_v0 = vld [vmem:[#allocation13 + $0x440] ss:$16 sps:$4 sm:$0xff]  }
 0x629   :  { %9612 = vmatprep.subr.bf16.mxu0 %v12477_v44  ;;  %9940 = vmatprep.subr.bf16.mxu1 %v12480_v19  ;;  %v5129_v15 = vunpack.c.l.b16 %v5114_v63  ;;  %v5351_v55 = vrot.slane %v5344_v10, %v14805_v40  ;;  %v5208_v12 = vunpack.c.l.b16 %v5193_v22  ;;  %v5287_v2 = vunpack.c.l.b16 %v5272_v36  ;;  %v12516_v36 = vld [vmem:[#allocation13 + $0x4ac] ss:$16 sps:$4 sm:$0xff]  }
 0x62a   :  { %v5070_v54 = vpack.c.bf16 %v5062_v5, %v5062_v5  ;;  %v5100_v60 = vrot.slane %v5093_v43, %v14796_v32  ;;  %v5172_v50 = vrot.slane %v5068_v4, %v14796_v32  ;;  %v5251_v35 = vrot.slane %v5069_v6, %v14796_v32  ;;  %v12496_v5 = vld [vmem:[#allocation13 + $0x448] ss:$16 sps:$4 sm:$0xff]   ;;  %v12501_v4 = vld [vmem:[#allocation13 + $0x464] ss:$16 sps:$4 sm:$0xff]   ;;  %v12504_v43 = vld [vmem:[#allocation13 + $0x46c] ss:$16 sps:$4 sm:$0xff]  }
 0x62b   :  { %9613 = vmatpush1.bf16.msra.mxu0 %v12475_v18  ;;  %v5366_v26 = vunpack.c.l.b16 %v5351_v55 }
 0x62c   :  { %v5121_v56 = vrot.slane %v5100_v60, %v14805_v40  ;;  %v5179_v53 = vrot.slane %v5172_v50, %v14796_v32  ;;  %v5258_v52 = vrot.slane %v5251_v35, %v14796_v32  ;;  %v5330_v45 = vrot.slane %v5070_v54, %v14796_v32  ;;  %9941 = vmatpush1.bf16.msra.mxu1 %v12478_v27  ;;  %v12499_v54 = vld [vmem:[#allocation13 + $0x460] ss:$16 sps:$4 sm:$0xff]   ;;  %v12502_v50 = vld [vmem:[#allocation13 + $0x468] ss:$16 sps:$4 sm:$0xff]   ;;  %v12507_v35 = vld [vmem:[#allocation13 + $0x484] ss:$16 sps:$4 sm:$0xff]  }
 0x62d   :  { %9623 = vmatprep.subr.bf16.mxu0 %v12483_v20  ;;  %9951 = vmatprep.subr.bf16.mxu1 %v12486_v14 }
 0x62e   :  { %v5128_v23 = vrot.slane %v5121_v56, %v14805_v40  ;;  %v5200_v33 = vrot.slane %v5179_v53, %v14805_v40  ;;  %v5279_v11 = vrot.slane %v5258_v52, %v14805_v40  ;;  %v5337_v28 = vrot.slane %v5330_v45, %v14796_v32  ;;  %9615 = vmatmul.mubr.bf16.vlgmr.msra.gmra.mrb[48].mxu0 %v6912_v37  ;;  %v12505_v53 = vld [vmem:[#allocation13 + $0x480] ss:$16 sps:$4 sm:$0xff]   ;;  %v12508_v52 = vld [vmem:[#allocation13 + $0x488] ss:$16 sps:$4 sm:$0xff]  }
 0x62f   :  { %9943 = vmatmul.mubr.bf16.vlgmr.msra.gmra.mrb[48].mxu1 %v6912_v37  ;;  %9624 = vmatpush1.bf16.msra.mxu0 %v12481_v46  ;;  %v12510_v46 = vld [vmem:[#allocation13 + $0x48c] ss:$16 sps:$4 sm:$0xff]  }
 0x630   :  { %v5130_v16 = vunpack.c.l.b16 %v5128_v23  ;;  %v5207_v61 = vrot.slane %v5200_v33, %v14805_v40  ;;  %v5286_v31 = vrot.slane %v5279_v11, %v14805_v40  ;;  %v5358_v17 = vrot.slane %v5337_v28, %v14805_v40  ;;  %9655 = vmatprep.mubr.bf16.mxu0 %v14968_v42  ;;  %9952 = vmatpush1.bf16.msra.mxu1 %v12484_v38  ;;  %v12513_v38 = vld [vmem:[#allocation13 + $0x4a4] ss:$16 sps:$4 sm:$0xff]   ;;  %v12511_v28 = vld [vmem:[#allocation13 + $0x4a0] ss:$16 sps:$4 sm:$0xff]  }
 0x631   :  { %9983 = vmatprep.mubr.bf16.mxu1 %v14968_v42  ;;  %9625 = vmatprep.subr.bf16.mxu0 %v12489_v1 }
 0x632   :  { %v5131_v29 = vrot.slane %v5130_v16, 7  ;;  %v5209_v44 = vunpack.c.l.b16 %v5207_v61  ;;  %v5288_v19 = vunpack.c.l.b16 %v5286_v31  ;;  %v5365_v49 = vrot.slane %v5358_v17, %v14805_v40  ;;  %9953 = vmatprep.subr.bf16.mxu1 %v12492_v8  ;;  %v12514_v16 = vld [vmem:[#allocation13 + $0x4a8] ss:$16 sps:$4 sm:$0xff]   ;;  %v12519_v61 = vld [vmem:[#allocation13 + $0x4c4] ss:$16 sps:$4 sm:$0xff]  }
 0x633   :  { %9626 = vmatpush1.bf16.msra.mxu0 %v12487_v21 }
 0x634   :  { %v5132_v9 = vsel %vm1565_vm5, %v5131_v29, %v5129_v15  ;;  %v5210_v25 = vrot.slane %v5209_v44, 7  ;;  %v5289_v47 = vrot.slane %v5288_v19, 7  ;;  %v5367_v18 = vunpack.c.l.b16 %v5365_v49  ;;  %9954 = vmatpush1.bf16.msra.mxu1 %v12490_v3  ;;  %9627 = vmatprep.subr.bf16.mxu0 %v12495_v13  ;;  %v12522_v3 = vld [vmem:[#allocation13 + $0x4cc] ss:$16 sps:$4 sm:$0xff]   ;;  %v12525_v29 = vld [vmem:[#allocation13 + $0x4e4] ss:$16 sps:$4 sm:$0xff]  }
 0x635   :  { %v5133_v6 = vpack.c.b16 %v5132_v9, %v5132_v9  ;;  %9955 = vmatprep.subr.bf16.mxu1 %v12498_v62  ;;  %v12520_v62 = vld [vmem:[#allocation13 + $0x4c8] ss:$16 sps:$4 sm:$0xff]  }
 0x636   :  { %v5211_v27 = vsel %vm1565_vm5, %v5210_v25, %v5208_v12  ;;  %v5290_v51 = vsel %vm1565_vm5, %v5289_v47, %v5287_v2  ;;  %v5368_v30 = vrot.slane %v5367_v18, 7  ;;  %v12517_v2 = vld [vmem:[#allocation13 + $0x4c0] ss:$16 sps:$4 sm:$0xff]  }
 0x637   :  { %v5140_v20 = vrot.slane %v5133_v6, %v14796_v32  ;;  %v5212_v14 = vpack.c.b16 %v5211_v27, %v5211_v27  ;;  %v5291_v41 = vpack.c.b16 %v5290_v51, %v5290_v51  ;;  %9628 = vmatpush1.bf16.msra.mxu0 %v12493_v0  ;;  %v12528_v0 = vld [vmem:[#allocation13 + $0x4ec] ss:$16 sps:$4 sm:$0xff]   ;;  %v12523_v6 = vld [vmem:[#allocation13 + $0x4e0] ss:$16 sps:$4 sm:$0xff]   ;;  %v12526_v27 = vld [vmem:[#allocation13 + $0x4e8] ss:$16 sps:$4 sm:$0xff]  }
 0x638   :  { %v5369_v60 = vsel %vm1565_vm5, %v5368_v30, %v5366_v26  ;;  %9956 = vmatpush1.bf16.msra.mxu1 %v12496_v5  ;;  %9629 = vmatprep.subr.bf16.mxu0 %v12501_v4  ;;  %v12531_v51 = vld [vmem:[#allocation13 + $0x504] ss:$16 sps:$4 sm:$0xff]  }
 0x639   :  { %11051 = vst.sshfl [vmem:[#allocation4 + $0x8] sm:$0x1 pattern:$0x73625140] %v5140_v20  ;;  %v5219_v63 = vrot.slane %v5212_v14, %v14796_v32  ;;  %v5298_v10 = vrot.slane %v5291_v41, %v14796_v32  ;;  %v5370_v37 = vpack.c.b16 %v5369_v60, %v5369_v60  ;;  %9957 = vmatprep.subr.bf16.mxu1 %v12504_v43 }
 0x63b   :  { %11052 = vst.sshfl [vmem:[#allocation4 + $0x9] sm:$0x1 pattern:$0x73625140] %v5219_v63  ;;  %v5377_v56 = vrot.slane %v5370_v37, %v14796_v32  ;;  %9630 = vmatpush1.bf16.msra.mxu0 %v12499_v54  ;;  %v12534_v54 = vld [vmem:[#allocation13 + $0x50c] ss:$16 sps:$4 sm:$0xff]  }
 0x63c   :  { %11053 = vst.sshfl [vmem:[#allocation4 + $0xa] sm:$0x1 pattern:$0x73625140] %v5298_v10  ;;  %9958 = vmatpush1.bf16.msra.mxu1 %v12502_v50  ;;  %9631 = vmatprep.subr.bf16.mxu0 %v12507_v35  ;;  %v5719_v45 = vpop.f32.mrb[40].mxu0  ;;  %v5893_v23 = vpop.f32.mrb[40].mxu1 }
 0x63d   :  { %11054 = vst.sshfl [vmem:[#allocation4 + $0xb] sm:$0x1 pattern:$0x73625140] %v5377_v56  ;;  %9959 = vmatprep.subr.bf16.mxu1 %v12510_v46  ;;  %v5720_v22 = vadd.f32 %v5719_v45, %v14914_v24  ;;  %v5721_v1 = vpop.f32.mrb[41].mxu0  ;;  %v5895_v11 = vpop.f32.mrb[41].mxu1 }
 0x63e   :  { %v5722_v33 = vpop.f32.mrb[42].mxu0  ;;  %v5896_v21 = vpop.f32.mrb[42].mxu1  ;;  %v12529_v35 = vld [vmem:[#allocation13 + $0x500] ss:$16 sps:$4 sm:$0xff]   ;;  %v12532_v37 = vld [vmem:[#allocation13 + $0x508] ss:$16 sps:$4 sm:$0xff]  }
 0x63f   :  { %9632 = vmatpush1.bf16.msra.mxu0 %v12505_v53  ;;  %v5723_v8 = vadd.f32 %v5722_v33, %v14920_v7  ;;  %v5908_v15 = vadd.f32 %v5893_v23, %v5720_v22  ;;  %v5724_v55 = vpop.f32.mrb[43].mxu0  ;;  %v5898_v31 = vpop.f32.mrb[43].mxu1  ;;  %v12537_v46 = vld [vmem:[#allocation13 + $0x524] ss:$16 sps:$4 sm:$0xff]   ;;  %v12535_v11 = vld [vmem:[#allocation13 + $0x520] ss:$16 sps:$4 sm:$0xff]  }
 0x640   :  { %9960 = vmatpush1.bf16.msra.mxu1 %v12508_v52  ;;  %9633 = vmatprep.subr.bf16.mxu0 %v12513_v38  ;;  %v12540_v38 = vld [vmem:[#allocation13 + $0x52c] ss:$16 sps:$4 sm:$0xff]  }
 0x641   :  { %9961 = vmatprep.subr.bf16.mxu1 %v12516_v36  ;;  %v5919_v24 = vadd.f32 %v14916_v57, %v5908_v15  ;;  %v5909_v17 = vadd.f32 %v5896_v21, %v5723_v8  ;;  %v12543_v8 = vld [vmem:[#allocation13 + $0x544] ss:$16 sps:$4 sm:$0xff]  }
 0x643   :  { %9634 = vmatpush1.bf16.msra.mxu0 %v12511_v28  ;;  %v5923_v13 = vmax.f32 %v5919_v24, 0.0  ;;  %v5920_v12 = vadd.f32 %v14916_v57, %v5909_v17 }
 0x644   :  { %9962 = vmatpush1.bf16.msra.mxu1 %v12514_v16  ;;  %v5727_v7 = vpop.f32.mrb[44].mxu0  ;;  %9635 = vmatprep.subr.bf16.mxu0 %v12519_v61  ;;  %v5901_v26 = vpop.f32.mrb[44].mxu1  ;;  %v12546_v61 = vld [vmem:[#allocation13 + $0x54c] ss:$16 sps:$4 sm:$0xff]  }
 0x645   :  { %v5728_v44 = vadd.f32 %v5727_v7, %v14924_v59  ;;  %v5924_v19 = vmax.f32 %v5920_v12, 0.0  ;;  %9963 = vmatprep.subr.bf16.mxu1 %v12522_v3  ;;  %v5729_v49 = vpop.f32.mrb[45].mxu0  ;;  %v5903_v25 = vpop.f32.mrb[45].mxu1  ;;  %v12541_v12 = vld [vmem:[#allocation13 + $0x540] ss:$16 sps:$4 sm:$0xff]  }
 0x646   :  { %v5730_v9 = vpop.f32.mrb[46].mxu0  ;;  %v5904_v4 = vpop.f32.mrb[46].mxu1 }
 0x647   :  { %v5927_v47 = vmax.f32 %v5923_v13, %v5924_v19  ;;  %9636 = vmatpush1.bf16.msra.mxu0 %v12517_v2  ;;  %v5731_v18 = vadd.f32 %v5730_v9, %v14928_v39  ;;  %v5910_v5 = vadd.f32 %v5901_v26, %v5728_v44  ;;  %v5732_v43 = vpop.f32.mrb[47].mxu0  ;;  %v5906_v59 = vpop.f32.mrb[47].mxu1  ;;  %v12549_v44 = vld [vmem:[#allocation13 + $0x564] ss:$16 sps:$4 sm:$0xff]   ;;  %v12552_v26 = vld [vmem:[#allocation13 + $0x56c] ss:$16 sps:$4 sm:$0xff]  }
 0x648   :  { %9964 = vmatpush1.bf16.msra.mxu1 %v12520_v62  ;;  %9637 = vmatprep.subr.bf16.mxu0 %v12525_v29  ;;  %v12544_v29 = vld [vmem:[#allocation13 + $0x548] ss:$16 sps:$4 sm:$0xff]  }
 0x649   :  { %v5931_v30 = vcombine.high %v5927_v47, %v5927_v47  ;;  %v5938_v20 = vrot.slane %v5927_v47, %v13839_v48  ;;  %v5921_v14 = vadd.f32 %v14916_v57, %v5910_v5  ;;  %v5911_v41 = vadd.f32 %v5904_v4, %v5731_v18  ;;  %9965 = vmatprep.subr.bf16.mxu1 %v12528_v0  ;;  %v12547_v5 = vld [vmem:[#allocation13 + $0x560] ss:$16 sps:$4 sm:$0xff]  }
 0x64b   :  { %v5945_v60 = vrot.slane %v5931_v30, %v13839_v48  ;;  %v5946_v39 = vcombine.high %v5938_v20, %v5938_v20  ;;  %v11110_v50 = vrot.slane %v5938_v20, 9  ;;  %9638 = vmatpush1.bf16.msra.mxu0 %v12523_v6  ;;  %v5925_v63 = vmax.f32 %v5921_v14, 0.0  ;;  %v12558_v14 = vld [vmem:[#allocation13 + $0x58c] ss:$16 sps:$4 sm:$0xff]  }
 0x64c   :  { %v5922_v10 = vadd.f32 %v14916_v57, %v5911_v41  ;;  %9966 = vmatpush1.bf16.msra.mxu1 %v12526_v27  ;;  %9639 = vmatprep.subr.bf16.mxu0 %v12531_v51  ;;  %v12538_v57 = vld [vmem:[#allocation13 + $0x528] ss:$16 sps:$4 sm:$0xff]  }
 0x64d   :  { %v5947_v56 = vcombine.high %v5945_v60, %v5945_v60  ;;  %v11111_v53 = vrot.slane %v5946_v39, 9  ;;  %v11112_v52 = vrot.slane %v5945_v60, 9  ;;  %v5997_v45 = vmax.f32 %v5938_v20, %v11110_v50  ;;  %9967 = vmatprep.subr.bf16.mxu1 %v12534_v54  ;;  %v12550_v51 = vld [vmem:[#allocation13 + $0x568] ss:$16 sps:$4 sm:$0xff]   ;;  %v12555_v20 = vld [vmem:[#allocation13 + $0x584] ss:$16 sps:$4 sm:$0xff]  }
 0x64e   :  { %v5926_v22 = vmax.f32 %v5922_v10, 0.0 }
 0x64f   :  { %v11113_v36 = vrot.slane %v5947_v56, 9  ;;  %v5998_v1 = vmax.f32 %v5946_v39, %v11111_v53  ;;  %v5999_v23 = vmax.f32 %v5945_v60, %v11112_v52  ;;  %v6005_v33 = vpack.c.bf16 %v5997_v45, %v5997_v45  ;;  %9640 = vmatpush1.bf16.msra.mxu0 %v12529_v35  ;;  %v12556_v53 = vld [vmem:[#allocation13 + $0x588] ss:$16 sps:$4 sm:$0xff]  }
 0x650   :  { %v5928_v28 = vmax.f32 %v5925_v63, %v5926_v22  ;;  %9968 = vmatpush1.bf16.msra.mxu1 %v12532_v37  ;;  %9641 = vmatprep.subr.bf16.mxu0 %v12537_v46  ;;  %v12553_v63 = vld [vmem:[#allocation13 + $0x580] ss:$16 sps:$4 sm:$0xff]   ;;  %v12564_v22 = vld [vmem:[#allocation13 + $0x5ac] ss:$16 sps:$4 sm:$0xff]  }
 0x651   :  { %v6000_v15 = vmax.f32 %v5947_v56, %v11113_v36  ;;  %v6006_v55 = vpack.c.bf16 %v5998_v1, %v5998_v1  ;;  %v6007_v21 = vpack.c.bf16 %v5999_v23, %v5999_v23  ;;  %v6021_v16 = vrot.slane %v6005_v33, %v14796_v32  ;;  %9969 = vmatprep.subr.bf16.mxu1 %v12540_v38  ;;  %v12561_v38 = vld [vmem:[#allocation13 + $0x5a4] ss:$16 sps:$4 sm:$0xff]  }
 0x652   :  { %v5948_v31 = vcombine.high %v5928_v28, %v5928_v28  ;;  %v5955_v24 = vrot.slane %v5928_v28, %v13839_v48 }
 0x653   :  { %v6008_v17 = vpack.c.bf16 %v6000_v15, %v6000_v15  ;;  %v6100_v3 = vrot.slane %v6006_v55, %v14796_v32  ;;  %v6179_v13 = vrot.slane %v6007_v21, %v14796_v32  ;;  %9642 = vmatpush1.bf16.msra.mxu0 %v12535_v11  ;;  %v6028_v19 = vrot.slane %v6021_v16, %v14796_v32  ;;  %v12562_v16 = vld [vmem:[#allocation13 + $0x5a8] ss:$16 sps:$4 sm:$0xff]  }
 0x654   :  { %v5962_v2 = vrot.slane %v5948_v31, %v13839_v48  ;;  %v5963_v7 = vcombine.high %v5955_v24, %v5955_v24  ;;  %v11114_v62 = vrot.slane %v5955_v24, 9  ;;  %9970 = vmatpush1.bf16.msra.mxu1 %v12538_v57  ;;  %9643 = vmatprep.subr.bf16.mxu0 %v12543_v8  ;;  %v12559_v57 = vld [vmem:[#allocation13 + $0x5a0] ss:$16 sps:$4 sm:$0xff]  }
 0x655   :  { %v6258_v49 = vrot.slane %v6008_v17, %v14796_v32  ;;  %9971 = vmatprep.subr.bf16.mxu1 %v12546_v61  ;;  %v6107_v18 = vrot.slane %v6100_v3, %v14796_v32  ;;  %v6186_v48 = vrot.slane %v6179_v13, %v14796_v32  ;;  %v6049_v59 = vrot.slane %v6028_v19, %v14805_v40  ;;  %v12567_v61 = vld [vmem:[#allocation13 + $0x5c4] ss:$16 sps:$4 sm:$0xff]   ;;  %v12570_v17 = vld [vmem:[#allocation13 + $0x5cc] ss:$16 sps:$4 sm:$0xff]  }
 0x656   :  { %v5964_v0 = vcombine.high %v5962_v2, %v5962_v2  ;;  %v11115_v9 = vrot.slane %v5963_v7, 9  ;;  %v11116_v25 = vrot.slane %v5962_v2, 9  ;;  %v6001_v47 = vmax.f32 %v5955_v24, %v11114_v62 }
 0x657   :  { %9644 = vmatpush1.bf16.msra.mxu0 %v12541_v12  ;;  %v6265_v30 = vrot.slane %v6258_v49, %v14796_v32  ;;  %v6128_v50 = vrot.slane %v6107_v18, %v14805_v40  ;;  %v6207_v35 = vrot.slane %v6186_v48, %v14805_v40  ;;  %v6056_v52 = vrot.slane %v6049_v59, %v14805_v40  ;;  %v12574_v59 = vld [vmem:[#allocation13 + $0x5e8] ss:$16 sps:$4 sm:$0xff]  }
 0x658   :  { %v11117_v4 = vrot.slane %v5964_v0, 9  ;;  %v6002_v6 = vmax.f32 %v5963_v7, %v11115_v9  ;;  %v6003_v43 = vmax.f32 %v5962_v2, %v11116_v25  ;;  %v6009_v27 = vpack.c.bf16 %v6001_v47, %v6001_v47  ;;  %9972 = vmatpush1.bf16.msra.mxu1 %v12544_v29  ;;  %9645 = vmatprep.subr.bf16.mxu0 %v12549_v44  ;;  %v12565_v29 = vld [vmem:[#allocation13 + $0x5c0] ss:$16 sps:$4 sm:$0xff]   ;;  %v12573_v9 = vld [vmem:[#allocation13 + $0x5e4] ss:$16 sps:$4 sm:$0xff]  }
 0x659   :  { %9973 = vmatprep.subr.bf16.mxu1 %v12552_v26  ;;  %v6286_v45 = vrot.slane %v6265_v30, %v14805_v40  ;;  %v6135_v11 = vrot.slane %v6128_v50, %v14805_v40  ;;  %v6214_v28 = vrot.slane %v6207_v35, %v14805_v40  ;;  %v6071_v31 = vunpack.c.l.b16 %v6056_v52  ;;  %v12576_v47 = vld [vmem:[#allocation13 + $0x5ec] ss:$16 sps:$4 sm:$0xff]   ;;  %v12579_v30 = vld [vmem:[#allocation13 + $0x604] ss:$16 sps:$4 sm:$0xff]  }
 0x65a   :  { %v6004_v41 = vmax.f32 %v5964_v0, %v11117_v4  ;;  %v6010_v54 = vpack.c.bf16 %v6002_v6, %v6002_v6  ;;  %v6011_v60 = vpack.c.bf16 %v6003_v43, %v6003_v43  ;;  %v6035_v39 = vrot.slane %v6009_v27, %v14796_v32  ;;  %v12568_v0 = vld [vmem:[#allocation13 + $0x5c8] ss:$16 sps:$4 sm:$0xff]   ;;  %v12571_v43 = vld [vmem:[#allocation13 + $0x5e0] ss:$16 sps:$4 sm:$0xff]   ;;  %v12588_v52 = vld [vmem:[#allocation13 + $0x62c] ss:$16 sps:$4 sm:$0xff]  }
 0x65b   :  { %9646 = vmatpush1.bf16.msra.mxu0 %v12547_v5  ;;  %v6293_v24 = vrot.slane %v6286_v45, %v14805_v40  ;;  %v6150_v7 = vunpack.c.l.b16 %v6135_v11  ;;  %v6229_v62 = vunpack.c.l.b16 %v6214_v28  ;;  %v12586_v45 = vld [vmem:[#allocation13 + $0x628] ss:$16 sps:$4 sm:$0xff]   ;;  %v12603_v28 = vld [vmem:[#allocation13 + $0x684] ss:$16 sps:$4 sm:$0xff]  }
 0x65c   :  { %v6012_v10 = vpack.c.bf16 %v6004_v41, %v6004_v41  ;;  %v6042_v37 = vrot.slane %v6035_v39, %v14796_v32  ;;  %v6114_v46 = vrot.slane %v6010_v54, %v14796_v32  ;;  %v6193_v56 = vrot.slane %v6011_v60, %v14796_v32  ;;  %9974 = vmatpush1.bf16.msra.mxu1 %v12550_v51  ;;  %v12582_v54 = vld [vmem:[#allocation13 + $0x60c] ss:$16 sps:$4 sm:$0xff]   ;;  %v12598_v11 = vld [vmem:[#allocation13 + $0x668] ss:$16 sps:$4 sm:$0xff]  }
 0x65d   :  { %9647 = vmatprep.subr.bf16.mxu0 %v12555_v20  ;;  %9975 = vmatprep.subr.bf16.mxu1 %v12558_v14  ;;  %v6308_v25 = vunpack.c.l.b16 %v6293_v24  ;;  %v12618_v24 = vld [vmem:[#allocation13 + $0x6cc] ss:$16 sps:$4 sm:$0xff]  }
 0x65e   :  { %v6063_v36 = vrot.slane %v6042_v37, %v14805_v40  ;;  %v6121_v1 = vrot.slane %v6114_v46, %v14796_v32  ;;  %v6200_v23 = vrot.slane %v6193_v56, %v14796_v32  ;;  %v6272_v33 = vrot.slane %v6012_v10, %v14796_v32  ;;  %v12580_v37 = vld [vmem:[#allocation13 + $0x608] ss:$16 sps:$4 sm:$0xff]   ;;  %v12585_v56 = vld [vmem:[#allocation13 + $0x624] ss:$16 sps:$4 sm:$0xff]  }
 0x65f   :  { %9648 = vmatpush1.bf16.msra.mxu0 %v12553_v63  ;;  %v12577_v63 = vld [vmem:[#allocation13 + $0x600] ss:$16 sps:$4 sm:$0xff]   ;;  %v15042_v10 = vrot.slane %v14945_v58, %v14796_v32 }
 0x660   :  { %v6070_v8 = vrot.slane %v6063_v36, %v14805_v40  ;;  %v6142_v15 = vrot.slane %v6121_v1, %v14805_v40  ;;  %v6221_v55 = vrot.slane %v6200_v23, %v14805_v40  ;;  %v6279_v21 = vrot.slane %v6272_v33, %v14796_v32  ;;  %9976 = vmatpush1.bf16.msra.mxu1 %v12556_v53  ;;  %v12583_v58 = vld [vmem:[#allocation13 + $0x620] ss:$16 sps:$4 sm:$0xff]   ;;  %v12592_v1 = vld [vmem:[#allocation13 + $0x648] ss:$16 sps:$4 sm:$0xff]   ;;  %v12600_v23 = vld [vmem:[#allocation13 + $0x66c] ss:$16 sps:$4 sm:$0xff]  }
 0x661   :  { %9649 = vmatprep.subr.bf16.mxu0 %v12561_v38  ;;  %9977 = vmatprep.subr.bf16.mxu1 %v12564_v22  ;;  %v6915_v53 = vcombine.high %v14968_v42, %v14968_v42  ;;  %v12591_v38 = vld [vmem:[#allocation13 + $0x644] ss:$16 sps:$4 sm:$0xff]   ;;  %v12594_v22 = vld [vmem:[#allocation13 + $0x64c] ss:$16 sps:$4 sm:$0xff]   ;;  %v12589_v36 = vld [vmem:[#allocation13 + $0x640] ss:$16 sps:$4 sm:$0xff]  }
 0x662   :  { %v6072_v3 = vunpack.c.l.b16 %v6070_v8  ;;  %v6149_v13 = vrot.slane %v6142_v15, %v14805_v40  ;;  %v6228_v12 = vrot.slane %v6221_v55, %v14805_v40  ;;  %v6300_v2 = vrot.slane %v6279_v21, %v14805_v40  ;;  %v12597_v42 = vld [vmem:[#allocation13 + $0x664] ss:$16 sps:$4 sm:$0xff]   ;;  %v12595_v33 = vld [vmem:[#allocation13 + $0x660] ss:$16 sps:$4 sm:$0xff]   ;;  %v12604_v15 = vld [vmem:[#allocation13 + $0x688] ss:$16 sps:$4 sm:$0xff]  }
 0x663   :  { %9650 = vmatpush1.bf16.msra.mxu0 %v12559_v57  ;;  %v12606_v57 = vld [vmem:[#allocation13 + $0x68c] ss:$16 sps:$4 sm:$0xff]   ;;  %v12601_v8 = vld [vmem:[#allocation13 + $0x680] ss:$16 sps:$4 sm:$0xff]   ;;  %v12609_v55 = vld [vmem:[#allocation13 + $0x6a4] ss:$16 sps:$4 sm:$0xff]  }
 0x664   :  { %v6073_v44 = vrot.slane %v6072_v3, 7  ;;  %v6151_v19 = vunpack.c.l.b16 %v6149_v13  ;;  %v6230_v49 = vunpack.c.l.b16 %v6228_v12  ;;  %v6307_v26 = vrot.slane %v6300_v2, %v14805_v40  ;;  %9978 = vmatpush1.bf16.msra.mxu1 %v12562_v16  ;;  %9651 = vmatprep.subr.bf16.mxu0 %v12567_v61  ;;  %v12612_v21 = vld [vmem:[#allocation13 + $0x6ac] ss:$16 sps:$4 sm:$0xff]   ;;  %v12607_v16 = vld [vmem:[#allocation13 + $0x6a0] ss:$16 sps:$4 sm:$0xff]  }
 0x665   :  { %9979 = vmatprep.subr.bf16.mxu1 %v12570_v17  ;;  %v12610_v61 = vld [vmem:[#allocation13 + $0x6a8] ss:$16 sps:$4 sm:$0xff]   ;;  %v12613_v17 = vld [vmem:[#allocation13 + $0x6c0] ss:$16 sps:$4 sm:$0xff]   ;;  %v12621_v13 = vld [vmem:[#allocation13 + $0x6e4] ss:$16 sps:$4 sm:$0xff]  }
 0x666   :  { %v6074_v18 = vsel %vm1565_vm5, %v6073_v44, %v6071_v31  ;;  %v6152_v48 = vrot.slane %v6151_v19, 7  ;;  %v6231_v5 = vrot.slane %v6230_v49, 7  ;;  %v6309_v4 = vunpack.c.l.b16 %v6307_v26  ;;  %v12615_v31 = vld [vmem:[#allocation13 + $0x6c4] ss:$16 sps:$4 sm:$0xff]   ;;  %v12616_v3 = vld [vmem:[#allocation13 + $0x6c8] ss:$16 sps:$4 sm:$0xff]  }
 0x667   :  { %v6075_v6 = vpack.c.b16 %v6074_v18, %v6074_v18  ;;  %9652 = vmatpush1.bf16.msra.mxu0 %v12565_v29  ;;  %v12624_v12 = vld [vmem:[#allocation13 + $0x6ec] ss:$16 sps:$4 sm:$0xff]   ;;  %v12619_v2 = vld [vmem:[#allocation13 + $0x6e0] ss:$16 sps:$4 sm:$0xff]   ;;  %v12628_v19 = vld [vmem:[#allocation13 + $0x708] ss:$16 sps:$4 sm:$0xff]  }
 0x668   :  { %v6153_v27 = vsel %vm1565_vm5, %v6152_v48, %v6150_v7  ;;  %v6232_v51 = vsel %vm1565_vm5, %v6231_v5, %v6229_v62  ;;  %v6310_v40 = vrot.slane %v6309_v4, 7  ;;  %9980 = vmatpush1.bf16.msra.mxu1 %v12568_v0  ;;  %9653 = vmatprep.subr.bf16.mxu0 %v12573_v9  ;;  %v12622_v7 = vld [vmem:[#allocation13 + $0x6e8] ss:$16 sps:$4 sm:$0xff]   ;;  %v12627_v62 = vld [vmem:[#allocation13 + $0x704] ss:$16 sps:$4 sm:$0xff]  }
 0x669   :  { %v6082_v20 = vrot.slane %v6075_v6, %v14796_v32  ;;  %v6154_v14 = vpack.c.b16 %v6153_v27, %v6153_v27  ;;  %v6233_v41 = vpack.c.b16 %v6232_v51, %v6232_v51  ;;  %9981 = vmatprep.subr.bf16.mxu1 %v12576_v47  ;;  %v12630_v29 = vld [vmem:[#allocation13 + $0x70c] ss:$16 sps:$4 sm:$0xff]   ;;  %v12625_v44 = vld [vmem:[#allocation13 + $0x700] ss:$16 sps:$4 sm:$0xff]   ;;  %v12633_v49 = vld [vmem:[#allocation13 + $0x724] ss:$16 sps:$4 sm:$0xff]  }
 0x66a   :  { %v6311_v60 = vsel %vm1565_vm5, %v6310_v40, %v6308_v25  ;;  %v12636_v26 = vld [vmem:[#allocation13 + $0x72c] ss:$16 sps:$4 sm:$0xff]   ;;  %v12631_v0 = vld [vmem:[#allocation13 + $0x720] ss:$16 sps:$4 sm:$0xff]   ;;  %v12634_v9 = vld [vmem:[#allocation13 + $0x728] ss:$16 sps:$4 sm:$0xff]  }
 0x66b   :  { %11118 = vst.sshfl [vmem:[#allocation4 + $0xc] sm:$0x1 pattern:$0x73625140] %v6082_v20  ;;  %v6161_v39 = vrot.slane %v6154_v14, %v14796_v32  ;;  %v6240_v50 = vrot.slane %v6233_v41, %v14796_v32  ;;  %v6312_v35 = vpack.c.b16 %v6311_v60, %v6311_v60  ;;  %9654 = vmatpush1.bf16.msra.mxu0 %v12571_v43  ;;  %v12639_v25 = vld [vmem:[#allocation13 + $0x744] ss:$16 sps:$4 sm:$0xff]  }
 0x66c   :  { %9982 = vmatpush1.bf16.msra.mxu1 %v12574_v59  ;;  %9664 = vmatprep.subr.bf16.mxu0 %v12579_v30  ;;  %v12642_v47 = vld [vmem:[#allocation13 + $0x74c] ss:$16 sps:$4 sm:$0xff]   ;;  %v12637_v18 = vld [vmem:[#allocation13 + $0x740] ss:$16 sps:$4 sm:$0xff]   ;;  %v12640_v48 = vld [vmem:[#allocation13 + $0x748] ss:$16 sps:$4 sm:$0xff]  }
 0x66d   :  { %11119 = vst.sshfl [vmem:[#allocation4 + $0xd] sm:$0x1 pattern:$0x73625140] %v6161_v39  ;;  %v6319_v46 = vrot.slane %v6312_v35, %v14796_v32  ;;  %9992 = vmatprep.subr.bf16.mxu1 %v12582_v54  ;;  %v12645_v5 = vld [vmem:[#allocation13 + $0x764] ss:$16 sps:$4 sm:$0xff]  }
 0x66e   :  { %11120 = vst.sshfl [vmem:[#allocation4 + $0xe] sm:$0x1 pattern:$0x73625140] %v6240_v50  ;;  %9656 = vmatmul.mubr.bf16.vlgmr.msra.gmra.mrb[48].mxu0 %v15042_v10  ;;  %v12648_v4 = vld [vmem:[#allocation13 + $0x76c] ss:$16 sps:$4 sm:$0xff]  }
 0x66f   :  { %11121 = vst.sshfl [vmem:[#allocation4 + $0xf] sm:$0x1 pattern:$0x73625140] %v6319_v46  ;;  %9984 = vmatmul.mubr.bf16.vlgmr.msra.gmra.mrb[48].mxu1 %v15042_v10  ;;  %9665 = vmatpush1.bf16.msra.mxu0 %v12577_v63  ;;  %v12643_v6 = vld [vmem:[#allocation13 + $0x760] ss:$16 sps:$4 sm:$0xff]  }
 0x670   :  { %9696 = vmatprep.mubr.bf16.mxu0 %v6915_v53  ;;  %9993 = vmatpush1.bf16.msra.mxu1 %v12580_v37  ;;  %v12646_v43 = vld [vmem:[#allocation13 + $0x768] ss:$16 sps:$4 sm:$0xff]   ;;  %v12651_v27 = vld [vmem:[#allocation13 + $0x784] ss:$16 sps:$4 sm:$0xff]   ;;  %v12654_v51 = vld [vmem:[#allocation13 + $0x78c] ss:$16 sps:$4 sm:$0xff]  }
 0x671   :  { %10024 = vmatprep.mubr.bf16.mxu1 %v6915_v53  ;;  %9666 = vmatprep.subr.bf16.mxu0 %v12585_v56  ;;  %v12649_v40 = vld [vmem:[#allocation13 + $0x780] ss:$16 sps:$4 sm:$0xff]   ;;  %v12652_v59 = vld [vmem:[#allocation13 + $0x788] ss:$16 sps:$4 sm:$0xff]   ;;  %v12657_v30 = vld [vmem:[#allocation13 + $0x7a4] ss:$16 sps:$4 sm:$0xff]  }
 0x672   :  { %9994 = vmatprep.subr.bf16.mxu1 %v12588_v52  ;;  %v12660_v20 = vld [vmem:[#allocation13 + $0x7ac] ss:$16 sps:$4 sm:$0xff]   ;;  %v12655_v14 = vld [vmem:[#allocation13 + $0x7a0] ss:$16 sps:$4 sm:$0xff]   ;;  %v12658_v41 = vld [vmem:[#allocation13 + $0x7a8] ss:$16 sps:$4 sm:$0xff]  }
 0x673   :  { %9667 = vmatpush1.bf16.msra.mxu0 %v12583_v58  ;;  %v12663_v54 = vld [vmem:[#allocation13 + $0x7c4] ss:$16 sps:$4 sm:$0xff]   ;;  %v12666_v60 = vld [vmem:[#allocation13 + $0x7cc] ss:$16 sps:$4 sm:$0xff]   ;;  %v12661_v39 = vld [vmem:[#allocation13 + $0x7c0] ss:$16 sps:$4 sm:$0xff]  }
 0x674   :  { %9995 = vmatpush1.bf16.msra.mxu1 %v12586_v45  ;;  %9668 = vmatprep.subr.bf16.mxu0 %v12591_v38  ;;  %v12664_v35 = vld [vmem:[#allocation13 + $0x7c8] ss:$16 sps:$4 sm:$0xff]   ;;  %v12669_v63 = vld [vmem:[#allocation13 + $0x7e4] ss:$16 sps:$4 sm:$0xff]   ;;  %v12672_v37 = vld [vmem:[#allocation13 + $0x7ec] ss:$16 sps:$4 sm:$0xff]  }
 0x675   :  { %9996 = vmatprep.subr.bf16.mxu1 %v12594_v22  ;;  %v12667_v56 = vld [vmem:[#allocation13 + $0x7e0] ss:$16 sps:$4 sm:$0xff]   ;;  %v12670_v53 = vld [vmem:[#allocation13 + $0x7e8] ss:$16 sps:$4 sm:$0xff]   ;;  %v12675_v52 = vld [vmem:[#allocation13 + $0x804] ss:$16 sps:$4 sm:$0xff]   ;;  %v6913_v22 = vcombine.high %v15042_v10, %v15042_v10 }
 0x676   :  { %v15049_v50 = vld [vmem:[#allocation4 + $0x8] sm:$0xff]  ;;  %v12678_v58 = vld [vmem:[#allocation13 + $0x80c] ss:$16 sps:$4 sm:$0xff]  }
 0x677   :  { %9669 = vmatpush1.bf16.msra.mxu0 %v12589_v36  ;;  %v15053_v46 = vrot.slane %v15049_v50, %v14796_v32  ;;  %v12673_v38 = vld [vmem:[#allocation13 + $0x800] ss:$16 sps:$4 sm:$0xff]   ;;  %v12676_v36 = vld [vmem:[#allocation13 + $0x808] ss:$16 sps:$4 sm:$0xff]   ;;  %v12690_v10 = vld [vmem:[#allocation13 + $0x84c] ss:$16 sps:$4 sm:$0xff]  }
 0x678   :  { %9997 = vmatpush1.bf16.msra.mxu1 %v12592_v1  ;;  %9670 = vmatprep.subr.bf16.mxu0 %v12597_v42  ;;  %v12681_v1 = vld [vmem:[#allocation13 + $0x824] ss:$16 sps:$4 sm:$0xff]  }
 0x679   :  { %9998 = vmatprep.subr.bf16.mxu1 %v12600_v23  ;;  %v6931_v45 = vcombine.high %v15053_v46, %v15053_v46  ;;  %v12684_v23 = vld [vmem:[#allocation13 + $0x82c] ss:$16 sps:$4 sm:$0xff]  }
 0x67b   :  { %9671 = vmatpush1.bf16.msra.mxu0 %v12595_v33  ;;  %v15060_v42 = vrot.slane %v6931_v45, %v14796_v32  ;;  %v12679_v33 = vld [vmem:[#allocation13 + $0x820] ss:$16 sps:$4 sm:$0xff]   ;;  %v12760_v45 = vld [vmem:[#allocation13 + $0x9c8] ss:$16 sps:$4 sm:$0xff]  }
 0x67c   :  { %9999 = vmatpush1.bf16.msra.mxu1 %v12598_v11  ;;  %9672 = vmatprep.subr.bf16.mxu0 %v12603_v28  ;;  %v12682_v11 = vld [vmem:[#allocation13 + $0x828] ss:$16 sps:$4 sm:$0xff]   ;;  %v12687_v28 = vld [vmem:[#allocation13 + $0x844] ss:$16 sps:$4 sm:$0xff]  }
 0x67d   :  { %10000 = vmatprep.subr.bf16.mxu1 %v12606_v57  ;;  %v12685_v57 = vld [vmem:[#allocation13 + $0x840] ss:$16 sps:$4 sm:$0xff]  }
 0x67f   :  { %9673 = vmatpush1.bf16.msra.mxu0 %v12601_v8  ;;  %v12688_v8 = vld [vmem:[#allocation13 + $0x848] ss:$16 sps:$4 sm:$0xff]  }
 0x680   :  { %10001 = vmatpush1.bf16.msra.mxu1 %v12604_v15  ;;  %9674 = vmatprep.subr.bf16.mxu0 %v12609_v55  ;;  %v12693_v15 = vld [vmem:[#allocation13 + $0x864] ss:$16 sps:$4 sm:$0xff]   ;;  %v12696_v55 = vld [vmem:[#allocation13 + $0x86c] ss:$16 sps:$4 sm:$0xff]  }
 0x681   :  { %10002 = vmatprep.subr.bf16.mxu1 %v12612_v21  ;;  %v12691_v21 = vld [vmem:[#allocation13 + $0x860] ss:$16 sps:$4 sm:$0xff]  }
 0x683   :  { %9675 = vmatpush1.bf16.msra.mxu0 %v12607_v16  ;;  %v12694_v16 = vld [vmem:[#allocation13 + $0x868] ss:$16 sps:$4 sm:$0xff]  }
 0x684   :  { %10003 = vmatpush1.bf16.msra.mxu1 %v12610_v61  ;;  %9676 = vmatprep.subr.bf16.mxu0 %v12615_v31  ;;  %v12699_v61 = vld [vmem:[#allocation13 + $0x884] ss:$16 sps:$4 sm:$0xff]   ;;  %v12702_v31 = vld [vmem:[#allocation13 + $0x88c] ss:$16 sps:$4 sm:$0xff]  }
 0x685   :  { %10004 = vmatprep.subr.bf16.mxu1 %v12618_v24  ;;  %v12697_v24 = vld [vmem:[#allocation13 + $0x880] ss:$16 sps:$4 sm:$0xff]  }
 0x687   :  { %9677 = vmatpush1.bf16.msra.mxu0 %v12613_v17  ;;  %v12700_v17 = vld [vmem:[#allocation13 + $0x888] ss:$16 sps:$4 sm:$0xff]  }
 0x688   :  { %10005 = vmatpush1.bf16.msra.mxu1 %v12616_v3  ;;  %9678 = vmatprep.subr.bf16.mxu0 %v12621_v13  ;;  %v12705_v3 = vld [vmem:[#allocation13 + $0x8a4] ss:$16 sps:$4 sm:$0xff]   ;;  %v12708_v13 = vld [vmem:[#allocation13 + $0x8ac] ss:$16 sps:$4 sm:$0xff]  }
 0x689   :  { %10006 = vmatprep.subr.bf16.mxu1 %v12624_v12  ;;  %v12703_v12 = vld [vmem:[#allocation13 + $0x8a0] ss:$16 sps:$4 sm:$0xff]  }
 0x68b   :  { %9679 = vmatpush1.bf16.msra.mxu0 %v12619_v2  ;;  %v12706_v2 = vld [vmem:[#allocation13 + $0x8a8] ss:$16 sps:$4 sm:$0xff]  }
 0x68c   :  { %10007 = vmatpush1.bf16.msra.mxu1 %v12622_v7  ;;  %9680 = vmatprep.subr.bf16.mxu0 %v12627_v62  ;;  %v12711_v7 = vld [vmem:[#allocation13 + $0x8c4] ss:$16 sps:$4 sm:$0xff]   ;;  %v12714_v62 = vld [vmem:[#allocation13 + $0x8cc] ss:$16 sps:$4 sm:$0xff]  }
 0x68d   :  { %10008 = vmatprep.subr.bf16.mxu1 %v12630_v29  ;;  %v12709_v29 = vld [vmem:[#allocation13 + $0x8c0] ss:$16 sps:$4 sm:$0xff]  }
 0x68f   :  { %9681 = vmatpush1.bf16.msra.mxu0 %v12625_v44  ;;  %v12712_v44 = vld [vmem:[#allocation13 + $0x8c8] ss:$16 sps:$4 sm:$0xff]  }
 0x690   :  { %10009 = vmatpush1.bf16.msra.mxu1 %v12628_v19  ;;  %9682 = vmatprep.subr.bf16.mxu0 %v12633_v49  ;;  %v12717_v19 = vld [vmem:[#allocation13 + $0x8e4] ss:$16 sps:$4 sm:$0xff]   ;;  %v12720_v49 = vld [vmem:[#allocation13 + $0x8ec] ss:$16 sps:$4 sm:$0xff]  }
 0x691   :  { %10010 = vmatprep.subr.bf16.mxu1 %v12636_v26  ;;  %v12715_v26 = vld [vmem:[#allocation13 + $0x8e0] ss:$16 sps:$4 sm:$0xff]  }
 0x693   :  { %9683 = vmatpush1.bf16.msra.mxu0 %v12631_v0  ;;  %v12718_v0 = vld [vmem:[#allocation13 + $0x8e8] ss:$16 sps:$4 sm:$0xff]  }
 0x694   :  { %10011 = vmatpush1.bf16.msra.mxu1 %v12634_v9  ;;  %9684 = vmatprep.subr.bf16.mxu0 %v12639_v25  ;;  %v12723_v9 = vld [vmem:[#allocation13 + $0x904] ss:$16 sps:$4 sm:$0xff]   ;;  %v12726_v25 = vld [vmem:[#allocation13 + $0x90c] ss:$16 sps:$4 sm:$0xff]  }
 0x695   :  { %10012 = vmatprep.subr.bf16.mxu1 %v12642_v47  ;;  %v12721_v47 = vld [vmem:[#allocation13 + $0x900] ss:$16 sps:$4 sm:$0xff]  }
 0x697   :  { %9685 = vmatpush1.bf16.msra.mxu0 %v12637_v18  ;;  %v12724_v18 = vld [vmem:[#allocation13 + $0x908] ss:$16 sps:$4 sm:$0xff]  }
 0x698   :  { %10013 = vmatpush1.bf16.msra.mxu1 %v12640_v48  ;;  %9686 = vmatprep.subr.bf16.mxu0 %v12645_v5  ;;  %v12729_v48 = vld [vmem:[#allocation13 + $0x924] ss:$16 sps:$4 sm:$0xff]   ;;  %v12732_v5 = vld [vmem:[#allocation13 + $0x92c] ss:$16 sps:$4 sm:$0xff]  }
 0x699   :  { %10014 = vmatprep.subr.bf16.mxu1 %v12648_v4  ;;  %v12727_v4 = vld [vmem:[#allocation13 + $0x920] ss:$16 sps:$4 sm:$0xff]  }
 0x69b   :  { %9687 = vmatpush1.bf16.msra.mxu0 %v12643_v6  ;;  %v12730_v6 = vld [vmem:[#allocation13 + $0x928] ss:$16 sps:$4 sm:$0xff]  }
 0x69c   :  { %10015 = vmatpush1.bf16.msra.mxu1 %v12646_v43  ;;  %9688 = vmatprep.subr.bf16.mxu0 %v12651_v27  ;;  %v12735_v43 = vld [vmem:[#allocation13 + $0x944] ss:$16 sps:$4 sm:$0xff]   ;;  %v12738_v27 = vld [vmem:[#allocation13 + $0x94c] ss:$16 sps:$4 sm:$0xff]  }
 0x69d   :  { %10016 = vmatprep.subr.bf16.mxu1 %v12654_v51  ;;  %v12733_v51 = vld [vmem:[#allocation13 + $0x940] ss:$16 sps:$4 sm:$0xff]  }
 0x69f   :  { %9689 = vmatpush1.bf16.msra.mxu0 %v12649_v40  ;;  %v12736_v40 = vld [vmem:[#allocation13 + $0x948] ss:$16 sps:$4 sm:$0xff]  }
 0x6a0   :  { %10017 = vmatpush1.bf16.msra.mxu1 %v12652_v59  ;;  %9690 = vmatprep.subr.bf16.mxu0 %v12657_v30  ;;  %v12741_v59 = vld [vmem:[#allocation13 + $0x964] ss:$16 sps:$4 sm:$0xff]   ;;  %v12744_v30 = vld [vmem:[#allocation13 + $0x96c] ss:$16 sps:$4 sm:$0xff]  }
 0x6a1   :  { %10018 = vmatprep.subr.bf16.mxu1 %v12660_v20  ;;  %v12739_v20 = vld [vmem:[#allocation13 + $0x960] ss:$16 sps:$4 sm:$0xff]  }
 0x6a3   :  { %9691 = vmatpush1.bf16.msra.mxu0 %v12655_v14  ;;  %v12742_v14 = vld [vmem:[#allocation13 + $0x968] ss:$16 sps:$4 sm:$0xff]  }
 0x6a4   :  { %10019 = vmatpush1.bf16.msra.mxu1 %v12658_v41  ;;  %9692 = vmatprep.subr.bf16.mxu0 %v12663_v54  ;;  %v12747_v41 = vld [vmem:[#allocation13 + $0x984] ss:$16 sps:$4 sm:$0xff]   ;;  %v12750_v54 = vld [vmem:[#allocation13 + $0x98c] ss:$16 sps:$4 sm:$0xff]  }
 0x6a5   :  { %10020 = vmatprep.subr.bf16.mxu1 %v12666_v60  ;;  %v12745_v60 = vld [vmem:[#allocation13 + $0x980] ss:$16 sps:$4 sm:$0xff]  }
 0x6a7   :  { %9693 = vmatpush1.bf16.msra.mxu0 %v12661_v39  ;;  %v12748_v39 = vld [vmem:[#allocation13 + $0x988] ss:$16 sps:$4 sm:$0xff]  }
 0x6a8   :  { %10021 = vmatpush1.bf16.msra.mxu1 %v12664_v35  ;;  %9694 = vmatprep.subr.bf16.mxu0 %v12669_v63  ;;  %v12753_v35 = vld [vmem:[#allocation13 + $0x9a4] ss:$16 sps:$4 sm:$0xff]   ;;  %v12756_v63 = vld [vmem:[#allocation13 + $0x9ac] ss:$16 sps:$4 sm:$0xff]  }
 0x6a9   :  { %10022 = vmatprep.subr.bf16.mxu1 %v12672_v37  ;;  %v12751_v37 = vld [vmem:[#allocation13 + $0x9a0] ss:$16 sps:$4 sm:$0xff]  }
 0x6ab   :  { %9695 = vmatpush1.bf16.msra.mxu0 %v12667_v56  ;;  %v12754_v56 = vld [vmem:[#allocation13 + $0x9a8] ss:$16 sps:$4 sm:$0xff]  }
 0x6ac   :  { %10023 = vmatpush1.bf16.msra.mxu1 %v12670_v53  ;;  %9705 = vmatprep.subr.bf16.mxu0 %v12675_v52  ;;  %v12759_v53 = vld [vmem:[#allocation13 + $0x9c4] ss:$16 sps:$4 sm:$0xff]   ;;  %v12762_v52 = vld [vmem:[#allocation13 + $0x9cc] ss:$16 sps:$4 sm:$0xff]  }
 0x6ad   :  { %10033 = vmatprep.subr.bf16.mxu1 %v12678_v58  ;;  %v12757_v58 = vld [vmem:[#allocation13 + $0x9c0] ss:$16 sps:$4 sm:$0xff]  }
 0x6ae   :  { %9697 = vmatmul.mubr.bf16.vlgmr.msra.gmra.mrb[48].mxu0 %v6913_v22 }
 0x6af   :  { %10025 = vmatmul.mubr.bf16.vlgmr.msra.gmra.mrb[48].mxu1 %v6913_v22  ;;  %9706 = vmatpush1.bf16.msra.mxu0 %v12673_v38  ;;  %v12765_v38 = vld [vmem:[#allocation13 + $0x9e4] ss:$16 sps:$4 sm:$0xff]   ;;  %v12768_v22 = vld [vmem:[#allocation13 + $0x9ec] ss:$16 sps:$4 sm:$0xff]  }
 0x6b0   :  { %9737 = vmatprep.mubr.bf16.mxu0 %v15060_v42  ;;  %10034 = vmatpush1.bf16.msra.mxu1 %v12676_v36  ;;  %v12763_v36 = vld [vmem:[#allocation13 + $0x9e0] ss:$16 sps:$4 sm:$0xff]  }
 0x6b1   :  { %10065 = vmatprep.mubr.bf16.mxu1 %v15060_v42  ;;  %9707 = vmatprep.subr.bf16.mxu0 %v12681_v1  ;;  %v12766_v1 = vld [vmem:[#allocation13 + $0x9e8] ss:$16 sps:$4 sm:$0xff]  }
 0x6b2   :  { %10035 = vmatprep.subr.bf16.mxu1 %v12684_v23  ;;  %v12771_v23 = vld [vmem:[#allocation13 + $0xa04] ss:$16 sps:$4 sm:$0xff]  }
 0x6b3   :  { %9708 = vmatpush1.bf16.msra.mxu0 %v12679_v33  ;;  %v12774_v33 = vld [vmem:[#allocation13 + $0xa0c] ss:$16 sps:$4 sm:$0xff]  }
 0x6b4   :  { %10036 = vmatpush1.bf16.msra.mxu1 %v12682_v11  ;;  %9709 = vmatprep.subr.bf16.mxu0 %v12687_v28  ;;  %v12769_v11 = vld [vmem:[#allocation13 + $0xa00] ss:$16 sps:$4 sm:$0xff]   ;;  %v15066_v28 = vrot.slane %v15053_v46, %v14796_v32  ;;  %v12786_v46 = vld [vmem:[#allocation13 + $0xa4c] ss:$16 sps:$4 sm:$0xff]  }
 0x6b5   :  { %10037 = vmatprep.subr.bf16.mxu1 %v12690_v10  ;;  %v12772_v10 = vld [vmem:[#allocation13 + $0xa08] ss:$16 sps:$4 sm:$0xff]  }
 0x6b7   :  { %9710 = vmatpush1.bf16.msra.mxu0 %v12685_v57  ;;  %v12777_v57 = vld [vmem:[#allocation13 + $0xa24] ss:$16 sps:$4 sm:$0xff]  }
 0x6b8   :  { %10038 = vmatpush1.bf16.msra.mxu1 %v12688_v8  ;;  %9711 = vmatprep.subr.bf16.mxu0 %v12693_v15  ;;  %v6963_v8 = vcombine.high %v15060_v42, %v15060_v42  ;;  %v12780_v15 = vld [vmem:[#allocation13 + $0xa2c] ss:$16 sps:$4 sm:$0xff]  }
 0x6b9   :  { %10039 = vmatprep.subr.bf16.mxu1 %v12696_v55  ;;  %v12775_v55 = vld [vmem:[#allocation13 + $0xa20] ss:$16 sps:$4 sm:$0xff]   ;;  %v12792_v42 = vld [vmem:[#allocation13 + $0xa6c] ss:$16 sps:$4 sm:$0xff]  }
 0x6bb   :  { %9712 = vmatpush1.bf16.msra.mxu0 %v12691_v21  ;;  %v12778_v21 = vld [vmem:[#allocation13 + $0xa28] ss:$16 sps:$4 sm:$0xff]  }
 0x6bc   :  { %10040 = vmatpush1.bf16.msra.mxu1 %v12694_v16  ;;  %9713 = vmatprep.subr.bf16.mxu0 %v12699_v61  ;;  %v12783_v16 = vld [vmem:[#allocation13 + $0xa44] ss:$16 sps:$4 sm:$0xff]   ;;  %v12781_v61 = vld [vmem:[#allocation13 + $0xa40] ss:$16 sps:$4 sm:$0xff]  }
 0x6bd   :  { %10041 = vmatprep.subr.bf16.mxu1 %v12702_v31  ;;  %v12784_v31 = vld [vmem:[#allocation13 + $0xa48] ss:$16 sps:$4 sm:$0xff]  }
 0x6bf   :  { %9714 = vmatpush1.bf16.msra.mxu0 %v12697_v24  ;;  %v12789_v24 = vld [vmem:[#allocation13 + $0xa64] ss:$16 sps:$4 sm:$0xff]  }
 0x6c0   :  { %10042 = vmatpush1.bf16.msra.mxu1 %v12700_v17  ;;  %9715 = vmatprep.subr.bf16.mxu0 %v12705_v3  ;;  %v12787_v17 = vld [vmem:[#allocation13 + $0xa60] ss:$16 sps:$4 sm:$0xff]   ;;  %v12790_v3 = vld [vmem:[#allocation13 + $0xa68] ss:$16 sps:$4 sm:$0xff]  }
 0x6c1   :  { %10043 = vmatprep.subr.bf16.mxu1 %v12708_v13  ;;  %v12795_v13 = vld [vmem:[#allocation13 + $0xa84] ss:$16 sps:$4 sm:$0xff]  }
 0x6c3   :  { %9716 = vmatpush1.bf16.msra.mxu0 %v12703_v12  ;;  %v12798_v12 = vld [vmem:[#allocation13 + $0xa8c] ss:$16 sps:$4 sm:$0xff]  }
 0x6c4   :  { %10044 = vmatpush1.bf16.msra.mxu1 %v12706_v2  ;;  %9717 = vmatprep.subr.bf16.mxu0 %v12711_v7  ;;  %v12793_v2 = vld [vmem:[#allocation13 + $0xa80] ss:$16 sps:$4 sm:$0xff]   ;;  %v12796_v7 = vld [vmem:[#allocation13 + $0xa88] ss:$16 sps:$4 sm:$0xff]  }
 0x6c5   :  { %10045 = vmatprep.subr.bf16.mxu1 %v12714_v62  ;;  %v12801_v62 = vld [vmem:[#allocation13 + $0xaa4] ss:$16 sps:$4 sm:$0xff]  }
 0x6c7   :  { %9718 = vmatpush1.bf16.msra.mxu0 %v12709_v29  ;;  %v12804_v29 = vld [vmem:[#allocation13 + $0xaac] ss:$16 sps:$4 sm:$0xff]  }
 0x6c8   :  { %10046 = vmatpush1.bf16.msra.mxu1 %v12712_v44  ;;  %9719 = vmatprep.subr.bf16.mxu0 %v12717_v19  ;;  %v12799_v44 = vld [vmem:[#allocation13 + $0xaa0] ss:$16 sps:$4 sm:$0xff]   ;;  %v12802_v19 = vld [vmem:[#allocation13 + $0xaa8] ss:$16 sps:$4 sm:$0xff]  }
 0x6c9   :  { %10047 = vmatprep.subr.bf16.mxu1 %v12720_v49  ;;  %v12807_v49 = vld [vmem:[#allocation13 + $0xac4] ss:$16 sps:$4 sm:$0xff]  }
 0x6cb   :  { %9720 = vmatpush1.bf16.msra.mxu0 %v12715_v26  ;;  %v12810_v26 = vld [vmem:[#allocation13 + $0xacc] ss:$16 sps:$4 sm:$0xff]  }
 0x6cc   :  { %10048 = vmatpush1.bf16.msra.mxu1 %v12718_v0  ;;  %9721 = vmatprep.subr.bf16.mxu0 %v12723_v9  ;;  %v12805_v0 = vld [vmem:[#allocation13 + $0xac0] ss:$16 sps:$4 sm:$0xff]   ;;  %v12808_v9 = vld [vmem:[#allocation13 + $0xac8] ss:$16 sps:$4 sm:$0xff]  }
 0x6cd   :  { %10049 = vmatprep.subr.bf16.mxu1 %v12726_v25  ;;  %v12813_v25 = vld [vmem:[#allocation13 + $0xae4] ss:$16 sps:$4 sm:$0xff]  }
 0x6cf   :  { %9722 = vmatpush1.bf16.msra.mxu0 %v12721_v47  ;;  %v12816_v47 = vld [vmem:[#allocation13 + $0xaec] ss:$16 sps:$4 sm:$0xff]  }
 0x6d0   :  { %10050 = vmatpush1.bf16.msra.mxu1 %v12724_v18  ;;  %9723 = vmatprep.subr.bf16.mxu0 %v12729_v48  ;;  %v12811_v18 = vld [vmem:[#allocation13 + $0xae0] ss:$16 sps:$4 sm:$0xff]   ;;  %v12814_v48 = vld [vmem:[#allocation13 + $0xae8] ss:$16 sps:$4 sm:$0xff]  }
 0x6d1   :  { %10051 = vmatprep.subr.bf16.mxu1 %v12732_v5  ;;  %v12819_v5 = vld [vmem:[#allocation13 + $0xb04] ss:$16 sps:$4 sm:$0xff]  }
 0x6d3   :  { %9724 = vmatpush1.bf16.msra.mxu0 %v12727_v4  ;;  %v12822_v4 = vld [vmem:[#allocation13 + $0xb0c] ss:$16 sps:$4 sm:$0xff]  }
 0x6d4   :  { %10052 = vmatpush1.bf16.msra.mxu1 %v12730_v6  ;;  %9725 = vmatprep.subr.bf16.mxu0 %v12735_v43  ;;  %v12817_v6 = vld [vmem:[#allocation13 + $0xb00] ss:$16 sps:$4 sm:$0xff]   ;;  %v12820_v43 = vld [vmem:[#allocation13 + $0xb08] ss:$16 sps:$4 sm:$0xff]  }
 0x6d5   :  { %10053 = vmatprep.subr.bf16.mxu1 %v12738_v27  ;;  %v12825_v27 = vld [vmem:[#allocation13 + $0xb24] ss:$16 sps:$4 sm:$0xff]  }
 0x6d7   :  { %9726 = vmatpush1.bf16.msra.mxu0 %v12733_v51  ;;  %v12828_v51 = vld [vmem:[#allocation13 + $0xb2c] ss:$16 sps:$4 sm:$0xff]  }
 0x6d8   :  { %10054 = vmatpush1.bf16.msra.mxu1 %v12736_v40  ;;  %9727 = vmatprep.subr.bf16.mxu0 %v12741_v59  ;;  %v12823_v40 = vld [vmem:[#allocation13 + $0xb20] ss:$16 sps:$4 sm:$0xff]   ;;  %v12826_v59 = vld [vmem:[#allocation13 + $0xb28] ss:$16 sps:$4 sm:$0xff]  }
 0x6d9   :  { %10055 = vmatprep.subr.bf16.mxu1 %v12744_v30  ;;  %v12831_v30 = vld [vmem:[#allocation13 + $0xb44] ss:$16 sps:$4 sm:$0xff]  }
 0x6db   :  { %9728 = vmatpush1.bf16.msra.mxu0 %v12739_v20  ;;  %v12834_v20 = vld [vmem:[#allocation13 + $0xb4c] ss:$16 sps:$4 sm:$0xff]  }
 0x6dc   :  { %10056 = vmatpush1.bf16.msra.mxu1 %v12742_v14  ;;  %9729 = vmatprep.subr.bf16.mxu0 %v12747_v41  ;;  %v12829_v14 = vld [vmem:[#allocation13 + $0xb40] ss:$16 sps:$4 sm:$0xff]   ;;  %v12832_v41 = vld [vmem:[#allocation13 + $0xb48] ss:$16 sps:$4 sm:$0xff]  }
 0x6dd   :  { %10057 = vmatprep.subr.bf16.mxu1 %v12750_v54  ;;  %v12837_v54 = vld [vmem:[#allocation13 + $0xb64] ss:$16 sps:$4 sm:$0xff]  }
 0x6df   :  { %9730 = vmatpush1.bf16.msra.mxu0 %v12745_v60  ;;  %v12840_v60 = vld [vmem:[#allocation13 + $0xb6c] ss:$16 sps:$4 sm:$0xff]  }
 0x6e0   :  { %10058 = vmatpush1.bf16.msra.mxu1 %v12748_v39  ;;  %9731 = vmatprep.subr.bf16.mxu0 %v12753_v35  ;;  %v12835_v39 = vld [vmem:[#allocation13 + $0xb60] ss:$16 sps:$4 sm:$0xff]   ;;  %v12838_v35 = vld [vmem:[#allocation13 + $0xb68] ss:$16 sps:$4 sm:$0xff]  }
 0x6e1   :  { %10059 = vmatprep.subr.bf16.mxu1 %v12756_v63  ;;  %v12843_v63 = vld [vmem:[#allocation13 + $0xb84] ss:$16 sps:$4 sm:$0xff]  }
 0x6e3   :  { %9732 = vmatpush1.bf16.msra.mxu0 %v12751_v37  ;;  %v12846_v37 = vld [vmem:[#allocation13 + $0xb8c] ss:$16 sps:$4 sm:$0xff]  }
 0x6e4   :  { %10060 = vmatpush1.bf16.msra.mxu1 %v12754_v56  ;;  %9733 = vmatprep.subr.bf16.mxu0 %v12759_v53  ;;  %v12841_v56 = vld [vmem:[#allocation13 + $0xb80] ss:$16 sps:$4 sm:$0xff]   ;;  %v12844_v53 = vld [vmem:[#allocation13 + $0xb88] ss:$16 sps:$4 sm:$0xff]  }
 0x6e5   :  { %10061 = vmatprep.subr.bf16.mxu1 %v12762_v52  ;;  %v12849_v52 = vld [vmem:[#allocation13 + $0xba4] ss:$16 sps:$4 sm:$0xff]  }
 0x6e7   :  { %9734 = vmatpush1.bf16.msra.mxu0 %v12757_v58  ;;  %v12852_v58 = vld [vmem:[#allocation13 + $0xbac] ss:$16 sps:$4 sm:$0xff]  }
 0x6e8   :  { %10062 = vmatpush1.bf16.msra.mxu1 %v12760_v45  ;;  %9735 = vmatprep.subr.bf16.mxu0 %v12765_v38  ;;  %v12847_v45 = vld [vmem:[#allocation13 + $0xba0] ss:$16 sps:$4 sm:$0xff]   ;;  %v12850_v38 = vld [vmem:[#allocation13 + $0xba8] ss:$16 sps:$4 sm:$0xff]  }
 0x6e9   :  { %10063 = vmatprep.subr.bf16.mxu1 %v12768_v22  ;;  %v12855_v22 = vld [vmem:[#allocation13 + $0xbc4] ss:$16 sps:$4 sm:$0xff]  }
 0x6eb   :  { %9736 = vmatpush1.bf16.msra.mxu0 %v12763_v36  ;;  %v12858_v36 = vld [vmem:[#allocation13 + $0xbcc] ss:$16 sps:$4 sm:$0xff]  }
 0x6ec   :  { %10064 = vmatpush1.bf16.msra.mxu1 %v12766_v1  ;;  %9746 = vmatprep.subr.bf16.mxu0 %v12771_v23  ;;  %v6916_v1 = vcombine.high %v15049_v50, %v15049_v50  ;;  %v12853_v23 = vld [vmem:[#allocation13 + $0xbc0] ss:$16 sps:$4 sm:$0xff]  }
 0x6ed   :  { %10074 = vmatprep.subr.bf16.mxu1 %v12774_v33  ;;  %v12856_v33 = vld [vmem:[#allocation13 + $0xbc8] ss:$16 sps:$4 sm:$0xff]  }
 0x6ee   :  { %9738 = vmatmul.mubr.bf16.vlgmr.msra.gmra.mrb[48].mxu0 %v15066_v28 }
 0x6ef   :  { %10066 = vmatmul.mubr.bf16.vlgmr.msra.gmra.mrb[48].mxu1 %v15066_v28  ;;  %9747 = vmatpush1.bf16.msra.mxu0 %v12769_v11  ;;  %v12861_v11 = vld [vmem:[#allocation13 + $0xbe4] ss:$16 sps:$4 sm:$0xff]  }
 0x6f0   :  { %9778 = vmatprep.mubr.bf16.mxu0 %v6963_v8  ;;  %10075 = vmatpush1.bf16.msra.mxu1 %v12772_v10  ;;  %v12864_v10 = vld [vmem:[#allocation13 + $0xbec] ss:$16 sps:$4 sm:$0xff]  }
 0x6f1   :  { %10106 = vmatprep.mubr.bf16.mxu1 %v6963_v8  ;;  %9748 = vmatprep.subr.bf16.mxu0 %v12777_v57  ;;  %v15075_v57 = vrot.slane %v6916_v1, %v14796_v32  ;;  %v12859_v8 = vld [vmem:[#allocation13 + $0xbe0] ss:$16 sps:$4 sm:$0xff]   ;;  %v12941_v1 = vld [vmem:[#allocation13 + $0xd88] ss:$16 sps:$4 sm:$0xff]  }
 0x6f2   :  { %10076 = vmatprep.subr.bf16.mxu1 %v12780_v15  ;;  %v12862_v15 = vld [vmem:[#allocation13 + $0xbe8] ss:$16 sps:$4 sm:$0xff]  }
 0x6f3   :  { %9749 = vmatpush1.bf16.msra.mxu0 %v12775_v55  ;;  %v12867_v55 = vld [vmem:[#allocation13 + $0xc04] ss:$16 sps:$4 sm:$0xff]   ;;  %v6932_v50 = vcombine.high %v15075_v57, %v15075_v57 }
 0x6f4   :  { %10077 = vmatpush1.bf16.msra.mxu1 %v12778_v21  ;;  %9750 = vmatprep.subr.bf16.mxu0 %v12783_v16  ;;  %v12870_v21 = vld [vmem:[#allocation13 + $0xc0c] ss:$16 sps:$4 sm:$0xff]   ;;  %v12865_v16 = vld [vmem:[#allocation13 + $0xc00] ss:$16 sps:$4 sm:$0xff]  }
 0x6f5   :  { %10078 = vmatprep.subr.bf16.mxu1 %v12786_v46  ;;  %v6961_v46 = vcombine.high %v15066_v28, %v15066_v28  ;;  %v12883_v28 = vld [vmem:[#allocation13 + $0xc4c] ss:$16 sps:$4 sm:$0xff]  }
 0x6f7   :  { %9751 = vmatpush1.bf16.msra.mxu0 %v12781_v61  ;;  %v12868_v61 = vld [vmem:[#allocation13 + $0xc08] ss:$16 sps:$4 sm:$0xff]  }
 0x6f8   :  { %10079 = vmatpush1.bf16.msra.mxu1 %v12784_v31  ;;  %9752 = vmatprep.subr.bf16.mxu0 %v12789_v24  ;;  %v12874_v31 = vld [vmem:[#allocation13 + $0xc24] ss:$16 sps:$4 sm:$0xff]   ;;  %v15082_v24 = vrot.slane %v6932_v50, %v14796_v32 }
 0x6f9   :  { %10080 = vmatprep.subr.bf16.mxu1 %v12792_v42  ;;  %v12877_v42 = vld [vmem:[#allocation13 + $0xc2c] ss:$16 sps:$4 sm:$0xff]   ;;  %v12958_v50 = vld [vmem:[#allocation13 + $0xde4] ss:$16 sps:$4 sm:$0xff]  }
 0x6fb   :  { %9753 = vmatpush1.bf16.msra.mxu0 %v12787_v17  ;;  %v12872_v17 = vld [vmem:[#allocation13 + $0xc20] ss:$16 sps:$4 sm:$0xff]  }
 0x6fc   :  { %10081 = vmatpush1.bf16.msra.mxu1 %v12790_v3  ;;  %9754 = vmatprep.subr.bf16.mxu0 %v12795_v13  ;;  %v12875_v3 = vld [vmem:[#allocation13 + $0xc28] ss:$16 sps:$4 sm:$0xff]   ;;  %v12880_v13 = vld [vmem:[#allocation13 + $0xc44] ss:$16 sps:$4 sm:$0xff]  }
 0x6fd   :  { %10082 = vmatprep.subr.bf16.mxu1 %v12798_v12  ;;  %v12878_v12 = vld [vmem:[#allocation13 + $0xc40] ss:$16 sps:$4 sm:$0xff]  }
 0x6ff   :  { %9755 = vmatpush1.bf16.msra.mxu0 %v12793_v2  ;;  %v12881_v2 = vld [vmem:[#allocation13 + $0xc48] ss:$16 sps:$4 sm:$0xff]  }
 0x700   :  { %10083 = vmatpush1.bf16.msra.mxu1 %v12796_v7  ;;  %9756 = vmatprep.subr.bf16.mxu0 %v12801_v62  ;;  %v12886_v7 = vld [vmem:[#allocation13 + $0xc64] ss:$16 sps:$4 sm:$0xff]   ;;  %v12889_v62 = vld [vmem:[#allocation13 + $0xc6c] ss:$16 sps:$4 sm:$0xff]  }
 0x701   :  { %10084 = vmatprep.subr.bf16.mxu1 %v12804_v29  ;;  %v12884_v29 = vld [vmem:[#allocation13 + $0xc60] ss:$16 sps:$4 sm:$0xff]  }
 0x703   :  { %9757 = vmatpush1.bf16.msra.mxu0 %v12799_v44  ;;  %v12887_v44 = vld [vmem:[#allocation13 + $0xc68] ss:$16 sps:$4 sm:$0xff]  }
 0x704   :  { %10085 = vmatpush1.bf16.msra.mxu1 %v12802_v19  ;;  %9758 = vmatprep.subr.bf16.mxu0 %v12807_v49  ;;  %v12892_v19 = vld [vmem:[#allocation13 + $0xc84] ss:$16 sps:$4 sm:$0xff]   ;;  %v12895_v49 = vld [vmem:[#allocation13 + $0xc8c] ss:$16 sps:$4 sm:$0xff]  }
 0x705   :  { %10086 = vmatprep.subr.bf16.mxu1 %v12810_v26  ;;  %v12890_v26 = vld [vmem:[#allocation13 + $0xc80] ss:$16 sps:$4 sm:$0xff]  }
 0x707   :  { %9759 = vmatpush1.bf16.msra.mxu0 %v12805_v0  ;;  %v12893_v0 = vld [vmem:[#allocation13 + $0xc88] ss:$16 sps:$4 sm:$0xff]  }
 0x708   :  { %10087 = vmatpush1.bf16.msra.mxu1 %v12808_v9  ;;  %9760 = vmatprep.subr.bf16.mxu0 %v12813_v25  ;;  %v12898_v9 = vld [vmem:[#allocation13 + $0xca4] ss:$16 sps:$4 sm:$0xff]   ;;  %v12901_v25 = vld [vmem:[#allocation13 + $0xcac] ss:$16 sps:$4 sm:$0xff]  }
 0x709   :  { %10088 = vmatprep.subr.bf16.mxu1 %v12816_v47  ;;  %v12896_v47 = vld [vmem:[#allocation13 + $0xca0] ss:$16 sps:$4 sm:$0xff]  }
 0x70b   :  { %9761 = vmatpush1.bf16.msra.mxu0 %v12811_v18  ;;  %v12899_v18 = vld [vmem:[#allocation13 + $0xca8] ss:$16 sps:$4 sm:$0xff]  }
 0x70c   :  { %10089 = vmatpush1.bf16.msra.mxu1 %v12814_v48  ;;  %9762 = vmatprep.subr.bf16.mxu0 %v12819_v5  ;;  %v12904_v48 = vld [vmem:[#allocation13 + $0xcc4] ss:$16 sps:$4 sm:$0xff]   ;;  %v12907_v5 = vld [vmem:[#allocation13 + $0xccc] ss:$16 sps:$4 sm:$0xff]  }
 0x70d   :  { %10090 = vmatprep.subr.bf16.mxu1 %v12822_v4  ;;  %v12902_v4 = vld [vmem:[#allocation13 + $0xcc0] ss:$16 sps:$4 sm:$0xff]  }
 0x70f   :  { %9763 = vmatpush1.bf16.msra.mxu0 %v12817_v6  ;;  %v12905_v6 = vld [vmem:[#allocation13 + $0xcc8] ss:$16 sps:$4 sm:$0xff]  }
 0x710   :  { %10091 = vmatpush1.bf16.msra.mxu1 %v12820_v43  ;;  %9764 = vmatprep.subr.bf16.mxu0 %v12825_v27  ;;  %v12910_v43 = vld [vmem:[#allocation13 + $0xce4] ss:$16 sps:$4 sm:$0xff]   ;;  %v12913_v27 = vld [vmem:[#allocation13 + $0xcec] ss:$16 sps:$4 sm:$0xff]  }
 0x711   :  { %10092 = vmatprep.subr.bf16.mxu1 %v12828_v51  ;;  %v12908_v51 = vld [vmem:[#allocation13 + $0xce0] ss:$16 sps:$4 sm:$0xff]  }
 0x713   :  { %9765 = vmatpush1.bf16.msra.mxu0 %v12823_v40  ;;  %v12911_v40 = vld [vmem:[#allocation13 + $0xce8] ss:$16 sps:$4 sm:$0xff]  }
 0x714   :  { %10093 = vmatpush1.bf16.msra.mxu1 %v12826_v59  ;;  %9766 = vmatprep.subr.bf16.mxu0 %v12831_v30  ;;  %v12916_v59 = vld [vmem:[#allocation13 + $0xd04] ss:$16 sps:$4 sm:$0xff]   ;;  %v12919_v30 = vld [vmem:[#allocation13 + $0xd0c] ss:$16 sps:$4 sm:$0xff]  }
 0x715   :  { %10094 = vmatprep.subr.bf16.mxu1 %v12834_v20  ;;  %v12914_v20 = vld [vmem:[#allocation13 + $0xd00] ss:$16 sps:$4 sm:$0xff]  }
 0x717   :  { %9767 = vmatpush1.bf16.msra.mxu0 %v12829_v14  ;;  %v12917_v14 = vld [vmem:[#allocation13 + $0xd08] ss:$16 sps:$4 sm:$0xff]  }
 0x718   :  { %10095 = vmatpush1.bf16.msra.mxu1 %v12832_v41  ;;  %9768 = vmatprep.subr.bf16.mxu0 %v12837_v54  ;;  %v12922_v41 = vld [vmem:[#allocation13 + $0xd24] ss:$16 sps:$4 sm:$0xff]   ;;  %v12925_v54 = vld [vmem:[#allocation13 + $0xd2c] ss:$16 sps:$4 sm:$0xff]  }
 0x719   :  { %10096 = vmatprep.subr.bf16.mxu1 %v12840_v60  ;;  %v12920_v60 = vld [vmem:[#allocation13 + $0xd20] ss:$16 sps:$4 sm:$0xff]  }
 0x71b   :  { %9769 = vmatpush1.bf16.msra.mxu0 %v12835_v39  ;;  %v12923_v39 = vld [vmem:[#allocation13 + $0xd28] ss:$16 sps:$4 sm:$0xff]  }
 0x71c   :  { %10097 = vmatpush1.bf16.msra.mxu1 %v12838_v35  ;;  %9770 = vmatprep.subr.bf16.mxu0 %v12843_v63  ;;  %v12928_v35 = vld [vmem:[#allocation13 + $0xd44] ss:$16 sps:$4 sm:$0xff]   ;;  %v12931_v63 = vld [vmem:[#allocation13 + $0xd4c] ss:$16 sps:$4 sm:$0xff]  }
 0x71d   :  { %10098 = vmatprep.subr.bf16.mxu1 %v12846_v37  ;;  %v12926_v37 = vld [vmem:[#allocation13 + $0xd40] ss:$16 sps:$4 sm:$0xff]  }
 0x71f   :  { %9771 = vmatpush1.bf16.msra.mxu0 %v12841_v56  ;;  %v12929_v56 = vld [vmem:[#allocation13 + $0xd48] ss:$16 sps:$4 sm:$0xff]  }
 0x720   :  { %10099 = vmatpush1.bf16.msra.mxu1 %v12844_v53  ;;  %9772 = vmatprep.subr.bf16.mxu0 %v12849_v52  ;;  %v12934_v53 = vld [vmem:[#allocation13 + $0xd64] ss:$16 sps:$4 sm:$0xff]   ;;  %v12937_v52 = vld [vmem:[#allocation13 + $0xd6c] ss:$16 sps:$4 sm:$0xff]  }
 0x721   :  { %10100 = vmatprep.subr.bf16.mxu1 %v12852_v58  ;;  %v12932_v58 = vld [vmem:[#allocation13 + $0xd60] ss:$16 sps:$4 sm:$0xff]  }
 0x723   :  { %9773 = vmatpush1.bf16.msra.mxu0 %v12847_v45  ;;  %v12935_v45 = vld [vmem:[#allocation13 + $0xd68] ss:$16 sps:$4 sm:$0xff]  }
 0x724   :  { %10101 = vmatpush1.bf16.msra.mxu1 %v12850_v38  ;;  %9774 = vmatprep.subr.bf16.mxu0 %v12855_v22  ;;  %v12940_v38 = vld [vmem:[#allocation13 + $0xd84] ss:$16 sps:$4 sm:$0xff]   ;;  %v12943_v22 = vld [vmem:[#allocation13 + $0xd8c] ss:$16 sps:$4 sm:$0xff]  }
 0x725   :  { %10102 = vmatprep.subr.bf16.mxu1 %v12858_v36  ;;  %v12938_v36 = vld [vmem:[#allocation13 + $0xd80] ss:$16 sps:$4 sm:$0xff]  }
 0x727   :  { %9775 = vmatpush1.bf16.msra.mxu0 %v12853_v23  ;;  %v12946_v23 = vld [vmem:[#allocation13 + $0xda4] ss:$16 sps:$4 sm:$0xff]  }
 0x728   :  { %10103 = vmatpush1.bf16.msra.mxu1 %v12856_v33  ;;  %9776 = vmatprep.subr.bf16.mxu0 %v12861_v11  ;;  %v12949_v33 = vld [vmem:[#allocation13 + $0xdac] ss:$16 sps:$4 sm:$0xff]   ;;  %v12944_v11 = vld [vmem:[#allocation13 + $0xda0] ss:$16 sps:$4 sm:$0xff]  }
 0x729   :  { %10104 = vmatprep.subr.bf16.mxu1 %v12864_v10  ;;  %v12947_v10 = vld [vmem:[#allocation13 + $0xda8] ss:$16 sps:$4 sm:$0xff]  }
 0x72b   :  { %9777 = vmatpush1.bf16.msra.mxu0 %v12859_v8  ;;  %v12952_v8 = vld [vmem:[#allocation13 + $0xdc4] ss:$16 sps:$4 sm:$0xff]  }
 0x72c   :  { %10105 = vmatpush1.bf16.msra.mxu1 %v12862_v15  ;;  %9787 = vmatprep.subr.bf16.mxu0 %v12867_v55  ;;  %v12955_v15 = vld [vmem:[#allocation13 + $0xdcc] ss:$16 sps:$4 sm:$0xff]   ;;  %v12950_v55 = vld [vmem:[#allocation13 + $0xdc0] ss:$16 sps:$4 sm:$0xff]  }
 0x72d   :  { %10115 = vmatprep.subr.bf16.mxu1 %v12870_v21  ;;  %v12953_v21 = vld [vmem:[#allocation13 + $0xdc8] ss:$16 sps:$4 sm:$0xff]  }
 0x72e   :  { %9779 = vmatmul.mubr.bf16.vlgmr.msra.gmra.mrb[48].mxu0 %v6961_v46 }
 0x72f   :  { %10107 = vmatmul.mubr.bf16.vlgmr.msra.gmra.mrb[48].mxu1 %v6961_v46  ;;  %9788 = vmatpush1.bf16.msra.mxu0 %v12865_v16  ;;  %v12961_v16 = vld [vmem:[#allocation13 + $0xdec] ss:$16 sps:$4 sm:$0xff]   ;;  %v12956_v46 = vld [vmem:[#allocation13 + $0xde0] ss:$16 sps:$4 sm:$0xff]  }
 0x730   :  { %9819 = vmatprep.mubr.bf16.mxu0 %v15082_v24  ;;  %10116 = vmatpush1.bf16.msra.mxu1 %v12868_v61  ;;  %v12959_v61 = vld [vmem:[#allocation13 + $0xde8] ss:$16 sps:$4 sm:$0xff]  }
 0x731   :  { %10147 = vmatprep.mubr.bf16.mxu1 %v15082_v24  ;;  %9789 = vmatprep.subr.bf16.mxu0 %v12874_v31  ;;  %v12964_v31 = vld [vmem:[#allocation13 + $0xe04] ss:$16 sps:$4 sm:$0xff]  }
 0x732   :  { %10117 = vmatprep.subr.bf16.mxu1 %v12877_v42  ;;  %v12967_v42 = vld [vmem:[#allocation13 + $0xe0c] ss:$16 sps:$4 sm:$0xff]  }
 0x733   :  { %9790 = vmatpush1.bf16.msra.mxu0 %v12872_v17  ;;  %v12962_v17 = vld [vmem:[#allocation13 + $0xe00] ss:$16 sps:$4 sm:$0xff]  }
 0x734   :  { %10118 = vmatpush1.bf16.msra.mxu1 %v12875_v3  ;;  %9791 = vmatprep.subr.bf16.mxu0 %v12880_v13  ;;  %v15088_v3 = vrot.slane %v15075_v57, %v14796_v32  ;;  %v12965_v13 = vld [vmem:[#allocation13 + $0xe08] ss:$16 sps:$4 sm:$0xff]   ;;  %v12979_v32 = vld [vmem:[#allocation13 + $0xe4c] ss:$16 sps:$4 sm:$0xff]   ;;  %v12974_v57 = vld [vmem:[#allocation13 + $0xe40] ss:$16 sps:$4 sm:$0xff]  }
 0x735   :  { %10119 = vmatprep.subr.bf16.mxu1 %v12883_v28  ;;  %v12970_v28 = vld [vmem:[#allocation13 + $0xe24] ss:$16 sps:$4 sm:$0xff]  }
 0x737   :  { %9792 = vmatpush1.bf16.msra.mxu0 %v12878_v12  ;;  %v6964_v12 = vcombine.high %v15082_v24, %v15082_v24  ;;  %v12985_v24 = vld [vmem:[#allocation13 + $0xe6c] ss:$16 sps:$4 sm:$0xff]  }
 0x738   :  { %10120 = vmatpush1.bf16.msra.mxu1 %v12881_v2  ;;  %9793 = vmatprep.subr.bf16.mxu0 %v12886_v7  ;;  %v12973_v2 = vld [vmem:[#allocation13 + $0xe2c] ss:$16 sps:$4 sm:$0xff]   ;;  %v12968_v7 = vld [vmem:[#allocation13 + $0xe20] ss:$16 sps:$4 sm:$0xff]  }
 0x739   :  { %10121 = vmatprep.subr.bf16.mxu1 %v12889_v62  ;;  %v12971_v62 = vld [vmem:[#allocation13 + $0xe28] ss:$16 sps:$4 sm:$0xff]  }
 0x73b   :  { %9794 = vmatpush1.bf16.msra.mxu0 %v12884_v29  ;;  %v12976_v29 = vld [vmem:[#allocation13 + $0xe44] ss:$16 sps:$4 sm:$0xff]  }
 0x73c   :  { %10122 = vmatpush1.bf16.msra.mxu1 %v12887_v44  ;;  %9795 = vmatprep.subr.bf16.mxu0 %v12892_v19  ;;  %v12977_v44 = vld [vmem:[#allocation13 + $0xe48] ss:$16 sps:$4 sm:$0xff]   ;;  %v12982_v19 = vld [vmem:[#allocation13 + $0xe64] ss:$16 sps:$4 sm:$0xff]  }
 0x73d   :  { %10123 = vmatprep.subr.bf16.mxu1 %v12895_v49  ;;  %v12980_v49 = vld [vmem:[#allocation13 + $0xe60] ss:$16 sps:$4 sm:$0xff]  }
 0x73f   :  { %9796 = vmatpush1.bf16.msra.mxu0 %v12890_v26  ;;  %v12983_v26 = vld [vmem:[#allocation13 + $0xe68] ss:$16 sps:$4 sm:$0xff]  }
 0x740   :  { %10124 = vmatpush1.bf16.msra.mxu1 %v12893_v0  ;;  %9797 = vmatprep.subr.bf16.mxu0 %v12898_v9  ;;  %v12988_v0 = vld [vmem:[#allocation13 + $0xe84] ss:$16 sps:$4 sm:$0xff]   ;;  %v12991_v9 = vld [vmem:[#allocation13 + $0xe8c] ss:$16 sps:$4 sm:$0xff]  }
 0x741   :  { %10125 = vmatprep.subr.bf16.mxu1 %v12901_v25  ;;  %v12986_v25 = vld [vmem:[#allocation13 + $0xe80] ss:$16 sps:$4 sm:$0xff]  }
 0x743   :  { %9798 = vmatpush1.bf16.msra.mxu0 %v12896_v47  ;;  %v12989_v47 = vld [vmem:[#allocation13 + $0xe88] ss:$16 sps:$4 sm:$0xff]  }
 0x744   :  { %10126 = vmatpush1.bf16.msra.mxu1 %v12899_v18  ;;  %9799 = vmatprep.subr.bf16.mxu0 %v12904_v48  ;;  %v12994_v18 = vld [vmem:[#allocation13 + $0xea4] ss:$16 sps:$4 sm:$0xff]   ;;  %v12997_v48 = vld [vmem:[#allocation13 + $0xeac] ss:$16 sps:$4 sm:$0xff]  }
 0x745   :  { %10127 = vmatprep.subr.bf16.mxu1 %v12907_v5  ;;  %v12992_v5 = vld [vmem:[#allocation13 + $0xea0] ss:$16 sps:$4 sm:$0xff]  }
 0x747   :  { %9800 = vmatpush1.bf16.msra.mxu0 %v12902_v4  ;;  %v12995_v4 = vld [vmem:[#allocation13 + $0xea8] ss:$16 sps:$4 sm:$0xff]  }
 0x748   :  { %10128 = vmatpush1.bf16.msra.mxu1 %v12905_v6  ;;  %9801 = vmatprep.subr.bf16.mxu0 %v12910_v43  ;;  %v13000_v6 = vld [vmem:[#allocation13 + $0xec4] ss:$16 sps:$4 sm:$0xff]   ;;  %v13003_v43 = vld [vmem:[#allocation13 + $0xecc] ss:$16 sps:$4 sm:$0xff]  }
 0x749   :  { %10129 = vmatprep.subr.bf16.mxu1 %v12913_v27  ;;  %v12998_v27 = vld [vmem:[#allocation13 + $0xec0] ss:$16 sps:$4 sm:$0xff]  }
 0x74b   :  { %9802 = vmatpush1.bf16.msra.mxu0 %v12908_v51  ;;  %v13001_v51 = vld [vmem:[#allocation13 + $0xec8] ss:$16 sps:$4 sm:$0xff]  }
 0x74c   :  { %10130 = vmatpush1.bf16.msra.mxu1 %v12911_v40  ;;  %9803 = vmatprep.subr.bf16.mxu0 %v12916_v59  ;;  %v13006_v40 = vld [vmem:[#allocation13 + $0xee4] ss:$16 sps:$4 sm:$0xff]   ;;  %v13009_v59 = vld [vmem:[#allocation13 + $0xeec] ss:$16 sps:$4 sm:$0xff]  }
 0x74d   :  { %10131 = vmatprep.subr.bf16.mxu1 %v12919_v30  ;;  %v13004_v30 = vld [vmem:[#allocation13 + $0xee0] ss:$16 sps:$4 sm:$0xff]  }
 0x74f   :  { %9804 = vmatpush1.bf16.msra.mxu0 %v12914_v20  ;;  %v13007_v20 = vld [vmem:[#allocation13 + $0xee8] ss:$16 sps:$4 sm:$0xff]  }
 0x750   :  { %10132 = vmatpush1.bf16.msra.mxu1 %v12917_v14  ;;  %9805 = vmatprep.subr.bf16.mxu0 %v12922_v41  ;;  %v13012_v14 = vld [vmem:[#allocation13 + $0xf04] ss:$16 sps:$4 sm:$0xff]   ;;  %v13015_v41 = vld [vmem:[#allocation13 + $0xf0c] ss:$16 sps:$4 sm:$0xff]  }
 0x751   :  { %10133 = vmatprep.subr.bf16.mxu1 %v12925_v54  ;;  %v13010_v54 = vld [vmem:[#allocation13 + $0xf00] ss:$16 sps:$4 sm:$0xff]  }
 0x753   :  { %9806 = vmatpush1.bf16.msra.mxu0 %v12920_v60  ;;  %v13013_v60 = vld [vmem:[#allocation13 + $0xf08] ss:$16 sps:$4 sm:$0xff]  }
 0x754   :  { %10134 = vmatpush1.bf16.msra.mxu1 %v12923_v39  ;;  %9807 = vmatprep.subr.bf16.mxu0 %v12928_v35  ;;  %v13018_v39 = vld [vmem:[#allocation13 + $0xf24] ss:$16 sps:$4 sm:$0xff]   ;;  %v13021_v35 = vld [vmem:[#allocation13 + $0xf2c] ss:$16 sps:$4 sm:$0xff]  }
 0x755   :  { %10135 = vmatprep.subr.bf16.mxu1 %v12931_v63  ;;  %v13016_v63 = vld [vmem:[#allocation13 + $0xf20] ss:$16 sps:$4 sm:$0xff]  }
 0x757   :  { %9808 = vmatpush1.bf16.msra.mxu0 %v12926_v37  ;;  %v13019_v37 = vld [vmem:[#allocation13 + $0xf28] ss:$16 sps:$4 sm:$0xff]  }
 0x758   :  { %10136 = vmatpush1.bf16.msra.mxu1 %v12929_v56  ;;  %9809 = vmatprep.subr.bf16.mxu0 %v12934_v53  ;;  %v13024_v56 = vld [vmem:[#allocation13 + $0xf44] ss:$16 sps:$4 sm:$0xff]   ;;  %v13027_v53 = vld [vmem:[#allocation13 + $0xf4c] ss:$16 sps:$4 sm:$0xff]  }
 0x759   :  { %10137 = vmatprep.subr.bf16.mxu1 %v12937_v52  ;;  %v13022_v52 = vld [vmem:[#allocation13 + $0xf40] ss:$16 sps:$4 sm:$0xff]  }
 0x75b   :  { %9810 = vmatpush1.bf16.msra.mxu0 %v12932_v58  ;;  %v13025_v58 = vld [vmem:[#allocation13 + $0xf48] ss:$16 sps:$4 sm:$0xff]  }
 0x75c   :  { %10138 = vmatpush1.bf16.msra.mxu1 %v12935_v45  ;;  %9811 = vmatprep.subr.bf16.mxu0 %v12940_v38  ;;  %v13030_v45 = vld [vmem:[#allocation13 + $0xf64] ss:$16 sps:$4 sm:$0xff]   ;;  %v13033_v38 = vld [vmem:[#allocation13 + $0xf6c] ss:$16 sps:$4 sm:$0xff]  }
 0x75d   :  { %10139 = vmatprep.subr.bf16.mxu1 %v12943_v22  ;;  %v13028_v22 = vld [vmem:[#allocation13 + $0xf60] ss:$16 sps:$4 sm:$0xff]  }
 0x75f   :  { %9812 = vmatpush1.bf16.msra.mxu0 %v12938_v36  ;;  %v13031_v36 = vld [vmem:[#allocation13 + $0xf68] ss:$16 sps:$4 sm:$0xff]  }
 0x760   :  { %10140 = vmatpush1.bf16.msra.mxu1 %v12941_v1  ;;  %9813 = vmatprep.subr.bf16.mxu0 %v12946_v23  ;;  %v13036_v1 = vld [vmem:[#allocation13 + $0xf84] ss:$16 sps:$4 sm:$0xff]   ;;  %v13039_v23 = vld [vmem:[#allocation13 + $0xf8c] ss:$16 sps:$4 sm:$0xff]  }
 0x761   :  { %10141 = vmatprep.subr.bf16.mxu1 %v12949_v33  ;;  %v13034_v33 = vld [vmem:[#allocation13 + $0xf80] ss:$16 sps:$4 sm:$0xff]  }
 0x763   :  { %9814 = vmatpush1.bf16.msra.mxu0 %v12944_v11  ;;  %v13037_v11 = vld [vmem:[#allocation13 + $0xf88] ss:$16 sps:$4 sm:$0xff]  }
 0x764   :  { %10142 = vmatpush1.bf16.msra.mxu1 %v12947_v10  ;;  %9815 = vmatprep.subr.bf16.mxu0 %v12952_v8  ;;  %v13042_v10 = vld [vmem:[#allocation13 + $0xfa4] ss:$16 sps:$4 sm:$0xff]   ;;  %v13045_v8 = vld [vmem:[#allocation13 + $0xfac] ss:$16 sps:$4 sm:$0xff]  }
 0x765   :  { %10143 = vmatprep.subr.bf16.mxu1 %v12955_v15  ;;  %v13040_v15 = vld [vmem:[#allocation13 + $0xfa0] ss:$16 sps:$4 sm:$0xff]  }
 0x767   :  { %9816 = vmatpush1.bf16.msra.mxu0 %v12950_v55  ;;  %v13043_v55 = vld [vmem:[#allocation13 + $0xfa8] ss:$16 sps:$4 sm:$0xff]  }
 0x768   :  { %10144 = vmatpush1.bf16.msra.mxu1 %v12953_v21  ;;  %9817 = vmatprep.subr.bf16.mxu0 %v12958_v50  ;;  %v13048_v21 = vld [vmem:[#allocation13 + $0xfc4] ss:$16 sps:$4 sm:$0xff]   ;;  %v13051_v50 = vld [vmem:[#allocation13 + $0xfcc] ss:$16 sps:$4 sm:$0xff]  }
 0x769   :  { %10145 = vmatprep.subr.bf16.mxu1 %v12961_v16  ;;  %v13046_v16 = vld [vmem:[#allocation13 + $0xfc0] ss:$16 sps:$4 sm:$0xff]  }
 0x76b   :  { %9818 = vmatpush1.bf16.msra.mxu0 %v12956_v46  ;;  %v13049_v46 = vld [vmem:[#allocation13 + $0xfc8] ss:$16 sps:$4 sm:$0xff]  }
 0x76c   :  { %10146 = vmatpush1.bf16.msra.mxu1 %v12959_v61  ;;  %9828 = vmatprep.subr.bf16.mxu0 %v12964_v31  ;;  %v13054_v61 = vld [vmem:[#allocation13 + $0xfe4] ss:$16 sps:$4 sm:$0xff]   ;;  %v13057_v31 = vld [vmem:[#allocation13 + $0xfec] ss:$16 sps:$4 sm:$0xff]  }
 0x76d   :  { %10156 = vmatprep.subr.bf16.mxu1 %v12967_v42  ;;  %v13052_v42 = vld [vmem:[#allocation13 + $0xfe0] ss:$16 sps:$4 sm:$0xff]  }
 0x76e   :  { %9820 = vmatmul.mubr.bf16.vlgmr.msra.gmra.mrb[48].mxu0 %v15088_v3 }
 0x76f   :  { %10148 = vmatmul.mubr.bf16.vlgmr.msra.gmra.mrb[48].mxu1 %v15088_v3  ;;  %9829 = vmatpush1.bf16.msra.mxu0 %v12962_v17  ;;  %v13055_v17 = vld [vmem:[#allocation13 + $0xfe8] ss:$16 sps:$4 sm:$0xff]  }
 0x770   :  { %9860 = vmatprep.mubr.bf16.mxu0 %v6964_v12  ;;  %10157 = vmatpush1.bf16.msra.mxu1 %v12965_v13  ;;  %v13058_v13 = vld [vmem:[#allocation16 + $0x40] sm:$0xff]  }
 0x771   :  { %10188 = vmatprep.mubr.bf16.mxu1 %v6964_v12  ;;  %9830 = vmatprep.subr.bf16.mxu0 %v12970_v28  ;;  %v13059_v28 = vld [vmem:[#allocation16 + $0xc0] sm:$0xff]  }
 0x772   :  { %10158 = vmatprep.subr.bf16.mxu1 %v12973_v2  ;;  %v13060_v12 = vld [vmem:[#allocation16] sm:$0xff]   ;;  %v6962_v2 = vcombine.high %v15088_v3, %v15088_v3  ;;  %v13069_v3 = vld [vmem:[#allocation16 + $0x90] sm:$0xff]  }
 0x773   :  { %9831 = vmatpush1.bf16.msra.mxu0 %v12968_v7  ;;  %v13061_v7 = vld [vmem:[#allocation16 + $0x80] sm:$0xff]  }
 0x774   :  { %10159 = vmatpush1.bf16.msra.mxu1 %v12971_v62  ;;  %9832 = vmatprep.subr.bf16.mxu0 %v12976_v29  ;;  %v13062_v62 = vld [vmem:[#allocation16 + $0x48] sm:$0xff]  }
 0x775   :  { %10160 = vmatprep.subr.bf16.mxu1 %v12979_v32  ;;  %v13063_v29 = vld [vmem:[#allocation16 + $0xc8] sm:$0xff]  }
 0x776   :  { %v13064_v32 = vld [vmem:[#allocation16 + $0x8] sm:$0xff]  }
 0x777   :  { %9833 = vmatpush1.bf16.msra.mxu0 %v12974_v57  ;;  %v13065_v57 = vld [vmem:[#allocation16 + $0x88] sm:$0xff]  }
 0x778   :  { %10161 = vmatpush1.bf16.msra.mxu1 %v12977_v44  ;;  %9834 = vmatprep.subr.bf16.mxu0 %v12982_v19  ;;  %v13066_v44 = vld [vmem:[#allocation16 + $0x50] sm:$0xff]  }
 0x779   :  { %10162 = vmatprep.subr.bf16.mxu1 %v12985_v24  ;;  %v13067_v19 = vld [vmem:[#allocation16 + $0xd0] sm:$0xff]  }
 0x77a   :  { %v13068_v24 = vld [vmem:[#allocation16 + $0x10] sm:$0xff]  }
 0x77b   :  { %9835 = vmatpush1.bf16.msra.mxu0 %v12980_v49  ;;  %v13070_v49 = vld [vmem:[#allocation16 + $0x58] sm:$0xff]  }
 0x77c   :  { %10163 = vmatpush1.bf16.msra.mxu1 %v12983_v26  ;;  %9836 = vmatprep.subr.bf16.mxu0 %v12988_v0  ;;  %v13071_v26 = vld [vmem:[#allocation16 + $0xd8] sm:$0xff]  }
 0x77d   :  { %10164 = vmatprep.subr.bf16.mxu1 %v12991_v9  ;;  %v13072_v0 = vld [vmem:[#allocation16 + $0x18] sm:$0xff]  }
 0x77e   :  { %v13073_v9 = vld [vmem:[#allocation16 + $0x98] sm:$0xff]  }
 0x77f   :  { %9837 = vmatpush1.bf16.msra.mxu0 %v12986_v25  ;;  %v13074_v25 = vld [vmem:[#allocation16 + $0x60] sm:$0xff]  }
 0x780   :  { %10165 = vmatpush1.bf16.msra.mxu1 %v12989_v47  ;;  %9838 = vmatprep.subr.bf16.mxu0 %v12994_v18  ;;  %v13075_v47 = vld [vmem:[#allocation16 + $0xe0] sm:$0xff]  }
 0x781   :  { %10166 = vmatprep.subr.bf16.mxu1 %v12997_v48  ;;  %v13076_v18 = vld [vmem:[#allocation16 + $0x20] sm:$0xff]  }
 0x782   :  { %v13077_v48 = vld [vmem:[#allocation16 + $0xa0] sm:$0xff]  }
 0x783   :  { %9839 = vmatpush1.bf16.msra.mxu0 %v12992_v5  ;;  %v13078_v5 = vld [vmem:[#allocation16 + $0x68] sm:$0xff]  }
 0x784   :  { %10167 = vmatpush1.bf16.msra.mxu1 %v12995_v4  ;;  %9840 = vmatprep.subr.bf16.mxu0 %v13000_v6  ;;  %v13079_v4 = vld [vmem:[#allocation16 + $0xe8] sm:$0xff]  }
 0x785   :  { %10168 = vmatprep.subr.bf16.mxu1 %v13003_v43  ;;  %v13080_v6 = vld [vmem:[#allocation16 + $0x28] sm:$0xff]  }
 0x786   :  { %v13081_v43 = vld [vmem:[#allocation16 + $0xa8] sm:$0xff]  }
 0x787   :  { %9841 = vmatpush1.bf16.msra.mxu0 %v12998_v27  ;;  %v13082_v27 = vld [vmem:[#allocation16 + $0x70] sm:$0xff]  }
 0x788   :  { %10169 = vmatpush1.bf16.msra.mxu1 %v13001_v51  ;;  %9842 = vmatprep.subr.bf16.mxu0 %v13006_v40  ;;  %v13083_v51 = vld [vmem:[#allocation16 + $0xf0] sm:$0xff]  }
 0x789   :  { %10170 = vmatprep.subr.bf16.mxu1 %v13009_v59  ;;  %v13084_v40 = vld [vmem:[#allocation16 + $0x30] sm:$0xff]  }
 0x78a   :  { %v13085_v59 = vld [vmem:[#allocation16 + $0xb0] sm:$0xff]  }
 0x78b   :  { %9843 = vmatpush1.bf16.msra.mxu0 %v13004_v30  ;;  %v13086_v30 = vld [vmem:[#allocation16 + $0x78] sm:$0xff]  }
 0x78c   :  { %10171 = vmatpush1.bf16.msra.mxu1 %v13007_v20  ;;  %9844 = vmatprep.subr.bf16.mxu0 %v13012_v14  ;;  %v13087_v20 = vld [vmem:[#allocation16 + $0xf8] sm:$0xff]  }
 0x78d   :  { %10172 = vmatprep.subr.bf16.mxu1 %v13015_v41  ;;  %v13088_v14 = vld [vmem:[#allocation16 + $0x38] sm:$0xff]  }
 0x78e   :  { %v13089_v41 = vld [vmem:[#allocation16 + $0xb8] sm:$0xff]  }
 0x78f   :  { %9845 = vmatpush1.bf16.msra.mxu0 %v13010_v54  ;;  %v6847_v54 = vsub.s32 0, %v13831_v34 }
 0x790   :  { %10173 = vmatpush1.bf16.msra.mxu1 %v13013_v60  ;;  %9846 = vmatprep.subr.bf16.mxu0 %v13018_v39  ;;  %v6843_v60 = vld [vmem:[#allocation14] sm:$0xf]  ;;  %v6855_v39 = vsub.s32 2, %v13831_v34 }
 0x791   :  { %10174 = vmatprep.subr.bf16.mxu1 %v13021_v35  ;;  %v6851_v35 = vsub.s32 1, %v13831_v34 }
 0x793   :  { %9847 = vmatpush1.bf16.msra.mxu0 %v13016_v63  ;;  %v6859_v63 = vsub.s32 3, %v13831_v34 }
 0x794   :  { %10175 = vmatpush1.bf16.msra.mxu1 %v13019_v37  ;;  %9848 = vmatprep.subr.bf16.mxu0 %v13024_v56  ;;  %v6848_v37 = vrot.slane %v6843_v60, %v6847_v54  ;;  %v6856_v56 = vrot.slane %v6843_v60, %v6855_v39 }
 0x795   :  { %10176 = vmatprep.subr.bf16.mxu1 %v13027_v53  ;;  %v6852_v53 = vrot.slane %v6843_v60, %v6851_v35 }
 0x797   :  { %9849 = vmatpush1.bf16.msra.mxu0 %v13022_v52  ;;  %v6860_v52 = vrot.slane %v6843_v60, %v6859_v63 }
 0x798   :  { %10177 = vmatpush1.bf16.msra.mxu1 %v13025_v58  ;;  %9850 = vmatprep.subr.bf16.mxu0 %v13030_v45 }
 0x799   :  { %10178 = vmatprep.subr.bf16.mxu1 %v13033_v38 }
 0x79b   :  { %9851 = vmatpush1.bf16.msra.mxu0 %v13028_v22 }
 0x79c   :  { %10179 = vmatpush1.bf16.msra.mxu1 %v13031_v36  ;;  %9852 = vmatprep.subr.bf16.mxu0 %v13036_v1 }
 0x79d   :  { %10180 = vmatprep.subr.bf16.mxu1 %v13039_v23 }
 0x79f   :  { %9853 = vmatpush1.bf16.msra.mxu0 %v13034_v33 }
 0x7a0   :  { %10181 = vmatpush1.bf16.msra.mxu1 %v13037_v11  ;;  %9854 = vmatprep.subr.bf16.mxu0 %v13042_v10 }
 0x7a1   :  { %10182 = vmatprep.subr.bf16.mxu1 %v13045_v8 }
 0x7a3   :  { %9855 = vmatpush1.bf16.msra.mxu0 %v13040_v15 }
 0x7a4   :  { %10183 = vmatpush1.bf16.msra.mxu1 %v13043_v55  ;;  %9856 = vmatprep.subr.bf16.mxu0 %v13048_v21 }
 0x7a5   :  { %10184 = vmatprep.subr.bf16.mxu1 %v13051_v50 }
 0x7a7   :  { %9857 = vmatpush1.bf16.msra.mxu0 %v13046_v16 }
 0x7a8   :  { %10185 = vmatpush1.bf16.msra.mxu1 %v13049_v46  ;;  %9858 = vmatprep.subr.bf16.mxu0 %v13054_v61 }
 0x7a9   :  { %10186 = vmatprep.subr.bf16.mxu1 %v13057_v31 }
 0x7ab   :  { %9859 = vmatpush1.bf16.msra.mxu0 %v13052_v42 }
 0x7ac   :  { %10187 = vmatpush1.bf16.msra.mxu1 %v13055_v17  ;;  %11747 = vmatprep.subr.bf16.mxu0 %v13058_v13  ;;  %v11634_v13 = vld [vmem:[#allocation17] ss:$0 sm:$0xff] }
 0x7ad   :  { %11769 = vmatprep.subr.bf16.mxu1 %v13059_v28 }
 0x7ae   :  { %9861 = vmatmul.mubr.bf16.vlgmr.msra.gmra.mrb[48].mxu0 %v6962_v2 }
 0x7af   :  { %10189 = vmatmul.mubr.bf16.vlgmr.msra.gmra.mrb[48].mxu1 %v6962_v2  ;;  %11748 = vmatpush3.bf16.msra.mxu0 %v13060_v12 }
 0x7b0   :  { %11770 = vmatpush3.bf16.msra.mxu1 %v13061_v7  ;;  %11749 = vmatprep.subr.bf16.mxu0 %v13062_v62 }
 0x7b1   :  { %11771 = vmatprep.subr.bf16.mxu1 %v13063_v29 }
 0x7b3   :  { %11750 = vmatpush3.bf16.msra.mxu0 %v13064_v32 }
 0x7b4   :  { %11772 = vmatpush3.bf16.msra.mxu1 %v13065_v57  ;;  %11751 = vmatprep.subr.bf16.mxu0 %v13066_v44 }
 0x7b5   :  { %11773 = vmatprep.subr.bf16.mxu1 %v13067_v19 }
 0x7b7   :  { %11752 = vmatpush3.bf16.msra.mxu0 %v13068_v24 }
 0x7b8   :  { %11774 = vmatpush3.bf16.msra.mxu1 %v13069_v3  ;;  %11753 = vmatprep.subr.bf16.mxu0 %v13070_v49 }
 0x7b9   :  { %11775 = vmatprep.subr.bf16.mxu1 %v13071_v26 }
 0x7bb   :  { %11754 = vmatpush3.bf16.msra.mxu0 %v13072_v0 }
 0x7bc   :  { %11776 = vmatpush3.bf16.msra.mxu1 %v13073_v9  ;;  %11755 = vmatprep.subr.bf16.mxu0 %v13074_v25 }
 0x7bd   :  { %11777 = vmatprep.subr.bf16.mxu1 %v13075_v47 }
 0x7bf   :  { %11756 = vmatpush3.bf16.msra.mxu0 %v13076_v18 }
 0x7c0   :  { %11778 = vmatpush3.bf16.msra.mxu1 %v13077_v48  ;;  %11757 = vmatprep.subr.bf16.mxu0 %v13078_v5 }
 0x7c1   :  { %11779 = vmatprep.subr.bf16.mxu1 %v13079_v4 }
 0x7c3   :  { %11758 = vmatpush3.bf16.msra.mxu0 %v13080_v6 }
 0x7c4   :  { %11780 = vmatpush3.bf16.msra.mxu1 %v13081_v43  ;;  %11759 = vmatprep.subr.bf16.mxu0 %v13082_v27 }
 0x7c5   :  { %11781 = vmatprep.subr.bf16.mxu1 %v13083_v51 }
 0x7c7   :  { %11760 = vmatpush3.bf16.msra.mxu0 %v13084_v40 }
 0x7c8   :  { %11782 = vmatpush3.bf16.msra.mxu1 %v13085_v59  ;;  %11761 = vmatprep.subr.bf16.mxu0 %v13086_v30 }
 0x7c9   :  { %11783 = vmatprep.subr.bf16.mxu1 %v13087_v20 }
 0x7cb   :  { %11762 = vmatpush3.bf16.msra.mxu0 %v13088_v14 }
 0x7cc   :  { %11784 = vmatpush3.bf16.msra.mxu1 %v13089_v41 }
 0x881   :  { %v9862_v58 = vpop.f32.mrb[48].mxu0 }
 0x882   :  { %v11967_v45 = vadd.f32 %v9862_v58, %v6848_v37  ;;  %v10190_v38 = vpop.f32.mrb[48].mxu1  ;;  %v9864_v22 = vpop.f32.mrb[49].mxu0 }
 0x883   :  { %v11969_v36 = vadd.f32 %v10190_v38, %v6856_v56  ;;  %v11968_v1 = vadd.f32 %v9864_v22, %v6852_v53  ;;  %v10192_v23 = vpop.f32.mrb[49].mxu1  ;;  %v9866_v33 = vpop.f32.mrb[50].mxu0 }
 0x884   :  { %v10197_v11 = vmax.f32 %v11967_v45, 0.0  ;;  %v11970_v10 = vadd.f32 %v10192_v23, %v6860_v52  ;;  %v10194_v8 = vpop.f32.mrb[50].mxu1  ;;  %v9867_v15 = vpop.f32.mrb[51].mxu0 }
 0x885   :  { %v10199_v55 = vmax.f32 %v11969_v36, 0.0  ;;  %v10198_v21 = vmax.f32 %v11968_v1, 0.0  ;;  %v10195_v50 = vpop.f32.mrb[51].mxu1 }
 0x886   :  { %v10200_v34 = vmax.f32 %v11970_v10, 0.0  ;;  %v10201_v46 = vpack.c.bf16 %v10197_v11, %v10197_v11 }
 0x887   :  { %v10202_v16 = vpack.c.bf16 %v10198_v21, %v10198_v21  ;;  %v10203_v31 = vpack.c.bf16 %v10199_v55, %v10199_v55 }
 0x888   :  { %v10204_v61 = vpack.c.bf16 %v10200_v34, %v10200_v34 }
 0x889   :  { %10500 = vmatprep.mubr.bf16.mxu0 %v10202_v16 }
 0x88a   :  { %10540 = vmatprep.mubr.bf16.mxu1 %v10204_v61  ;;  %10501 = vmatmul.mubr.bf16.vlgmr.msra.gmra.mrb[52].mxu0 %v10201_v46 }
 0x88b   :  { %10541 = vmatmul.mubr.bf16.vlgmr.msra.gmra.mrb[52].mxu1 %v10203_v31 }
 0x95d   :  { %v11763_v42 = vpop.f32.mrb[52].mxu0 }
 0x95e   :  { %v11785_v17 = vpop.f32.mrb[52].mxu1  ;;  %v11764_v28 = vpop.f32.mrb[53].mxu0 }
 0x95f   :  { %v11765_v12 = vadd.f32 %v11764_v28, %v11763_v42  ;;  %v11786_v2 = vpop.f32.mrb[53].mxu1  ;;  %v11766_v7 = vpop.f32.mrb[54].mxu0 }
 0x960   :  { %v11787_v62 = vadd.f32 %v11786_v2, %v11785_v17  ;;  %v11788_v29 = vpop.f32.mrb[54].mxu1  ;;  %v11767_v32 = vpop.f32.mrb[55].mxu0 }
 0x961   :  { %v10503_v57 = vadd.f32 %v11765_v12, %v11634_v13  ;;  %v11789_v44 = vpop.f32.mrb[55].mxu1 }
 0x963   :  { %v10543_v19 = vadd.f32 %v11787_v62, %v10503_v57 }
 0x965   :  { %10548 = vst [vmem:[#allocation19] sm:$0x3] %v10543_v19 }
 0x966   :  { %13277 = shalt.err (!%p13274_p0)
}
 0x967   :  { %s13278_s14 = scalar_lea.hbm %s15123_s11, 32 }
 0x968   :  { %p13279_p1 = scmp.ne.s32.totalorder %s15123_s11, %s13278_s14  ;;  %p13282_p2 = scmp.lt.u32.totalorder %s13278_s14, %s15123_s11 }
 0x96a   :  { %p13284_p3 = pnand %p13282_p2, %p13279_p1 }
 0x96c   :  { %13287 = shalt.err (!%p13284_p3)
}
 0x96d   :  { %10558 = dma.vmem_to_hbm [thread:$0]  %s10556_s18, 32, %s15123_s11, [#allocation7]  }
 0x96e   :  { %13306 = dma.done.wait [#allocation7], 32  }
 0x96f   :  { %13307 = vsyncadd [#allocation7], 4294967264 }
 0x970   :  { %10562 = vsyncpa [#allocation6], 1 }
 0x971   :  { %10563 = vsyncpa [#allocation9], 1 }
 0x972   :  { %10564 = vsyncpa [#allocation12], 1 }
 0x973   :  { %10565 = vsyncpa [#allocation15], 1 }
 0x974   :  { %10566 = vsyncpa [#allocation18], 1 }
 0x975   :  { %10567 = vsyncpa [#allocation7], 1 }

</bundles_post_ra>
